<compile_context>
chip_gen: v7x
topology: tpu7x:2x2x1
jax: 0.10.0
libtpu: 0.0.40
codegen_flags: <defaults>
</compile_context>

<pallas_src>
import numpy as np
import jax
import jax.numpy as jnp
from jax.experimental import pallas as pl
from jax.experimental.pallas import tpu as pltpu

# Model hyper-parameters (small, consistent with the module's __init__).
IN_CH, HID_CH, OUT_CH = 8, 32, 16
N_NODES, T_STEPS, N_EDGES = 16, 8, 40


# ----------------------------- fused Pallas kernel -----------------------------

def temporal_gnn_kernel(x2d_ref, abd_ref, pool_ref, w1_ref, b1_ref, w2_ref, b2_ref,
                        wi_ref, bi_ref, wh_ref, bh_ref,
                        w1a_ref, w1b_ref, w1c_ref, db1_ref, w2col_ref, db2_ref,
                        out_ref):
    """Whole TemporalGNN forward in one kernel invocation (everything VMEM/vreg resident).

    x2d_ref   : (T*N, C_in)   node features of all snapshots, stacked along rows
    abd_ref   : (T*N, T*N)    block-diagonal GCN-normalized adjacency (block t = A_hat[t])
    pool_ref  : (T, T*N)      constant per-snapshot mean-pooling matrix (1/N in block t)
    wi/wh     : (3, C, H) / (3, H, H)   GRU gate weights, gate-major (r, z, n)
    bi/bh     : (3, 1, H)               GRU gate biases, gate-major
    db2_ref   : (1,) in SMEM  decoder output bias (scalar)
    out_ref   : (N*N, 1)      dense all-pairs scores, row-major flattened (i*N + j)
    """
    t_steps = pool_ref.shape[0]
    tn = abd_ref.shape[0]
    n = tn // t_steps
    hid = wh_ref.shape[1]

    a_bd = abd_ref[...]

    # ---- GCN encoder over all T snapshots: two full-height block-diagonal matmuls ----
    xw1 = jnp.dot(x2d_ref[...], w1_ref[...], preferred_element_type=jnp.float32)        # (T*N, HID)
    h1 = jnp.maximum(jnp.dot(a_bd, xw1, preferred_element_type=jnp.float32)
                     + b1_ref[...], 0.0)                                                 # (T*N, HID)
    emb = (jnp.dot(a_bd, jnp.dot(h1, w2_ref[...], preferred_element_type=jnp.float32),
                   preferred_element_type=jnp.float32)
           + b2_ref[...])                                                                # (T*N, OUT)

    # ---- per-snapshot mean pooling as one (T, T*N) @ (T*N, OUT) matmul ----
    pooled = jnp.dot(pool_ref[...], emb, preferred_element_type=jnp.float32)             # (T, OUT)

    # ---- GRU over pooled snapshot embeddings (PyTorch semantics, batch=1) ----
    # Input-gate matmuls hoisted out of the recurrence; each gate on its own (T, H) slab
    # (no lane-offset slicing at 32 / 64 inside the serial chain).
    gi_r = jnp.dot(pooled, wi_ref[0], preferred_element_type=jnp.float32) + bi_ref[0]    # (T, H)
    gi_z = jnp.dot(pooled, wi_ref[1], preferred_element_type=jnp.float32) + bi_ref[1]
    gi_n = jnp.dot(pooled, wi_ref[2], preferred_element_type=jnp.float32) + bi_ref[2]
    wh_r, wh_z, wh_n = wh_ref[0], wh_ref[1], wh_ref[2]                                   # (H, H) each
    bh_r, bh_z, bh_n = bh_ref[0], bh_ref[1], bh_ref[2]                                   # (1, H) each
    h = jnp.zeros((1, hid), jnp.float32)
    for t in range(t_steps):        # static trip count -> fully unrolled serial recurrence;
        #                             loop-invariant wh_* let Mosaic hoist the MXU RHS pushes.
        gh_r = jnp.dot(h, wh_r, preferred_element_type=jnp.float32) + bh_r               # (1, H)
        gh_z = jnp.dot(h, wh_z, preferred_element_type=jnp.float32) + bh_z
        gh_n = jnp.dot(h, wh_n, preferred_element_type=jnp.float32) + bh_n
        r = jax.nn.sigmoid(gi_r[t:t + 1, :] + gh_r)
        z = jax.nn.sigmoid(gi_z[t:t + 1, :] + gh_z)
        c = jnp.tanh(gi_n[t:t + 1, :] + r * gh_n)
        h = (1.0 - z) * c + z * h                                                        # (1, H)

    # ---- dense all-pairs edge decoder, built fully in registers ----
    # score[i, j] = w2 . relu(e_i @ W1a + e_j @ W1b + h @ W1c + b1) + b2
    e_last = emb[(t_steps - 1) * n:, :]                                                  # (N, OUT)
    da = jnp.dot(e_last, w1a_ref[...], preferred_element_type=jnp.float32)               # (N, H)
    dbc = (jnp.dot(e_last, w1b_ref[...], preferred_element_type=jnp.float32)
           + jnp.dot(h, w1c_ref[...], preferred_element_type=jnp.float32)
           + db1_ref[...])                                                               # (N, H)
    # Leading-dim collapse (N, N, H) -> (N*N, H) preserves the lane layout (H stays minor).
    pre = jnp.maximum(da[:, None, :] + dbc[None, :, :], 0.0).reshape(n * n, hid)         # (N*N, H)
    # Lane-axis reduction as one MXU matmul (N*N, H) @ (H, 1); bias is a cheap SMEM scalar.
    out_ref[...] = (jnp.dot(pre, w2col_ref[...], preferred_element_type=jnp.float32)
                    + db2_ref[0])


# ------------------------------ wrapper / glue ------------------------------

def build_norm_adj(edge_index, n):
    """COO edge_index (2, E) -> dense GCN-normalized adjacency D^-1/2 (A+I) D^-1/2."""
    src, dst = edge_index[0], edge_index[1]
    a = jnp.zeros((n, n), jnp.float32).at[dst, src].add(1.0)
    a = a + jnp.eye(n, dtype=jnp.float32)                 # add self loops
    deg = jnp.sum(a, axis=1)                              # degree (incl. self loop)
    d = jax.lax.rsqrt(deg)
    return d[:, None] * a * d[None, :]


@jax.jit
def temporal_gnn_forward(xs, adjs, p):
    t, n, c_in = xs.shape

    x2d = xs.reshape(t * n, c_in)                                             # (T*N, C_in)

    # Block-diagonal adjacency: A_bd[t*N+i, t*N+j] = adjs[t, i, j], zero elsewhere.
    eye_t = jnp.eye(t, dtype=jnp.float32)
    a_bd = (eye_t[:, None, :, None] * adjs[:, :, None, :]).reshape(t * n, t * n)

    # Constant per-snapshot mean-pooling matrix (T, T*N): 1/N inside block t.
    pool = jnp.repeat(eye_t, n, axis=1) / float(n)

    w2col = p["w2row"].T                                                      # (H, 1)
    db2s = p["db2"].reshape(1)                                                # scalar bias -> SMEM

    vmem = pl.BlockSpec(memory_space=pltpu.MemorySpace.VMEM)
    smem = pl.BlockSpec(memory_space=pltpu.MemorySpace.SMEM)

    cost = pl.CostEstimate(flops=2_000_000, transcendentals=800, bytes_accessed=100_000)

    # Single fused invocation, no grid: the whole problem (< 0.2 MiB) lives in VMEM.
    # (With a batch of sequences, a leading 'parallel' grid axis would use both v7x TCs.)
    s_flat = pl.pallas_call(
        temporal_gnn_kernel,
        out_shape=jax.ShapeDtypeStruct((n * n, 1), jnp.float32),
        in_specs=[vmem] * 16 + [smem],
        out_specs=vmem,
        cost_estimate=cost,
    )(x2d, a_bd, pool, p["w1"], p["b1"], p["w2"], p["b2"],
      p["wi"], p["bi"], p["wh"], p["bh"],
      p["w1a"], p["w1b"], p["w1c"], p["db1"], w2col, db2s)

    # Off-diagonal (i != j) extraction in row-major order via the diagonal-drop reshape
    # trick (no gather): drop flat[0], reshape (N-1, N+1), drop the last column.
    # TODO(synk): in-kernel compaction of the 240 off-diagonal scores would need a gather /
    # odd-shaped reshape with no clean Mosaic lowering; it stays in the jitted wrapper.
    flat = s_flat.reshape(-1)                                                 # (N*N,)
    return flat[1:].reshape(n - 1, n + 1)[:, :-1].reshape(n * (n - 1), 1)


# --------------------------- pure-JAX reference ---------------------------

def reference_forward(xs, adjs, p):
    def encode(x, a):
        h = jnp.maximum(a @ (x @ p["w1"]) + p["b1"], 0.0)
        return a @ (h @ p["w2"]) + p["b2"]

    embs = jax.vmap(encode)(xs, adjs)                      # (T, N, C_out)
    pooled = embs.mean(axis=1)                             # (T, C_out)

    h = jnp.zeros((1, HID_CH), jnp.float32)
    for t in range(T_STEPS):
        x = pooled[t:t + 1]
        r = jax.nn.sigmoid(x @ p["wi"][0] + p["bi"][0] + h @ p["wh"][0] + p["bh"][0])
        z = jax.nn.sigmoid(x @ p["wi"][1] + p["bi"][1] + h @ p["wh"][1] + p["bh"][1])
        nn_ = jnp.tanh(x @ p["wi"][2] + p["bi"][2] + r * (h @ p["wh"][2] + p["bh"][2]))
        h = (1.0 - z) * nn_ + z * h

    last_emb = embs[-1]
    n = last_emb.shape[0]
    w1_full = jnp.concatenate([p["w1a"], p["w1b"], p["w1c"]], axis=0)   # (2C+H, H)
    pair = jnp.concatenate([
        jnp.broadcast_to(last_emb[:, None, :], (n, n, OUT_CH)),
        jnp.broadcast_to(last_emb[None, :, :], (n, n, OUT_CH)),
        jnp.broadcast_to(h.reshape(1, 1, HID_CH), (n, n, HID_CH)),
    ], axis=-1)
    hid = jnp.maximum(pair @ w1_full + p["db1"][0], 0.0)
    scores = hid @ p["w2row"][0] + p["db2"][0, 0]                        # (N, N)
    offdiag = np.array([i * n + j for i in range(n) for j in range(n) if i != j])
    return scores.reshape(-1)[offdiag][:, None]


# ------------------------------ main ------------------------------

if __name__ == "__main__":
    # Full-f32 matmuls in the pure-JAX reference so it matches the kernel's f32 MXU path.
    jax.config.update("jax_default_matmul_precision", "highest")

    key = jax.random.PRNGKey(0)
    ks = jax.random.split(key, 20)

    # Deterministic synthetic parameters (shapes follow the module's __init__).
    scale = 0.2
    params = {
        # GCNEncoder: conv1 (in->hid), conv2 (hid->out)
        "w1": scale * jax.random.normal(ks[0], (IN_CH, HID_CH), jnp.float32),
        "b1": scale * jax.random.normal(ks[1], (1, HID_CH), jnp.float32),
        "w2": scale * jax.random.normal(ks[2], (HID_CH, OUT_CH), jnp.float32),
        "b2": scale * jax.random.normal(ks[3], (1, OUT_CH), jnp.float32),
        # GRU(out_channels -> hidden_channels), gates ordered (r, z, n)
        "wi": scale * jax.random.normal(ks[4], (3, OUT_CH, HID_CH), jnp.float32),
        "wh": scale * jax.random.normal(ks[5], (3, HID_CH, HID_CH), jnp.float32),
        "bi": scale * jax.random.normal(ks[6], (3, 1, HID_CH), jnp.float32),
        "bh": scale * jax.random.normal(ks[7], (3, 1, HID_CH), jnp.float32),
        # decoder Linear(2*out + hid -> hid), split along its input dimension
        "w1a": scale * jax.random.normal(ks[8], (OUT_CH, HID_CH), jnp.float32),
        "w1b": scale * jax.random.normal(ks[9], (OUT_CH, HID_CH), jnp.float32),
        "w1c": scale * jax.random.normal(ks[10], (HID_CH, HID_CH), jnp.float32),
        "db1": scale * jax.random.normal(ks[11], (1, HID_CH), jnp.float32),
        # decoder Linear(hid -> 1), stored as a row vector + scalar bias
        "w2row": scale * jax.random.normal(ks[12], (1, HID_CH), jnp.float32),
        "db2": scale * jax.random.normal(ks[13], (1, 1), jnp.float32),
    }

    # Synthetic sequence of graph snapshots: node features + random COO edges.
    xs = jax.random.normal(ks[14], (T_STEPS, N_NODES, IN_CH), jnp.float32)
    src = jax.random.randint(ks[15], (T_STEPS, N_EDGES), 0, N_NODES)
    off = jax.random.randint(ks[16], (T_STEPS, N_EDGES), 1, N_NODES)
    dst = (src + off) % N_NODES                       # no self loops in raw edges
    edge_index = jnp.stack([src, dst], axis=1)        # (T, 2, E)
    adjs = jax.vmap(lambda ei: build_norm_adj(ei, N_NODES))(edge_index)  # (T, N, N)

    out = temporal_gnn_forward(xs, adjs, params)
    out = jax.block_until_ready(out)

    assert out.shape == (N_NODES * (N_NODES - 1), 1), out.shape

    ref = reference_forward(xs, adjs, params)
    np.testing.assert_allclose(np.asarray(out), np.asarray(ref), rtol=1e-3, atol=1e-3)

    print("KERNEL_OK")
</pallas_src>

<mosaic_0001>
module attributes {stable_mosaic.version = 11 : i64} {
  func.func @temporal_gnn_kernel(%arg0: memref<128x8xf32, #tpu.memory_space<vmem>>, %arg1: memref<128x128xf32, #tpu.memory_space<vmem>>, %arg2: memref<8x128xf32, #tpu.memory_space<vmem>>, %arg3: memref<8x32xf32, #tpu.memory_space<vmem>>, %arg4: memref<1x32xf32, #tpu.memory_space<vmem>>, %arg5: memref<32x16xf32, #tpu.memory_space<vmem>>, %arg6: memref<1x16xf32, #tpu.memory_space<vmem>>, %arg7: memref<3x16x32xf32, #tpu.memory_space<vmem>>, %arg8: memref<3x1x32xf32, #tpu.memory_space<vmem>>, %arg9: memref<3x32x32xf32, #tpu.memory_space<vmem>>, %arg10: memref<3x1x32xf32, #tpu.memory_space<vmem>>, %arg11: memref<16x32xf32, #tpu.memory_space<vmem>>, %arg12: memref<16x32xf32, #tpu.memory_space<vmem>>, %arg13: memref<32x32xf32, #tpu.memory_space<vmem>>, %arg14: memref<1x32xf32, #tpu.memory_space<vmem>>, %arg15: memref<32x1xf32, #tpu.memory_space<vmem>>, %arg16: memref<1xf32, #tpu.memory_space<smem>>, %arg17: memref<256x1xf32, #tpu.memory_space<vmem>>) attributes {dimension_semantics = [], scalar_prefetch = 0 : i64, scratch_operands = 0 : i64, tpu.core_type = #tpu.core_type<tc>} {
    %c0 = arith.constant 0 : index
    %c0_0 = arith.constant 0 : index
    %0 = vector.load %arg1[%c0, %c0_0] : memref<128x128xf32, #tpu.memory_space<vmem>>, vector<128x128xf32>
    %c0_1 = arith.constant 0 : index
    %c0_2 = arith.constant 0 : index
    %1 = vector.load %arg0[%c0_1, %c0_2] : memref<128x8xf32, #tpu.memory_space<vmem>>, vector<128x8xf32>
    %c0_3 = arith.constant 0 : index
    %c0_4 = arith.constant 0 : index
    %2 = vector.load %arg3[%c0_3, %c0_4] : memref<8x32xf32, #tpu.memory_space<vmem>>, vector<8x32xf32>
    %cst = arith.constant dense<0.000000e+00> : vector<128x32xf32>
    %3 = tpu.matmul %1, %2, %cst {dimension_numbers = #tpu.dot_dimension_numbers<[1], [0], [0], [1], [0, 0, 1, 1], [], []>, precision = #tpu.contract_precision<fp32>} : vector<128x8xf32>, vector<8x32xf32>, vector<128x32xf32> -> vector<128x32xf32>
    %cst_5 = arith.constant dense<0.000000e+00> : vector<128x32xf32>
    %4 = tpu.matmul %0, %3, %cst_5 {dimension_numbers = #tpu.dot_dimension_numbers<[1], [0], [0], [1], [0, 0, 1, 1], [], []>, precision = #tpu.contract_precision<fp32>} : vector<128x128xf32>, vector<128x32xf32>, vector<128x32xf32> -> vector<128x32xf32>
    %c0_6 = arith.constant 0 : index
    %c0_7 = arith.constant 0 : index
    %5 = vector.load %arg4[%c0_6, %c0_7] : memref<1x32xf32, #tpu.memory_space<vmem>>, vector<1x32xf32>
    %6 = vector.broadcast %5 : vector<1x32xf32> to vector<128x32xf32>
    %7 = arith.addf %4, %6 : vector<128x32xf32>
    %cst_8 = arith.constant 0.000000e+00 : f32
    %8 = vector.broadcast %cst_8 : f32 to vector<128x32xf32>
    %9 = arith.maximumf %7, %8 : vector<128x32xf32>
    %c0_9 = arith.constant 0 : index
    %c0_10 = arith.constant 0 : index
    %10 = vector.load %arg5[%c0_9, %c0_10] : memref<32x16xf32, #tpu.memory_space<vmem>>, vector<32x16xf32>
    %cst_11 = arith.constant dense<0.000000e+00> : vector<128x16xf32>
    %11 = tpu.matmul %9, %10, %cst_11 {dimension_numbers = #tpu.dot_dimension_numbers<[1], [0], [0], [1], [0, 0, 1, 1], [], []>, precision = #tpu.contract_precision<fp32>} : vector<128x32xf32>, vector<32x16xf32>, vector<128x16xf32> -> vector<128x16xf32>
    %cst_12 = arith.constant dense<0.000000e+00> : vector<128x16xf32>
    %12 = tpu.matmul %0, %11, %cst_12 {dimension_numbers = #tpu.dot_dimension_numbers<[1], [0], [0], [1], [0, 0, 1, 1], [], []>, precision = #tpu.contract_precision<fp32>} : vector<128x128xf32>, vector<128x16xf32>, vector<128x16xf32> -> vector<128x16xf32>
    %c0_13 = arith.constant 0 : index
    %c0_14 = arith.constant 0 : index
    %13 = vector.load %arg6[%c0_13, %c0_14] : memref<1x16xf32, #tpu.memory_space<vmem>>, vector<1x16xf32>
    %14 = vector.broadcast %13 : vector<1x16xf32> to vector<128x16xf32>
    %15 = arith.addf %12, %14 : vector<128x16xf32>
    %c0_15 = arith.constant 0 : index
    %c0_16 = arith.constant 0 : index
    %16 = vector.load %arg2[%c0_15, %c0_16] : memref<8x128xf32, #tpu.memory_space<vmem>>, vector<8x128xf32>
    %cst_17 = arith.constant dense<0.000000e+00> : vector<8x16xf32>
    %17 = tpu.matmul %16, %15, %cst_17 {dimension_numbers = #tpu.dot_dimension_numbers<[1], [0], [0], [1], [0, 0, 1, 1], [], []>, precision = #tpu.contract_precision<fp32>} : vector<8x128xf32>, vector<128x16xf32>, vector<8x16xf32> -> vector<8x16xf32>
    %c0_18 = arith.constant 0 : index
    %c0_19 = arith.constant 0 : index
    %c0_20 = arith.constant 0 : index
    %18 = vector.load %arg7[%c0_18, %c0_19, %c0_20] : memref<3x16x32xf32, #tpu.memory_space<vmem>>, vector<1x16x32xf32>
    %19 = vector.shape_cast %18 : vector<1x16x32xf32> to vector<16x32xf32>
    %cst_21 = arith.constant dense<0.000000e+00> : vector<8x32xf32>
    %20 = tpu.matmul %17, %19, %cst_21 {dimension_numbers = #tpu.dot_dimension_numbers<[1], [0], [0], [1], [0, 0, 1, 1], [], []>, precision = #tpu.contract_precision<fp32>} : vector<8x16xf32>, vector<16x32xf32>, vector<8x32xf32> -> vector<8x32xf32>
    %c0_22 = arith.constant 0 : index
    %c0_23 = arith.constant 0 : index
    %c0_24 = arith.constant 0 : index
    %21 = vector.load %arg8[%c0_22, %c0_23, %c0_24] : memref<3x1x32xf32, #tpu.memory_space<vmem>>, vector<1x1x32xf32>
    %22 = vector.shape_cast %21 : vector<1x1x32xf32> to vector<1x32xf32>
    %23 = vector.broadcast %22 : vector<1x32xf32> to vector<8x32xf32>
    %24 = arith.addf %20, %23 : vector<8x32xf32>
    %c1 = arith.constant 1 : index
    %c0_25 = arith.constant 0 : index
    %c0_26 = arith.constant 0 : index
    %25 = vector.load %arg7[%c1, %c0_25, %c0_26] : memref<3x16x32xf32, #tpu.memory_space<vmem>>, vector<1x16x32xf32>
    %26 = vector.shape_cast %25 : vector<1x16x32xf32> to vector<16x32xf32>
    %cst_27 = arith.constant dense<0.000000e+00> : vector<8x32xf32>
    %27 = tpu.matmul %17, %26, %cst_27 {dimension_numbers = #tpu.dot_dimension_numbers<[1], [0], [0], [1], [0, 0, 1, 1], [], []>, precision = #tpu.contract_precision<fp32>} : vector<8x16xf32>, vector<16x32xf32>, vector<8x32xf32> -> vector<8x32xf32>
    %c1_28 = arith.constant 1 : index
    %c0_29 = arith.constant 0 : index
    %c0_30 = arith.constant 0 : index
    %28 = vector.load %arg8[%c1_28, %c0_29, %c0_30] : memref<3x1x32xf32, #tpu.memory_space<vmem>>, vector<1x1x32xf32>
    %29 = vector.shape_cast %28 : vector<1x1x32xf32> to vector<1x32xf32>
    %30 = vector.broadcast %29 : vector<1x32xf32> to vector<8x32xf32>
    %31 = arith.addf %27, %30 : vector<8x32xf32>
    %c2 = arith.constant 2 : index
    %c0_31 = arith.constant 0 : index
    %c0_32 = arith.constant 0 : index
    %32 = vector.load %arg7[%c2, %c0_31, %c0_32] : memref<3x16x32xf32, #tpu.memory_space<vmem>>, vector<1x16x32xf32>
    %33 = vector.shape_cast %32 : vector<1x16x32xf32> to vector<16x32xf32>
    %cst_33 = arith.constant dense<0.000000e+00> : vector<8x32xf32>
    %34 = tpu.matmul %17, %33, %cst_33 {dimension_numbers = #tpu.dot_dimension_numbers<[1], [0], [0], [1], [0, 0, 1, 1], [], []>, precision = #tpu.contract_precision<fp32>} : vector<8x16xf32>, vector<16x32xf32>, vector<8x32xf32> -> vector<8x32xf32>
    %c2_34 = arith.constant 2 : index
    %c0_35 = arith.constant 0 : index
    %c0_36 = arith.constant 0 : index
    %35 = vector.load %arg8[%c2_34, %c0_35, %c0_36] : memref<3x1x32xf32, #tpu.memory_space<vmem>>, vector<1x1x32xf32>
    %36 = vector.shape_cast %35 : vector<1x1x32xf32> to vector<1x32xf32>
    %37 = vector.broadcast %36 : vector<1x32xf32> to vector<8x32xf32>
    %38 = arith.addf %34, %37 : vector<8x32xf32>
    %c0_37 = arith.constant 0 : index
    %c0_38 = arith.constant 0 : index
    %c0_39 = arith.constant 0 : index
    %39 = vector.load %arg9[%c0_37, %c0_38, %c0_39] : memref<3x32x32xf32, #tpu.memory_space<vmem>>, vector<1x32x32xf32>
    %40 = vector.shape_cast %39 : vector<1x32x32xf32> to vector<32x32xf32>
    %c1_40 = arith.constant 1 : index
    %c0_41 = arith.constant 0 : index
    %c0_42 = arith.constant 0 : index
    %41 = vector.load %arg9[%c1_40, %c0_41, %c0_42] : memref<3x32x32xf32, #tpu.memory_space<vmem>>, vector<1x32x32xf32>
    %42 = vector.shape_cast %41 : vector<1x32x32xf32> to vector<32x32xf32>
    %c2_43 = arith.constant 2 : index
    %c0_44 = arith.constant 0 : index
    %c0_45 = arith.constant 0 : index
    %43 = vector.load %arg9[%c2_43, %c0_44, %c0_45] : memref<3x32x32xf32, #tpu.memory_space<vmem>>, vector<1x32x32xf32>
    %44 = vector.shape_cast %43 : vector<1x32x32xf32> to vector<32x32xf32>
    %c0_46 = arith.constant 0 : index
    %c0_47 = arith.constant 0 : index
    %c0_48 = arith.constant 0 : index
    %45 = vector.load %arg10[%c0_46, %c0_47, %c0_48] : memref<3x1x32xf32, #tpu.memory_space<vmem>>, vector<1x1x32xf32>
    %46 = vector.shape_cast %45 : vector<1x1x32xf32> to vector<1x32xf32>
    %c1_49 = arith.constant 1 : index
    %c0_50 = arith.constant 0 : index
    %c0_51 = arith.constant 0 : index
    %47 = vector.load %arg10[%c1_49, %c0_50, %c0_51] : memref<3x1x32xf32, #tpu.memory_space<vmem>>, vector<1x1x32xf32>
    %48 = vector.shape_cast %47 : vector<1x1x32xf32> to vector<1x32xf32>
    %c2_52 = arith.constant 2 : index
    %c0_53 = arith.constant 0 : index
    %c0_54 = arith.constant 0 : index
    %49 = vector.load %arg10[%c2_52, %c0_53, %c0_54] : memref<3x1x32xf32, #tpu.memory_space<vmem>>, vector<1x1x32xf32>
    %50 = vector.shape_cast %49 : vector<1x1x32xf32> to vector<1x32xf32>
    %cst_55 = arith.constant 0.000000e+00 : f32
    %51 = vector.broadcast %cst_55 : f32 to vector<1x32xf32>
    %cst_56 = arith.constant dense<0.000000e+00> : vector<1x32xf32>
    %52 = tpu.matmul %51, %40, %cst_56 {dimension_numbers = #tpu.dot_dimension_numbers<[1], [0], [0], [1], [0, 0, 1, 1], [], []>, precision = #tpu.contract_precision<fp32>} : vector<1x32xf32>, vector<32x32xf32>, vector<1x32xf32> -> vector<1x32xf32>
    %53 = arith.addf %52, %46 : vector<1x32xf32>
    %cst_57 = arith.constant dense<0.000000e+00> : vector<1x32xf32>
    %54 = tpu.matmul %51, %42, %cst_57 {dimension_numbers = #tpu.dot_dimension_numbers<[1], [0], [0], [1], [0, 0, 1, 1], [], []>, precision = #tpu.contract_precision<fp32>} : vector<1x32xf32>, vector<32x32xf32>, vector<1x32xf32> -> vector<1x32xf32>
    %55 = arith.addf %54, %48 : vector<1x32xf32>
    %cst_58 = arith.constant dense<0.000000e+00> : vector<1x32xf32>
    %56 = tpu.matmul %51, %44, %cst_58 {dimension_numbers = #tpu.dot_dimension_numbers<[1], [0], [0], [1], [0, 0, 1, 1], [], []>, precision = #tpu.contract_precision<fp32>} : vector<1x32xf32>, vector<32x32xf32>, vector<1x32xf32> -> vector<1x32xf32>
    %57 = arith.addf %56, %50 : vector<1x32xf32>
    %58 = vector.extract_strided_slice %24 {offsets = [0, 0], sizes = [1, 32], strides = [1, 1]} : vector<8x32xf32> to vector<1x32xf32>
    %59 = arith.addf %58, %53 : vector<1x32xf32>
    %60 = arith.negf %59 : vector<1x32xf32>
    %61 = math.exp %60 : vector<1x32xf32>
    %cst_59 = arith.constant 1.000000e+00 : f32
    %62 = vector.broadcast %cst_59 : f32 to vector<1x32xf32>
    %63 = arith.addf %62, %61 : vector<1x32xf32>
    %64 = arith.divf %62, %63 : vector<1x32xf32>
    %65 = vector.extract_strided_slice %31 {offsets = [0, 0], sizes = [1, 32], strides = [1, 1]} : vector<8x32xf32> to vector<1x32xf32>
    %66 = arith.addf %65, %55 : vector<1x32xf32>
    %67 = arith.negf %66 : vector<1x32xf32>
    %68 = math.exp %67 : vector<1x32xf32>
    %cst_60 = arith.constant 1.000000e+00 : f32
    %69 = vector.broadcast %cst_60 : f32 to vector<1x32xf32>
    %70 = arith.addf %69, %68 : vector<1x32xf32>
    %71 = arith.divf %69, %70 : vector<1x32xf32>
    %72 = vector.extract_strided_slice %38 {offsets = [0, 0], sizes = [1, 32], strides = [1, 1]} : vector<8x32xf32> to vector<1x32xf32>
    %73 = arith.mulf %64, %57 : vector<1x32xf32>
    %74 = arith.addf %72, %73 : vector<1x32xf32>
    %75 = math.tanh %74 : vector<1x32xf32>
    %cst_61 = arith.constant 1.000000e+00 : f32
    %76 = vector.broadcast %cst_61 : f32 to vector<1x32xf32>
    %77 = arith.subf %76, %71 : vector<1x32xf32>
    %78 = arith.mulf %77, %75 : vector<1x32xf32>
    %79 = arith.mulf %71, %51 : vector<1x32xf32>
    %80 = arith.addf %78, %79 : vector<1x32xf32>
    %cst_62 = arith.constant dense<0.000000e+00> : vector<1x32xf32>
    %81 = tpu.matmul %80, %40, %cst_62 {dimension_numbers = #tpu.dot_dimension_numbers<[1], [0], [0], [1], [0, 0, 1, 1], [], []>, precision = #tpu.contract_precision<fp32>} : vector<1x32xf32>, vector<32x32xf32>, vector<1x32xf32> -> vector<1x32xf32>
    %82 = arith.addf %81, %46 : vector<1x32xf32>
    %cst_63 = arith.constant dense<0.000000e+00> : vector<1x32xf32>
    %83 = tpu.matmul %80, %42, %cst_63 {dimension_numbers = #tpu.dot_dimension_numbers<[1], [0], [0], [1], [0, 0, 1, 1], [], []>, precision = #tpu.contract_precision<fp32>} : vector<1x32xf32>, vector<32x32xf32>, vector<1x32xf32> -> vector<1x32xf32>
    %84 = arith.addf %83, %48 : vector<1x32xf32>
    %cst_64 = arith.constant dense<0.000000e+00> : vector<1x32xf32>
    %85 = tpu.matmul %80, %44, %cst_64 {dimension_numbers = #tpu.dot_dimension_numbers<[1], [0], [0], [1], [0, 0, 1, 1], [], []>, precision = #tpu.contract_precision<fp32>} : vector<1x32xf32>, vector<32x32xf32>, vector<1x32xf32> -> vector<1x32xf32>
    %86 = arith.addf %85, %50 : vector<1x32xf32>
    %87 = vector.extract_strided_slice %24 {offsets = [1, 0], sizes = [1, 32], strides = [1, 1]} : vector<8x32xf32> to vector<1x32xf32>
    %88 = arith.addf %87, %82 : vector<1x32xf32>
    %89 = arith.negf %88 : vector<1x32xf32>
    %90 = math.exp %89 : vector<1x32xf32>
    %cst_65 = arith.constant 1.000000e+00 : f32
    %91 = vector.broadcast %cst_65 : f32 to vector<1x32xf32>
    %92 = arith.addf %91, %90 : vector<1x32xf32>
    %93 = arith.divf %91, %92 : vector<1x32xf32>
    %94 = vector.extract_strided_slice %31 {offsets = [1, 0], sizes = [1, 32], strides = [1, 1]} : vector<8x32xf32> to vector<1x32xf32>
    %95 = arith.addf %94, %84 : vector<1x32xf32>
    %96 = arith.negf %95 : vector<1x32xf32>
    %97 = math.exp %96 : vector<1x32xf32>
    %cst_66 = arith.constant 1.000000e+00 : f32
    %98 = vector.broadcast %cst_66 : f32 to vector<1x32xf32>
    %99 = arith.addf %98, %97 : vector<1x32xf32>
    %100 = arith.divf %98, %99 : vector<1x32xf32>
    %101 = vector.extract_strided_slice %38 {offsets = [1, 0], sizes = [1, 32], strides = [1, 1]} : vector<8x32xf32> to vector<1x32xf32>
    %102 = arith.mulf %93, %86 : vector<1x32xf32>
    %103 = arith.addf %101, %102 : vector<1x32xf32>
    %104 = math.tanh %103 : vector<1x32xf32>
    %cst_67 = arith.constant 1.000000e+00 : f32
    %105 = vector.broadcast %cst_67 : f32 to vector<1x32xf32>
    %106 = arith.subf %105, %100 : vector<1x32xf32>
    %107 = arith.mulf %106, %104 : vector<1x32xf32>
    %108 = arith.mulf %100, %80 : vector<1x32xf32>
    %109 = arith.addf %107, %108 : vector<1x32xf32>
    %cst_68 = arith.constant dense<0.000000e+00> : vector<1x32xf32>
    %110 = tpu.matmul %109, %40, %cst_68 {dimension_numbers = #tpu.dot_dimension_numbers<[1], [0], [0], [1], [0, 0, 1, 1], [], []>, precision = #tpu.contract_precision<fp32>} : vector<1x32xf32>, vector<32x32xf32>, vector<1x32xf32> -> vector<1x32xf32>
    %111 = arith.addf %110, %46 : vector<1x32xf32>
    %cst_69 = arith.constant dense<0.000000e+00> : vector<1x32xf32>
    %112 = tpu.matmul %109, %42, %cst_69 {dimension_numbers = #tpu.dot_dimension_numbers<[1], [0], [0], [1], [0, 0, 1, 1], [], []>, precision = #tpu.contract_precision<fp32>} : vector<1x32xf32>, vector<32x32xf32>, vector<1x32xf32> -> vector<1x32xf32>
    %113 = arith.addf %112, %48 : vector<1x32xf32>
    %cst_70 = arith.constant dense<0.000000e+00> : vector<1x32xf32>
    %114 = tpu.matmul %109, %44, %cst_70 {dimension_numbers = #tpu.dot_dimension_numbers<[1], [0], [0], [1], [0, 0, 1, 1], [], []>, precision = #tpu.contract_precision<fp32>} : vector<1x32xf32>, vector<32x32xf32>, vector<1x32xf32> -> vector<1x32xf32>
    %115 = arith.addf %114, %50 : vector<1x32xf32>
    %116 = vector.extract_strided_slice %24 {offsets = [2, 0], sizes = [1, 32], strides = [1, 1]} : vector<8x32xf32> to vector<1x32xf32>
    %117 = arith.addf %116, %111 : vector<1x32xf32>
    %118 = arith.negf %117 : vector<1x32xf32>
    %119 = math.exp %118 : vector<1x32xf32>
    %cst_71 = arith.constant 1.000000e+00 : f32
    %120 = vector.broadcast %cst_71 : f32 to vector<1x32xf32>
    %121 = arith.addf %120, %119 : vector<1x32xf32>
    %122 = arith.divf %120, %121 : vector<1x32xf32>
    %123 = vector.extract_strided_slice %31 {offsets = [2, 0], sizes = [1, 32], strides = [1, 1]} : vector<8x32xf32> to vector<1x32xf32>
    %124 = arith.addf %123, %113 : vector<1x32xf32>
    %125 = arith.negf %124 : vector<1x32xf32>
    %126 = math.exp %125 : vector<1x32xf32>
    %cst_72 = arith.constant 1.000000e+00 : f32
    %127 = vector.broadcast %cst_72 : f32 to vector<1x32xf32>
    %128 = arith.addf %127, %126 : vector<1x32xf32>
    %129 = arith.divf %127, %128 : vector<1x32xf32>
    %130 = vector.extract_strided_slice %38 {offsets = [2, 0], sizes = [1, 32], strides = [1, 1]} : vector<8x32xf32> to vector<1x32xf32>
    %131 = arith.mulf %122, %115 : vector<1x32xf32>
    %132 = arith.addf %130, %131 : vector<1x32xf32>
    %133 = math.tanh %132 : vector<1x32xf32>
    %cst_73 = arith.constant 1.000000e+00 : f32
    %134 = vector.broadcast %cst_73 : f32 to vector<1x32xf32>
    %135 = arith.subf %134, %129 : vector<1x32xf32>
    %136 = arith.mulf %135, %133 : vector<1x32xf32>
    %137 = arith.mulf %129, %109 : vector<1x32xf32>
    %138 = arith.addf %136, %137 : vector<1x32xf32>
    %cst_74 = arith.constant dense<0.000000e+00> : vector<1x32xf32>
    %139 = tpu.matmul %138, %40, %cst_74 {dimension_numbers = #tpu.dot_dimension_numbers<[1], [0], [0], [1], [0, 0, 1, 1], [], []>, precision = #tpu.contract_precision<fp32>} : vector<1x32xf32>, vector<32x32xf32>, vector<1x32xf32> -> vector<1x32xf32>
    %140 = arith.addf %139, %46 : vector<1x32xf32>
    %cst_75 = arith.constant dense<0.000000e+00> : vector<1x32xf32>
    %141 = tpu.matmul %138, %42, %cst_75 {dimension_numbers = #tpu.dot_dimension_numbers<[1], [0], [0], [1], [0, 0, 1, 1], [], []>, precision = #tpu.contract_precision<fp32>} : vector<1x32xf32>, vector<32x32xf32>, vector<1x32xf32> -> vector<1x32xf32>
    %142 = arith.addf %141, %48 : vector<1x32xf32>
    %cst_76 = arith.constant dense<0.000000e+00> : vector<1x32xf32>
    %143 = tpu.matmul %138, %44, %cst_76 {dimension_numbers = #tpu.dot_dimension_numbers<[1], [0], [0], [1], [0, 0, 1, 1], [], []>, precision = #tpu.contract_precision<fp32>} : vector<1x32xf32>, vector<32x32xf32>, vector<1x32xf32> -> vector<1x32xf32>
    %144 = arith.addf %143, %50 : vector<1x32xf32>
    %145 = vector.extract_strided_slice %24 {offsets = [3, 0], sizes = [1, 32], strides = [1, 1]} : vector<8x32xf32> to vector<1x32xf32>
    %146 = arith.addf %145, %140 : vector<1x32xf32>
    %147 = arith.negf %146 : vector<1x32xf32>
    %148 = math.exp %147 : vector<1x32xf32>
    %cst_77 = arith.constant 1.000000e+00 : f32
    %149 = vector.broadcast %cst_77 : f32 to vector<1x32xf32>
    %150 = arith.addf %149, %148 : vector<1x32xf32>
    %151 = arith.divf %149, %150 : vector<1x32xf32>
    %152 = vector.extract_strided_slice %31 {offsets = [3, 0], sizes = [1, 32], strides = [1, 1]} : vector<8x32xf32> to vector<1x32xf32>
    %153 = arith.addf %152, %142 : vector<1x32xf32>
    %154 = arith.negf %153 : vector<1x32xf32>
    %155 = math.exp %154 : vector<1x32xf32>
    %cst_78 = arith.constant 1.000000e+00 : f32
    %156 = vector.broadcast %cst_78 : f32 to vector<1x32xf32>
    %157 = arith.addf %156, %155 : vector<1x32xf32>
    %158 = arith.divf %156, %157 : vector<1x32xf32>
    %159 = vector.extract_strided_slice %38 {offsets = [3, 0], sizes = [1, 32], strides = [1, 1]} : vector<8x32xf32> to vector<1x32xf32>
    %160 = arith.mulf %151, %144 : vector<1x32xf32>
    %161 = arith.addf %159, %160 : vector<1x32xf32>
    %162 = math.tanh %161 : vector<1x32xf32>
    %cst_79 = arith.constant 1.000000e+00 : f32
    %163 = vector.broadcast %cst_79 : f32 to vector<1x32xf32>
    %164 = arith.subf %163, %158 : vector<1x32xf32>
    %165 = arith.mulf %164, %162 : vector<1x32xf32>
    %166 = arith.mulf %158, %138 : vector<1x32xf32>
    %167 = arith.addf %165, %166 : vector<1x32xf32>
    %cst_80 = arith.constant dense<0.000000e+00> : vector<1x32xf32>
    %168 = tpu.matmul %167, %40, %cst_80 {dimension_numbers = #tpu.dot_dimension_numbers<[1], [0], [0], [1], [0, 0, 1, 1], [], []>, precision = #tpu.contract_precision<fp32>} : vector<1x32xf32>, vector<32x32xf32>, vector<1x32xf32> -> vector<1x32xf32>
    %169 = arith.addf %168, %46 : vector<1x32xf32>
    %cst_81 = arith.constant dense<0.000000e+00> : vector<1x32xf32>
    %170 = tpu.matmul %167, %42, %cst_81 {dimension_numbers = #tpu.dot_dimension_numbers<[1], [0], [0], [1], [0, 0, 1, 1], [], []>, precision = #tpu.contract_precision<fp32>} : vector<1x32xf32>, vector<32x32xf32>, vector<1x32xf32> -> vector<1x32xf32>
    %171 = arith.addf %170, %48 : vector<1x32xf32>
    %cst_82 = arith.constant dense<0.000000e+00> : vector<1x32xf32>
    %172 = tpu.matmul %167, %44, %cst_82 {dimension_numbers = #tpu.dot_dimension_numbers<[1], [0], [0], [1], [0, 0, 1, 1], [], []>, precision = #tpu.contract_precision<fp32>} : vector<1x32xf32>, vector<32x32xf32>, vector<1x32xf32> -> vector<1x32xf32>
    %173 = arith.addf %172, %50 : vector<1x32xf32>
    %174 = vector.extract_strided_slice %24 {offsets = [4, 0], sizes = [1, 32], strides = [1, 1]} : vector<8x32xf32> to vector<1x32xf32>
    %175 = arith.addf %174, %169 : vector<1x32xf32>
    %176 = arith.negf %175 : vector<1x32xf32>
    %177 = math.exp %176 : vector<1x32xf32>
    %cst_83 = arith.constant 1.000000e+00 : f32
    %178 = vector.broadcast %cst_83 : f32 to vector<1x32xf32>
    %179 = arith.addf %178, %177 : vector<1x32xf32>
    %180 = arith.divf %178, %179 : vector<1x32xf32>
    %181 = vector.extract_strided_slice %31 {offsets = [4, 0], sizes = [1, 32], strides = [1, 1]} : vector<8x32xf32> to vector<1x32xf32>
    %182 = arith.addf %181, %171 : vector<1x32xf32>
    %183 = arith.negf %182 : vector<1x32xf32>
    %184 = math.exp %183 : vector<1x32xf32>
    %cst_84 = arith.constant 1.000000e+00 : f32
    %185 = vector.broadcast %cst_84 : f32 to vector<1x32xf32>
    %186 = arith.addf %185, %184 : vector<1x32xf32>
    %187 = arith.divf %185, %186 : vector<1x32xf32>
    %188 = vector.extract_strided_slice %38 {offsets = [4, 0], sizes = [1, 32], strides = [1, 1]} : vector<8x32xf32> to vector<1x32xf32>
    %189 = arith.mulf %180, %173 : vector<1x32xf32>
    %190 = arith.addf %188, %189 : vector<1x32xf32>
    %191 = math.tanh %190 : vector<1x32xf32>
    %cst_85 = arith.constant 1.000000e+00 : f32
    %192 = vector.broadcast %cst_85 : f32 to vector<1x32xf32>
    %193 = arith.subf %192, %187 : vector<1x32xf32>
    %194 = arith.mulf %193, %191 : vector<1x32xf32>
    %195 = arith.mulf %187, %167 : vector<1x32xf32>
    %196 = arith.addf %194, %195 : vector<1x32xf32>
    %cst_86 = arith.constant dense<0.000000e+00> : vector<1x32xf32>
    %197 = tpu.matmul %196, %40, %cst_86 {dimension_numbers = #tpu.dot_dimension_numbers<[1], [0], [0], [1], [0, 0, 1, 1], [], []>, precision = #tpu.contract_precision<fp32>} : vector<1x32xf32>, vector<32x32xf32>, vector<1x32xf32> -> vector<1x32xf32>
    %198 = arith.addf %197, %46 : vector<1x32xf32>
    %cst_87 = arith.constant dense<0.000000e+00> : vector<1x32xf32>
    %199 = tpu.matmul %196, %42, %cst_87 {dimension_numbers = #tpu.dot_dimension_numbers<[1], [0], [0], [1], [0, 0, 1, 1], [], []>, precision = #tpu.contract_precision<fp32>} : vector<1x32xf32>, vector<32x32xf32>, vector<1x32xf32> -> vector<1x32xf32>
    %200 = arith.addf %199, %48 : vector<1x32xf32>
    %cst_88 = arith.constant dense<0.000000e+00> : vector<1x32xf32>
    %201 = tpu.matmul %196, %44, %cst_88 {dimension_numbers = #tpu.dot_dimension_numbers<[1], [0], [0], [1], [0, 0, 1, 1], [], []>, precision = #tpu.contract_precision<fp32>} : vector<1x32xf32>, vector<32x32xf32>, vector<1x32xf32> -> vector<1x32xf32>
    %202 = arith.addf %201, %50 : vector<1x32xf32>
    %203 = vector.extract_strided_slice %24 {offsets = [5, 0], sizes = [1, 32], strides = [1, 1]} : vector<8x32xf32> to vector<1x32xf32>
    %204 = arith.addf %203, %198 : vector<1x32xf32>
    %205 = arith.negf %204 : vector<1x32xf32>
    %206 = math.exp %205 : vector<1x32xf32>
    %cst_89 = arith.constant 1.000000e+00 : f32
    %207 = vector.broadcast %cst_89 : f32 to vector<1x32xf32>
    %208 = arith.addf %207, %206 : vector<1x32xf32>
    %209 = arith.divf %207, %208 : vector<1x32xf32>
    %210 = vector.extract_strided_slice %31 {offsets = [5, 0], sizes = [1, 32], strides = [1, 1]} : vector<8x32xf32> to vector<1x32xf32>
    %211 = arith.addf %210, %200 : vector<1x32xf32>
    %212 = arith.negf %211 : vector<1x32xf32>
    %213 = math.exp %212 : vector<1x32xf32>
    %cst_90 = arith.constant 1.000000e+00 : f32
    %214 = vector.broadcast %cst_90 : f32 to vector<1x32xf32>
    %215 = arith.addf %214, %213 : vector<1x32xf32>
    %216 = arith.divf %214, %215 : vector<1x32xf32>
    %217 = vector.extract_strided_slice %38 {offsets = [5, 0], sizes = [1, 32], strides = [1, 1]} : vector<8x32xf32> to vector<1x32xf32>
    %218 = arith.mulf %209, %202 : vector<1x32xf32>
    %219 = arith.addf %217, %218 : vector<1x32xf32>
    %220 = math.tanh %219 : vector<1x32xf32>
    %cst_91 = arith.constant 1.000000e+00 : f32
    %221 = vector.broadcast %cst_91 : f32 to vector<1x32xf32>
    %222 = arith.subf %221, %216 : vector<1x32xf32>
    %223 = arith.mulf %222, %220 : vector<1x32xf32>
    %224 = arith.mulf %216, %196 : vector<1x32xf32>
    %225 = arith.addf %223, %224 : vector<1x32xf32>
    %cst_92 = arith.constant dense<0.000000e+00> : vector<1x32xf32>
    %226 = tpu.matmul %225, %40, %cst_92 {dimension_numbers = #tpu.dot_dimension_numbers<[1], [0], [0], [1], [0, 0, 1, 1], [], []>, precision = #tpu.contract_precision<fp32>} : vector<1x32xf32>, vector<32x32xf32>, vector<1x32xf32> -> vector<1x32xf32>
    %227 = arith.addf %226, %46 : vector<1x32xf32>
    %cst_93 = arith.constant dense<0.000000e+00> : vector<1x32xf32>
    %228 = tpu.matmul %225, %42, %cst_93 {dimension_numbers = #tpu.dot_dimension_numbers<[1], [0], [0], [1], [0, 0, 1, 1], [], []>, precision = #tpu.contract_precision<fp32>} : vector<1x32xf32>, vector<32x32xf32>, vector<1x32xf32> -> vector<1x32xf32>
    %229 = arith.addf %228, %48 : vector<1x32xf32>
    %cst_94 = arith.constant dense<0.000000e+00> : vector<1x32xf32>
    %230 = tpu.matmul %225, %44, %cst_94 {dimension_numbers = #tpu.dot_dimension_numbers<[1], [0], [0], [1], [0, 0, 1, 1], [], []>, precision = #tpu.contract_precision<fp32>} : vector<1x32xf32>, vector<32x32xf32>, vector<1x32xf32> -> vector<1x32xf32>
    %231 = arith.addf %230, %50 : vector<1x32xf32>
    %232 = vector.extract_strided_slice %24 {offsets = [6, 0], sizes = [1, 32], strides = [1, 1]} : vector<8x32xf32> to vector<1x32xf32>
    %233 = arith.addf %232, %227 : vector<1x32xf32>
    %234 = arith.negf %233 : vector<1x32xf32>
    %235 = math.exp %234 : vector<1x32xf32>
    %cst_95 = arith.constant 1.000000e+00 : f32
    %236 = vector.broadcast %cst_95 : f32 to vector<1x32xf32>
    %237 = arith.addf %236, %235 : vector<1x32xf32>
    %238 = arith.divf %236, %237 : vector<1x32xf32>
    %239 = vector.extract_strided_slice %31 {offsets = [6, 0], sizes = [1, 32], strides = [1, 1]} : vector<8x32xf32> to vector<1x32xf32>
    %240 = arith.addf %239, %229 : vector<1x32xf32>
    %241 = arith.negf %240 : vector<1x32xf32>
    %242 = math.exp %241 : vector<1x32xf32>
    %cst_96 = arith.constant 1.000000e+00 : f32
    %243 = vector.broadcast %cst_96 : f32 to vector<1x32xf32>
    %244 = arith.addf %243, %242 : vector<1x32xf32>
    %245 = arith.divf %243, %244 : vector<1x32xf32>
    %246 = vector.extract_strided_slice %38 {offsets = [6, 0], sizes = [1, 32], strides = [1, 1]} : vector<8x32xf32> to vector<1x32xf32>
    %247 = arith.mulf %238, %231 : vector<1x32xf32>
    %248 = arith.addf %246, %247 : vector<1x32xf32>
    %249 = math.tanh %248 : vector<1x32xf32>
    %cst_97 = arith.constant 1.000000e+00 : f32
    %250 = vector.broadcast %cst_97 : f32 to vector<1x32xf32>
    %251 = arith.subf %250, %245 : vector<1x32xf32>
    %252 = arith.mulf %251, %249 : vector<1x32xf32>
    %253 = arith.mulf %245, %225 : vector<1x32xf32>
    %254 = arith.addf %252, %253 : vector<1x32xf32>
    %cst_98 = arith.constant dense<0.000000e+00> : vector<1x32xf32>
    %255 = tpu.matmul %254, %40, %cst_98 {dimension_numbers = #tpu.dot_dimension_numbers<[1], [0], [0], [1], [0, 0, 1, 1], [], []>, precision = #tpu.contract_precision<fp32>} : vector<1x32xf32>, vector<32x32xf32>, vector<1x32xf32> -> vector<1x32xf32>
    %256 = arith.addf %255, %46 : vector<1x32xf32>
    %cst_99 = arith.constant dense<0.000000e+00> : vector<1x32xf32>
    %257 = tpu.matmul %254, %42, %cst_99 {dimension_numbers = #tpu.dot_dimension_numbers<[1], [0], [0], [1], [0, 0, 1, 1], [], []>, precision = #tpu.contract_precision<fp32>} : vector<1x32xf32>, vector<32x32xf32>, vector<1x32xf32> -> vector<1x32xf32>
    %258 = arith.addf %257, %48 : vector<1x32xf32>
    %cst_100 = arith.constant dense<0.000000e+00> : vector<1x32xf32>
    %259 = tpu.matmul %254, %44, %cst_100 {dimension_numbers = #tpu.dot_dimension_numbers<[1], [0], [0], [1], [0, 0, 1, 1], [], []>, precision = #tpu.contract_precision<fp32>} : vector<1x32xf32>, vector<32x32xf32>, vector<1x32xf32> -> vector<1x32xf32>
    %260 = arith.addf %259, %50 : vector<1x32xf32>
    %261 = vector.extract_strided_slice %24 {offsets = [7, 0], sizes = [1, 32], strides = [1, 1]} : vector<8x32xf32> to vector<1x32xf32>
    %262 = arith.addf %261, %256 : vector<1x32xf32>
    %263 = arith.negf %262 : vector<1x32xf32>
    %264 = math.exp %263 : vector<1x32xf32>
    %cst_101 = arith.constant 1.000000e+00 : f32
    %265 = vector.broadcast %cst_101 : f32 to vector<1x32xf32>
    %266 = arith.addf %265, %264 : vector<1x32xf32>
    %267 = arith.divf %265, %266 : vector<1x32xf32>
    %268 = vector.extract_strided_slice %31 {offsets = [7, 0], sizes = [1, 32], strides = [1, 1]} : vector<8x32xf32> to vector<1x32xf32>
    %269 = arith.addf %268, %258 : vector<1x32xf32>
    %270 = arith.negf %269 : vector<1x32xf32>
    %271 = math.exp %270 : vector<1x32xf32>
    %cst_102 = arith.constant 1.000000e+00 : f32
    %272 = vector.broadcast %cst_102 : f32 to vector<1x32xf32>
    %273 = arith.addf %272, %271 : vector<1x32xf32>
    %274 = arith.divf %272, %273 : vector<1x32xf32>
    %275 = vector.extract_strided_slice %38 {offsets = [7, 0], sizes = [1, 32], strides = [1, 1]} : vector<8x32xf32> to vector<1x32xf32>
    %276 = arith.mulf %267, %260 : vector<1x32xf32>
    %277 = arith.addf %275, %276 : vector<1x32xf32>
    %278 = math.tanh %277 : vector<1x32xf32>
    %cst_103 = arith.constant 1.000000e+00 : f32
    %279 = vector.broadcast %cst_103 : f32 to vector<1x32xf32>
    %280 = arith.subf %279, %274 : vector<1x32xf32>
    %281 = arith.mulf %280, %278 : vector<1x32xf32>
    %282 = arith.mulf %274, %254 : vector<1x32xf32>
    %283 = arith.addf %281, %282 : vector<1x32xf32>
    %284 = vector.extract_strided_slice %15 {offsets = [112, 0], sizes = [16, 16], strides = [1, 1]} : vector<128x16xf32> to vector<16x16xf32>
    %c0_104 = arith.constant 0 : index
    %c0_105 = arith.constant 0 : index
    %285 = vector.load %arg11[%c0_104, %c0_105] : memref<16x32xf32, #tpu.memory_space<vmem>>, vector<16x32xf32>
    %cst_106 = arith.constant dense<0.000000e+00> : vector<16x32xf32>
    %286 = tpu.matmul %284, %285, %cst_106 {dimension_numbers = #tpu.dot_dimension_numbers<[1], [0], [0], [1], [0, 0, 1, 1], [], []>, precision = #tpu.contract_precision<fp32>} : vector<16x16xf32>, vector<16x32xf32>, vector<16x32xf32> -> vector<16x32xf32>
    %c0_107 = arith.constant 0 : index
    %c0_108 = arith.constant 0 : index
    %287 = vector.load %arg12[%c0_107, %c0_108] : memref<16x32xf32, #tpu.memory_space<vmem>>, vector<16x32xf32>
    %cst_109 = arith.constant dense<0.000000e+00> : vector<16x32xf32>
    %288 = tpu.matmul %284, %287, %cst_109 {dimension_numbers = #tpu.dot_dimension_numbers<[1], [0], [0], [1], [0, 0, 1, 1], [], []>, precision = #tpu.contract_precision<fp32>} : vector<16x16xf32>, vector<16x32xf32>, vector<16x32xf32> -> vector<16x32xf32>
    %c0_110 = arith.constant 0 : index
    %c0_111 = arith.constant 0 : index
    %289 = vector.load %arg13[%c0_110, %c0_111] : memref<32x32xf32, #tpu.memory_space<vmem>>, vector<32x32xf32>
    %cst_112 = arith.constant dense<0.000000e+00> : vector<1x32xf32>
    %290 = tpu.matmul %283, %289, %cst_112 {dimension_numbers = #tpu.dot_dimension_numbers<[1], [0], [0], [1], [0, 0, 1, 1], [], []>, precision = #tpu.contract_precision<fp32>} : vector<1x32xf32>, vector<32x32xf32>, vector<1x32xf32> -> vector<1x32xf32>
    %291 = vector.broadcast %290 : vector<1x32xf32> to vector<16x32xf32>
    %292 = arith.addf %288, %291 : vector<16x32xf32>
    %c0_113 = arith.constant 0 : index
    %c0_114 = arith.constant 0 : index
    %293 = vector.load %arg14[%c0_113, %c0_114] : memref<1x32xf32, #tpu.memory_space<vmem>>, vector<1x32xf32>
    %294 = vector.broadcast %293 : vector<1x32xf32> to vector<16x32xf32>
    %295 = arith.addf %292, %294 : vector<16x32xf32>
    %296 = vector.shape_cast %286 : vector<16x32xf32> to vector<16x1x32xf32>
    %297 = vector.shape_cast %295 : vector<16x32xf32> to vector<1x16x32xf32>
    %298 = vector.broadcast %296 : vector<16x1x32xf32> to vector<16x16x32xf32>
    %299 = vector.broadcast %297 : vector<1x16x32xf32> to vector<16x16x32xf32>
    %300 = arith.addf %298, %299 : vector<16x16x32xf32>
    %cst_115 = arith.constant 0.000000e+00 : f32
    %301 = vector.broadcast %cst_115 : f32 to vector<16x16x32xf32>
    %302 = arith.maximumf %300, %301 : vector<16x16x32xf32>
    %303 = vector.shape_cast %302 : vector<16x16x32xf32> to vector<256x32xf32>
    %c0_116 = arith.constant 0 : index
    %c0_117 = arith.constant 0 : index
    %304 = vector.load %arg15[%c0_116, %c0_117] : memref<32x1xf32, #tpu.memory_space<vmem>>, vector<32x1xf32>
    %cst_118 = arith.constant dense<0.000000e+00> : vector<256x1xf32>
    %305 = tpu.matmul %303, %304, %cst_118 {dimension_numbers = #tpu.dot_dimension_numbers<[1], [0], [0], [1], [0, 0, 1, 1], [], []>, precision = #tpu.contract_precision<fp32>} : vector<256x32xf32>, vector<32x1xf32>, vector<256x1xf32> -> vector<256x1xf32>
    %c0_119 = arith.constant 0 : index
    %306 = memref.load %arg16[%c0_119] : memref<1xf32, #tpu.memory_space<smem>>
    %307 = vector.broadcast %306 : f32 to vector<256x1xf32>
    %308 = arith.addf %305, %307 : vector<256x1xf32>
    %c0_120 = arith.constant 0 : index
    %c0_121 = arith.constant 0 : index
    %309 = vector.load %arg17[%c0_120, %c0_121] : memref<256x1xf32, #tpu.memory_space<vmem>>, vector<256x1xf32>
    tpu.vector_store %arg17[%c0_120, %c0_121], %308 {strides = array<i32>} : memref<256x1xf32, #tpu.memory_space<vmem>>, vector<256x1xf32>,
    return
  }
}

</mosaic_0001>

<bundles_post_ra>
// kernel: temporal_gnn_forward.1
= control target key start
LH: loop header
LB: loop body
LE: loop exit
PB: predicated region body
PF: predicated region fallthrough
CT: control target
= control target key end

     0   :  { %vm90_vm0 = vcmask 64512   ;;  %vm2543_vm1 = vcmask 261120   ;;  %vm30542_vm2 = vmmov 0   ;;  %vm5666_vm3 = vcmask 130048   ;;  %s34768_s3 = inlined_call_operand.vmem [shape: f32[8,32], index: 3, kind: input, shape index: {}]   ;;  %s34769_s0 = inlined_call_operand.vmem [shape: f32[128,8], index: 0, kind: input, shape index: {}]   ;;  %s34770_s1 = inlined_call_operand.vmem [shape: f32[128,128], index: 1, kind: input, shape index: {}]   ;;  %s34771_s5 = inlined_call_operand.vmem [shape: f32[32,16], index: 5, kind: input, shape index: {}]   ;;  %s34772_s4 = inlined_call_operand.vmem [shape: f32[1,32], index: 4, kind: input, shape index: {}]   ;;  %s34773_s6 = inlined_call_operand.vmem [shape: f32[1,16], index: 6, kind: input, shape index: {}]   ;;  %s34774_s2 = inlined_call_operand.vmem [shape: f32[8,128], index: 2, kind: input, shape index: {}]   ;;  %s34775_s7 = inlined_call_operand.vmem [shape: f32[3,16,32], index: 7, kind: input, shape index: {}]   ;;  %s34776_s9 = inlined_call_operand.vmem [shape: f32[3,32,32], index: 9, kind: input, shape index: {}]   ;;  %s34777_s10 = inlined_call_operand.vmem [shape: f32[3,1,32], index: 10, kind: input, shape index: {}]   ;;  %s34778_s8 = inlined_call_operand.vmem [shape: f32[3,1,32], index: 8, kind: input, shape index: {}]   ;;  %s34779_s11 = inlined_call_operand.vmem [shape: f32[16,32], index: 11, kind: input, shape index: {}]   ;;  %s34780_s12 = inlined_call_operand.vmem [shape: f32[16,32], index: 12, kind: input, shape index: {}]   ;;  %s34781_s13 = inlined_call_operand.vmem [shape: f32[32,32], index: 13, kind: input, shape index: {}]   ;;  %s34782_s15 = inlined_call_operand.vmem [shape: f32[32,1], index: 15, kind: input, shape index: {}]   ;;  %s34783_s14 = inlined_call_operand.vmem [shape: f32[1,32], index: 14, kind: input, shape index: {}]   ;;  %s34784_s16 = inlined_call_operand.<no memory space> [shape: f32[1], index: 16, kind: input, shape index: {}]   ;;  %s34785_s17 = inlined_call_operand.vmem [shape: f32[256,1], index: 17, kind: output, shape index: {}]  }
   0x1   :  { %34910 = sst [smem:[#allocation64_spill]] %s34768_s3  ;;  %vm22687_vm4 = vcmask 7168  }
   0x2   :  { %34911 = sst [smem:[#allocation65_spill]] %s34769_s0  ;;  %s34912_s26 = sld [smem:[#allocation64_spill]] }
   0x3   :  { %s34913_s29 = sld [smem:[#allocation65_spill]] }
   0x8   :  { %v89_v0 = vld [vmem:[%s34912_s26] sm:$0xff] }
   0x9   :  { %v73_v1 = vld [vmem:[%s34913_s29] sm:$0xff]  ;;  %v74_v2 = vld [vmem:[%s34913_s29 + $0x8] sm:$0xff]  ;;  %v30644_v3 = vand.u32 4294901760, %v89_v0  ;;  %v75_v6 = vld [vmem:[%s34913_s29 + $0x10] sm:$0xff] }
   0xa   :  { %v92_v4 = vsel %vm90_vm0, %v73_v1, 0  ;;  %v95_v5 = vsel %vm90_vm0, %v74_v2, 0  ;;  %v76_v7 = vld [vmem:[%s34913_s29 + $0x18] sm:$0xff]  ;;  %v77_v8 = vld [vmem:[%s34913_s29 + $0x20] sm:$0xff]  ;;  %v98_v11 = vsel %vm90_vm0, %v75_v6, 0  ;;  %v78_v13 = vld [vmem:[%s34913_s29 + $0x28] sm:$0xff] }
   0xb   :  { %v30657_v9 = vand.u32 4294901760, %v92_v4  ;;  %v30659_v10 = vand.u32 4294901760, %v95_v5  ;;  %v101_v12 = vsel %vm90_vm0, %v76_v7, 0  ;;  %24538 = vmatprep.subr.mxu0 %v30644_v3  ;;  %v30668_v14 = vsub.f32 %v89_v0, %v30644_v3  ;;  %v79_v18 = vld [vmem:[%s34913_s29 + $0x30] sm:$0xff]  ;;  %v80_v39 = vld [vmem:[%s34913_s29 + $0x38] sm:$0xff]  ;;  %v81_v44 = vld [vmem:[%s34913_s29 + $0x40] sm:$0xff] }
   0xc   :  { %v30670_v15 = vand.u32 4294901760, %v98_v11  ;;  %v30672_v16 = vand.u32 4294901760, %v101_v12  ;;  %v104_v17 = vsel %vm90_vm0, %v77_v8, 0  ;;  %24539 = vmatpush3.msra.mxu0 %v30644_v3  ;;  %v107_v22 = vsel %vm90_vm0, %v78_v13, 0  ;;  %v82_v49 = vld [vmem:[%s34913_s29 + $0x48] sm:$0xff]  ;;  %v83_v50 = vld [vmem:[%s34913_s29 + $0x50] sm:$0xff] }
   0xd   :  { %v30680_v19 = vsub.f32 %v92_v4, %v30657_v9  ;;  %v30683_v20 = vsub.f32 %v95_v5, %v30659_v10  ;;  %v30685_v21 = vand.u32 4294901760, %v104_v17  ;;  %v30689_v23 = vand.u32 4294901760, %v30668_v14  ;;  %v84_v55 = vld [vmem:[%s34913_s29 + $0x58] sm:$0xff]  ;;  %v85_v60 = vld [vmem:[%s34913_s29 + $0x60] sm:$0xff]  ;;  %v86_v61 = vld [vmem:[%s34913_s29 + $0x68] sm:$0xff] }
   0xe   :  { %v30692_v24 = vsub.f32 %v98_v11, %v30670_v15  ;;  %v30695_v25 = vsub.f32 %v101_v12, %v30672_v16  ;;  %v30697_v26 = vand.u32 4294901760, %v107_v22  ;;  %v110_v30 = vsel %vm90_vm0, %v79_v18, 0  ;;  %v87_v13 = vld [vmem:[%s34913_s29 + $0x70] sm:$0xff] }
   0xf   :  { %v207_v27 = vand.u32 4294901760, %v30680_v19  ;;  %v217_v28 = vand.u32 4294901760, %v30683_v20  ;;  %v30702_v29 = vsub.f32 %v104_v17, %v30685_v21  ;;  %v369_v31 = vsub.f32 %v30668_v14, %v30689_v23 }
  0x10   :  { %v227_v32 = vand.u32 4294901760, %v30692_v24  ;;  %v237_v33 = vand.u32 4294901760, %v30695_v25  ;;  %v30710_v34 = vsub.f32 %v107_v22, %v30697_v26  ;;  %v30719_v38 = vand.u32 4294901760, %v110_v30 }
  0x11   :  { %v208_v35 = vsub.f32 %v30680_v19, %v207_v27  ;;  %v218_v36 = vsub.f32 %v30683_v20, %v217_v28  ;;  %v247_v37 = vand.u32 4294901760, %v30702_v29  ;;  %v370_v40 = vand.u32 4294901760, %v369_v31 }
  0x12   :  { %v228_v41 = vsub.f32 %v30692_v24, %v227_v32  ;;  %v238_v42 = vsub.f32 %v30695_v25, %v237_v33  ;;  %v257_v43 = vand.u32 4294901760, %v30710_v34  ;;  %v30738_v48 = vsub.f32 %v110_v30, %v30719_v38 }
  0x13   :  { %v209_v45 = vand.u32 4294901760, %v208_v35  ;;  %v219_v46 = vand.u32 4294901760, %v218_v36  ;;  %v248_v47 = vsub.f32 %v30702_v29, %v247_v37  ;;  %24564 = vmatprep.subr.mxu0 %v370_v40  ;;  %v113_v54 = vsel %vm90_vm0, %v80_v39, 0 }
  0x14   :  { %v229_v51 = vand.u32 4294901760, %v228_v41  ;;  %v239_v52 = vand.u32 4294901760, %v238_v42  ;;  %v258_v53 = vsub.f32 %v30710_v34, %v257_v43  ;;  %v267_v57 = vand.u32 4294901760, %v30738_v48 }
  0x15   :  { %24540 = vmatprep.mubr.f32.mxu0 %v209_v45  ;;  %v249_v56 = vand.u32 4294901760, %v248_v47  ;;  %v30754_v58 = vand.u32 4294901760, %v113_v54  ;;  %v116_v59 = vsel %vm90_vm0, %v81_v44, 0  ;;  %v119_v0 = vsel %vm90_vm0, %v82_v49, 0  ;;  %v88_v49 = vld [vmem:[%s34913_s29 + $0x78] sm:$0xff] }
  0x16   :  { %24541 = vmatmul.mubr.f32.vlgmr.msra.gmra.mrb[0].mxu0 %v219_v46  ;;  %v259_v62 = vand.u32 4294901760, %v258_v53  ;;  %v30763_v63 = vand.u32 4294901760, %v116_v59  ;;  %v122_v1 = vsel %vm90_vm0, %v83_v50, 0  ;;  %v268_v2 = vsub.f32 %v30738_v48, %v267_v57 }
  0x17   :  { %24565 = vmatpush3.msra.mxu0 %v370_v40  ;;  %24543 = vmatprep.mubr.f32.mxu0 %v229_v51  ;;  %v30771_v4 = vsub.f32 %v113_v54, %v30754_v58  ;;  %v30773_v5 = vand.u32 4294901760, %v119_v0  ;;  %v30775_v6 = vand.u32 4294901760, %v122_v1  ;;  %v125_v8 = vsel %vm90_vm0, %v84_v55, 0 }
  0x18   :  { %v30778_v7 = vsub.f32 %v116_v59, %v30763_v63  ;;  %v128_v11 = vsel %vm90_vm0, %v85_v60, 0  ;;  %v131_v12 = vsel %vm90_vm0, %v86_v61, 0  ;;  %24590 = vmatprep.subr.mxu0 %v30668_v14  ;;  %v269_v17 = vand.u32 4294901760, %v268_v2 }
  0x19   :  { %v277_v18 = vand.u32 4294901760, %v30771_v4  ;;  %v30789_v22 = vsub.f32 %v119_v0, %v30773_v5  ;;  %v30792_v30 = vsub.f32 %v122_v1, %v30775_v6  ;;  %v30795_v35 = vand.u32 4294901760, %v125_v8 }
  0x1a   :  { %24544 = vmatmul.mubr.f32.gmra.mrb[2].mxu0 %v239_v52  ;;  %v287_v31 = vand.u32 4294901760, %v30778_v7  ;;  %v30797_v36 = vand.u32 4294901760, %v128_v11  ;;  %v30799_v39 = vand.u32 4294901760, %v131_v12  ;;  %v134_v44 = vsel %vm90_vm0, %v87_v13, 0 }
  0x1b   :  { %24546 = vmatprep.mubr.f32.mxu0 %v249_v56  ;;  %v278_v40 = vsub.f32 %v30771_v4, %v277_v18  ;;  %v297_v41 = vand.u32 4294901760, %v30789_v22  ;;  %v307_v42 = vand.u32 4294901760, %v30792_v30  ;;  %v30811_v46 = vsub.f32 %v125_v8, %v30795_v35 }
  0x1c   :  { %v288_v45 = vsub.f32 %v30778_v7, %v287_v31  ;;  %v30814_v47 = vsub.f32 %v128_v11, %v30797_v36  ;;  %v30820_v50 = vsub.f32 %v131_v12, %v30799_v39  ;;  %v30822_v51 = vand.u32 4294901760, %v134_v44 }
  0x1d   :  { %v279_v52 = vand.u32 4294901760, %v278_v40  ;;  %v298_v53 = vsub.f32 %v30789_v22, %v297_v41  ;;  %v308_v54 = vsub.f32 %v30792_v30, %v307_v42  ;;  %v317_v55 = vand.u32 4294901760, %v30811_v46 }
  0x1e   :  { %24547 = vmatmul.mubr.f32.gmra.mrb[4].mxu0 %v259_v62  ;;  %v289_v56 = vand.u32 4294901760, %v288_v45  ;;  %v327_v59 = vand.u32 4294901760, %v30814_v47  ;;  %v30833_v60 = vsub.f32 %v134_v44, %v30822_v51  ;;  %v137_v61 = vsel %vm90_vm0, %v88_v49, 0 }
  0x1f   :  { %24549 = vmatprep.mubr.f32.mxu0 %v269_v17  ;;  %v30836_v62 = vand.u32 4294901760, %v137_v61  ;;  %v299_v0 = vand.u32 4294901760, %v298_v53  ;;  %v318_v1 = vsub.f32 %v30811_v46, %v317_v55  ;;  %v337_v2 = vand.u32 4294901760, %v30820_v50 }
  0x20   :  { %v309_v11 = vand.u32 4294901760, %v308_v54  ;;  %v328_v12 = vsub.f32 %v30814_v47, %v327_v59  ;;  %v347_v13 = vand.u32 4294901760, %v30833_v60 }
  0x21   :  { %v30843_v8 = vsub.f32 %v137_v61, %v30836_v62  ;;  %v319_v17 = vand.u32 4294901760, %v318_v1  ;;  %v338_v40 = vsub.f32 %v30820_v50, %v337_v2 }
  0x22   :  { %24550 = vmatmul.mubr.f32.gmra.mrb[6].mxu0 %v279_v52  ;;  %v329_v45 = vand.u32 4294901760, %v328_v12  ;;  %v348_v49 = vsub.f32 %v30833_v60, %v347_v13 }
  0x23   :  { %24552 = vmatprep.mubr.f32.mxu0 %v289_v56  ;;  %v357_v44 = vand.u32 4294901760, %v30843_v8  ;;  %v339_v52 = vand.u32 4294901760, %v338_v40 }
  0x24   :  { %v349_v54 = vand.u32 4294901760, %v348_v49 }
  0x25   :  { %v358_v53 = vsub.f32 %v30843_v8, %v357_v44 }
  0x26   :  { %24553 = vmatmul.mubr.f32.gmra.mrb[8].mxu0 %v299_v0 }
  0x27   :  { %24555 = vmatprep.mubr.f32.mxu0 %v309_v11  ;;  %v359_v56 = vand.u32 4294901760, %v358_v53 }
  0x2a   :  { %24556 = vmatmul.mubr.f32.gmra.mrb[10].mxu0 %v319_v17 }
  0x2b   :  { %24558 = vmatprep.mubr.f32.mxu0 %v329_v45 }
  0x2e   :  { %24559 = vmatmul.mubr.f32.gmra.mrb[12].mxu0 %v339_v52 }
  0x2f   :  { %24561 = vmatprep.mubr.f32.mxu0 %v349_v54 }
  0x32   :  { %24562 = vmatmul.mubr.f32.gmra.mrb[14].mxu0 %v359_v56 }
  0x33   :  { %24566 = vmatprep.mubr.f32.mxu0 %v30657_v9 }
  0x36   :  { %24567 = vmatmul.mubr.f32.vlgmr.msra.gmra.mrb[0].mxu0 %v30659_v10 }
  0x37   :  { %24591 = vmatpush3.msra.mxu0 %v30668_v14  ;;  %24569 = vmatprep.mubr.f32.mxu0 %v30670_v15 }
  0x38   :  { %24616 = vmatprep.subr.mxu0 %v30644_v3 }
  0x3a   :  { %24570 = vmatmul.mubr.f32.gmra.mrb[2].mxu0 %v30672_v16 }
  0x3b   :  { %24572 = vmatprep.mubr.f32.mxu0 %v30685_v21 }
  0x3e   :  { %24573 = vmatmul.mubr.f32.gmra.mrb[4].mxu0 %v30697_v26 }
  0x3f   :  { %24575 = vmatprep.mubr.f32.mxu0 %v30719_v38 }
  0x42   :  { %24576 = vmatmul.mubr.f32.gmra.mrb[6].mxu0 %v30754_v58 }
  0x43   :  { %24578 = vmatprep.mubr.f32.mxu0 %v30763_v63 }
  0x46   :  { %24579 = vmatmul.mubr.f32.gmra.mrb[8].mxu0 %v30773_v5 }
  0x47   :  { %24581 = vmatprep.mubr.f32.mxu0 %v30775_v6 }
  0x4a   :  { %24582 = vmatmul.mubr.f32.gmra.mrb[10].mxu0 %v30795_v35 }
  0x4b   :  { %24584 = vmatprep.mubr.f32.mxu0 %v30797_v36 }
  0x4e   :  { %24585 = vmatmul.mubr.f32.gmra.mrb[12].mxu0 %v30799_v39 }
  0x4f   :  { %24587 = vmatprep.mubr.f32.mxu0 %v30822_v51 }
  0x52   :  { %24588 = vmatmul.mubr.f32.gmra.mrb[14].mxu0 %v30836_v62 }
  0x53   :  { %24592 = vmatprep.mubr.f32.mxu0 %v30680_v19  ;;  %v58_v19 = vld [vmem:[%s34770_s1 + $0x8] sm:$0xff] }
  0x56   :  { %24593 = vmatmul.mubr.f32.vlgmr.msra.gmra.mrb[0].mxu0 %v30683_v20  ;;  %v30981_v20 = vand.u32 4294901760, %v58_v19 }
  0x57   :  { %24617 = vmatpush3.msra.mxu0 %v30644_v3  ;;  %24595 = vmatprep.mubr.f32.mxu0 %v30692_v24  ;;  %v60_v24 = vld [vmem:[%s34770_s1 + $0x18] sm:$0xff] }
  0x58   :  { %24642 = vmatprep.subr.mxu0 %v30689_v23 }
  0x5a   :  { %24596 = vmatmul.mubr.f32.gmra.mrb[2].mxu0 %v30695_v25 }
  0x5b   :  { %24598 = vmatprep.mubr.f32.mxu0 %v30702_v29 }
  0x5e   :  { %24599 = vmatmul.mubr.f32.gmra.mrb[4].mxu0 %v30710_v34 }
  0x5f   :  { %24601 = vmatprep.mubr.f32.mxu0 %v30738_v48  ;;  %v61_v48 = vld [vmem:[%s34770_s1 + $0x20] sm:$0xff] }
  0x62   :  { %24602 = vmatmul.mubr.f32.gmra.mrb[6].mxu0 %v30771_v4 }
  0x63   :  { %24604 = vmatprep.mubr.f32.mxu0 %v30778_v7 }
  0x66   :  { %24605 = vmatmul.mubr.f32.gmra.mrb[8].mxu0 %v30789_v22 }
  0x67   :  { %24607 = vmatprep.mubr.f32.mxu0 %v30792_v30  ;;  %v31016_v30 = vand.u32 4294901760, %v61_v48 }
  0x69   :  { %v31042_v40 = vsub.f32 %v61_v48, %v31016_v30 }
  0x6a   :  { %24608 = vmatmul.mubr.f32.gmra.mrb[10].mxu0 %v30811_v46 }
  0x6b   :  { %24610 = vmatprep.mubr.f32.mxu0 %v30814_v47  ;;  %34925 = vst [vmem:[#allocation14_spill] sm:$0xff] %v31042_v40 }
  0x6e   :  { %24611 = vmatmul.mubr.f32.gmra.mrb[12].mxu0 %v30820_v50 }
  0x6f   :  { %24613 = vmatprep.mubr.f32.mxu0 %v30833_v60 }
  0x72   :  { %24614 = vmatmul.mubr.f32.gmra.mrb[14].mxu0 %v30843_v8 }
  0x73   :  { %24618 = vmatprep.mubr.f32.mxu0 %v207_v27  ;;  %v30997_v27 = vand.u32 4294901760, %v60_v24 }
  0x76   :  { %24619 = vmatmul.mubr.f32.vlgmr.msra.gmra.mrb[0].mxu0 %v217_v28 }
  0x77   :  { %24643 = vmatpush3.msra.mxu0 %v30689_v23  ;;  %24621 = vmatprep.mubr.f32.mxu0 %v227_v32  ;;  %v30987_v23 = vsub.f32 %v58_v19, %v30981_v20 }
  0x78   :  { %24668 = vmatprep.subr.mxu0 %v30644_v3 }
  0x79   :  { %34917 = vst [vmem:[#allocation6_spill] sm:$0xff] %v30987_v23 }
  0x7a   :  { %24622 = vmatmul.mubr.f32.gmra.mrb[2].mxu0 %v237_v33 }
  0x7b   :  { %24624 = vmatprep.mubr.f32.mxu0 %v247_v37 }
  0x7e   :  { %24625 = vmatmul.mubr.f32.gmra.mrb[4].mxu0 %v257_v43  ;;  %v31005_v43 = vsub.f32 %v60_v24, %v30997_v27 }
  0x7f   :  { %24627 = vmatprep.mubr.f32.mxu0 %v267_v57 }
  0x80   :  { %34920 = vst [vmem:[#allocation9_spill] sm:$0xff] %v31005_v43 }
  0x82   :  { %24628 = vmatmul.mubr.f32.gmra.mrb[6].mxu0 %v277_v18 }
  0x83   :  { %24630 = vmatprep.mubr.f32.mxu0 %v287_v31  ;;  %v62_v31 = vld [vmem:[%s34770_s1 + $0x28] sm:$0xff] }
  0x84   :  { %v31033_v0 = vand.u32 4294901760, %v62_v31 }
  0x86   :  { %24631 = vmatmul.mubr.f32.gmra.mrb[8].mxu0 %v297_v41 }
  0x87   :  { %24633 = vmatprep.mubr.f32.mxu0 %v307_v42  ;;  %v31027_v42 = vand.u32 4294901760, %v31005_v43 }
  0x89   :  { %34923 = vst [vmem:[#allocation12_spill] sm:$0xff] %v31027_v42 }
  0x8a   :  { %24634 = vmatmul.mubr.f32.gmra.mrb[10].mxu0 %v317_v55 }
  0x8b   :  { %24636 = vmatprep.mubr.f32.mxu0 %v327_v59 }
  0x8e   :  { %24637 = vmatmul.mubr.f32.gmra.mrb[12].mxu0 %v337_v2 }
  0x8f   :  { %24639 = vmatprep.mubr.f32.mxu0 %v347_v13 }
  0x92   :  { %24640 = vmatmul.mubr.f32.gmra.mrb[14].mxu0 %v357_v44 }
  0x93   :  { %24644 = vmatprep.mubr.f32.mxu0 %v30657_v9 }
  0x96   :  { %24645 = vmatmul.mubr.f32.vlgmr.msra.gmra.mrb[0].mxu0 %v30659_v10 }
  0x97   :  { %24669 = vmatpush3.msra.mxu0 %v30644_v3  ;;  %24647 = vmatprep.mubr.f32.mxu0 %v30670_v15  ;;  %v57_v3 = vld [vmem:[%s34770_s1] sm:$0xff] }
  0x9a   :  { %24648 = vmatmul.mubr.f32.gmra.mrb[2].mxu0 %v30672_v16 }
  0x9b   :  { %24650 = vmatprep.mubr.f32.mxu0 %v30685_v21 }
  0x9e   :  { %24651 = vmatmul.mubr.f32.gmra.mrb[4].mxu0 %v30697_v26 }
  0x9f   :  { %24653 = vmatprep.mubr.f32.mxu0 %v30719_v38 }
  0xa2   :  { %24654 = vmatmul.mubr.f32.gmra.mrb[6].mxu0 %v30754_v58 }
  0xa3   :  { %24656 = vmatprep.mubr.f32.mxu0 %v30763_v63 }
  0xa6   :  { %24657 = vmatmul.mubr.f32.gmra.mrb[8].mxu0 %v30773_v5 }
  0xa7   :  { %24659 = vmatprep.mubr.f32.mxu0 %v30775_v6 }
  0xaa   :  { %24660 = vmatmul.mubr.f32.gmra.mrb[10].mxu0 %v30795_v35 }
  0xab   :  { %24662 = vmatprep.mubr.f32.mxu0 %v30797_v36 }
  0xae   :  { %24663 = vmatmul.mubr.f32.gmra.mrb[12].mxu0 %v30799_v39 }
  0xaf   :  { %24665 = vmatprep.mubr.f32.mxu0 %v30822_v51 }
  0xb2   :  { %24666 = vmatmul.mubr.f32.gmra.mrb[14].mxu0 %v30836_v62 }
  0xb3   :  { %24670 = vmatprep.mubr.f32.mxu0 %v30657_v9  ;;  %v30965_v9 = vand.u32 4294901760, %v57_v3 }
  0xb6   :  { %24671 = vmatmul.mubr.f32.vlgmr.msra.gmra.mrb[0].mxu0 %v30659_v10  ;;  %v30968_v10 = vsub.f32 %v57_v3, %v30965_v9 }
  0xb7   :  { %24673 = vmatprep.mubr.f32.mxu0 %v30670_v15 }
  0xb8   :  { %34914 = vst [vmem:[#allocation3_spill] sm:$0xff] %v30968_v10  ;;  %v30971_v14 = vand.u32 4294901760, %v30968_v10 }
  0xba   :  { %24674 = vmatmul.mubr.f32.gmra.mrb[2].mxu0 %v30672_v16  ;;  %34915 = vst [vmem:[#allocation4_spill] sm:$0xff] %v30971_v14  ;;  %v1321_v15 = vsub.f32 %v30968_v10, %v30971_v14 }
  0xbb   :  { %24676 = vmatprep.mubr.f32.mxu0 %v30685_v21  ;;  %v59_v21 = vld [vmem:[%s34770_s1 + $0x10] sm:$0xff] }
  0xbc   :  { %v30975_v16 = vand.u32 4294901760, %v1321_v15  ;;  %v30992_v25 = vand.u32 4294901760, %v59_v21 }
  0xbe   :  { %24677 = vmatmul.mubr.f32.gmra.mrb[4].mxu0 %v30697_v26  ;;  %34916 = vst [vmem:[#allocation5_spill] sm:$0xff] %v30975_v16  ;;  %24726 = vmatprep.mubr.f32.mxu1 %v30975_v16  ;;  %v30995_v26 = vand.u32 4294901760, %v30987_v23  ;;  %v31000_v33 = vsub.f32 %v59_v21, %v30992_v25 }
  0xbf   :  { %24679 = vmatprep.mubr.f32.mxu0 %v30719_v38 }
  0xc0   :  { %34918 = vst [vmem:[#allocation7_spill] sm:$0xff] %v30995_v26  ;;  %34919 = vst [vmem:[#allocation8_spill] sm:$0xff] %v31000_v33  ;;  %v1331_v38 = vsub.f32 %v30987_v23, %v30995_v26  ;;  %v31013_v7 = vand.u32 4294901760, %v31000_v33 }
  0xc2   :  { %24680 = vmatmul.mubr.f32.gmra.mrb[6].mxu0 %v30754_v58  ;;  %34921 = vst [vmem:[#allocation10_spill] sm:$0xff] %v31013_v7  ;;  %v31024_v41 = vand.u32 4294901760, %v1331_v38  ;;  %v1341_v17 = vsub.f32 %v31000_v33, %v31013_v7  ;;  %v31057_v38 = vsub.f32 %v62_v31, %v31033_v0 }
  0xc3   :  { %24682 = vmatprep.mubr.f32.mxu0 %v30763_v63 }
  0xc4   :  { %34922 = vst [vmem:[#allocation11_spill] sm:$0xff] %v31024_v41  ;;  %34927 = vst [vmem:[#allocation16_spill] sm:$0xff] %v31057_v38 }
  0xc6   :  { %24683 = vmatmul.mubr.f32.gmra.mrb[8].mxu0 %v30773_v5 }
  0xc7   :  { %24685 = vmatprep.mubr.f32.mxu0 %v30775_v6 }
  0xca   :  { %24686 = vmatmul.mubr.f32.gmra.mrb[10].mxu0 %v30795_v35 }
  0xcb   :  { %24688 = vmatprep.mubr.f32.mxu0 %v30797_v36 }
  0xce   :  { %24689 = vmatmul.mubr.f32.gmra.mrb[12].mxu0 %v30799_v39 }
  0xcf   :  { %24691 = vmatprep.mubr.f32.mxu0 %v30822_v51 }
  0xd2   :  { %24692 = vmatmul.mubr.f32.gmra.mrb[14].mxu0 %v30836_v62 }
 0x189   :  { %v24672_v28 = vpop.f32.mrb[0].mxu0 }
 0x18a   :  { %v1241_v29 = vand.u32 4294901760, %v24672_v28  ;;  %v1136_v32 = vpop.f32.mrb[1].mxu0 }
 0x18b   :  { %v1238_v34 = vand.u32 4294901760, %v1136_v32 }
 0x18c   :  { %v1487_v37 = vsub.f32 %v24672_v28, %v1241_v29 }
 0x18d   :  { %v31010_v57 = vpack.c.bf16 %v1241_v29, %v1238_v34  ;;  %v1480_v58 = vsub.f32 %v1136_v32, %v1238_v34  ;;  %v24675_v63 = vpop.f32.mrb[2].mxu0 }
 0x18e   :  { %v1488_v4 = vand.u32 4294901760, %v1487_v37  ;;  %v1247_v5 = vand.u32 4294901760, %v24675_v63  ;;  %v1148_v6 = vpop.f32.mrb[3].mxu0 }
 0x18f   :  { %v1481_v18 = vand.u32 4294901760, %v1480_v58  ;;  %v1244_v22 = vand.u32 4294901760, %v1148_v6  ;;  %27965 = vmatprep.subr.bf16.mxu1 %v31010_v57  ;;  %v31021_v35 = vpack.c.bf16 %v1487_v37, %v1480_v58 }
 0x190   :  { %v1489_v36 = vsub.f32 %v1487_v37, %v1488_v4  ;;  %v1501_v39 = vsub.f32 %v24675_v63, %v1247_v5  ;;  %27967 = vmatpush3.bf16.msra.mxu1 %v31010_v57 }
 0x191   :  { %v1482_v46 = vsub.f32 %v1480_v58, %v1481_v18  ;;  %v31029_v47 = vpack.c.bf16 %v1247_v5, %v1244_v22  ;;  %v1494_v50 = vsub.f32 %v1148_v6, %v1244_v22  ;;  %v24678_v51 = vpop.f32.mrb[4].mxu0  ;;  %v31031_v55 = vpack.c.bf16 %v1488_v4, %v1481_v18 }
 0x192   :  { %v1502_v59 = vand.u32 4294901760, %v1501_v39  ;;  %v1253_v60 = vand.u32 4294901760, %v24678_v51  ;;  %v1160_v61 = vpop.f32.mrb[5].mxu0  ;;  %v1490_v62 = vand.u32 4294901760, %v1489_v36 }
 0x193   :  { %34924 = vst [vmem:[#allocation13_spill] sm:$0xff] %v31031_v55  ;;  %v1495_v1 = vand.u32 4294901760, %v1494_v50  ;;  %v1250_v2 = vand.u32 4294901760, %v1160_v61  ;;  %27969 = vmatprep.subr.bf16.mxu1 %v31029_v47  ;;  %v1483_v8 = vand.u32 4294901760, %v1482_v46  ;;  %v31036_v11 = vpack.c.bf16 %v1501_v39, %v1494_v50 }
 0x194   :  { %v1503_v12 = vsub.f32 %v1501_v39, %v1502_v59  ;;  %v1515_v13 = vsub.f32 %v24678_v51, %v1253_v60  ;;  %27971 = vmatpush3.bf16.msra.mxu1 %v31029_v47 }
 0x195   :  { %v1496_v44 = vsub.f32 %v1494_v50, %v1495_v1  ;;  %v31044_v45 = vpack.c.bf16 %v1253_v60, %v1250_v2  ;;  %v1508_v49 = vsub.f32 %v1160_v61, %v1250_v2  ;;  %v24681_v52 = vpop.f32.mrb[6].mxu0  ;;  %v31046_v53 = vpack.c.bf16 %v1490_v62, %v1483_v8 }
 0x196   :  { %v1516_v54 = vand.u32 4294901760, %v1515_v13  ;;  %v1259_v56 = vand.u32 4294901760, %v24681_v52  ;;  %v1172_v3 = vpop.f32.mrb[7].mxu0  ;;  %v1504_v15 = vand.u32 4294901760, %v1503_v12  ;;  %v31048_v19 = vpack.c.bf16 %v1502_v59, %v1495_v1 }
 0x197   :  { %v1509_v21 = vand.u32 4294901760, %v1508_v49  ;;  %v1256_v24 = vand.u32 4294901760, %v1172_v3  ;;  %27973 = vmatprep.subr.bf16.mxu1 %v31044_v45  ;;  %v1497_v28 = vand.u32 4294901760, %v1496_v44  ;;  %v31051_v29 = vpack.c.bf16 %v1515_v13, %v1508_v49  ;;  %v63_v44 = vld [vmem:[%s34770_s1 + $0x30] sm:$0xff] }
 0x198   :  { %34926 = vst [vmem:[#allocation15_spill] sm:$0xff] %v31048_v19  ;;  %v1517_v32 = vsub.f32 %v1515_v13, %v1516_v54  ;;  %v1529_v34 = vsub.f32 %v24681_v52, %v1259_v56  ;;  %27975 = vmatpush3.bf16.msra.mxu1 %v31044_v45  ;;  %v31069_v61 = vand.u32 4294901760, %v1341_v17  ;;  %v31072_v62 = vand.u32 4294901760, %v31042_v40 }
 0x199   :  { %v1510_v48 = vsub.f32 %v1508_v49, %v1509_v21  ;;  %v31059_v58 = vpack.c.bf16 %v1259_v56, %v1256_v24  ;;  %v1522_v63 = vsub.f32 %v1172_v3, %v1256_v24  ;;  %v24684_v4 = vpop.f32.mrb[8].mxu0  ;;  %v31061_v5 = vpack.c.bf16 %v1504_v15, %v1497_v28 }
 0x19a   :  { %v1530_v6 = vand.u32 4294901760, %v1529_v34  ;;  %v1265_v18 = vand.u32 4294901760, %v24684_v4  ;;  %v1184_v22 = vpop.f32.mrb[9].mxu0  ;;  %v1518_v36 = vand.u32 4294901760, %v1517_v32  ;;  %v31063_v39 = vpack.c.bf16 %v1516_v54, %v1509_v21  ;;  %34929 = vst [vmem:[#allocation18_spill] sm:$0xff] %v31069_v61  ;;  %34930 = vst [vmem:[#allocation19_spill] sm:$0xff] %v31072_v62 }
 0x19b   :  { %v1523_v46 = vand.u32 4294901760, %v1522_v63  ;;  %v1262_v50 = vand.u32 4294901760, %v1184_v22  ;;  %27977 = vmatprep.subr.bf16.mxu1 %v31059_v58  ;;  %v1511_v51 = vand.u32 4294901760, %v1510_v48  ;;  %v31066_v31 = vpack.c.bf16 %v1529_v34, %v1522_v63 }
 0x19c   :  { %34928 = vst [vmem:[#allocation17_spill] sm:$0xff] %v31063_v39  ;;  %v1531_v59 = vsub.f32 %v1529_v34, %v1530_v6  ;;  %v1543_v60 = vsub.f32 %v24684_v4, %v1265_v18  ;;  %27979 = vmatpush3.bf16.msra.mxu1 %v31059_v58  ;;  %v31088_v34 = vand.u32 4294901760, %v31057_v38  ;;  %v31090_v48 = vand.u32 4294901760, %v63_v44 }
 0x19d   :  { %v1524_v1 = vsub.f32 %v1522_v63, %v1523_v46  ;;  %v31074_v2 = vpack.c.bf16 %v1265_v18, %v1262_v50  ;;  %v1536_v8 = vsub.f32 %v1184_v22, %v1262_v50  ;;  %v24687_v12 = vpop.f32.mrb[10].mxu0  ;;  %v31076_v13 = vpack.c.bf16 %v1518_v36, %v1511_v51  ;;  %v64_v36 = vld [vmem:[%s34770_s1 + $0x38] sm:$0xff] }
 0x19e   :  { %v1544_v49 = vand.u32 4294901760, %v1543_v60  ;;  %v1271_v52 = vand.u32 4294901760, %v24687_v12  ;;  %v1196_v54 = vpop.f32.mrb[11].mxu0  ;;  %v1532_v56 = vand.u32 4294901760, %v1531_v59  ;;  %v31081_v17 = vpack.c.bf16 %v1530_v6, %v1523_v46  ;;  %34932 = vst [vmem:[#allocation21_spill] sm:$0xff] %v31088_v34  ;;  %34933 = vst [vmem:[#allocation22_spill] sm:$0xff] %v31090_v48 }
 0x19f   :  { %v1537_v3 = vand.u32 4294901760, %v1536_v8  ;;  %v1268_v15 = vand.u32 4294901760, %v1196_v54  ;;  %27981 = vmatprep.subr.bf16.mxu1 %v31074_v2  ;;  %v1525_v21 = vand.u32 4294901760, %v1524_v1  ;;  %v31084_v24 = vpack.c.bf16 %v1543_v60, %v1536_v8 }
 0x1a0   :  { %34931 = vst [vmem:[#allocation20_spill] sm:$0xff] %v31081_v17  ;;  %v1545_v28 = vsub.f32 %v1543_v60, %v1544_v49  ;;  %v1557_v32 = vsub.f32 %v24687_v12, %v1271_v52  ;;  %27983 = vmatpush3.bf16.msra.mxu1 %v31074_v2  ;;  %v1371_v14 = vsub.f32 %v31057_v38, %v31088_v34 }
 0x1a1   :  { %v1538_v63 = vsub.f32 %v1536_v8, %v1537_v3  ;;  %v31092_v4 = vpack.c.bf16 %v1271_v52, %v1268_v15  ;;  %v1550_v6 = vsub.f32 %v1196_v54, %v1268_v15  ;;  %v24690_v18 = vpop.f32.mrb[12].mxu0  ;;  %v31094_v22 = vpack.c.bf16 %v1532_v56, %v1525_v21 }
 0x1a2   :  { %v1558_v46 = vand.u32 4294901760, %v1557_v32  ;;  %v1277_v50 = vand.u32 4294901760, %v24690_v18  ;;  %v1208_v51 = vpop.f32.mrb[13].mxu0  ;;  %v1546_v59 = vand.u32 4294901760, %v1545_v28  ;;  %v31099_v60 = vpack.c.bf16 %v1544_v49, %v1537_v3 }
 0x1a3   :  { %v1551_v1 = vand.u32 4294901760, %v1550_v6  ;;  %v1274_v12 = vand.u32 4294901760, %v1208_v51  ;;  %27985 = vmatprep.subr.bf16.mxu1 %v31092_v4  ;;  %v1539_v8 = vand.u32 4294901760, %v1538_v63  ;;  %v31102_v52 = vpack.c.bf16 %v1557_v32, %v1550_v6  ;;  %v65_v63 = vld [vmem:[%s34770_s1 + $0x40] sm:$0xff] }
 0x1a4   :  { %34934 = vst [vmem:[#allocation23_spill] sm:$0xff] %v31099_v60  ;;  %v1559_v54 = vsub.f32 %v1557_v32, %v1558_v46  ;;  %v1571_v56 = vsub.f32 %v24690_v18, %v1277_v50  ;;  %27987 = vmatpush3.bf16.msra.mxu1 %v31092_v4  ;;  %v31106_v15 = vsub.f32 %v63_v44, %v31090_v48  ;;  %v31108_v21 = vand.u32 4294901760, %v64_v36 }
 0x1a5   :  { %v1552_v37 = vsub.f32 %v1550_v6, %v1551_v1  ;;  %v31110_v28 = vpack.c.bf16 %v1277_v50, %v1274_v12  ;;  %v1564_v49 = vsub.f32 %v1208_v51, %v1274_v12  ;;  %v24693_v3 = vpop.f32.mrb[14].mxu0  ;;  %v31112_v16 = vpack.c.bf16 %v1546_v59, %v1539_v8 }
 0x1a6   :  { %34935 = vst [vmem:[#allocation24_spill] sm:$0xff] %v31106_v15  ;;  %34936 = vst [vmem:[#allocation25_spill] sm:$0xff] %v31108_v21  ;;  %v1572_v32 = vand.u32 4294901760, %v1571_v56  ;;  %v1283_v18 = vand.u32 4294901760, %v24693_v3  ;;  %v1220_v60 = vpop.f32.mrb[15].mxu0  ;;  %v1560_v17 = vand.u32 4294901760, %v1559_v54  ;;  %v31117_v39 = vpack.c.bf16 %v1558_v46, %v1551_v1 }
 0x1a7   :  { %v1565_v44 = vand.u32 4294901760, %v1564_v49  ;;  %v1280_v19 = vand.u32 4294901760, %v1220_v60  ;;  %27989 = vmatprep.subr.bf16.mxu1 %v31110_v28  ;;  %v1553_v6 = vand.u32 4294901760, %v1552_v37  ;;  %v31120_v50 = vpack.c.bf16 %v1571_v56, %v1564_v49  ;;  %v66_v46 = vld [vmem:[%s34770_s1 + $0x48] sm:$0xff] }
 0x1a8   :  { %34937 = vst [vmem:[#allocation26_spill] sm:$0xff] %v31117_v39  ;;  %v1573_v51 = vsub.f32 %v1571_v56, %v1572_v32  ;;  %v1585_v59 = vsub.f32 %v24693_v3, %v1283_v18  ;;  %27991 = vmatpush3.bf16.msra.mxu1 %v31110_v28  ;;  %v31124_v12 = vsub.f32 %v64_v36, %v31108_v21  ;;  %v31126_v8 = vand.u32 4294901760, %v65_v63  ;;  %v67_v56 = vld [vmem:[%s34770_s1 + $0x50] sm:$0xff] }
 0x1a9   :  { %v1566_v1 = vsub.f32 %v1564_v49, %v1565_v44  ;;  %v31131_v54 = vpack.c.bf16 %v1283_v18, %v1280_v19  ;;  %v1578_v39 = vsub.f32 %v1220_v60, %v1280_v19  ;;  %v31133_v37 = vpack.c.bf16 %v1560_v17, %v1553_v6 }
 0x1aa   :  { %34938 = vst [vmem:[#allocation27_spill] sm:$0xff] %v31124_v12  ;;  %34939 = vst [vmem:[#allocation28_spill] sm:$0xff] %v31126_v8  ;;  %v1586_v3 = vand.u32 4294901760, %v1585_v59  ;;  %v31139_v36 = vand.u32 4294901760, %v31106_v15  ;;  %v1574_v7 = vand.u32 4294901760, %v1573_v51  ;;  %v31141_v26 = vpack.c.bf16 %v1572_v32, %v1565_v44  ;;  %v68_v32 = vld [vmem:[%s34770_s1 + $0x58] sm:$0xff] }
 0x1ab   :  { %34940 = vst [vmem:[#allocation29_spill] sm:$0xff] %v31131_v54  ;;  %v1579_v55 = vand.u32 4294901760, %v1578_v39  ;;  %27993 = vmatprep.subr.bf16.mxu1 %v31131_v54  ;;  %v31144_v49 = vand.u32 4294901760, %v66_v46  ;;  %v1567_v18 = vand.u32 4294901760, %v1566_v1  ;;  %v31146_v19 = vpack.c.bf16 %v1585_v59, %v1578_v39 }
 0x1ac   :  { %34941 = vst [vmem:[#allocation30_spill] sm:$0xff] %v31139_v36  ;;  %34942 = vst [vmem:[#allocation31_spill] sm:$0xff] %v31141_v26  ;;  %v1587_v17 = vsub.f32 %v1585_v59, %v1586_v3  ;;  %27995 = vmatpush3.bf16.msra.mxu1 %v31131_v54  ;;  %v1361_v60 = vsub.f32 %v31042_v40, %v31072_v62  ;;  %v31152_v6 = vsub.f32 %v65_v63, %v31126_v8  ;;  %v69_v59 = vld [vmem:[%s34770_s1 + $0x60] sm:$0xff] }
 0x1ad   :  { %34943 = vst [vmem:[#allocation32_spill] sm:$0xff] %v31144_v49  ;;  %v31154_v51 = vand.u32 4294901760, %v67_v56  ;;  %v1580_v44 = vsub.f32 %v1578_v39, %v1579_v55  ;;  %27997 = vmatprep.subr.bf16.mxu1 %v31046_v53  ;;  %v31160_v1 = vpack.c.bf16 %v1574_v7, %v1567_v18  ;;  %v31165_v26 = vpack.c.bf16 %v1586_v3, %v1579_v55 }
 0x1ae   :  { %34944 = vst [vmem:[#allocation33_spill] sm:$0xff] %v31152_v6  ;;  %v34947_v63 = vsub.f32 %v31005_v43, %v31027_v42  ;;  %v31175_v39 = vand.u32 4294901760, %v31124_v12  ;;  %v1588_v54 = vand.u32 4294901760, %v1587_v17  ;;  %v1381_v7 = vsub.f32 %v31106_v15, %v31139_v36 }
 0x1af   :  { %34945 = vst [vmem:[#allocation34_spill] sm:$0xff] %v31154_v51  ;;  %34946 = vst [vmem:[#allocation35_spill] sm:$0xff] %v31165_v26  ;;  %24727 = vmatmul.mubr.f32.vlgmr.msra.gmra.mrb[0].mxu1 %v31024_v41  ;;  %v31181_v55 = vsub.f32 %v66_v46, %v31144_v49  ;;  %v31183_v3 = vand.u32 4294901760, %v68_v32  ;;  %v1581_v18 = vand.u32 4294901760, %v1580_v44  ;;  %v31190_v26 = vand.u32 4294901760, %v31152_v6  ;;  %v70_v46 = vld [vmem:[%s34770_s1 + $0x68] sm:$0xff] }
 0x1b0   :  { %v31170_v62 = vand.u32 4294901760, %v34947_v63  ;;  %34949 = vst [vmem:[#allocation37_spill] sm:$0xff] %v31175_v39  ;;  %27999 = vmatpush3.bf16.msra.mxu1 %v31046_v53  ;;  %24729 = vmatprep.mubr.f32.mxu1 %v31069_v61  ;;  %v31187_v63 = vand.u32 4294901760, %v1361_v60  ;;  %v31193_v17 = vsub.f32 %v67_v56, %v31154_v51  ;;  %v31195_v41 = vand.u32 4294901760, %v69_v59  ;;  %v71_v53 = vld [vmem:[%s34770_s1 + $0x70] sm:$0xff] }
 0x1b1   :  { %34950 = vst [vmem:[#allocation38_spill] sm:$0xff] %v31181_v55  ;;  %34951 = vst [vmem:[#allocation39_spill] sm:$0xff] %v31183_v3  ;;  %28001 = vmatprep.subr.bf16.mxu1 %v31061_v5  ;;  %v28024_v44 = vpack.c.bf16 %v1588_v54, %v1581_v18  ;;  %v31204_v60 = vand.u32 4294901760, %v1371_v14  ;;  %v1391_v61 = vsub.f32 %v31124_v12, %v31175_v39  ;;  %v31209_v56 = vand.u32 4294901760, %v1381_v7 }
 0x1b2   :  { %34948 = vst [vmem:[#allocation36_spill] sm:$0xff] %v31170_v62  ;;  %34952 = vst [vmem:[#allocation40_spill] sm:$0xff] %v31187_v63  ;;  %v31212_v36 = vand.u32 4294901760, %v31181_v55  ;;  %v31215_v34 = vsub.f32 %v68_v32, %v31183_v3  ;;  %v31217_v54 = vand.u32 4294901760, %v70_v46  ;;  %v1401_v14 = vsub.f32 %v31152_v6, %v31190_v26  ;;  %v72_v32 = vld [vmem:[%s34770_s1 + $0x78] sm:$0xff] }
 0x1b3   :  { %34953 = vst [vmem:[#allocation41_spill] sm:$0xff] %v31190_v26  ;;  %34954 = vst [vmem:[#allocation42_spill] sm:$0xff] %v31193_v17  ;;  %24730 = vmatmul.mubr.f32.gmra.mrb[2].mxu1 %v31170_v62  ;;  %v31224_v18 = vand.u32 4294901760, %v31193_v17  ;;  %v31227_v7 = vsub.f32 %v69_v59, %v31195_v41  ;;  %v31229_v62 = vand.u32 4294901760, %v71_v53  ;;  %v31246_v39 = vand.u32 4294901760, %v72_v32 }
 0x1b4   :  { %34955 = vst [vmem:[#allocation43_spill] sm:$0xff] %v31195_v41  ;;  %34956 = vst [vmem:[#allocation44_spill] sm:$0xff] %v31204_v60  ;;  %28003 = vmatpush3.bf16.msra.mxu1 %v31061_v5  ;;  %24732 = vmatprep.mubr.f32.mxu1 %v31187_v63  ;;  %v31235_v5 = vand.u32 4294901760, %v1391_v61  ;;  %v1411_v63 = vsub.f32 %v31181_v55, %v31212_v36  ;;  %v31241_v26 = vand.u32 4294901760, %v31215_v34  ;;  %v31250_v42 = vand.u32 4294901760, %v1401_v14 }
 0x1b5   :  { %34957 = vst [vmem:[#allocation45_spill] sm:$0xff] %v31209_v56  ;;  %34958 = vst [vmem:[#allocation46_spill] sm:$0xff] %v31212_v36  ;;  %28005 = vmatprep.subr.bf16.mxu1 %v31076_v13  ;;  %v31244_v59 = vsub.f32 %v70_v46, %v31217_v54  ;;  %v1421_v61 = vsub.f32 %v31193_v17, %v31224_v18  ;;  %v31258_v36 = vsub.f32 %v71_v53, %v31229_v62 }
 0x1b6   :  { %34959 = vst [vmem:[#allocation47_spill] sm:$0xff] %v31215_v34  ;;  %34960 = vst [vmem:[#allocation48_spill] sm:$0xff] %v31217_v54  ;;  %v31262_v46 = vand.u32 4294901760, %v1411_v63 }
 0x1b7   :  { %34961 = vst [vmem:[#allocation49_spill] sm:$0xff] %v31224_v18  ;;  %34962 = vst [vmem:[#allocation50_spill] sm:$0xff] %v31227_v7  ;;  %24733 = vmatmul.mubr.f32.gmra.mrb[4].mxu1 %v31204_v60  ;;  %v31255_v60 = vand.u32 4294901760, %v31227_v7  ;;  %v31267_v14 = vand.u32 4294901760, %v31244_v59  ;;  %v31274_v53 = vand.u32 4294901760, %v1421_v61  ;;  %v31279_v63 = vand.u32 4294901760, %v31258_v36 }
 0x1b8   :  { %34963 = vst [vmem:[#allocation51_spill] sm:$0xff] %v31229_v62  ;;  %34964 = vst [vmem:[#allocation52_spill] sm:$0xff] %v31235_v5  ;;  %28007 = vmatpush3.bf16.msra.mxu1 %v31076_v13  ;;  %24735 = vmatprep.mubr.f32.mxu1 %v31209_v56  ;;  %v1431_v13 = vsub.f32 %v31215_v34, %v31241_v26  ;;  %v31270_v56 = vsub.f32 %v72_v32, %v31246_v39 }
 0x1b9   :  { %34965 = vst [vmem:[#allocation53_spill] sm:$0xff] %v31241_v26  ;;  %34966 = vst [vmem:[#allocation54_spill] sm:$0xff] %v31244_v59  ;;  %28009 = vmatprep.subr.bf16.mxu1 %v31094_v22  ;;  %v1451_v32 = vsub.f32 %v31244_v59, %v31267_v14 }
 0x1ba   :  { %34967 = vst [vmem:[#allocation55_spill] sm:$0xff] %v31246_v39  ;;  %34968 = vst [vmem:[#allocation56_spill] sm:$0xff] %v31250_v42  ;;  %v31283_v26 = vand.u32 4294901760, %v1431_v13 }
 0x1bb   :  { %34969 = vst [vmem:[#allocation57_spill] sm:$0xff] %v31255_v60  ;;  %34970 = vst [vmem:[#allocation58_spill] sm:$0xff] %v31258_v36  ;;  %24736 = vmatmul.mubr.f32.gmra.mrb[6].mxu1 %v31235_v5  ;;  %v1441_v5 = vsub.f32 %v31227_v7, %v31255_v60  ;;  %v31298_v13 = vand.u32 4294901760, %v1451_v32  ;;  %v34984_v32 = vld [vmem:[#allocation17_spill] sm:$0xff] }
 0x1bc   :  { %34971 = vst [vmem:[#allocation59_spill] sm:$0xff] %v31262_v46  ;;  %34972 = vst [vmem:[#allocation60_spill] sm:$0xff] %v31267_v14  ;;  %28011 = vmatpush3.bf16.msra.mxu1 %v31094_v22  ;;  %24738 = vmatprep.mubr.f32.mxu1 %v31250_v42  ;;  %v31288_v22 = vand.u32 4294901760, %v31270_v56  ;;  %v1461_v42 = vsub.f32 %v31258_v36, %v31279_v63 }
 0x1bd   :  { %34973 = vst [vmem:[#allocation61_spill] sm:$0xff] %v31270_v56  ;;  %34974 = vst [vmem:[#allocation62_spill] sm:$0xff] %v31279_v63  ;;  %28013 = vmatprep.subr.bf16.mxu1 %v31112_v16  ;;  %v31292_v61 = vand.u32 4294901760, %v1441_v5 }
 0x1be   :  { %34975 = vst [vmem:[#allocation63_spill] sm:$0xff] %v31288_v22 }
 0x1bf   :  { %24739 = vmatmul.mubr.f32.gmra.mrb[8].mxu1 %v31262_v46  ;;  %v1471_v46 = vsub.f32 %v31270_v56, %v31288_v22 }
 0x1c0   :  { %28015 = vmatpush3.bf16.msra.mxu1 %v31112_v16  ;;  %24741 = vmatprep.mubr.f32.mxu1 %v31274_v53  ;;  %v31304_v16 = vand.u32 4294901760, %v1461_v42  ;;  %v31354_v42 = vld [vmem:[%s34771_s5 + $0x8] sm:$0xff] }
 0x1c1   :  { %28017 = vmatprep.subr.bf16.mxu1 %v31133_v37  ;;  %v31308_v5 = vand.u32 4294901760, %v1471_v46  ;;  %v34983_v46 = vld [vmem:[#allocation19_spill] sm:$0xff] }
 0x1c3   :  { %24742 = vmatmul.mubr.f32.gmra.mrb[10].mxu1 %v31283_v26 }
 0x1c4   :  { %28019 = vmatpush3.bf16.msra.mxu1 %v31133_v37  ;;  %24744 = vmatprep.mubr.f32.mxu1 %v31292_v61  ;;  %v34979_v37 = vld [vmem:[#allocation7_spill] sm:$0xff] }
 0x1c5   :  { %28021 = vmatprep.subr.bf16.mxu1 %v31160_v1 }
 0x1c7   :  { %24745 = vmatmul.mubr.f32.gmra.mrb[12].mxu1 %v31298_v13 }
 0x1c8   :  { %28023 = vmatpush3.bf16.msra.mxu1 %v31160_v1  ;;  %24747 = vmatprep.mubr.f32.mxu1 %v31304_v16  ;;  %v34981_v1 = vld [vmem:[#allocation15_spill] sm:$0xff] }
 0x1c9   :  { %28025 = vmatprep.subr.bf16.mxu1 %v28024_v44 }
 0x1cb   :  { %24748 = vmatmul.mubr.f32.gmra.mrb[14].mxu1 %v31308_v5 }
 0x1cc   :  { %28027 = vmatpush3.bf16.msra.mxu1 %v28024_v44  ;;  %24782 = vmatprep.mubr.f32.mxu1 %v30965_v9  ;;  %v34982_v44 = vld [vmem:[#allocation12_spill] sm:$0xff] }
 0x1cd   :  { %28029 = vmatprep.subr.bf16.mxu1 %v31021_v35 }
 0x1cf   :  { %24783 = vmatmul.mubr.f32.vlgmr.msra.gmra.mrb[0].mxu1 %v30981_v20 }
 0x1d0   :  { %28031 = vmatpush3.bf16.msra.mxu1 %v31021_v35  ;;  %24785 = vmatprep.mubr.f32.mxu1 %v30992_v25  ;;  %v31349_v35 = vld [vmem:[%s34771_s5] sm:$0xff] }
 0x1d1   :  { %28033 = vmatprep.subr.bf16.mxu1 %v31036_v11 }
 0x1d3   :  { %24786 = vmatmul.mubr.f32.gmra.mrb[2].mxu1 %v30997_v27 }
 0x1d4   :  { %28035 = vmatpush3.bf16.msra.mxu1 %v31036_v11  ;;  %24788 = vmatprep.mubr.f32.mxu1 %v31016_v30  ;;  %v34830_v11 = vand.u32 4294901760, %v31349_v35 }
 0x1d5   :  { %28037 = vmatprep.subr.bf16.mxu1 %v31051_v29 }
 0x1d7   :  { %24789 = vmatmul.mubr.f32.gmra.mrb[4].mxu1 %v31033_v0 }
 0x1d8   :  { %28039 = vmatpush3.bf16.msra.mxu1 %v31051_v29  ;;  %24791 = vmatprep.mubr.f32.mxu1 %v31090_v48  ;;  %v34829_v29 = vand.u32 4294901760, %v31354_v42 }
 0x1d9   :  { %28041 = vmatprep.subr.bf16.mxu1 %v31066_v31 }
 0x1db   :  { %24792 = vmatmul.mubr.f32.gmra.mrb[6].mxu1 %v31108_v21 }
 0x1dc   :  { %28043 = vmatpush3.bf16.msra.mxu1 %v31066_v31  ;;  %24794 = vmatprep.mubr.f32.mxu1 %v31126_v8  ;;  %v31364_v31 = vpack.c.bf16 %v34829_v29, %v34830_v11  ;;  %v34985_v29 = vld [vmem:[#allocation21_spill] sm:$0xff]  ;;  %v34986_v11 = vld [vmem:[#allocation30_spill] sm:$0xff] }
 0x1dd   :  { %28045 = vmatprep.subr.bf16.mxu1 %v31084_v24 }
 0x1de   :  { %28157 = vmatprep.subr.bf16.mxu0 %v31364_v31 }
 0x1df   :  { %24795 = vmatmul.mubr.f32.gmra.mrb[8].mxu1 %v31144_v49  ;;  %28159 = vmatpush3.bf16.msra.mxu0 %v31364_v31 }
 0x1e0   :  { %28047 = vmatpush3.bf16.msra.mxu1 %v31084_v24  ;;  %24797 = vmatprep.mubr.f32.mxu1 %v31154_v51  ;;  %v34976_v24 = vld [vmem:[#allocation29_spill] sm:$0xff] }
 0x1e1   :  { %28049 = vmatprep.subr.bf16.mxu1 %v31102_v52 }
 0x1e3   :  { %24798 = vmatmul.mubr.f32.gmra.mrb[10].mxu1 %v31183_v3 }
 0x1e4   :  { %28051 = vmatpush3.bf16.msra.mxu1 %v31102_v52  ;;  %24800 = vmatprep.mubr.f32.mxu1 %v31195_v41  ;;  %v34977_v52 = vld [vmem:[#allocation4_spill] sm:$0xff] }
 0x1e5   :  { %28053 = vmatprep.subr.bf16.mxu1 %v31120_v50 }
 0x1e7   :  { %24801 = vmatmul.mubr.f32.gmra.mrb[12].mxu1 %v31217_v54 }
 0x1e8   :  { %28055 = vmatpush3.bf16.msra.mxu1 %v31120_v50  ;;  %24803 = vmatprep.mubr.f32.mxu1 %v31229_v62  ;;  %v34978_v50 = vld [vmem:[#allocation13_spill] sm:$0xff] }
 0x1e9   :  { %28057 = vmatprep.subr.bf16.mxu1 %v31146_v19 }
 0x1eb   :  { %24804 = vmatmul.mubr.f32.gmra.mrb[14].mxu1 %v31246_v39 }
 0x1ec   :  { %28059 = vmatpush3.bf16.msra.mxu1 %v31146_v19  ;;  %24838 = vmatprep.mubr.f32.mxu1 %v30968_v10  ;;  %v34980_v19 = vld [vmem:[#allocation10_spill] sm:$0xff] }
 0x1ed   :  { %28061 = vmatprep.subr.bf16.mxu1 %v31010_v57 }
 0x1ef   :  { %24839 = vmatmul.mubr.f32.vlgmr.msra.gmra.mrb[0].mxu1 %v30987_v23 }
 0x1f0   :  { %28063 = vmatpush3.bf16.msra.mxu1 %v31010_v57  ;;  %24841 = vmatprep.mubr.f32.mxu1 %v31000_v33 }
 0x1f1   :  { %28065 = vmatprep.subr.bf16.mxu1 %v31029_v47 }
 0x1f3   :  { %24842 = vmatmul.mubr.f32.gmra.mrb[2].mxu1 %v31005_v43 }
 0x1f4   :  { %28067 = vmatpush3.bf16.msra.mxu1 %v31029_v47  ;;  %24844 = vmatprep.mubr.f32.mxu1 %v31042_v40 }
 0x1f5   :  { %28069 = vmatprep.subr.bf16.mxu1 %v31044_v45 }
 0x1f7   :  { %24845 = vmatmul.mubr.f32.gmra.mrb[4].mxu1 %v31057_v38 }
 0x1f8   :  { %28071 = vmatpush3.bf16.msra.mxu1 %v31044_v45  ;;  %24847 = vmatprep.mubr.f32.mxu1 %v31106_v15 }
 0x1f9   :  { %28073 = vmatprep.subr.bf16.mxu1 %v31059_v58 }
 0x1fb   :  { %24848 = vmatmul.mubr.f32.gmra.mrb[6].mxu1 %v31124_v12 }
 0x1fc   :  { %28075 = vmatpush3.bf16.msra.mxu1 %v31059_v58  ;;  %24850 = vmatprep.mubr.f32.mxu1 %v31152_v6 }
 0x1fd   :  { %28077 = vmatprep.subr.bf16.mxu1 %v31074_v2 }
 0x1ff   :  { %24851 = vmatmul.mubr.f32.gmra.mrb[8].mxu1 %v31181_v55 }
 0x200   :  { %28079 = vmatpush3.bf16.msra.mxu1 %v31074_v2  ;;  %24853 = vmatprep.mubr.f32.mxu1 %v31193_v17 }
 0x201   :  { %28081 = vmatprep.subr.bf16.mxu1 %v31092_v4 }
 0x203   :  { %24854 = vmatmul.mubr.f32.gmra.mrb[10].mxu1 %v31215_v34 }
 0x204   :  { %28083 = vmatpush3.bf16.msra.mxu1 %v31092_v4  ;;  %24856 = vmatprep.mubr.f32.mxu1 %v31227_v7 }
 0x205   :  { %28085 = vmatprep.subr.bf16.mxu1 %v31110_v28 }
 0x207   :  { %24857 = vmatmul.mubr.f32.gmra.mrb[12].mxu1 %v31244_v59 }
 0x208   :  { %28087 = vmatpush3.bf16.msra.mxu1 %v31110_v28  ;;  %24859 = vmatprep.mubr.f32.mxu1 %v31258_v36 }
 0x209   :  { %28089 = vmatprep.subr.bf16.mxu1 %v34976_v24 }
 0x20b   :  { %24860 = vmatmul.mubr.f32.gmra.mrb[14].mxu1 %v31270_v56 }
 0x20c   :  { %28091 = vmatpush3.bf16.msra.mxu1 %v34976_v24  ;;  %24894 = vmatprep.mubr.f32.mxu1 %v34977_v52 }
 0x20d   :  { %28093 = vmatprep.subr.bf16.mxu1 %v34978_v50 }
 0x20f   :  { %24895 = vmatmul.mubr.f32.vlgmr.msra.gmra.mrb[0].mxu1 %v34979_v37  ;;  %v34987_v37 = vld [vmem:[#allocation20_spill] sm:$0xff] }
 0x210   :  { %28095 = vmatpush3.bf16.msra.mxu1 %v34978_v50  ;;  %24897 = vmatprep.mubr.f32.mxu1 %v34980_v19  ;;  %v34988_v50 = vld [vmem:[#allocation37_spill] sm:$0xff] }
 0x211   :  { %28097 = vmatprep.subr.bf16.mxu1 %v34981_v1  ;;  %v34989_v19 = vld [vmem:[#allocation41_spill] sm:$0xff] }
 0x213   :  { %24898 = vmatmul.mubr.f32.gmra.mrb[2].mxu1 %v34982_v44  ;;  %v34990_v44 = vld [vmem:[#allocation23_spill] sm:$0xff] }
 0x214   :  { %28099 = vmatpush3.bf16.msra.mxu1 %v34981_v1  ;;  %24900 = vmatprep.mubr.f32.mxu1 %v34983_v46  ;;  %v34991_v1 = vld [vmem:[#allocation46_spill] sm:$0xff] }
 0x215   :  { %28101 = vmatprep.subr.bf16.mxu1 %v34984_v32 }
 0x217   :  { %24901 = vmatmul.mubr.f32.gmra.mrb[4].mxu1 %v34985_v29  ;;  %v34992_v29 = vld [vmem:[#allocation26_spill] sm:$0xff] }
 0x218   :  { %28103 = vmatpush3.bf16.msra.mxu1 %v34984_v32  ;;  %24903 = vmatprep.mubr.f32.mxu1 %v34986_v11  ;;  %v34993_v32 = vld [vmem:[#allocation53_spill] sm:$0xff] }
 0x219   :  { %28105 = vmatprep.subr.bf16.mxu1 %v34987_v37 }
 0x21b   :  { %24904 = vmatmul.mubr.f32.gmra.mrb[6].mxu1 %v34988_v50  ;;  %v34994_v50 = vld [vmem:[#allocation31_spill] sm:$0xff] }
 0x21c   :  { %28107 = vmatpush3.bf16.msra.mxu1 %v34987_v37  ;;  %24906 = vmatprep.mubr.f32.mxu1 %v34989_v19  ;;  %v34995_v37 = vld [vmem:[#allocation35_spill] sm:$0xff] }
 0x21d   :  { %28109 = vmatprep.subr.bf16.mxu1 %v34990_v44 }
 0x21f   :  { %24907 = vmatmul.mubr.f32.gmra.mrb[8].mxu1 %v34991_v1 }
 0x220   :  { %28111 = vmatpush3.bf16.msra.mxu1 %v34990_v44  ;;  %24909 = vmatprep.mubr.f32.mxu1 %v31224_v18 }
 0x221   :  { %28113 = vmatprep.subr.bf16.mxu1 %v34992_v29 }
 0x223   :  { %24910 = vmatmul.mubr.f32.gmra.mrb[10].mxu1 %v34993_v32 }
 0x224   :  { %28115 = vmatpush3.bf16.msra.mxu1 %v34992_v29  ;;  %24912 = vmatprep.mubr.f32.mxu1 %v31255_v60 }
 0x225   :  { %28117 = vmatprep.subr.bf16.mxu1 %v34994_v50 }
 0x227   :  { %24913 = vmatmul.mubr.f32.gmra.mrb[12].mxu1 %v31267_v14 }
 0x228   :  { %28119 = vmatpush3.bf16.msra.mxu1 %v34994_v50  ;;  %24915 = vmatprep.mubr.f32.mxu1 %v31279_v63 }
 0x229   :  { %28121 = vmatprep.subr.bf16.mxu1 %v34995_v37 }
 0x22b   :  { %24916 = vmatmul.mubr.f32.gmra.mrb[14].mxu1 %v31288_v22 }
 0x22c   :  { %28123 = vmatpush3.bf16.msra.mxu1 %v34995_v37  ;;  %24950 = vmatprep.mubr.f32.mxu1 %v30965_v9 }
 0x22d   :  { %28125 = vmatprep.subr.bf16.mxu1 %v31010_v57 }
 0x22f   :  { %24951 = vmatmul.mubr.f32.vlgmr.msra.gmra.mrb[0].mxu1 %v30981_v20 }
 0x230   :  { %28127 = vmatpush3.bf16.msra.mxu1 %v31010_v57  ;;  %24953 = vmatprep.mubr.f32.mxu1 %v30992_v25  ;;  %v34996_v57 = vld [vmem:[#allocation5_spill] sm:$0xff] }
 0x231   :  { %28129 = vmatprep.subr.bf16.mxu1 %v31029_v47 }
 0x233   :  { %24954 = vmatmul.mubr.f32.gmra.mrb[2].mxu1 %v30997_v27 }
 0x234   :  { %28131 = vmatpush3.bf16.msra.mxu1 %v31029_v47  ;;  %24956 = vmatprep.mubr.f32.mxu1 %v31016_v30  ;;  %v2541_v47 = vld [vmem:[%s34771_s5 + $0x10] sm:$0xff] }
 0x235   :  { %28133 = vmatprep.subr.bf16.mxu1 %v31044_v45 }
 0x237   :  { %24957 = vmatmul.mubr.f32.gmra.mrb[4].mxu1 %v31033_v0 }
 0x238   :  { %28135 = vmatpush3.bf16.msra.mxu1 %v31044_v45  ;;  %24959 = vmatprep.mubr.f32.mxu1 %v31090_v48  ;;  %v2542_v45 = vld [vmem:[%s34771_s5 + $0x18] sm:$0xff] }
 0x239   :  { %28137 = vmatprep.subr.bf16.mxu1 %v31059_v58 }
 0x23b   :  { %24960 = vmatmul.mubr.f32.gmra.mrb[6].mxu1 %v31108_v21 }
 0x23c   :  { %28139 = vmatpush3.bf16.msra.mxu1 %v31059_v58  ;;  %24962 = vmatprep.mubr.f32.mxu1 %v31126_v8  ;;  %v2599_v58 = vand.u32 4294901760, %v2541_v47 }
 0x23d   :  { %28141 = vmatprep.subr.bf16.mxu1 %v31074_v2 }
 0x23f   :  { %24963 = vmatmul.mubr.f32.gmra.mrb[8].mxu1 %v31144_v49 }
 0x240   :  { %28143 = vmatpush3.bf16.msra.mxu1 %v31074_v2  ;;  %24965 = vmatprep.mubr.f32.mxu1 %v31154_v51  ;;  %v2602_v2 = vand.u32 4294901760, %v2542_v45 }
 0x241   :  { %28145 = vmatprep.subr.bf16.mxu1 %v31092_v4 }
 0x243   :  { %24966 = vmatmul.mubr.f32.gmra.mrb[10].mxu1 %v31183_v3 }
 0x244   :  { %28147 = vmatpush3.bf16.msra.mxu1 %v31092_v4  ;;  %24968 = vmatprep.mubr.f32.mxu1 %v31195_v41  ;;  %v31484_v4 = vpack.c.bf16 %v2602_v2, %v2599_v58 }
 0x245   :  { %28149 = vmatprep.subr.bf16.mxu1 %v31110_v28 }
 0x246   :  { %28161 = vmatprep.subr.bf16.mxu0 %v31484_v4 }
 0x247   :  { %24969 = vmatmul.mubr.f32.gmra.mrb[12].mxu1 %v31217_v54  ;;  %28163 = vmatpush3.bf16.msra.mxu0 %v31484_v4 }
 0x248   :  { %28151 = vmatpush3.bf16.msra.mxu1 %v31110_v28  ;;  %24971 = vmatprep.mubr.f32.mxu1 %v31229_v62  ;;  %v34997_v28 = vand.u32 4294901760, %v31349_v35 }
 0x249   :  { %28153 = vmatprep.subr.bf16.mxu1 %v34976_v24 }
 0x24a   :  { %v31491_v29 = vsub.f32 %v31349_v35, %v34997_v28 }
 0x24b   :  { %24972 = vmatmul.mubr.f32.gmra.mrb[14].mxu1 %v31246_v39 }
 0x24c   :  { %28155 = vmatpush3.bf16.msra.mxu1 %v34976_v24  ;;  %25006 = vmatprep.mubr.f32.mxu1 %v30965_v9  ;;  %v34998_v24 = vand.u32 4294901760, %v31354_v42  ;;  %v34835_v50 = vand.u32 4294901760, %v31491_v29 }
 0x24e   :  { %v31496_v44 = vsub.f32 %v31354_v42, %v34998_v24  ;;  %v31509_v42 = vsub.f32 %v2541_v47, %v2599_v58  ;;  %v31511_v24 = vsub.f32 %v2542_v45, %v2602_v2  ;;  %v31534_v58 = vld [vmem:[%s34772_s4] ss:$0 sm:$0xff] }
 0x24f   :  { %25007 = vmatmul.mubr.f32.vlgmr.msra.gmra.mrb[0].mxu1 %v30981_v20 }
 0x250   :  { %25009 = vmatprep.mubr.f32.mxu1 %v30992_v25  ;;  %v34838_v37 = vand.u32 4294901760, %v31496_v44  ;;  %v34837_v14 = vand.u32 4294901760, %v31509_v42  ;;  %v34836_v60 = vand.u32 4294901760, %v31511_v24  ;;  %v31525_v47 = vpack.c.bf16 %v31496_v44, %v31491_v29 }
 0x251   :  { %v31529_v45 = vpack.c.bf16 %v31511_v24, %v31509_v42 }
 0x252   :  { %v2832_v22 = vsub.f32 %v31496_v44, %v34838_v37 }
 0x253   :  { %25010 = vmatmul.mubr.f32.gmra.mrb[2].mxu1 %v30997_v27 }
 0x254   :  { %25012 = vmatprep.mubr.f32.mxu1 %v31016_v30  ;;  %v2833_v35 = vand.u32 4294901760, %v2832_v22  ;;  %v2846_v22 = vsub.f32 %v31511_v24, %v34836_v60 }
 0x257   :  { %25013 = vmatmul.mubr.f32.gmra.mrb[4].mxu1 %v31033_v0 }
 0x258   :  { %25015 = vmatprep.mubr.f32.mxu1 %v31090_v48 }
 0x25b   :  { %25016 = vmatmul.mubr.f32.gmra.mrb[6].mxu1 %v31108_v21 }
 0x25c   :  { %25018 = vmatprep.mubr.f32.mxu1 %v31126_v8 }
 0x25f   :  { %25019 = vmatmul.mubr.f32.gmra.mrb[8].mxu1 %v31144_v49 }
 0x260   :  { %25021 = vmatprep.mubr.f32.mxu1 %v31154_v51 }
 0x263   :  { %25022 = vmatmul.mubr.f32.gmra.mrb[10].mxu1 %v31183_v3 }
 0x264   :  { %25024 = vmatprep.mubr.f32.mxu1 %v31195_v41 }
 0x267   :  { %25025 = vmatmul.mubr.f32.gmra.mrb[12].mxu1 %v31217_v54 }
 0x268   :  { %25027 = vmatprep.mubr.f32.mxu1 %v31229_v62 }
 0x26b   :  { %25028 = vmatmul.mubr.f32.gmra.mrb[14].mxu1 %v31246_v39 }
 0x26c   :  { %25254 = vmatprep.mubr.f32.mxu1 %v34996_v57  ;;  %v2825_v57 = vsub.f32 %v31491_v29, %v34835_v50  ;;  %v2839_v50 = vsub.f32 %v31509_v42, %v34837_v14 }
 0x26e   :  { %v2826_v63 = vand.u32 4294901760, %v2825_v57  ;;  %v2847_v57 = vand.u32 4294901760, %v2846_v22 }
 0x270   :  { %v31506_v28 = vpack.c.bf16 %v2833_v35, %v2826_v63  ;;  %v2840_v63 = vand.u32 4294901760, %v2839_v50 }
 0x272   :  { %28165 = vmatprep.subr.bf16.mxu0 %v31506_v28  ;;  %v31521_v35 = vpack.c.bf16 %v2847_v57, %v2840_v63 }
 0x322   :  { %v25008_v2 = vpop.f32.mrb[0].mxu1 }
 0x323   :  { %v29590_v60 = vadd.f32 %v25008_v2, %v31534_v58  ;;  %v2429_v50 = vpop.f32.mrb[1].mxu1 }
 0x324   :  { %v29591_v22 = vadd.f32 %v31534_v58, %v2429_v50 }
 0x325   :  { %v2524_v63 = vmax.f32 %v29590_v60, 0.0 }
 0x326   :  { %v2523_v57 = vmax.f32 %v29591_v22, 0.0  ;;  %v25011_v14 = vpop.f32.mrb[2].mxu1 }
 0x327   :  { %v2548_v37 = vsel %vm2543_vm1, %v2524_v63, 0  ;;  %v29592_v32 = vadd.f32 %v25011_v14, %v31534_v58  ;;  %v2441_v18 = vpop.f32.mrb[3].mxu1 }
 0x328   :  { %v31540_v1 = vand.u32 4294901760, %v2548_v37  ;;  %v2545_v19 = vsel %vm2543_vm1, %v2523_v57, 0  ;;  %v29593_v11 = vadd.f32 %v31534_v58, %v2441_v18 }
 0x329   :  { %v31544_v46 = vand.u32 4294901760, %v2545_v19  ;;  %v2526_v2 = vmax.f32 %v29592_v32, 0.0 }
 0x32a   :  { %v31547_v52 = vsub.f32 %v2548_v37, %v31540_v1  ;;  %v2525_v60 = vmax.f32 %v29593_v11, 0.0  ;;  %v25014_v50 = vpop.f32.mrb[4].mxu1 }
 0x32b   :  { %v31550_v22 = vsub.f32 %v2545_v19, %v31544_v46  ;;  %v2554_v14 = vsel %vm2543_vm1, %v2526_v2, 0  ;;  %v29594_v63 = vadd.f32 %v25014_v50, %v31534_v58  ;;  %v2453_v56 = vpop.f32.mrb[5].mxu1 }
 0x32c   :  { %v34847_v57 = vand.u32 4294901760, %v31547_v52  ;;  %v31555_v36 = vand.u32 4294901760, %v2554_v14  ;;  %v2551_v18 = vsel %vm2543_vm1, %v2525_v60, 0  ;;  %v29595_v32 = vadd.f32 %v31534_v58, %v2453_v56 }
 0x32d   :  { %v31559_v37 = vand.u32 4294901760, %v2551_v18  ;;  %v2528_v11 = vmax.f32 %v29594_v63, 0.0  ;;  %v34852_v59 = vand.u32 4294901760, %v31550_v22 }
 0x32e   :  { %v2674_v19 = vsub.f32 %v31547_v52, %v34847_v57  ;;  %v31566_v2 = vsub.f32 %v2554_v14, %v31555_v36  ;;  %v2527_v50 = vmax.f32 %v29595_v32, 0.0  ;;  %v25017_v7 = vpop.f32.mrb[6].mxu1 }
 0x32f   :  { %v31569_v34 = vsub.f32 %v2551_v18, %v31559_v37  ;;  %v2560_v60 = vsel %vm2543_vm1, %v2528_v11, 0  ;;  %v29596_v56 = vadd.f32 %v25017_v7, %v31534_v58  ;;  %v2465_v17 = vpop.f32.mrb[7].mxu1  ;;  %v2664_v63 = vsub.f32 %v31550_v22, %v34852_v59 }
 0x330   :  { %v31576_v55 = vand.u32 4294901760, %v2560_v60  ;;  %v2557_v57 = vsel %vm2543_vm1, %v2527_v50, 0  ;;  %v29597_v14 = vadd.f32 %v31534_v58, %v2465_v17  ;;  %v2675_v11 = vand.u32 4294901760, %v2674_v19 }
 0x331   :  { %v31580_v32 = vand.u32 4294901760, %v2557_v57  ;;  %v2530_v6 = vmax.f32 %v29596_v56, 0.0  ;;  %v2665_v18 = vand.u32 4294901760, %v2664_v63  ;;  %v34855_v12 = vand.u32 4294901760, %v31569_v34 }
 0x332   :  { %v31584_v7 = vsub.f32 %v2560_v60, %v31576_v55  ;;  %v2529_v15 = vmax.f32 %v29597_v14, 0.0  ;;  %v25020_v38 = vpop.f32.mrb[8].mxu1  ;;  %v34858_v59 = vand.u32 4294901760, %v31566_v2 }
 0x333   :  { %v31588_v40 = vsub.f32 %v2557_v57, %v31580_v32  ;;  %v2566_v50 = vsel %vm2543_vm1, %v2530_v6, 0  ;;  %v29598_v17 = vadd.f32 %v25020_v38, %v31534_v58  ;;  %v2477_v43 = vpop.f32.mrb[9].mxu1  ;;  %25038 = vmatprep.mubr.f32.mxu0 %v2665_v18  ;;  %v2684_v19 = vsub.f32 %v31569_v34, %v34855_v12 }
 0x334   :  { %v31595_v56 = vand.u32 4294901760, %v2566_v50  ;;  %v2563_v60 = vsel %vm2543_vm1, %v2529_v15, 0  ;;  %v29599_v63 = vadd.f32 %v31534_v58, %v2477_v43  ;;  %25039 = vmatmul.mubr.f32.vlgmr.msra.gmra.mrb[16].mxu0 %v2675_v11  ;;  %v2694_v57 = vsub.f32 %v31566_v2, %v34858_v59 }
 0x335   :  { %v31602_v6 = vand.u32 4294901760, %v2563_v60  ;;  %v2532_v38 = vmax.f32 %v29598_v17, 0.0  ;;  %28167 = vmatpush3.bf16.msra.mxu0 %v31506_v28  ;;  %v2685_v14 = vand.u32 4294901760, %v2684_v19  ;;  %v34860_v18 = vand.u32 4294901760, %v31588_v40 }
 0x336   :  { %v31607_v12 = vsub.f32 %v2566_v50, %v31595_v56  ;;  %v2531_v33 = vmax.f32 %v29599_v63, 0.0  ;;  %v25023_v15 = vpop.f32.mrb[10].mxu1  ;;  %v2695_v23 = vand.u32 4294901760, %v2694_v57  ;;  %v34865_v43 = vand.u32 4294901760, %v31584_v7  ;;  %28169 = vmatprep.subr.bf16.mxu0 %v31521_v35 }
 0x337   :  { %v31612_v11 = vsub.f32 %v2563_v60, %v31602_v6  ;;  %v2572_v17 = vsel %vm2543_vm1, %v2532_v38, 0  ;;  %v29600_v28 = vadd.f32 %v25023_v15, %v31534_v58  ;;  %v2489_v19 = vpop.f32.mrb[11].mxu1  ;;  %25041 = vmatprep.mubr.f32.mxu0 %v2685_v14  ;;  %v2704_v50 = vsub.f32 %v31588_v40, %v34860_v18 }
 0x338   :  { %v31619_v63 = vand.u32 4294901760, %v2572_v17  ;;  %v2569_v57 = vsel %vm2543_vm1, %v2531_v33, 0  ;;  %v29601_v59 = vadd.f32 %v31534_v58, %v2489_v19  ;;  %25042 = vmatmul.mubr.f32.gmra.mrb[18].mxu0 %v2695_v23  ;;  %v2714_v60 = vsub.f32 %v31584_v7, %v34865_v43 }
 0x339   :  { %v31626_v38 = vand.u32 4294901760, %v2569_v57  ;;  %v2534_v15 = vmax.f32 %v29600_v28, 0.0  ;;  %v2705_v10 = vand.u32 4294901760, %v2704_v50  ;;  %v34870_v14 = vand.u32 4294901760, %v31612_v11  ;;  %28171 = vmatpush3.bf16.msra.mxu0 %v31521_v35 }
 0x33a   :  { %v31631_v18 = vsub.f32 %v2572_v17, %v31619_v63  ;;  %v2533_v39 = vmax.f32 %v29601_v59, 0.0  ;;  %v25026_v33 = vpop.f32.mrb[12].mxu1  ;;  %v2715_v62 = vand.u32 4294901760, %v2714_v60  ;;  %v34875_v23 = vand.u32 4294901760, %v31607_v12  ;;  %28173 = vmatprep.subr.bf16.mxu0 %v31525_v47 }
 0x33b   :  { %v31636_v19 = vsub.f32 %v2569_v57, %v31626_v38  ;;  %v2578_v28 = vsel %vm2543_vm1, %v2534_v15, 0  ;;  %v29602_v50 = vadd.f32 %v25026_v33, %v31534_v58  ;;  %v2501_v43 = vpop.f32.mrb[13].mxu1  ;;  %25044 = vmatprep.mubr.f32.mxu0 %v2705_v10  ;;  %v2724_v35 = vsub.f32 %v31612_v11, %v34870_v14 }
 0x33c   :  { %v31643_v59 = vand.u32 4294901760, %v2578_v28  ;;  %v2575_v17 = vsel %vm2543_vm1, %v2533_v39, 0  ;;  %v29603_v60 = vadd.f32 %v31534_v58, %v2501_v43  ;;  %25045 = vmatmul.mubr.f32.gmra.mrb[20].mxu0 %v2715_v62  ;;  %v2734_v57 = vsub.f32 %v31607_v12, %v34875_v23 }
 0x33d   :  { %v31650_v15 = vand.u32 4294901760, %v2575_v17  ;;  %v2536_v33 = vmax.f32 %v29602_v50, 0.0  ;;  %v2725_v54 = vand.u32 4294901760, %v2724_v35  ;;  %v34880_v10 = vand.u32 4294901760, %v31636_v19 }
 0x33e   :  { %v31654_v41 = vsub.f32 %v2578_v28, %v31643_v59  ;;  %v2535_v14 = vmax.f32 %v29603_v60, 0.0  ;;  %v25029_v3 = vpop.f32.mrb[14].mxu1  ;;  %v2735_v51 = vand.u32 4294901760, %v2734_v57  ;;  %v34885_v39 = vand.u32 4294901760, %v31631_v18 }
 0x33f   :  { %v31658_v62 = vsub.f32 %v2575_v17, %v31650_v15  ;;  %v2584_v43 = vsel %vm2543_vm1, %v2536_v33, 0  ;;  %v29604_v23 = vadd.f32 %v25029_v3, %v31534_v58  ;;  %v2513_v49 = vpop.f32.mrb[15].mxu1  ;;  %25047 = vmatprep.mubr.f32.mxu0 %v2725_v54  ;;  %v2744_v50 = vsub.f32 %v31636_v19, %v34880_v10 }
 0x340   :  { %v31665_v28 = vand.u32 4294901760, %v2584_v43  ;;  %v2581_v35 = vsel %vm2543_vm1, %v2535_v14, 0  ;;  %v29605_v60 = vadd.f32 %v31534_v58, %v2513_v49  ;;  %25048 = vmatmul.mubr.f32.gmra.mrb[22].mxu0 %v2735_v51  ;;  %v2754_v17 = vsub.f32 %v31631_v18, %v34885_v39 }
 0x341   :  { %v31672_v57 = vand.u32 4294901760, %v2581_v35  ;;  %v2538_v3 = vmax.f32 %v29604_v23, 0.0  ;;  %v2745_v33 = vand.u32 4294901760, %v2744_v50  ;;  %v34883_v54 = vand.u32 4294901760, %v31658_v62 }
 0x342   :  { %v31676_v8 = vsub.f32 %v2584_v43, %v31665_v28  ;;  %v2537_v10 = vmax.f32 %v29605_v60, 0.0  ;;  %v2755_v21 = vand.u32 4294901760, %v2754_v17  ;;  %v34884_v14 = vand.u32 4294901760, %v31654_v41 }
 0x343   :  { %v31680_v49 = vsub.f32 %v2581_v35, %v31672_v57  ;;  %v2590_v51 = vsel %vm2543_vm1, %v2538_v3, 0  ;;  %25050 = vmatprep.mubr.f32.mxu0 %v2745_v33  ;;  %v2764_v58 = vsub.f32 %v31658_v62, %v34883_v54 }
 0x344   :  { %v31686_v23 = vand.u32 4294901760, %v2590_v51  ;;  %v2587_v50 = vsel %vm2543_vm1, %v2537_v10, 0  ;;  %25051 = vmatmul.mubr.f32.gmra.mrb[24].mxu0 %v2755_v21  ;;  %v2774_v43 = vsub.f32 %v31654_v41, %v34884_v14  ;;  %v34888_v60 = vand.u32 4294901760, %v31676_v8 }
 0x345   :  { %v31693_v35 = vand.u32 4294901760, %v2587_v50  ;;  %v2765_v17 = vand.u32 4294901760, %v2764_v58  ;;  %v2783_v3 = vand.u32 4294901760, %v31680_v49 }
 0x346   :  { %v31697_v33 = vsub.f32 %v2590_v51, %v31686_v23  ;;  %v2775_v54 = vand.u32 4294901760, %v2774_v43  ;;  %v2794_v10 = vsub.f32 %v31676_v8, %v34888_v60 }
 0x347   :  { %v31703_v21 = vsub.f32 %v2587_v50, %v31693_v35  ;;  %25053 = vmatprep.mubr.f32.mxu0 %v2765_v17  ;;  %v2784_v14 = vsub.f32 %v31680_v49, %v2783_v3 }
 0x348   :  { %25054 = vmatmul.mubr.f32.gmra.mrb[26].mxu0 %v2775_v54  ;;  %v2813_v58 = vand.u32 4294901760, %v31697_v33  ;;  %v2795_v48 = vand.u32 4294901760, %v2794_v10  ;;  %v35006_v10 = vand.u32 4294901760, %v31566_v2 }
 0x349   :  { %v2785_v39 = vand.u32 4294901760, %v2784_v14  ;;  %v2803_v51 = vand.u32 4294901760, %v31703_v21  ;;  %v35004_v14 = vand.u32 4294901760, %v31547_v52 }
 0x34a   :  { %v2814_v43 = vsub.f32 %v31697_v33, %v2813_v58 }
 0x34b   :  { %25056 = vmatprep.mubr.f32.mxu0 %v2785_v39  ;;  %v2804_v50 = vsub.f32 %v31703_v21, %v2803_v51  ;;  %v35003_v39 = vand.u32 4294901760, %v31511_v24  ;;  %v35011_v24 = vand.u32 4294901760, %v31636_v19 }
 0x34c   :  { %25057 = vmatmul.mubr.f32.gmra.mrb[28].mxu0 %v2795_v48  ;;  %v2815_v60 = vand.u32 4294901760, %v2814_v43  ;;  %v34999_v48 = vand.u32 4294901760, %v31491_v29  ;;  %v35001_v29 = vand.u32 4294901760, %v31550_v22  ;;  %v35007_v43 = vand.u32 4294901760, %v31588_v40 }
 0x34d   :  { %v2805_v17 = vand.u32 4294901760, %v2804_v50 }
 0x34f   :  { %25059 = vmatprep.mubr.f32.mxu0 %v2805_v17 }
 0x350   :  { %25060 = vmatmul.mubr.f32.gmra.mrb[30].mxu0 %v2815_v60  ;;  %v35005_v60 = vand.u32 4294901760, %v31569_v34 }
 0x351   :  { %25070 = vmatprep.mubr.f32.mxu0 %v31544_v46 }
 0x354   :  { %25071 = vmatmul.mubr.f32.vlgmr.msra.gmra.mrb[16].mxu0 %v31540_v1 }
 0x355   :  { %25073 = vmatprep.mubr.f32.mxu0 %v31559_v37  ;;  %28175 = vmatpush3.bf16.msra.mxu0 %v31525_v47  ;;  %v35000_v47 = vand.u32 4294901760, %v31496_v44  ;;  %v35002_v44 = vand.u32 4294901760, %v31509_v42  ;;  %v35008_v42 = vand.u32 4294901760, %v31584_v7 }
 0x356   :  { %28177 = vmatprep.subr.bf16.mxu0 %v31529_v45 }
 0x357   :  { %v28192_v54 = vpack.c.bf16 %v35003_v39, %v35002_v44 }
 0x358   :  { %25074 = vmatmul.mubr.f32.gmra.mrb[18].mxu0 %v31555_v36 }
 0x359   :  { %25076 = vmatprep.mubr.f32.mxu0 %v31580_v32  ;;  %28179 = vmatpush3.bf16.msra.mxu0 %v31529_v45  ;;  %v28188_v45 = vpack.c.bf16 %v35000_v47, %v34999_v48 }
 0x35a   :  { %28181 = vmatprep.subr.bf16.mxu0 %v31364_v31 }
 0x35c   :  { %25077 = vmatmul.mubr.f32.gmra.mrb[20].mxu0 %v31576_v55 }
 0x35d   :  { %25079 = vmatprep.mubr.f32.mxu0 %v31602_v6 }
 0x360   :  { %25080 = vmatmul.mubr.f32.gmra.mrb[22].mxu0 %v31595_v56 }
 0x361   :  { %25082 = vmatprep.mubr.f32.mxu0 %v31626_v38 }
 0x364   :  { %25083 = vmatmul.mubr.f32.gmra.mrb[24].mxu0 %v31619_v63 }
 0x365   :  { %25085 = vmatprep.mubr.f32.mxu0 %v31650_v15 }
 0x368   :  { %25086 = vmatmul.mubr.f32.gmra.mrb[26].mxu0 %v31643_v59 }
 0x369   :  { %25088 = vmatprep.mubr.f32.mxu0 %v31672_v57 }
 0x36c   :  { %25089 = vmatmul.mubr.f32.gmra.mrb[28].mxu0 %v31665_v28 }
 0x36d   :  { %25091 = vmatprep.mubr.f32.mxu0 %v31693_v35 }
 0x370   :  { %25092 = vmatmul.mubr.f32.gmra.mrb[30].mxu0 %v31686_v23 }
 0x371   :  { %25102 = vmatprep.mubr.f32.mxu0 %v31550_v22  ;;  %v35012_v22 = vand.u32 4294901760, %v31631_v18 }
 0x374   :  { %25103 = vmatmul.mubr.f32.vlgmr.msra.gmra.mrb[16].mxu0 %v31547_v52  ;;  %v35009_v52 = vand.u32 4294901760, %v31612_v11 }
 0x375   :  { %25105 = vmatprep.mubr.f32.mxu0 %v31569_v34  ;;  %28183 = vmatpush3.bf16.msra.mxu0 %v31364_v31  ;;  %v35010_v34 = vand.u32 4294901760, %v31607_v12 }
 0x376   :  { %28185 = vmatprep.subr.bf16.mxu0 %v31484_v4 }
 0x378   :  { %25106 = vmatmul.mubr.f32.gmra.mrb[18].mxu0 %v31566_v2  ;;  %v35014_v2 = vand.u32 4294901760, %v31654_v41 }
 0x379   :  { %25108 = vmatprep.mubr.f32.mxu0 %v31588_v40  ;;  %28187 = vmatpush3.bf16.msra.mxu0 %v31484_v4  ;;  %v35013_v40 = vand.u32 4294901760, %v31658_v62 }
 0x37a   :  { %28189 = vmatprep.subr.bf16.mxu0 %v28188_v45 }
 0x37c   :  { %25109 = vmatmul.mubr.f32.gmra.mrb[20].mxu0 %v31584_v7  ;;  %v35015_v7 = vand.u32 4294901760, %v31676_v8 }
 0x37d   :  { %25111 = vmatprep.mubr.f32.mxu0 %v31612_v11 }
 0x380   :  { %25112 = vmatmul.mubr.f32.gmra.mrb[22].mxu0 %v31607_v12 }
 0x381   :  { %25114 = vmatprep.mubr.f32.mxu0 %v31636_v19 }
 0x384   :  { %25115 = vmatmul.mubr.f32.gmra.mrb[24].mxu0 %v31631_v18 }
 0x385   :  { %25117 = vmatprep.mubr.f32.mxu0 %v31658_v62 }
 0x388   :  { %25118 = vmatmul.mubr.f32.gmra.mrb[26].mxu0 %v31654_v41 }
 0x389   :  { %25120 = vmatprep.mubr.f32.mxu0 %v31680_v49 }
 0x38c   :  { %25121 = vmatmul.mubr.f32.gmra.mrb[28].mxu0 %v31676_v8 }
 0x38d   :  { %25123 = vmatprep.mubr.f32.mxu0 %v31703_v21 }
 0x390   :  { %25124 = vmatmul.mubr.f32.gmra.mrb[30].mxu0 %v31697_v33 }
 0x391   :  { %25134 = vmatprep.mubr.f32.mxu0 %v35001_v29 }
 0x394   :  { %25135 = vmatmul.mubr.f32.vlgmr.msra.gmra.mrb[16].mxu0 %v35004_v14 }
 0x395   :  { %25137 = vmatprep.mubr.f32.mxu0 %v35005_v60  ;;  %28191 = vmatpush3.bf16.msra.mxu0 %v28188_v45 }
 0x396   :  { %28193 = vmatprep.subr.bf16.mxu0 %v28192_v54 }
 0x398   :  { %25138 = vmatmul.mubr.f32.gmra.mrb[18].mxu0 %v35006_v10 }
 0x399   :  { %25140 = vmatprep.mubr.f32.mxu0 %v35007_v43  ;;  %28195 = vmatpush3.bf16.msra.mxu0 %v28192_v54 }
 0x39a   :  { %28197 = vmatprep.subr.bf16.mxu0 %v31364_v31 }
 0x39c   :  { %25141 = vmatmul.mubr.f32.gmra.mrb[20].mxu0 %v35008_v42 }
 0x39d   :  { %25143 = vmatprep.mubr.f32.mxu0 %v35009_v52 }
 0x3a0   :  { %25144 = vmatmul.mubr.f32.gmra.mrb[22].mxu0 %v35010_v34 }
 0x3a1   :  { %25146 = vmatprep.mubr.f32.mxu0 %v35011_v24 }
 0x3a4   :  { %25147 = vmatmul.mubr.f32.gmra.mrb[24].mxu0 %v35012_v22 }
 0x3a5   :  { %25149 = vmatprep.mubr.f32.mxu0 %v35013_v40 }
 0x3a8   :  { %25150 = vmatmul.mubr.f32.gmra.mrb[26].mxu0 %v35014_v2 }
 0x3a9   :  { %25152 = vmatprep.mubr.f32.mxu0 %v2783_v3 }
 0x3ac   :  { %25153 = vmatmul.mubr.f32.gmra.mrb[28].mxu0 %v35015_v7 }
 0x3ad   :  { %25155 = vmatprep.mubr.f32.mxu0 %v2803_v51 }
 0x3b0   :  { %25156 = vmatmul.mubr.f32.gmra.mrb[30].mxu0 %v2813_v58 }
 0x3b1   :  { %25166 = vmatprep.mubr.f32.mxu0 %v31544_v46 }
 0x3b4   :  { %25167 = vmatmul.mubr.f32.vlgmr.msra.gmra.mrb[16].mxu0 %v31540_v1 }
 0x3b5   :  { %25169 = vmatprep.mubr.f32.mxu0 %v31559_v37  ;;  %28199 = vmatpush3.bf16.msra.mxu0 %v31364_v31 }
 0x3b6   :  { %28201 = vmatprep.subr.bf16.mxu0 %v31484_v4 }
 0x3b8   :  { %25170 = vmatmul.mubr.f32.gmra.mrb[18].mxu0 %v31555_v36 }
 0x3b9   :  { %25172 = vmatprep.mubr.f32.mxu0 %v31580_v32  ;;  %28203 = vmatpush3.bf16.msra.mxu0 %v31484_v4 }
 0x3bc   :  { %25173 = vmatmul.mubr.f32.gmra.mrb[20].mxu0 %v31576_v55 }
 0x3bd   :  { %25175 = vmatprep.mubr.f32.mxu0 %v31602_v6 }
 0x3c0   :  { %25176 = vmatmul.mubr.f32.gmra.mrb[22].mxu0 %v31595_v56 }
 0x3c1   :  { %25178 = vmatprep.mubr.f32.mxu0 %v31626_v38 }
 0x3c4   :  { %25179 = vmatmul.mubr.f32.gmra.mrb[24].mxu0 %v31619_v63 }
 0x3c5   :  { %25181 = vmatprep.mubr.f32.mxu0 %v31650_v15 }
 0x3c8   :  { %25182 = vmatmul.mubr.f32.gmra.mrb[26].mxu0 %v31643_v59 }
 0x3c9   :  { %25184 = vmatprep.mubr.f32.mxu0 %v31672_v57 }
 0x3cc   :  { %25185 = vmatmul.mubr.f32.gmra.mrb[28].mxu0 %v31665_v28 }
 0x3cd   :  { %25187 = vmatprep.mubr.f32.mxu0 %v31693_v35 }
 0x3d0   :  { %25188 = vmatmul.mubr.f32.gmra.mrb[30].mxu0 %v31686_v23 }
 0x3d1   :  { %25198 = vmatprep.mubr.f32.mxu0 %v31544_v46 }
 0x3d4   :  { %25199 = vmatmul.mubr.f32.vlgmr.msra.gmra.mrb[16].mxu0 %v31540_v1 }
 0x3d5   :  { %25201 = vmatprep.mubr.f32.mxu0 %v31559_v37 }
 0x3d8   :  { %25202 = vmatmul.mubr.f32.gmra.mrb[18].mxu0 %v31555_v36 }
 0x3d9   :  { %25204 = vmatprep.mubr.f32.mxu0 %v31580_v32 }
 0x3dc   :  { %25205 = vmatmul.mubr.f32.gmra.mrb[20].mxu0 %v31576_v55 }
 0x3dd   :  { %25207 = vmatprep.mubr.f32.mxu0 %v31602_v6 }
 0x3e0   :  { %25208 = vmatmul.mubr.f32.gmra.mrb[22].mxu0 %v31595_v56 }
 0x3e1   :  { %25210 = vmatprep.mubr.f32.mxu0 %v31626_v38 }
 0x3e4   :  { %25211 = vmatmul.mubr.f32.gmra.mrb[24].mxu0 %v31619_v63 }
 0x3e5   :  { %25213 = vmatprep.mubr.f32.mxu0 %v31650_v15 }
 0x3e8   :  { %25214 = vmatmul.mubr.f32.gmra.mrb[26].mxu0 %v31643_v59 }
 0x3e9   :  { %25216 = vmatprep.mubr.f32.mxu0 %v31672_v57 }
 0x3ec   :  { %25217 = vmatmul.mubr.f32.gmra.mrb[28].mxu0 %v31665_v28 }
 0x3ed   :  { %25219 = vmatprep.mubr.f32.mxu0 %v31693_v35 }
 0x3f0   :  { %25220 = vmatmul.mubr.f32.gmra.mrb[30].mxu0 %v31686_v23 }
 0x4a7   :  { %v25200_v41 = vpop.f32.mrb[16].mxu0 }
 0x4a8   :  { %v3733_v12 = vand.u32 4294901760, %v25200_v41  ;;  %v3628_v8 = vpop.f32.mrb[17].mxu0 }
 0x4a9   :  { %v3730_v36 = vand.u32 4294901760, %v3628_v8 }
 0x4aa   :  { %v3979_v55 = vsub.f32 %v25200_v41, %v3733_v12 }
 0x4ab   :  { %v31831_v31 = vpack.c.bf16 %v3733_v12, %v3730_v36  ;;  %v3972_v46 = vsub.f32 %v3628_v8, %v3730_v36  ;;  %v25203_v1 = vpop.f32.mrb[18].mxu0 }
 0x4ac   :  { %v3980_v4 = vand.u32 4294901760, %v3979_v55  ;;  %v3739_v37 = vand.u32 4294901760, %v25203_v1  ;;  %v3640_v32 = vpop.f32.mrb[19].mxu0 }
 0x4ad   :  { %v3973_v56 = vand.u32 4294901760, %v3972_v46  ;;  %v3736_v6 = vand.u32 4294901760, %v3640_v32  ;;  %28205 = vmatprep.subr.bf16.mxu1 %v31831_v31  ;;  %v31834_v18 = vpack.c.bf16 %v3979_v55, %v3972_v46 }
 0x4ae   :  { %v3981_v11 = vsub.f32 %v3979_v55, %v3980_v4  ;;  %v3993_v63 = vsub.f32 %v25203_v1, %v3739_v37  ;;  %28207 = vmatpush3.bf16.msra.mxu1 %v31831_v31 }
 0x4af   :  { %v3974_v38 = vsub.f32 %v3972_v46, %v3973_v56  ;;  %v31837_v19 = vpack.c.bf16 %v3739_v37, %v3736_v6  ;;  %v3986_v59 = vsub.f32 %v3640_v32, %v3736_v6  ;;  %v25206_v15 = vpop.f32.mrb[20].mxu0  ;;  %v31839_v62 = vpack.c.bf16 %v3980_v4, %v3973_v56 }
 0x4b0   :  { %v3994_v28 = vand.u32 4294901760, %v3993_v63  ;;  %v3745_v57 = vand.u32 4294901760, %v25206_v15  ;;  %v3652_v49 = vpop.f32.mrb[21].mxu0  ;;  %v3982_v23 = vand.u32 4294901760, %v3981_v11 }
 0x4b1   :  { %v3987_v35 = vand.u32 4294901760, %v3986_v59  ;;  %v3742_v3 = vand.u32 4294901760, %v3652_v49  ;;  %28209 = vmatprep.subr.bf16.mxu1 %v31837_v19  ;;  %v3975_v33 = vand.u32 4294901760, %v3974_v38  ;;  %v31842_v21 = vpack.c.bf16 %v3993_v63, %v3986_v59 }
 0x4b2   :  { %v3995_v58 = vsub.f32 %v3993_v63, %v3994_v28  ;;  %v4007_v51 = vsub.f32 %v25206_v15, %v3745_v57  ;;  %28211 = vmatpush3.bf16.msra.mxu1 %v31837_v19 }
 0x4b3   :  { %v3988_v50 = vsub.f32 %v3986_v59, %v3987_v35  ;;  %v31845_v17 = vpack.c.bf16 %v3745_v57, %v3742_v3  ;;  %v4000_v48 = vsub.f32 %v3652_v49, %v3742_v3  ;;  %v25209_v47 = vpop.f32.mrb[22].mxu0  ;;  %v31847_v45 = vpack.c.bf16 %v3982_v23, %v3975_v33 }
 0x4b4   :  { %v4008_v29 = vand.u32 4294901760, %v4007_v51  ;;  %v3751_v44 = vand.u32 4294901760, %v25209_v47  ;;  %v3664_v39 = vpop.f32.mrb[23].mxu0  ;;  %v3996_v54 = vand.u32 4294901760, %v3995_v58  ;;  %v31849_v14 = vpack.c.bf16 %v3994_v28, %v3987_v35 }
 0x4b5   :  { %v4001_v60 = vand.u32 4294901760, %v4000_v48  ;;  %v3748_v10 = vand.u32 4294901760, %v3664_v39  ;;  %28213 = vmatprep.subr.bf16.mxu1 %v31845_v17  ;;  %v3989_v43 = vand.u32 4294901760, %v3988_v50  ;;  %v31852_v42 = vpack.c.bf16 %v4007_v51, %v4000_v48 }
 0x4b6   :  { %v4009_v52 = vsub.f32 %v4007_v51, %v4008_v29  ;;  %v4021_v34 = vsub.f32 %v25209_v47, %v3751_v44  ;;  %28215 = vmatpush3.bf16.msra.mxu1 %v31845_v17 }
 0x4b7   :  { %v4002_v24 = vsub.f32 %v4000_v48, %v4001_v60  ;;  %v31855_v22 = vpack.c.bf16 %v3751_v44, %v3748_v10  ;;  %v4014_v40 = vsub.f32 %v3664_v39, %v3748_v10  ;;  %v25212_v2 = vpop.f32.mrb[24].mxu0  ;;  %v31857_v7 = vpack.c.bf16 %v3996_v54, %v3989_v43 }
 0x4b8   :  { %v4022_v41 = vand.u32 4294901760, %v4021_v34  ;;  %v3757_v12 = vand.u32 4294901760, %v25212_v2  ;;  %v3676_v8 = vpop.f32.mrb[25].mxu0  ;;  %v4010_v36 = vand.u32 4294901760, %v4009_v52  ;;  %v31859_v55 = vpack.c.bf16 %v4008_v29, %v4001_v60 }
 0x4b9   :  { %v4015_v46 = vand.u32 4294901760, %v4014_v40  ;;  %v3754_v1 = vand.u32 4294901760, %v3676_v8  ;;  %28217 = vmatprep.subr.bf16.mxu1 %v31855_v22  ;;  %v4003_v4 = vand.u32 4294901760, %v4002_v24  ;;  %v31862_v37 = vpack.c.bf16 %v4021_v34, %v4014_v40 }
 0x4ba   :  { %v4023_v32 = vsub.f32 %v4021_v34, %v4022_v41  ;;  %v4035_v56 = vsub.f32 %v25212_v2, %v3757_v12  ;;  %28219 = vmatpush3.bf16.msra.mxu1 %v31855_v22 }
 0x4bb   :  { %v4016_v6 = vsub.f32 %v4014_v40, %v4015_v46  ;;  %v31865_v11 = vpack.c.bf16 %v3757_v12, %v3754_v1  ;;  %v4028_v63 = vsub.f32 %v3676_v8, %v3754_v1  ;;  %v25215_v38 = vpop.f32.mrb[26].mxu0  ;;  %v31867_v59 = vpack.c.bf16 %v4010_v36, %v4003_v4 }
 0x4bc   :  { %v4036_v15 = vand.u32 4294901760, %v4035_v56  ;;  %v3763_v28 = vand.u32 4294901760, %v25215_v38  ;;  %v3688_v57 = vpop.f32.mrb[27].mxu0  ;;  %v4024_v49 = vand.u32 4294901760, %v4023_v32  ;;  %v31869_v23 = vpack.c.bf16 %v4022_v41, %v4015_v46 }
 0x4bd   :  { %v4029_v35 = vand.u32 4294901760, %v4028_v63  ;;  %v3760_v3 = vand.u32 4294901760, %v3688_v57  ;;  %28221 = vmatprep.subr.bf16.mxu1 %v31865_v11  ;;  %v4017_v33 = vand.u32 4294901760, %v4016_v6  ;;  %v31872_v58 = vpack.c.bf16 %v4035_v56, %v4028_v63 }
 0x4be   :  { %v4037_v51 = vsub.f32 %v4035_v56, %v4036_v15  ;;  %v4049_v50 = vsub.f32 %v25215_v38, %v3763_v28  ;;  %28223 = vmatpush3.bf16.msra.mxu1 %v31865_v11 }
 0x4bf   :  { %v4030_v48 = vsub.f32 %v4028_v63, %v4029_v35  ;;  %v31875_v47 = vpack.c.bf16 %v3763_v28, %v3760_v3  ;;  %v4042_v29 = vsub.f32 %v3688_v57, %v3760_v3  ;;  %v25218_v44 = vpop.f32.mrb[28].mxu0  ;;  %v31877_v39 = vpack.c.bf16 %v4024_v49, %v4017_v33 }
 0x4c0   :  { %v4050_v54 = vand.u32 4294901760, %v4049_v50  ;;  %v3769_v60 = vand.u32 4294901760, %v25218_v44  ;;  %v3700_v10 = vpop.f32.mrb[29].mxu0  ;;  %v4038_v43 = vand.u32 4294901760, %v4037_v51  ;;  %v31879_v52 = vpack.c.bf16 %v4036_v15, %v4029_v35 }
 0x4c1   :  { %v4043_v34 = vand.u32 4294901760, %v4042_v29  ;;  %v3766_v24 = vand.u32 4294901760, %v3700_v10  ;;  %28225 = vmatprep.subr.bf16.mxu1 %v31875_v47  ;;  %v4031_v40 = vand.u32 4294901760, %v4030_v48  ;;  %v31882_v2 = vpack.c.bf16 %v4049_v50, %v4042_v29 }
 0x4c2   :  { %v4051_v41 = vsub.f32 %v4049_v50, %v4050_v54  ;;  %v4063_v12 = vsub.f32 %v25218_v44, %v3769_v60  ;;  %28227 = vmatpush3.bf16.msra.mxu1 %v31875_v47 }
 0x4c3   :  { %v4044_v8 = vsub.f32 %v4042_v29, %v4043_v34  ;;  %v31885_v36 = vpack.c.bf16 %v3769_v60, %v3766_v24  ;;  %v4056_v46 = vsub.f32 %v3700_v10, %v3766_v24  ;;  %v25221_v1 = vpop.f32.mrb[30].mxu0  ;;  %v28252_v4 = vpack.c.bf16 %v4038_v43, %v4031_v40 }
 0x4c4   :  { %v4064_v32 = vand.u32 4294901760, %v4063_v12  ;;  %v3775_v56 = vand.u32 4294901760, %v25221_v1  ;;  %v3712_v6 = vpop.f32.mrb[31].mxu0  ;;  %v4052_v63 = vand.u32 4294901760, %v4051_v41  ;;  %v31887_v38 = vpack.c.bf16 %v4050_v54, %v4043_v34 }
 0x4c5   :  { %v4057_v15 = vand.u32 4294901760, %v4056_v46  ;;  %v3772_v28 = vand.u32 4294901760, %v3712_v6  ;;  %28229 = vmatprep.subr.bf16.mxu1 %v31885_v36  ;;  %v4045_v57 = vand.u32 4294901760, %v4044_v8  ;;  %v31890_v49 = vpack.c.bf16 %v4063_v12, %v4056_v46  ;;  %v35016_v8 = vld [vmem:[#allocation11_spill] sm:$0xff] }
 0x4c6   :  { %v4065_v35 = vsub.f32 %v4063_v12, %v4064_v32  ;;  %v4077_v3 = vsub.f32 %v25221_v1, %v3775_v56  ;;  %28231 = vmatpush3.bf16.msra.mxu1 %v31885_v36  ;;  %v35017_v1 = vld [vmem:[#allocation18_spill] sm:$0xff] }
 0x4c7   :  { %v4058_v33 = vsub.f32 %v4056_v46, %v4057_v15  ;;  %v31893_v51 = vpack.c.bf16 %v3775_v56, %v3772_v28  ;;  %v4070_v50 = vsub.f32 %v3712_v6, %v3772_v28  ;;  %v28256_v48 = vpack.c.bf16 %v4052_v63, %v4045_v57  ;;  %v35018_v56 = vld [vmem:[#allocation36_spill] sm:$0xff] }
 0x4c8   :  { %v4078_v29 = vand.u32 4294901760, %v4077_v3  ;;  %v4066_v44 = vand.u32 4294901760, %v4065_v35  ;;  %v31895_v54 = vpack.c.bf16 %v4064_v32, %v4057_v15  ;;  %v35019_v6 = vld [vmem:[#allocation40_spill] sm:$0xff]  ;;  %v35021_v15 = vld [vmem:[#allocation45_spill] sm:$0xff]  ;;  %v35042_v35 = vld [vmem:[#allocation27_spill] sm:$0xff] }
 0x4c9   :  { %v4071_v60 = vand.u32 4294901760, %v4070_v50  ;;  %28233 = vmatprep.subr.bf16.mxu1 %v31893_v51  ;;  %v4059_v10 = vand.u32 4294901760, %v4058_v33  ;;  %v31898_v43 = vpack.c.bf16 %v4077_v3, %v4070_v50  ;;  %v35020_v63 = vld [vmem:[#allocation44_spill] sm:$0xff]  ;;  %v35044_v33 = vld [vmem:[#allocation38_spill] sm:$0xff] }
 0x4ca   :  { %v4079_v34 = vsub.f32 %v4077_v3, %v4078_v29  ;;  %28235 = vmatpush3.bf16.msra.mxu1 %v31893_v51  ;;  %v35023_v28 = vld [vmem:[#allocation56_spill] sm:$0xff]  ;;  %v35043_v3 = vld [vmem:[#allocation33_spill] sm:$0xff] }
 0x4cb   :  { %v4072_v24 = vsub.f32 %v4070_v50, %v4071_v60  ;;  %28237 = vmatprep.subr.bf16.mxu1 %v31847_v45  ;;  %v28260_v40 = vpack.c.bf16 %v4066_v44, %v4059_v10  ;;  %v31902_v41 = vpack.c.bf16 %v4078_v29, %v4071_v60  ;;  %v35040_v57 = vld [vmem:[#allocation16_spill] sm:$0xff]  ;;  %v35045_v50 = vld [vmem:[#allocation42_spill] sm:$0xff]  ;;  %v35050_v10 = vld [vmem:[#allocation61_spill] sm:$0xff] }
 0x4cc   :  { %v4080_v12 = vand.u32 4294901760, %v4079_v34  ;;  %v35047_v29 = vld [vmem:[#allocation50_spill] sm:$0xff]  ;;  %v35052_v34 = vld [vmem:[#allocation7_spill] sm:$0xff] }
 0x4cd   :  { %25255 = vmatmul.mubr.f32.vlgmr.msra.gmra.mrb[16].mxu1 %v35016_v8  ;;  %v4073_v46 = vand.u32 4294901760, %v4072_v24  ;;  %v35048_v44 = vld [vmem:[#allocation54_spill] sm:$0xff]  ;;  %v35056_v8 = vld [vmem:[#allocation21_spill] sm:$0xff] }
 0x4ce   :  { %28239 = vmatpush3.bf16.msra.mxu1 %v31847_v45  ;;  %25257 = vmatprep.mubr.f32.mxu1 %v35017_v1  ;;  %v35022_v45 = vld [vmem:[#allocation52_spill] sm:$0xff]  ;;  %v35049_v60 = vld [vmem:[#allocation58_spill] sm:$0xff]  ;;  %v35059_v1 = vld [vmem:[#allocation41_spill] sm:$0xff] }
 0x4cf   :  { %28241 = vmatprep.subr.bf16.mxu1 %v31857_v7  ;;  %v28264_v32 = vpack.c.bf16 %v4080_v12, %v4073_v46  ;;  %v35053_v24 = vld [vmem:[#allocation10_spill] sm:$0xff]  ;;  %v35055_v12 = vld [vmem:[#allocation19_spill] sm:$0xff] }
 0x4d0   :  { %v35057_v46 = vld [vmem:[#allocation30_spill] sm:$0xff] }
 0x4d1   :  { %25258 = vmatmul.mubr.f32.gmra.mrb[18].mxu1 %v35018_v56  ;;  %v35063_v56 = vld [vmem:[#allocation57_spill] sm:$0xff] }
 0x4d2   :  { %28243 = vmatpush3.bf16.msra.mxu1 %v31857_v7  ;;  %25260 = vmatprep.mubr.f32.mxu1 %v35019_v6  ;;  %v35024_v7 = vld [vmem:[#allocation59_spill] sm:$0xff]  ;;  %v35065_v6 = vld [vmem:[#allocation62_spill] sm:$0xff] }
 0x4d3   :  { %28245 = vmatprep.subr.bf16.mxu1 %v31867_v59 }
 0x4d5   :  { %25261 = vmatmul.mubr.f32.gmra.mrb[20].mxu1 %v35020_v63 }
 0x4d6   :  { %28247 = vmatpush3.bf16.msra.mxu1 %v31867_v59  ;;  %25263 = vmatprep.mubr.f32.mxu1 %v35021_v15  ;;  %v35035_v59 = vld [vmem:[#allocation3_spill] sm:$0xff] }
 0x4d7   :  { %28249 = vmatprep.subr.bf16.mxu1 %v31877_v39 }
 0x4d9   :  { %25264 = vmatmul.mubr.f32.gmra.mrb[22].mxu1 %v35022_v45 }
 0x4da   :  { %28251 = vmatpush3.bf16.msra.mxu1 %v31877_v39  ;;  %25266 = vmatprep.mubr.f32.mxu1 %v35023_v28  ;;  %v35037_v39 = vld [vmem:[#allocation8_spill] sm:$0xff] }
 0x4db   :  { %28253 = vmatprep.subr.bf16.mxu1 %v28252_v4 }
 0x4dd   :  { %25267 = vmatmul.mubr.f32.gmra.mrb[24].mxu1 %v35024_v7 }
 0x4de   :  { %28255 = vmatpush3.bf16.msra.mxu1 %v28252_v4  ;;  %25269 = vmatprep.mubr.f32.mxu1 %v31274_v53  ;;  %v35026_v53 = vld [vmem:[#allocation25_spill] sm:$0xff]  ;;  %v35039_v4 = vld [vmem:[#allocation14_spill] sm:$0xff] }
 0x4df   :  { %28257 = vmatprep.subr.bf16.mxu1 %v28256_v48 }
 0x4e1   :  { %25270 = vmatmul.mubr.f32.gmra.mrb[26].mxu1 %v31283_v26  ;;  %v35025_v26 = vld [vmem:[#allocation22_spill] sm:$0xff] }
 0x4e2   :  { %28259 = vmatpush3.bf16.msra.mxu1 %v28256_v48  ;;  %25272 = vmatprep.mubr.f32.mxu1 %v31292_v61  ;;  %v35027_v61 = vld [vmem:[#allocation28_spill] sm:$0xff]  ;;  %v35046_v48 = vld [vmem:[#allocation47_spill] sm:$0xff] }
 0x4e3   :  { %28261 = vmatprep.subr.bf16.mxu1 %v28260_v40 }
 0x4e5   :  { %25273 = vmatmul.mubr.f32.gmra.mrb[28].mxu1 %v31298_v13  ;;  %v35028_v13 = vld [vmem:[#allocation32_spill] sm:$0xff] }
 0x4e6   :  { %28263 = vmatpush3.bf16.msra.mxu1 %v28260_v40  ;;  %25275 = vmatprep.mubr.f32.mxu1 %v31304_v16  ;;  %v35029_v16 = vld [vmem:[#allocation34_spill] sm:$0xff]  ;;  %v35054_v40 = vld [vmem:[#allocation12_spill] sm:$0xff] }
 0x4e7   :  { %28265 = vmatprep.subr.bf16.mxu1 %v28264_v32 }
 0x4e9   :  { %25276 = vmatmul.mubr.f32.gmra.mrb[30].mxu1 %v31308_v5  ;;  %v35030_v5 = vld [vmem:[#allocation39_spill] sm:$0xff] }
 0x4ea   :  { %28267 = vmatpush3.bf16.msra.mxu1 %v28264_v32  ;;  %25310 = vmatprep.mubr.f32.mxu1 %v30965_v9  ;;  %v35061_v32 = vld [vmem:[#allocation49_spill] sm:$0xff] }
 0x4eb   :  { %28269 = vmatprep.subr.bf16.mxu1 %v31834_v18 }
 0x4ed   :  { %25311 = vmatmul.mubr.f32.vlgmr.msra.gmra.mrb[16].mxu1 %v30981_v20 }
 0x4ee   :  { %28271 = vmatpush3.bf16.msra.mxu1 %v31834_v18  ;;  %25313 = vmatprep.mubr.f32.mxu1 %v30992_v25  ;;  %v35031_v18 = vld [vmem:[#allocation43_spill] sm:$0xff] }
 0x4ef   :  { %28273 = vmatprep.subr.bf16.mxu1 %v31842_v21 }
 0x4f1   :  { %25314 = vmatmul.mubr.f32.gmra.mrb[18].mxu1 %v30997_v27 }
 0x4f2   :  { %28275 = vmatpush3.bf16.msra.mxu1 %v31842_v21  ;;  %25316 = vmatprep.mubr.f32.mxu1 %v31016_v30  ;;  %v35032_v21 = vld [vmem:[#allocation48_spill] sm:$0xff] }
 0x4f3   :  { %28277 = vmatprep.subr.bf16.mxu1 %v31852_v42 }
 0x4f5   :  { %25317 = vmatmul.mubr.f32.gmra.mrb[20].mxu1 %v31033_v0 }
 0x4f6   :  { %28279 = vmatpush3.bf16.msra.mxu1 %v31852_v42  ;;  %25319 = vmatprep.mubr.f32.mxu1 %v35025_v26  ;;  %v35033_v42 = vld [vmem:[#allocation51_spill] sm:$0xff] }
 0x4f7   :  { %28281 = vmatprep.subr.bf16.mxu1 %v31862_v37 }
 0x4f9   :  { %25320 = vmatmul.mubr.f32.gmra.mrb[22].mxu1 %v35026_v53 }
 0x4fa   :  { %28283 = vmatpush3.bf16.msra.mxu1 %v31862_v37  ;;  %25322 = vmatprep.mubr.f32.mxu1 %v35027_v61  ;;  %v35034_v37 = vld [vmem:[#allocation55_spill] sm:$0xff] }
 0x4fb   :  { %28285 = vmatprep.subr.bf16.mxu1 %v31872_v58 }
 0x4fd   :  { %25323 = vmatmul.mubr.f32.gmra.mrb[24].mxu1 %v35028_v13 }
 0x4fe   :  { %28287 = vmatpush3.bf16.msra.mxu1 %v31872_v58  ;;  %25325 = vmatprep.mubr.f32.mxu1 %v35029_v16  ;;  %v35036_v58 = vld [vmem:[#allocation6_spill] sm:$0xff] }
 0x4ff   :  { %28289 = vmatprep.subr.bf16.mxu1 %v31882_v2 }
 0x501   :  { %25326 = vmatmul.mubr.f32.gmra.mrb[26].mxu1 %v35030_v5 }
 0x502   :  { %28291 = vmatpush3.bf16.msra.mxu1 %v31882_v2  ;;  %25328 = vmatprep.mubr.f32.mxu1 %v35031_v18  ;;  %v35038_v2 = vld [vmem:[#allocation9_spill] sm:$0xff] }
 0x503   :  { %28293 = vmatprep.subr.bf16.mxu1 %v31890_v49 }
 0x505   :  { %25329 = vmatmul.mubr.f32.gmra.mrb[28].mxu1 %v35032_v21 }
 0x506   :  { %28295 = vmatpush3.bf16.msra.mxu1 %v31890_v49  ;;  %25331 = vmatprep.mubr.f32.mxu1 %v35033_v42  ;;  %v35041_v49 = vld [vmem:[#allocation24_spill] sm:$0xff] }
 0x507   :  { %28297 = vmatprep.subr.bf16.mxu1 %v31898_v43 }
 0x509   :  { %25332 = vmatmul.mubr.f32.gmra.mrb[30].mxu1 %v35034_v37 }
 0x50a   :  { %28299 = vmatpush3.bf16.msra.mxu1 %v31898_v43  ;;  %25366 = vmatprep.mubr.f32.mxu1 %v35035_v59  ;;  %v35051_v43 = vld [vmem:[#allocation4_spill] sm:$0xff] }
 0x50b   :  { %28301 = vmatprep.subr.bf16.mxu1 %v31831_v31 }
 0x50d   :  { %25367 = vmatmul.mubr.f32.vlgmr.msra.gmra.mrb[16].mxu1 %v35036_v58 }
 0x50e   :  { %28303 = vmatpush3.bf16.msra.mxu1 %v31831_v31  ;;  %25369 = vmatprep.mubr.f32.mxu1 %v35037_v39 }
 0x50f   :  { %28305 = vmatprep.subr.bf16.mxu1 %v31837_v19 }
 0x511   :  { %25370 = vmatmul.mubr.f32.gmra.mrb[18].mxu1 %v35038_v2 }
 0x512   :  { %28307 = vmatpush3.bf16.msra.mxu1 %v31837_v19  ;;  %25372 = vmatprep.mubr.f32.mxu1 %v35039_v4 }
 0x513   :  { %28309 = vmatprep.subr.bf16.mxu1 %v31845_v17 }
 0x515   :  { %25373 = vmatmul.mubr.f32.gmra.mrb[20].mxu1 %v35040_v57 }
 0x516   :  { %28311 = vmatpush3.bf16.msra.mxu1 %v31845_v17  ;;  %25375 = vmatprep.mubr.f32.mxu1 %v35041_v49 }
 0x517   :  { %28313 = vmatprep.subr.bf16.mxu1 %v31855_v22 }
 0x519   :  { %25376 = vmatmul.mubr.f32.gmra.mrb[22].mxu1 %v35042_v35 }
 0x51a   :  { %28315 = vmatpush3.bf16.msra.mxu1 %v31855_v22  ;;  %25378 = vmatprep.mubr.f32.mxu1 %v35043_v3 }
 0x51b   :  { %28317 = vmatprep.subr.bf16.mxu1 %v31865_v11 }
 0x51d   :  { %25379 = vmatmul.mubr.f32.gmra.mrb[24].mxu1 %v35044_v33 }
 0x51e   :  { %28319 = vmatpush3.bf16.msra.mxu1 %v31865_v11  ;;  %25381 = vmatprep.mubr.f32.mxu1 %v35045_v50 }
 0x51f   :  { %28321 = vmatprep.subr.bf16.mxu1 %v31875_v47 }
 0x521   :  { %25382 = vmatmul.mubr.f32.gmra.mrb[26].mxu1 %v35046_v48 }
 0x522   :  { %28323 = vmatpush3.bf16.msra.mxu1 %v31875_v47  ;;  %25384 = vmatprep.mubr.f32.mxu1 %v35047_v29 }
 0x523   :  { %28325 = vmatprep.subr.bf16.mxu1 %v31885_v36 }
 0x525   :  { %25385 = vmatmul.mubr.f32.gmra.mrb[28].mxu1 %v35048_v44 }
 0x526   :  { %28327 = vmatpush3.bf16.msra.mxu1 %v31885_v36  ;;  %25387 = vmatprep.mubr.f32.mxu1 %v35049_v60 }
 0x527   :  { %28329 = vmatprep.subr.bf16.mxu1 %v31893_v51 }
 0x529   :  { %25388 = vmatmul.mubr.f32.gmra.mrb[30].mxu1 %v35050_v10 }
 0x52a   :  { %28331 = vmatpush3.bf16.msra.mxu1 %v31893_v51  ;;  %25422 = vmatprep.mubr.f32.mxu1 %v35051_v43 }
 0x52b   :  { %28333 = vmatprep.subr.bf16.mxu1 %v31839_v62 }
 0x52d   :  { %25423 = vmatmul.mubr.f32.vlgmr.msra.gmra.mrb[16].mxu1 %v35052_v34 }
 0x52e   :  { %28335 = vmatpush3.bf16.msra.mxu1 %v31839_v62  ;;  %25425 = vmatprep.mubr.f32.mxu1 %v35053_v24  ;;  %v35058_v62 = vld [vmem:[#allocation37_spill] sm:$0xff] }
 0x52f   :  { %28337 = vmatprep.subr.bf16.mxu1 %v31849_v14 }
 0x531   :  { %25426 = vmatmul.mubr.f32.gmra.mrb[18].mxu1 %v35054_v40 }
 0x532   :  { %28339 = vmatpush3.bf16.msra.mxu1 %v31849_v14  ;;  %25428 = vmatprep.mubr.f32.mxu1 %v35055_v12  ;;  %v35060_v14 = vld [vmem:[#allocation46_spill] sm:$0xff] }
 0x533   :  { %28341 = vmatprep.subr.bf16.mxu1 %v31859_v55 }
 0x535   :  { %25429 = vmatmul.mubr.f32.gmra.mrb[20].mxu1 %v35056_v8 }
 0x536   :  { %28343 = vmatpush3.bf16.msra.mxu1 %v31859_v55  ;;  %25431 = vmatprep.mubr.f32.mxu1 %v35057_v46  ;;  %v35062_v55 = vld [vmem:[#allocation53_spill] sm:$0xff] }
 0x537   :  { %28345 = vmatprep.subr.bf16.mxu1 %v31869_v23 }
 0x539   :  { %25432 = vmatmul.mubr.f32.gmra.mrb[22].mxu1 %v35058_v62 }
 0x53a   :  { %28347 = vmatpush3.bf16.msra.mxu1 %v31869_v23  ;;  %25434 = vmatprep.mubr.f32.mxu1 %v35059_v1  ;;  %v35064_v23 = vld [vmem:[#allocation60_spill] sm:$0xff] }
 0x53b   :  { %28349 = vmatprep.subr.bf16.mxu1 %v31879_v52 }
 0x53d   :  { %25435 = vmatmul.mubr.f32.gmra.mrb[24].mxu1 %v35060_v14 }
 0x53e   :  { %28351 = vmatpush3.bf16.msra.mxu1 %v31879_v52  ;;  %25437 = vmatprep.mubr.f32.mxu1 %v35061_v32  ;;  %v35066_v52 = vld [vmem:[#allocation63_spill] sm:$0xff] }
 0x53f   :  { %28353 = vmatprep.subr.bf16.mxu1 %v31887_v38 }
 0x541   :  { %25438 = vmatmul.mubr.f32.gmra.mrb[26].mxu1 %v35062_v55 }
 0x542   :  { %28355 = vmatpush3.bf16.msra.mxu1 %v31887_v38  ;;  %25440 = vmatprep.mubr.f32.mxu1 %v35063_v56 }
 0x543   :  { %28357 = vmatprep.subr.bf16.mxu1 %v31895_v54 }
 0x545   :  { %25441 = vmatmul.mubr.f32.gmra.mrb[28].mxu1 %v35064_v23 }
 0x546   :  { %28359 = vmatpush3.bf16.msra.mxu1 %v31895_v54  ;;  %25443 = vmatprep.mubr.f32.mxu1 %v35065_v6 }
 0x547   :  { %28361 = vmatprep.subr.bf16.mxu1 %v31902_v41 }
 0x549   :  { %25444 = vmatmul.mubr.f32.gmra.mrb[30].mxu1 %v35066_v52 }
 0x54a   :  { %28363 = vmatpush3.bf16.msra.mxu1 %v31902_v41  ;;  %25478 = vmatprep.mubr.f32.mxu1 %v30965_v9 }
 0x54b   :  { %28365 = vmatprep.subr.bf16.mxu1 %v31831_v31 }
 0x54d   :  { %25479 = vmatmul.mubr.f32.vlgmr.msra.gmra.mrb[16].mxu1 %v30981_v20 }
 0x54e   :  { %28367 = vmatpush3.bf16.msra.mxu1 %v31831_v31  ;;  %25481 = vmatprep.mubr.f32.mxu1 %v30992_v25 }
 0x54f   :  { %28369 = vmatprep.subr.bf16.mxu1 %v31837_v19 }
 0x551   :  { %25482 = vmatmul.mubr.f32.gmra.mrb[18].mxu1 %v30997_v27 }
 0x552   :  { %28371 = vmatpush3.bf16.msra.mxu1 %v31837_v19  ;;  %25484 = vmatprep.mubr.f32.mxu1 %v31016_v30 }
 0x553   :  { %28373 = vmatprep.subr.bf16.mxu1 %v31845_v17 }
 0x555   :  { %25485 = vmatmul.mubr.f32.gmra.mrb[20].mxu1 %v31033_v0 }
 0x556   :  { %28375 = vmatpush3.bf16.msra.mxu1 %v31845_v17  ;;  %25487 = vmatprep.mubr.f32.mxu1 %v35025_v26 }
 0x557   :  { %28377 = vmatprep.subr.bf16.mxu1 %v31855_v22 }
 0x559   :  { %25488 = vmatmul.mubr.f32.gmra.mrb[22].mxu1 %v35026_v53 }
 0x55a   :  { %28379 = vmatpush3.bf16.msra.mxu1 %v31855_v22  ;;  %25490 = vmatprep.mubr.f32.mxu1 %v35027_v61 }
 0x55b   :  { %28381 = vmatprep.subr.bf16.mxu1 %v31865_v11 }
 0x55d   :  { %25491 = vmatmul.mubr.f32.gmra.mrb[24].mxu1 %v35028_v13 }
 0x55e   :  { %28383 = vmatpush3.bf16.msra.mxu1 %v31865_v11  ;;  %25493 = vmatprep.mubr.f32.mxu1 %v35029_v16 }
 0x55f   :  { %28385 = vmatprep.subr.bf16.mxu1 %v31875_v47 }
 0x561   :  { %25494 = vmatmul.mubr.f32.gmra.mrb[26].mxu1 %v35030_v5 }
 0x562   :  { %28387 = vmatpush3.bf16.msra.mxu1 %v31875_v47  ;;  %25496 = vmatprep.mubr.f32.mxu1 %v35031_v18 }
 0x563   :  { %28389 = vmatprep.subr.bf16.mxu1 %v31885_v36 }
 0x565   :  { %25497 = vmatmul.mubr.f32.gmra.mrb[28].mxu1 %v35032_v21 }
 0x566   :  { %28391 = vmatpush3.bf16.msra.mxu1 %v31885_v36  ;;  %25499 = vmatprep.mubr.f32.mxu1 %v35033_v42 }
 0x567   :  { %28393 = vmatprep.subr.bf16.mxu1 %v31893_v51 }
 0x569   :  { %25500 = vmatmul.mubr.f32.gmra.mrb[30].mxu1 %v35034_v37 }
 0x56a   :  { %28395 = vmatpush3.bf16.msra.mxu1 %v31893_v51  ;;  %25534 = vmatprep.mubr.f32.mxu1 %v30965_v9  ;;  %v30541_v9 = vmov 0.0|0.0  }
 0x56b   :  { %28396 = vmatprep.subr.bf16.mxu0 %v30541_v9  ;;  %28540 = vmatprep.subr.bf16.mxu1 %v30541_v9 }
 0x56d   :  { %25535 = vmatmul.mubr.f32.vlgmr.msra.gmra.mrb[16].mxu1 %v30981_v20  ;;  %v30543_v20 = vmov 0.0  }
 0x56e   :  { %25537 = vmatprep.mubr.f32.mxu1 %v30992_v25  ;;  %25590 = vmatprep.mubr.msk.f32.mxu0 %vm30542_vm2, %v30543_v20  ;;  %v32079_v25 = vld [vmem:[%s34773_s6] ss:$0 sm:$0xff] }
 0x571   :  { %25538 = vmatmul.mubr.f32.gmra.mrb[18].mxu1 %v30997_v27  ;;  %v5015_v27 = vld [vmem:[%s34774_s2] sm:$0xff] }
 0x572   :  { %25540 = vmatprep.mubr.f32.mxu1 %v31016_v30  ;;  %v32085_v19 = vand.u32 4294901760, %v5015_v27 }
 0x574   :  { %v32092_v54 = vsub.f32 %v5015_v27, %v32085_v19 }
 0x575   :  { %25541 = vmatmul.mubr.f32.gmra.mrb[20].mxu1 %v31033_v0 }
 0x576   :  { %25543 = vmatprep.mubr.f32.mxu1 %v35025_v26 }
 0x579   :  { %25544 = vmatmul.mubr.f32.gmra.mrb[22].mxu1 %v35026_v53 }
 0x57a   :  { %25546 = vmatprep.mubr.f32.mxu1 %v35027_v61 }
 0x57d   :  { %25547 = vmatmul.mubr.f32.gmra.mrb[24].mxu1 %v35028_v13 }
 0x57e   :  { %25549 = vmatprep.mubr.f32.mxu1 %v35029_v16 }
 0x581   :  { %25550 = vmatmul.mubr.f32.gmra.mrb[26].mxu1 %v35030_v5 }
 0x582   :  { %25552 = vmatprep.mubr.f32.mxu1 %v35031_v18 }
 0x585   :  { %25553 = vmatmul.mubr.f32.gmra.mrb[28].mxu1 %v35032_v21  ;;  %v34889_v21 = vand.u32 4294901760, %v32092_v54 }
 0x586   :  { %25555 = vmatprep.mubr.f32.mxu1 %v35033_v42 }
 0x587   :  { %v32131_v10 = vsub.f32 %v32092_v54, %v34889_v21 }
 0x589   :  { %25556 = vmatmul.mubr.f32.gmra.mrb[30].mxu1 %v35034_v37 }
 0x58a   :  { %25772 = vmatprep.mubr.msk.f32.mxu1 %vm30542_vm2, %v30543_v20 }
 0x640   :  { %v25536_v30 = vpop.f32.mrb[16].mxu1 }
 0x641   :  { %v29606_v0 = vadd.f32 %v25536_v30, %v32079_v25  ;;  %v4921_v31 = vpop.f32.mrb[17].mxu1 }
 0x642   :  { %v29607_v17 = vadd.f32 %v32079_v25, %v4921_v31 }
 0x643   :  { %v5020_v22 = vand.u32 4294901760, %v29606_v0 }
 0x644   :  { %v5017_v11 = vand.u32 4294901760, %v29607_v17  ;;  %v25539_v47 = vpop.f32.mrb[18].mxu1 }
 0x645   :  { %v32088_v36 = vsub.f32 %v29606_v0, %v5020_v22  ;;  %v29608_v38 = vadd.f32 %v25539_v47, %v32079_v25  ;;  %v4933_v51 = vpop.f32.mrb[19].mxu1 }
 0x646   :  { %v32094_v41 = vpack.c.bf16 %v5020_v22, %v5017_v11  ;;  %v32096_v63 = vsub.f32 %v29607_v17, %v5017_v11  ;;  %v29609_v15 = vadd.f32 %v32079_v25, %v4933_v51 }
 0x647   :  { %v5117_v45 = vand.u32 4294901760, %v32088_v36  ;;  %v5026_v28 = vand.u32 4294901760, %v29608_v38 }
 0x648   :  { %v5110_v7 = vand.u32 4294901760, %v32096_v63  ;;  %v28445_v26 = vpack.c.bf16 %v32088_v36, %v32096_v63  ;;  %v5023_v53 = vand.u32 4294901760, %v29609_v15  ;;  %v25542_v61 = vpop.f32.mrb[20].mxu1  ;;  %28398 = vmatpush3.bf16.msra.mxu0 %v32094_v41 }
 0x649   :  { %v5118_v13 = vsub.f32 %v32088_v36, %v5117_v45  ;;  %v32105_v16 = vsub.f32 %v29608_v38, %v5026_v28  ;;  %v29610_v5 = vadd.f32 %v25542_v61, %v32079_v25  ;;  %v4945_v18 = vpop.f32.mrb[21].mxu1  ;;  %28399 = vmatprep.subr.bf16.mxu0 %v30541_v9 }
 0x64a   :  { %v5111_v42 = vsub.f32 %v32096_v63, %v5110_v7  ;;  %v32111_v37 = vpack.c.bf16 %v5026_v28, %v5023_v53  ;;  %v32113_v59 = vsub.f32 %v29609_v15, %v5023_v53  ;;  %v29611_v58 = vadd.f32 %v32079_v25, %v4945_v18 }
 0x64b   :  { %v5119_v39 = vand.u32 4294901760, %v5118_v13  ;;  %v5131_v2 = vand.u32 4294901760, %v32105_v16  ;;  %v5032_v4 = vand.u32 4294901760, %v29610_v5  ;;  %v32117_v57 = vpack.c.bf16 %v5117_v45, %v5110_v7 }
 0x64c   :  { %v5112_v49 = vand.u32 4294901760, %v5111_v42  ;;  %v5124_v35 = vand.u32 4294901760, %v32113_v59  ;;  %v28448_v3 = vpack.c.bf16 %v32105_v16, %v32113_v59  ;;  %v5029_v33 = vand.u32 4294901760, %v29611_v58  ;;  %v25545_v50 = vpop.f32.mrb[22].mxu1  ;;  %28401 = vmatpush3.bf16.msra.mxu0 %v32111_v37 }
 0x64d   :  { %v5132_v48 = vsub.f32 %v32105_v16, %v5131_v2  ;;  %v32124_v29 = vsub.f32 %v29610_v5, %v5032_v4  ;;  %v29612_v44 = vadd.f32 %v25545_v50, %v32079_v25  ;;  %v4957_v60 = vpop.f32.mrb[23].mxu1  ;;  %28402 = vmatprep.subr.bf16.mxu0 %v30541_v9  ;;  %v35069_v16 = vand.u32 4294901760, %v32092_v54 }
 0x64e   :  { %v5125_v43 = vsub.f32 %v32113_v59, %v5124_v35  ;;  %v32134_v34 = vpack.c.bf16 %v5032_v4, %v5029_v33  ;;  %v32136_v24 = vsub.f32 %v29611_v58, %v5029_v33  ;;  %v29613_v40 = vadd.f32 %v32079_v25, %v4957_v60 }
 0x64f   :  { %v5133_v12 = vand.u32 4294901760, %v5132_v48  ;;  %v5145_v8 = vand.u32 4294901760, %v32124_v29  ;;  %v5038_v46 = vand.u32 4294901760, %v29612_v44  ;;  %v32140_v62 = vpack.c.bf16 %v5119_v39, %v5112_v49 }
 0x650   :  { %v5126_v1 = vand.u32 4294901760, %v5125_v43  ;;  %v5138_v14 = vand.u32 4294901760, %v32136_v24  ;;  %v28451_v32 = vpack.c.bf16 %v32124_v29, %v32136_v24  ;;  %v5035_v55 = vand.u32 4294901760, %v29613_v40  ;;  %v25548_v56 = vpop.f32.mrb[24].mxu1  ;;  %28404 = vmatpush3.bf16.msra.mxu0 %v32134_v34 }
 0x651   :  { %v5146_v23 = vsub.f32 %v32124_v29, %v5145_v8  ;;  %v32147_v6 = vsub.f32 %v29612_v44, %v5038_v46  ;;  %v29614_v52 = vadd.f32 %v25548_v56, %v32079_v25  ;;  %v4969_v27 = vpop.f32.mrb[25].mxu1  ;;  %28405 = vmatprep.subr.bf16.mxu0 %v30541_v9  ;;  %v32151_v30 = vpack.c.bf16 %v5131_v2, %v5124_v35 }
 0x652   :  { %v5139_v0 = vsub.f32 %v32136_v24, %v5138_v14  ;;  %v32154_v31 = vpack.c.bf16 %v5038_v46, %v5035_v55  ;;  %v32156_v17 = vsub.f32 %v29613_v40, %v5035_v55  ;;  %v29615_v22 = vadd.f32 %v32079_v25, %v4969_v27  ;;  %v22736_v24 = vld [vmem:[%s34776_s9 + $0x28] sm:$0xff] }
 0x653   :  { %v5147_v11 = vand.u32 4294901760, %v5146_v23  ;;  %v5159_v47 = vand.u32 4294901760, %v32147_v6  ;;  %v5044_v38 = vand.u32 4294901760, %v29614_v52  ;;  %v32160_v51 = vpack.c.bf16 %v5133_v12, %v5126_v1 }
 0x654   :  { %v5140_v15 = vand.u32 4294901760, %v5139_v0  ;;  %v5152_v45 = vand.u32 4294901760, %v32156_v17  ;;  %v28454_v28 = vpack.c.bf16 %v32147_v6, %v32156_v17  ;;  %v5041_v7 = vand.u32 4294901760, %v29615_v22  ;;  %v25551_v53 = vpop.f32.mrb[26].mxu1  ;;  %28407 = vmatpush3.bf16.msra.mxu0 %v32154_v31 }
 0x655   :  { %v5160_v61 = vsub.f32 %v32147_v6, %v5159_v47  ;;  %v32167_v13 = vsub.f32 %v29614_v52, %v5044_v38  ;;  %v29616_v5 = vadd.f32 %v25551_v53, %v32079_v25  ;;  %v4981_v18 = vpop.f32.mrb[27].mxu1  ;;  %28408 = vmatprep.subr.bf16.mxu0 %v30541_v9  ;;  %v32171_v42 = vpack.c.bf16 %v5145_v8, %v5138_v14 }
 0x656   :  { %v5153_v58 = vsub.f32 %v32156_v17, %v5152_v45  ;;  %v32174_v39 = vpack.c.bf16 %v5044_v38, %v5041_v7  ;;  %v32176_v2 = vsub.f32 %v29615_v22, %v5041_v7  ;;  %v29617_v4 = vadd.f32 %v32079_v25, %v4981_v18 }
 0x657   :  { %v5161_v49 = vand.u32 4294901760, %v5160_v61  ;;  %v5173_v35 = vand.u32 4294901760, %v32167_v13  ;;  %v5050_v33 = vand.u32 4294901760, %v29616_v5  ;;  %v32180_v50 = vpack.c.bf16 %v5147_v11, %v5140_v15 }
 0x658   :  { %v5154_v48 = vand.u32 4294901760, %v5153_v58  ;;  %v5166_v44 = vand.u32 4294901760, %v32176_v2  ;;  %v28457_v60 = vpack.c.bf16 %v32167_v13, %v32176_v2  ;;  %v5047_v43 = vand.u32 4294901760, %v29617_v4  ;;  %v25554_v40 = vpop.f32.mrb[28].mxu1  ;;  %28410 = vmatpush3.bf16.msra.mxu0 %v32174_v39 }
 0x659   :  { %v5174_v12 = vsub.f32 %v32167_v13, %v5173_v35  ;;  %v32187_v8 = vsub.f32 %v29616_v5, %v5050_v33  ;;  %v29618_v46 = vadd.f32 %v25554_v40, %v32079_v25  ;;  %v4993_v1 = vpop.f32.mrb[29].mxu1  ;;  %28411 = vmatprep.subr.bf16.mxu0 %v30541_v9  ;;  %v32191_v14 = vpack.c.bf16 %v5159_v47, %v5152_v45 }
 0x65a   :  { %v5167_v55 = vsub.f32 %v32176_v2, %v5166_v44  ;;  %v32194_v56 = vpack.c.bf16 %v5050_v33, %v5047_v43  ;;  %v32196_v23 = vsub.f32 %v29617_v4, %v5047_v43  ;;  %v29619_v52 = vadd.f32 %v32079_v25, %v4993_v1 }
 0x65b   :  { %v5175_v27 = vand.u32 4294901760, %v5174_v12  ;;  %v5187_v0 = vand.u32 4294901760, %v32187_v8  ;;  %v5056_v22 = vand.u32 4294901760, %v29618_v46  ;;  %v28430_v11 = vpack.c.bf16 %v5161_v49, %v5154_v48 }
 0x65c   :  { %v5168_v38 = vand.u32 4294901760, %v5167_v55  ;;  %v5180_v15 = vand.u32 4294901760, %v32196_v23  ;;  %v5053_v45 = vand.u32 4294901760, %v29619_v52  ;;  %v25557_v7 = vpop.f32.mrb[30].mxu1  ;;  %28413 = vmatpush3.bf16.msra.mxu0 %v32194_v56  ;;  %v32211_v58 = vpack.c.bf16 %v5173_v35, %v5166_v44 }
 0x65d   :  { %v5188_v53 = vsub.f32 %v32187_v8, %v5187_v0  ;;  %v32205_v61 = vsub.f32 %v29618_v46, %v5056_v22  ;;  %v32208_v5 = vadd.f32 %v25557_v7, %v32079_v25  ;;  %v5005_v18 = vpop.f32.mrb[31].mxu1  ;;  %28414 = vmatprep.subr.bf16.mxu0 %v30541_v9  ;;  %v35067_v63 = vpack.c.bf16 %v32187_v8, %v32196_v23  ;;  %v22738_v8 = vld [vmem:[%s34776_s9 + $0x38] sm:$0xff] }
 0x65e   :  { %v5181_v4 = vsub.f32 %v32196_v23, %v5180_v15  ;;  %v32214_v49 = vpack.c.bf16 %v5056_v22, %v5053_v45  ;;  %v32216_v33 = vsub.f32 %v29619_v52, %v5053_v45  ;;  %v32219_v48 = vadd.f32 %v32079_v25, %v5005_v18 }
 0x65f   :  { %v5189_v43 = vand.u32 4294901760, %v5188_v53  ;;  %v5201_v40 = vand.u32 4294901760, %v32205_v61  ;;  %v5062_v12 = vand.u32 4294901760, %v32208_v5  ;;  %v28433_v46 = vpack.c.bf16 %v5175_v27, %v5168_v38 }
 0x660   :  { %v5182_v1 = vand.u32 4294901760, %v5181_v4  ;;  %v5194_v55 = vand.u32 4294901760, %v32216_v33  ;;  %v5059_v44 = vand.u32 4294901760, %v32219_v48  ;;  %28416 = vmatpush3.bf16.msra.mxu0 %v32214_v49  ;;  %v32233_v22 = vpack.c.bf16 %v5187_v0, %v5180_v15 }
 0x661   :  { %v5202_v52 = vsub.f32 %v32205_v61, %v5201_v40  ;;  %v32230_v25 = vsub.f32 %v32208_v5, %v5062_v12  ;;  %28417 = vmatprep.subr.bf16.mxu0 %v30541_v9  ;;  %v5101_v4 = vand.u32 4294901760, %v32131_v10  ;;  %v7580_v17 = vand.u32 4294901760, %v22736_v24 }
 0x662   :  { %v5195_v27 = vsub.f32 %v32216_v33, %v5194_v55  ;;  %v32236_v38 = vpack.c.bf16 %v5062_v12, %v5059_v44  ;;  %v5207_v45 = vsub.f32 %v32219_v48, %v5059_v44  ;;  %v28436_v7 = vpack.c.bf16 %v5189_v43, %v5182_v1 }
 0x663   :  { %v5203_v53 = vand.u32 4294901760, %v5202_v52  ;;  %v5215_v18 = vand.u32 4294901760, %v32230_v25  ;;  %v32241_v21 = vpack.c.bf16 %v5201_v40, %v5194_v55  ;;  %v7586_v23 = vand.u32 4294901760, %v22738_v8 }
 0x664   :  { %v5196_v35 = vand.u32 4294901760, %v5195_v27  ;;  %v5208_v47 = vand.u32 4294901760, %v5207_v45  ;;  %28419 = vmatpush3.bf16.msra.mxu0 %v32236_v38  ;;  %v28466_v0 = vpack.c.bf16 %v32230_v25, %v5207_v45 }
 0x665   :  { %v5216_v15 = vsub.f32 %v32230_v25, %v5215_v18  ;;  %28420 = vmatprep.subr.bf16.mxu0 %v30541_v9  ;;  %v32414_v55 = vsub.f32 %v22738_v8, %v7586_v23 }
 0x666   :  { %v5209_v12 = vsub.f32 %v5207_v45, %v5208_v47  ;;  %v28439_v44 = vpack.c.bf16 %v5203_v53, %v5196_v35  ;;  %v32247_v43 = vpack.c.bf16 %v5215_v18, %v5208_v47  ;;  %v22740_v45 = vld [vmem:[%s34776_s9 + $0x48] sm:$0xff] }
 0x667   :  { %25591 = vmatmul.mubr.f32.vlgmr.msra.gmra.mrb[32].mxu0 %v5101_v4  ;;  %v5217_v1 = vand.u32 4294901760, %v5216_v15  ;;  %v7679_v53 = vand.u32 4294901760, %v32414_v55  ;;  %v8065_v4 = vand.u32 4294901760, %v22740_v45  ;;  %v22741_v15 = vld [vmem:[%s34776_s9 + $0x50] sm:$0xff] }
 0x668   :  { %28422 = vmatpush3.bf16.msra.mxu0 %v32140_v62  ;;  %v5210_v10 = vand.u32 4294901760, %v5209_v12  ;;  %25625 = vmatprep.mubr.msk.f32.mxu0 %vm30542_vm2, %v30543_v20  ;;  %v5657_v62 = vld [vmem:[%s34775_s7] sm:$0xff]  ;;  %v22742_v12 = vld [vmem:[%s34776_s9 + $0x58] sm:$0xff] }
 0x669   :  { %28423 = vmatprep.subr.bf16.mxu0 %v30541_v9 }
 0x66a   :  { %v28442_v40 = vpack.c.bf16 %v5217_v1, %v5210_v10  ;;  %v8071_v1 = vand.u32 4294901760, %v22742_v12 }
 0x66c   :  { %28425 = vmatpush3.bf16.msra.mxu0 %v32160_v51  ;;  %v5658_v51 = vld [vmem:[%s34775_s7 + $0x8] sm:$0xff] }
 0x66d   :  { %28426 = vmatprep.subr.bf16.mxu0 %v30541_v9 }
 0x670   :  { %28428 = vmatpush3.bf16.msra.mxu0 %v32180_v50  ;;  %v5671_v50 = vand.u32 4294901760, %v5657_v62 }
 0x671   :  { %28429 = vmatprep.subr.bf16.mxu0 %v30541_v9 }
 0x674   :  { %28431 = vmatpush3.bf16.msra.mxu0 %v28430_v11  ;;  %v5674_v11 = vand.u32 4294901760, %v5658_v51 }
 0x675   :  { %28432 = vmatprep.subr.bf16.mxu0 %v30541_v9 }
 0x676   :  { %v32275_v47 = vpack.c.bf16 %v5674_v11, %v5671_v50  ;;  %v32279_v36 = vsub.f32 %v5658_v51, %v5674_v11 }
 0x678   :  { %28434 = vmatpush3.bf16.msra.mxu0 %v28433_v46  ;;  %v32277_v46 = vsub.f32 %v5657_v62, %v5671_v50  ;;  %28542 = vmatpush3.bf16.msra.mxu1 %v32275_v47 }
 0x679   :  { %28435 = vmatprep.subr.bf16.mxu0 %v30541_v9  ;;  %28543 = vmatprep.subr.bf16.mxu1 %v30541_v9 }
 0x67a   :  { %v28547_v29 = vpack.c.bf16 %v32279_v36, %v32277_v46 }
 0x67c   :  { %28437 = vmatpush3.bf16.msra.mxu0 %v28436_v7 }
 0x67d   :  { %28438 = vmatprep.subr.bf16.mxu0 %v30541_v9 }
 0x680   :  { %28440 = vmatpush3.bf16.msra.mxu0 %v28439_v44 }
 0x681   :  { %28441 = vmatprep.subr.bf16.mxu0 %v30541_v9 }
 0x684   :  { %28443 = vmatpush3.bf16.msra.mxu0 %v28442_v40  ;;  %v32474_v40 = vsub.f32 %v22740_v45, %v8065_v4 }
 0x685   :  { %28444 = vmatprep.subr.bf16.mxu0 %v30541_v9 }
 0x686   :  { %v8150_v50 = vand.u32 4294901760, %v32474_v40 }
 0x687   :  { %25626 = vmatmul.mubr.f32.vlgmr.msra.gmra.mrb[32].mxu0 %v32085_v19 }
 0x688   :  { %28446 = vmatpush3.bf16.msra.mxu0 %v28445_v26  ;;  %25660 = vmatprep.mubr.msk.f32.mxu0 %vm30542_vm2, %v30543_v20  ;;  %v35068_v26 = vpack.c.bf16 %v32205_v61, %v32216_v33 }
 0x689   :  { %28447 = vmatprep.subr.bf16.mxu0 %v30541_v9 }
 0x68c   :  { %28449 = vmatpush3.bf16.msra.mxu0 %v28448_v3 }
 0x68d   :  { %28450 = vmatprep.subr.bf16.mxu0 %v30541_v9 }
 0x690   :  { %28452 = vmatpush3.bf16.msra.mxu0 %v28451_v32 }
 0x691   :  { %28453 = vmatprep.subr.bf16.mxu0 %v30541_v9 }
 0x694   :  { %28455 = vmatpush3.bf16.msra.mxu0 %v28454_v28 }
 0x695   :  { %28456 = vmatprep.subr.bf16.mxu0 %v30541_v9 }
 0x698   :  { %28458 = vmatpush3.bf16.msra.mxu0 %v28457_v60  ;;  %v22737_v60 = vld [vmem:[%s34776_s9 + $0x30] sm:$0xff] }
 0x699   :  { %28459 = vmatprep.subr.bf16.mxu0 %v30541_v9 }
 0x69c   :  { %28461 = vmatpush3.bf16.msra.mxu0 %v35067_v63  ;;  %v8151_v63 = vsub.f32 %v32474_v40, %v8150_v50 }
 0x69d   :  { %28462 = vmatprep.subr.bf16.mxu0 %v30541_v9 }
 0x6a0   :  { %28464 = vmatpush3.bf16.msra.mxu0 %v35068_v26 }
 0x6a1   :  { %28465 = vmatprep.subr.bf16.mxu0 %v30541_v9 }
 0x6a4   :  { %28467 = vmatpush3.bf16.msra.mxu0 %v28466_v0 }
 0x6a5   :  { %28468 = vmatprep.subr.bf16.mxu0 %v30541_v9 }
 0x6a7   :  { %25661 = vmatmul.mubr.f32.vlgmr.msra.gmra.mrb[32].mxu0 %v32092_v54  ;;  %v5750_v54 = vand.u32 4294901760, %v32277_v46 }
 0x6a8   :  { %28470 = vmatpush3.bf16.msra.mxu0 %v32094_v41  ;;  %25695 = vmatprep.mubr.msk.f32.mxu0 %vm30542_vm2, %v30543_v20 }
 0x6a9   :  { %28471 = vmatprep.subr.bf16.mxu0 %v30541_v9 }
 0x6ac   :  { %28473 = vmatpush3.bf16.msra.mxu0 %v32111_v37 }
 0x6ad   :  { %28474 = vmatprep.subr.bf16.mxu0 %v30541_v9 }
 0x6b0   :  { %28476 = vmatpush3.bf16.msra.mxu0 %v32134_v34 }
 0x6b1   :  { %28477 = vmatprep.subr.bf16.mxu0 %v30541_v9 }
 0x6b4   :  { %28479 = vmatpush3.bf16.msra.mxu0 %v32154_v31 }
 0x6b5   :  { %28480 = vmatprep.subr.bf16.mxu0 %v30541_v9 }
 0x6b8   :  { %28482 = vmatpush3.bf16.msra.mxu0 %v32174_v39 }
 0x6b9   :  { %28483 = vmatprep.subr.bf16.mxu0 %v30541_v9 }
 0x6bc   :  { %28485 = vmatpush3.bf16.msra.mxu0 %v32194_v56 }
 0x6bd   :  { %28486 = vmatprep.subr.bf16.mxu0 %v30541_v9 }
 0x6c0   :  { %28488 = vmatpush3.bf16.msra.mxu0 %v32214_v49 }
 0x6c1   :  { %28489 = vmatprep.subr.bf16.mxu0 %v30541_v9 }
 0x6c4   :  { %28491 = vmatpush3.bf16.msra.mxu0 %v32236_v38 }
 0x6c5   :  { %28492 = vmatprep.subr.bf16.mxu0 %v30541_v9 }
 0x6c7   :  { %25696 = vmatmul.mubr.f32.vlgmr.msra.gmra.mrb[32].mxu0 %v35069_v16 }
 0x6c8   :  { %28494 = vmatpush3.bf16.msra.mxu0 %v32117_v57  ;;  %25730 = vmatprep.mubr.msk.f32.mxu0 %vm30542_vm2, %v30543_v20 }
 0x6c9   :  { %28495 = vmatprep.subr.bf16.mxu0 %v30541_v9 }
 0x6cc   :  { %28497 = vmatpush3.bf16.msra.mxu0 %v32151_v30 }
 0x6cd   :  { %28498 = vmatprep.subr.bf16.mxu0 %v30541_v9 }
 0x6d0   :  { %28500 = vmatpush3.bf16.msra.mxu0 %v32171_v42 }
 0x6d1   :  { %28501 = vmatprep.subr.bf16.mxu0 %v30541_v9 }
 0x6d4   :  { %28503 = vmatpush3.bf16.msra.mxu0 %v32191_v14 }
 0x6d5   :  { %28504 = vmatprep.subr.bf16.mxu0 %v30541_v9 }
 0x6d8   :  { %28506 = vmatpush3.bf16.msra.mxu0 %v32211_v58 }
 0x6d9   :  { %28507 = vmatprep.subr.bf16.mxu0 %v30541_v9 }
 0x6dc   :  { %28509 = vmatpush3.bf16.msra.mxu0 %v32233_v22 }
 0x6dd   :  { %28510 = vmatprep.subr.bf16.mxu0 %v30541_v9 }
 0x6e0   :  { %28512 = vmatpush3.bf16.msra.mxu0 %v32241_v21  ;;  %v5751_v21 = vsub.f32 %v32277_v46, %v5750_v54  ;;  %v32486_v46 = vsub.f32 %v22742_v12, %v8071_v1 }
 0x6e1   :  { %28513 = vmatprep.subr.bf16.mxu0 %v30541_v9 }
 0x6e2   :  { %v5752_v59 = vand.u32 4294901760, %v5751_v21  ;;  %v8164_v16 = vand.u32 4294901760, %v32486_v46 }
 0x6e4   :  { %28515 = vmatpush3.bf16.msra.mxu0 %v32247_v43  ;;  %v8068_v43 = vand.u32 4294901760, %v22741_v15 }
 0x6e5   :  { %28516 = vmatprep.subr.bf16.mxu0 %v30541_v9 }
 0x6e6   :  { %v32476_v62 = vpack.c.bf16 %v8071_v1, %v8068_v43  ;;  %v32484_v11 = vsub.f32 %v22741_v15, %v8068_v43 }
 0x6e7   :  { %25731 = vmatmul.mubr.f32.vlgmr.msra.gmra.mrb[32].mxu0 %v32085_v19 }
 0x6e8   :  { %28518 = vmatpush3.bf16.msra.mxu0 %v32094_v41  ;;  %25765 = vmatprep.mubr.msk.f32.mxu0 %vm30542_vm2, %v30543_v20  ;;  %v5757_v41 = vand.u32 4294901760, %v32279_v36  ;;  %v8157_v26 = vand.u32 4294901760, %v32484_v11 }
 0x6e9   :  { %28519 = vmatprep.subr.bf16.mxu0 %v30541_v9 }
 0x6ea   :  { %v8158_v21 = vsub.f32 %v32484_v11, %v8157_v26 }
 0x6ec   :  { %28521 = vmatpush3.bf16.msra.mxu0 %v32111_v37  ;;  %v5758_v37 = vsub.f32 %v32279_v36, %v5757_v41 }
 0x6ed   :  { %28522 = vmatprep.subr.bf16.mxu0 %v30541_v9 }
 0x6ee   :  { %v5759_v57 = vand.u32 4294901760, %v5758_v37  ;;  %v8165_v37 = vsub.f32 %v32486_v46, %v8164_v16 }
 0x6f0   :  { %28524 = vmatpush3.bf16.msra.mxu0 %v32134_v34  ;;  %v28544_v3 = vpack.c.bf16 %v5759_v57, %v5752_v59  ;;  %v32375_v34 = vpack.c.bf16 %v5757_v41, %v5750_v54  ;;  %v8152_v41 = vand.u32 4294901760, %v8151_v63  ;;  %v22727_v59 = vld [vmem:[%s34775_s7 + $0x10] sm:$0xff]  ;;  %v22728_v57 = vld [vmem:[%s34775_s7 + $0x18] sm:$0xff] }
 0x6f1   :  { %28525 = vmatprep.subr.bf16.mxu0 %v30541_v9 }
 0x6f4   :  { %28527 = vmatpush3.bf16.msra.mxu0 %v32154_v31 }
 0x6f5   :  { %28528 = vmatprep.subr.bf16.mxu0 %v30541_v9 }
 0x6f8   :  { %28530 = vmatpush3.bf16.msra.mxu0 %v32174_v39  ;;  %v32390_v39 = vsub.f32 %v22736_v24, %v7580_v17  ;;  %v6141_v24 = vand.u32 4294901760, %v22727_v59 }
 0x6f9   :  { %28531 = vmatprep.subr.bf16.mxu0 %v30541_v9 }
 0x6fa   :  { %v7665_v35 = vand.u32 4294901760, %v32390_v39 }
 0x6fc   :  { %28533 = vmatpush3.bf16.msra.mxu0 %v32194_v56  ;;  %v7583_v56 = vand.u32 4294901760, %v22737_v60  ;;  %v7666_v43 = vsub.f32 %v32390_v39, %v7665_v35 }
 0x6fd   :  { %28534 = vmatprep.subr.bf16.mxu0 %v30541_v9 }
 0x6fe   :  { %v32412_v33 = vsub.f32 %v22737_v60, %v7583_v56  ;;  %v32541_v60 = vpack.c.bf16 %v32486_v46, %v32484_v11 }
 0x700   :  { %28536 = vmatpush3.bf16.msra.mxu0 %v32214_v49  ;;  %v32410_v49 = vpack.c.bf16 %v7586_v23, %v7583_v56  ;;  %v32422_v25 = vpack.c.bf16 %v32414_v55, %v32412_v33  ;;  %v7672_v7 = vand.u32 4294901760, %v32412_v33 }
 0x701   :  { %28537 = vmatprep.subr.bf16.mxu0 %v30541_v9 }
 0x702   :  { %v32452_v0 = vpack.c.bf16 %v7679_v53, %v7672_v7 }
 0x704   :  { %28539 = vmatpush3.bf16.msra.mxu0 %v32236_v38  ;;  %v22739_v38 = vld [vmem:[%s34776_s9 + $0x40] sm:$0xff] }
 0x705   :  { %28642 = vmatprep.subr.bf16.mxu0 %v30541_v9  ;;  %v8062_v18 = vand.u32 4294901760, %v22739_v38 }
 0x707   :  { %25766 = vmatmul.mubr.f32.vlgmr.msra.gmra.mrb[32].mxu0 %v32085_v19  ;;  %v22735_v19 = vld [vmem:[%s34776_s9 + $0x20] sm:$0xff]  ;;  %v32463_v44 = vpack.c.bf16 %v8065_v4, %v8062_v18  ;;  %v32472_v10 = vsub.f32 %v22739_v38, %v8062_v18  ;;  %v32586_v4 = vpack.c.bf16 %v8164_v16, %v8157_v26 }
 0x708   :  { %25990 = vmatprep.mubr.msk.f32.mxu0 %vm30542_vm2, %v30543_v20  ;;  %v7577_v6 = vand.u32 4294901760, %v22735_v19 }
 0x709   :  { %v8143_v51 = vand.u32 4294901760, %v32472_v10 }
 0x70a   :  { %v32386_v13 = vsub.f32 %v22735_v19, %v7577_v6  ;;  %v32388_v42 = vpack.c.bf16 %v7580_v17, %v7577_v6  ;;  %v8166_v19 = vand.u32 4294901760, %v8165_v37 }
 0x70b   :  { %v8144_v36 = vsub.f32 %v32472_v10, %v8143_v51  ;;  %v32572_v45 = vpack.c.bf16 %v8150_v50, %v8143_v51  ;;  %v7680_v51 = vsub.f32 %v32414_v55, %v7679_v53  ;;  %v22732_v55 = vld [vmem:[%s34775_s7 + $0x28] sm:$0xff] }
 0x70c   :  { %v32403_v14 = vpack.c.bf16 %v32390_v39, %v32386_v13  ;;  %v7658_v58 = vand.u32 4294901760, %v32386_v13  ;;  %v6614_v50 = vand.u32 4294901760, %v22732_v55 }
 0x70d   :  { %v8145_v54 = vand.u32 4294901760, %v8144_v36 }
 0x70e   :  { %28644 = vmatpush3.bf16.msra.mxu0 %v32403_v14  ;;  %v32431_v27 = vpack.c.bf16 %v7665_v35, %v7658_v58  ;;  %v7659_v12 = vsub.f32 %v32386_v13, %v7658_v58  ;;  %v7681_v58 = vand.u32 4294901760, %v7680_v51  ;;  %v6696_v46 = vsub.f32 %v22732_v55, %v6614_v50 }
 0x70f   :  { %28645 = vmatprep.subr.bf16.mxu0 %v30541_v9 }
 0x710   :  { %v7660_v1 = vand.u32 4294901760, %v7659_v12  ;;  %v6697_v63 = vand.u32 4294901760, %v6696_v46 }
 0x712   :  { %28647 = vmatpush3.bf16.msra.mxu0 %v32422_v25  ;;  %v6698_v16 = vsub.f32 %v6696_v46, %v6697_v63 }
 0x713   :  { %28654 = vmatprep.subr.bf16.mxu0 %v30541_v9 }
 0x715   :  { %25991 = vmatmul.mubr.f32.vlgmr.msra.gmra.mrb[34].mxu0 %v30543_v20 }
 0x716   :  { %28656 = vmatpush3.bf16.msra.mxu0 %v32431_v27  ;;  %26012 = vmatprep.mubr.msk.f32.mxu0 %vm30542_vm2, %v30543_v20 }
 0x717   :  { %28657 = vmatprep.subr.bf16.mxu0 %v30541_v9 }
 0x71a   :  { %28659 = vmatpush3.bf16.msra.mxu0 %v32452_v0 }
 0x71b   :  { %28666 = vmatprep.subr.bf16.mxu0 %v30541_v9 }
 0x71d   :  { %26013 = vmatmul.mubr.f32.vlgmr.msra.gmra.mrb[36].mxu0 %v30543_v20 }
 0x71e   :  { %28668 = vmatpush3.bf16.msra.mxu0 %v32463_v44  ;;  %26034 = vmatprep.mubr.msk.f32.mxu0 %vm30542_vm2, %v30543_v20 }
 0x71f   :  { %28669 = vmatprep.subr.bf16.mxu0 %v30541_v9 }
 0x722   :  { %28671 = vmatpush3.bf16.msra.mxu0 %v32476_v62 }
 0x723   :  { %28672 = vmatprep.subr.bf16.mxu0 %v30541_v9 }
 0x725   :  { %26035 = vmatmul.mubr.f32.vlgmr.msra.gmra.mrb[38].mxu0 %v30543_v20 }
 0x726   :  { %26045 = vmatprep.mubr.msk.f32.mxu0 %vm30542_vm2, %v30543_v20 }
 0x7da   :  { %v5653_v32 = vpop.f32.mrb[32].mxu0 }
 0x7db   :  { %v5668_v30 = vsel %vm5666_vm3, %v5653_v32, 0  ;;  %v25767_v31 = vpop.f32.mrb[33].mxu0  ;;  %v6144_v32 = vand.u32 4294901760, %v22728_v57 }
 0x7dc   :  { %v32384_v28 = vand.u32 4294901760, %v5668_v30  ;;  %v32531_v31 = vsub.f32 %v22727_v59, %v6141_v24 }
 0x7dd   :  { %v32533_v17 = vsub.f32 %v22728_v57, %v6144_v32  ;;  %v7069_v57 = vld [vmem:[%s34776_s9] sm:$0xff] }
 0x7de   :  { %v32393_v2 = vsub.f32 %v5668_v30, %v32384_v28  ;;  %v32526_v30 = vpack.c.bf16 %v32474_v40, %v32472_v10  ;;  %v7667_v10 = vand.u32 4294901760, %v7666_v43  ;;  %v7673_v40 = vsub.f32 %v32412_v33, %v7672_v7  ;;  %v22731_v33 = vld [vmem:[%s34775_s7 + $0x20] sm:$0xff] }
 0x7df   :  { %v6227_v8 = vand.u32 4294901760, %v32533_v17  ;;  %v28565_v15 = vpack.c.bf16 %v32533_v17, %v32531_v31  ;;  %v6611_v53 = vand.u32 4294901760, %v22731_v33 }
 0x7e0   :  { %v32406_v61 = vand.u32 4294901760, %v32393_v2  ;;  %v32622_v13 = vpack.c.bf16 %v7667_v10, %v7660_v1  ;;  %v7674_v39 = vand.u32 4294901760, %v7673_v40 }
 0x7e1   :  { %v6228_v23 = vsub.f32 %v32533_v17, %v6227_v8  ;;  %v6689_v11 = vsub.f32 %v22731_v33, %v6611_v53 }
 0x7e2   :  { %v5740_v52 = vsub.f32 %v32393_v2, %v32406_v61  ;;  %v32636_v35 = vpack.c.bf16 %v7681_v58, %v7674_v39 }
 0x7e3   :  { %v6229_v38 = vand.u32 4294901760, %v6228_v23  ;;  %v6690_v36 = vand.u32 4294901760, %v6689_v11  ;;  %v28583_v59 = vpack.c.bf16 %v6696_v46, %v6689_v11 }
 0x7e4   :  { %v32424_v22 = vand.u32 4294901760, %v5740_v52 }
 0x7e5   :  { %v6691_v26 = vsub.f32 %v6689_v11, %v6690_v36 }
 0x7e6   :  { %25773 = vmatmul.mubr.f32.vlgmr.msra.gmra.mrb[32].mxu1 %v32424_v22 }
 0x7e7   :  { %28545 = vmatpush3.bf16.msra.mxu1 %v28544_v3  ;;  %25779 = vmatprep.mubr.msk.f32.mxu1 %vm30542_vm2, %v30543_v20  ;;  %v32514_v3 = vpack.c.bf16 %v8152_v41, %v8145_v54  ;;  %v28577_v54 = vpack.c.bf16 %v6614_v50, %v6611_v53  ;;  %v6692_v41 = vand.u32 4294901760, %v6691_v26 }
 0x7e8   :  { %28546 = vmatprep.subr.bf16.mxu1 %v30541_v9  ;;  %v7822_v11 = vpop.f32.mrb[34].mxu0 }
 0x7e9   :  { %28674 = vmatpush3.bf16.msra.mxu0 %v32514_v3  ;;  %v25992_v46 = vpop.f32.mrb[35].mxu0 }
 0x7ea   :  { %28675 = vmatprep.subr.bf16.mxu0 %v30541_v9 }
 0x7ee   :  { %25780 = vmatmul.mubr.f32.vlgmr.msra.gmra.mrb[32].mxu1 %v32384_v28 }
 0x7ef   :  { %28548 = vmatpush3.bf16.msra.mxu1 %v28547_v29  ;;  %25786 = vmatprep.mubr.msk.f32.mxu1 %vm30542_vm2, %v30543_v20  ;;  %v8159_v29 = vand.u32 4294901760, %v8158_v21  ;;  %v6699_v21 = vand.u32 4294901760, %v6698_v16 }
 0x7f0   :  { %28549 = vmatprep.subr.bf16.mxu1 %v30541_v9  ;;  %v7982_v26 = vpop.f32.mrb[36].mxu0 }
 0x7f1   :  { %v32520_v6 = vpack.c.bf16 %v8166_v19, %v8159_v29  ;;  %v28580_v37 = vpack.c.bf16 %v6699_v21, %v6692_v41  ;;  %v7070_v29 = vld [vmem:[%s34776_s9 + $0x8] sm:$0xff]  ;;  %v7092_v19 = vand.u32 4294901760, %v7069_v57  ;;  %v26014_v16 = vpop.f32.mrb[37].mxu0 }
 0x7f3   :  { %28677 = vmatpush3.bf16.msra.mxu0 %v32520_v6 }
 0x7f4   :  { %28678 = vmatprep.subr.bf16.mxu0 %v30541_v9 }
 0x7f6   :  { %25787 = vmatmul.mubr.f32.vlgmr.msra.gmra.mrb[32].mxu1 %v32393_v2  ;;  %26046 = vmatmul.mubr.f32.vlgmr.msra.gmra.mrb[38].mxu0 %v30543_v20 }
 0x7f7   :  { %28551 = vmatpush3.bf16.msra.mxu1 %v32275_v47  ;;  %25793 = vmatprep.mubr.msk.f32.mxu1 %vm30542_vm2, %v30543_v20 }
 0x7f8   :  { %28552 = vmatprep.subr.bf16.mxu1 %v30541_v9  ;;  %28680 = vmatpush3.bf16.msra.mxu0 %v32526_v30 }
 0x7f9   :  { %26056 = vmatprep.mubr.msk.f32.mxu0 %vm30542_vm2, %v30543_v20  ;;  %28681 = vmatprep.subr.bf16.mxu0 %v30541_v9 }
 0x7fc   :  { %28683 = vmatpush3.bf16.msra.mxu0 %v32541_v60 }
 0x7fd   :  { %28684 = vmatprep.subr.bf16.mxu0 %v30541_v9 }
 0x7fe   :  { %25794 = vmatmul.mubr.f32.vlgmr.msra.gmra.mrb[32].mxu1 %v32406_v61 }
 0x7ff   :  { %28554 = vmatpush3.bf16.msra.mxu1 %v32375_v34  ;;  %25800 = vmatprep.mubr.msk.f32.mxu1 %vm30542_vm2, %v30543_v20  ;;  %v6220_v34 = vand.u32 4294901760, %v32531_v31 }
 0x800   :  { %28555 = vmatprep.subr.bf16.mxu1 %v30541_v9  ;;  %26057 = vmatmul.mubr.f32.vlgmr.msra.gmra.mrb[38].mxu0 %v30543_v20 }
 0x801   :  { %v6221_v56 = vsub.f32 %v32531_v31, %v6220_v34  ;;  %28686 = vmatpush3.bf16.msra.mxu0 %v32463_v44  ;;  %26067 = vmatprep.mubr.msk.f32.mxu0 %vm30542_vm2, %v30543_v20  ;;  %v28571_v7 = vpack.c.bf16 %v6227_v8, %v6220_v34  ;;  %v7172_v34 = vsub.f32 %v7069_v57, %v7092_v19 }
 0x802   :  { %28687 = vmatprep.subr.bf16.mxu0 %v30541_v9 }
 0x803   :  { %v6222_v52 = vand.u32 4294901760, %v6221_v56  ;;  %v7173_v8 = vand.u32 4294901760, %v7172_v34 }
 0x805   :  { %28689 = vmatpush3.bf16.msra.mxu0 %v32476_v62  ;;  %v28562_v18 = vpack.c.bf16 %v6229_v38, %v6222_v52  ;;  %v7174_v38 = vsub.f32 %v7172_v34, %v7173_v8 }
 0x806   :  { %25801 = vmatmul.mubr.f32.vlgmr.msra.gmra.mrb[32].mxu1 %v32384_v28  ;;  %28690 = vmatprep.subr.bf16.mxu0 %v30541_v9 }
 0x807   :  { %28557 = vmatpush3.bf16.msra.mxu1 %v32275_v47  ;;  %25807 = vmatprep.mubr.msk.f32.mxu1 %vm30542_vm2, %v30543_v20  ;;  %v32565_v47 = vpack.c.bf16 %v6144_v32, %v6141_v24  ;;  %v7071_v24 = vld [vmem:[%s34776_s9 + $0x10] sm:$0xff]  ;;  %v7072_v32 = vld [vmem:[%s34776_s9 + $0x18] sm:$0xff]  ;;  %v7175_v1 = vand.u32 4294901760, %v7174_v38 }
 0x808   :  { %28558 = vmatprep.subr.bf16.mxu1 %v30541_v9  ;;  %26068 = vmatmul.mubr.f32.vlgmr.msra.gmra.mrb[38].mxu0 %v30543_v20  ;;  %v7098_v31 = vand.u32 4294901760, %v7071_v24  ;;  %v7101_v17 = vand.u32 4294901760, %v7072_v32 }
 0x809   :  { %28692 = vmatpush3.bf16.msra.mxu0 %v32572_v45  ;;  %26078 = vmatprep.mubr.msk.f32.mxu0 %vm30542_vm2, %v30543_v20 }
 0x80a   :  { %28693 = vmatprep.subr.bf16.mxu0 %v30541_v9  ;;  %v7186_v23 = vsub.f32 %v7071_v24, %v7098_v31  ;;  %v32694_v43 = vpack.c.bf16 %v7101_v17, %v7098_v31 }
 0x80d   :  { %28695 = vmatpush3.bf16.msra.mxu0 %v32586_v4 }
 0x80e   :  { %25808 = vmatmul.mubr.f32.vlgmr.msra.gmra.mrb[32].mxu1 %v32384_v28  ;;  %28696 = vmatprep.subr.bf16.mxu0 %v30541_v9 }
 0x80f   :  { %28560 = vmatpush3.bf16.msra.mxu1 %v32565_v47  ;;  %25814 = vmatprep.mubr.msk.f32.mxu1 %vm30542_vm2, %v30543_v20 }
 0x810   :  { %28561 = vmatprep.subr.bf16.mxu1 %v30541_v9  ;;  %26079 = vmatmul.mubr.f32.vlgmr.msra.gmra.mrb[38].mxu0 %v30543_v20 }
 0x811   :  { %28698 = vmatpush3.bf16.msra.mxu0 %v32463_v44  ;;  %26089 = vmatprep.mubr.msk.f32.mxu0 %vm30542_vm2, %v30543_v20 }
 0x812   :  { %25815 = vmatmul.mubr.f32.vlgmr.msra.gmra.mrb[34].mxu1 %v32424_v22  ;;  %28699 = vmatprep.subr.bf16.mxu0 %v30541_v9 }
 0x813   :  { %28563 = vmatpush3.bf16.msra.mxu1 %v28562_v18  ;;  %25821 = vmatprep.mubr.msk.f32.mxu1 %vm30542_vm2, %v30543_v20 }
 0x814   :  { %28564 = vmatprep.subr.bf16.mxu1 %v30541_v9 }
 0x815   :  { %28701 = vmatpush3.bf16.msra.mxu0 %v32476_v62 }
 0x816   :  { %28738 = vmatprep.subr.bf16.mxu0 %v30541_v9 }
 0x818   :  { %26090 = vmatmul.mubr.f32.vlgmr.msra.gmra.mrb[38].mxu0 %v30543_v20 }
 0x819   :  { %28740 = vmatpush3.bf16.msra.mxu0 %v32388_v42  ;;  %26166 = vmatprep.mubr.msk.f32.mxu0 %vm30542_vm2, %v30543_v20 }
 0x81a   :  { %25822 = vmatmul.mubr.f32.vlgmr.msra.gmra.mrb[34].mxu1 %v32384_v28  ;;  %28741 = vmatprep.subr.bf16.mxu0 %v30541_v9 }
 0x81b   :  { %28566 = vmatpush3.bf16.msra.mxu1 %v28565_v15  ;;  %25828 = vmatprep.mubr.msk.f32.mxu1 %vm30542_vm2, %v30543_v20  ;;  %v7187_v15 = vand.u32 4294901760, %v7186_v23 }
 0x81c   :  { %28567 = vmatprep.subr.bf16.mxu1 %v30541_v9 }
 0x81d   :  { %28743 = vmatpush3.bf16.msra.mxu0 %v32410_v49  ;;  %v7188_v40 = vsub.f32 %v7186_v23, %v7187_v15 }
 0x81e   :  { %28744 = vmatprep.subr.bf16.mxu0 %v30541_v9 }
 0x81f   :  { %v7189_v58 = vand.u32 4294901760, %v7188_v40 }
 0x822   :  { %25829 = vmatmul.mubr.f32.vlgmr.msra.gmra.mrb[34].mxu1 %v32393_v2 }
 0x823   :  { %28569 = vmatpush3.bf16.msra.mxu1 %v32565_v47  ;;  %25835 = vmatprep.mubr.msk.f32.mxu1 %vm30542_vm2, %v30543_v20 }
 0x824   :  { %28570 = vmatprep.subr.bf16.mxu1 %v30541_v9 }
 0x82a   :  { %25836 = vmatmul.mubr.f32.vlgmr.msra.gmra.mrb[34].mxu1 %v32406_v61 }
 0x82b   :  { %28572 = vmatpush3.bf16.msra.mxu1 %v28571_v7  ;;  %25842 = vmatprep.mubr.msk.f32.mxu1 %vm30542_vm2, %v30543_v20 }
 0x82c   :  { %28573 = vmatprep.subr.bf16.mxu1 %v30541_v9 }
 0x832   :  { %25843 = vmatmul.mubr.f32.vlgmr.msra.gmra.mrb[34].mxu1 %v32384_v28 }
 0x833   :  { %28575 = vmatpush3.bf16.msra.mxu1 %v32565_v47  ;;  %25849 = vmatprep.mubr.msk.f32.mxu1 %vm30542_vm2, %v30543_v20  ;;  %v7193_v47 = vsub.f32 %v7072_v32, %v7101_v17 }
 0x834   :  { %28576 = vmatprep.subr.bf16.mxu1 %v30541_v9 }
 0x835   :  { %v7194_v12 = vand.u32 4294901760, %v7193_v47  ;;  %v32718_v7 = vpack.c.bf16 %v7193_v47, %v7186_v23 }
 0x837   :  { %v7195_v51 = vsub.f32 %v7193_v47, %v7194_v12  ;;  %v32736_v50 = vpack.c.bf16 %v7194_v12, %v7187_v15  ;;  %v22726_v15 = vld [vmem:[%s34778_s8] ss:$0 sm:$0xff] }
 0x839   :  { %v7196_v33 = vand.u32 4294901760, %v7195_v51 }
 0x83a   :  { %25850 = vmatmul.mubr.f32.vlgmr.msra.gmra.mrb[34].mxu1 %v32384_v28 }
 0x83b   :  { %28578 = vmatpush3.bf16.msra.mxu1 %v28577_v54  ;;  %25856 = vmatprep.mubr.msk.f32.mxu1 %vm30542_vm2, %v30543_v20 }
 0x83c   :  { %28579 = vmatprep.subr.bf16.mxu1 %v30541_v9 }
 0x83e   :  { %25857 = vmatmul.mubr.f32.vlgmr.msra.gmra.mrb[36].mxu1 %v32424_v22  ;;  %v28589_v22 = vpack.c.bf16 %v6697_v63, %v6690_v36 }
 0x83f   :  { %28581 = vmatpush3.bf16.msra.mxu1 %v28580_v37  ;;  %25863 = vmatprep.mubr.msk.f32.mxu1 %vm30542_vm2, %v30543_v20 }
 0x840   :  { %28582 = vmatprep.subr.bf16.mxu1 %v30541_v9 }
 0x846   :  { %25864 = vmatmul.mubr.f32.vlgmr.msra.gmra.mrb[36].mxu1 %v32384_v28 }
 0x847   :  { %28584 = vmatpush3.bf16.msra.mxu1 %v28583_v59  ;;  %25870 = vmatprep.mubr.msk.f32.mxu1 %vm30542_vm2, %v30543_v20 }
 0x848   :  { %28585 = vmatprep.subr.bf16.mxu1 %v30541_v9 }
 0x84e   :  { %25871 = vmatmul.mubr.f32.vlgmr.msra.gmra.mrb[36].mxu1 %v32393_v2  ;;  %v7095_v2 = vand.u32 4294901760, %v7070_v29 }
 0x84f   :  { %28587 = vmatpush3.bf16.msra.mxu1 %v28577_v54  ;;  %25877 = vmatprep.mubr.msk.f32.mxu1 %vm30542_vm2, %v30543_v20 }
 0x850   :  { %28588 = vmatprep.subr.bf16.mxu1 %v30541_v9  ;;  %v32692_v52 = vpack.c.bf16 %v7095_v2, %v7092_v19  ;;  %v32788_v19 = vld [vmem:[%s34777_s10] sm:$0x1] }
 0x856   :  { %25878 = vmatmul.mubr.f32.vlgmr.msra.gmra.mrb[36].mxu1 %v32406_v61  ;;  %v7179_v61 = vsub.f32 %v7070_v29, %v7095_v2 }
 0x857   :  { %28590 = vmatpush3.bf16.msra.mxu1 %v28589_v22  ;;  %25884 = vmatprep.mubr.msk.f32.mxu1 %vm30542_vm2, %v30543_v20 }
 0x858   :  { %28591 = vmatprep.subr.bf16.mxu1 %v30541_v9  ;;  %v7180_v56 = vand.u32 4294901760, %v7179_v61  ;;  %v32713_v55 = vpack.c.bf16 %v7179_v61, %v7172_v34 }
 0x85a   :  { %v7181_v18 = vsub.f32 %v7179_v61, %v7180_v56  ;;  %v32731_v53 = vpack.c.bf16 %v7180_v56, %v7173_v8 }
 0x85c   :  { %v7182_v10 = vand.u32 4294901760, %v7181_v18 }
 0x85e   :  { %25885 = vmatmul.mubr.f32.vlgmr.msra.gmra.mrb[36].mxu1 %v32384_v28  ;;  %v32702_v39 = vpack.c.bf16 %v7182_v10, %v7175_v1 }
 0x85f   :  { %28593 = vmatpush3.bf16.msra.mxu1 %v28577_v54  ;;  %25891 = vmatprep.mubr.msk.f32.mxu1 %vm30542_vm2, %v30543_v20 }
 0x860   :  { %28594 = vmatprep.subr.bf16.mxu1 %v30541_v9 }
 0x866   :  { %25892 = vmatmul.mubr.f32.vlgmr.msra.gmra.mrb[36].mxu1 %v32384_v28  ;;  %v32707_v28 = vpack.c.bf16 %v7196_v33, %v7189_v58 }
 0x867   :  { %28596 = vmatpush3.bf16.msra.mxu1 %v32692_v52  ;;  %25902 = vmatprep.mubr.msk.f32.mxu1 %vm30542_vm2, %v30543_v20 }
 0x868   :  { %28597 = vmatprep.subr.bf16.mxu1 %v30541_v9 }
 0x86b   :  { %28599 = vmatpush3.bf16.msra.mxu1 %v32694_v43 }
 0x86c   :  { %28600 = vmatprep.subr.bf16.mxu1 %v30541_v9 }
 0x86e   :  { %25903 = vmatmul.mubr.f32.vlgmr.msra.gmra.mrb[38].mxu1 %v30543_v20 }
 0x86f   :  { %28602 = vmatpush3.bf16.msra.mxu1 %v32702_v39  ;;  %25913 = vmatprep.mubr.msk.f32.mxu1 %vm30542_vm2, %v30543_v20 }
 0x870   :  { %28603 = vmatprep.subr.bf16.mxu1 %v30541_v9 }
 0x873   :  { %28605 = vmatpush3.bf16.msra.mxu1 %v32707_v28 }
 0x874   :  { %28606 = vmatprep.subr.bf16.mxu1 %v30541_v9 }
 0x876   :  { %25914 = vmatmul.mubr.f32.vlgmr.msra.gmra.mrb[40].mxu1 %v30543_v20 }
 0x877   :  { %28608 = vmatpush3.bf16.msra.mxu1 %v32713_v55  ;;  %25924 = vmatprep.mubr.msk.f32.mxu1 %vm30542_vm2, %v30543_v20 }
 0x878   :  { %28609 = vmatprep.subr.bf16.mxu1 %v30541_v9 }
 0x87b   :  { %28611 = vmatpush3.bf16.msra.mxu1 %v32718_v7 }
 0x87c   :  { %28612 = vmatprep.subr.bf16.mxu1 %v30541_v9 }
 0x87e   :  { %25925 = vmatmul.mubr.f32.vlgmr.msra.gmra.mrb[42].mxu1 %v30543_v20 }
 0x87f   :  { %28614 = vmatpush3.bf16.msra.mxu1 %v32692_v52  ;;  %25935 = vmatprep.mubr.msk.f32.mxu1 %vm30542_vm2, %v30543_v20 }
 0x880   :  { %28615 = vmatprep.subr.bf16.mxu1 %v30541_v9 }
 0x883   :  { %28617 = vmatpush3.bf16.msra.mxu1 %v32694_v43 }
 0x884   :  { %28618 = vmatprep.subr.bf16.mxu1 %v30541_v9 }
 0x886   :  { %25936 = vmatmul.mubr.f32.vlgmr.msra.gmra.mrb[44].mxu1 %v30543_v20 }
 0x887   :  { %28620 = vmatpush3.bf16.msra.mxu1 %v32731_v53  ;;  %25946 = vmatprep.mubr.msk.f32.mxu1 %vm30542_vm2, %v30543_v20 }
 0x888   :  { %28621 = vmatprep.subr.bf16.mxu1 %v30541_v9 }
 0x88b   :  { %28623 = vmatpush3.bf16.msra.mxu1 %v32736_v50 }
 0x88c   :  { %28624 = vmatprep.subr.bf16.mxu1 %v30541_v9 }
 0x88e   :  { %25947 = vmatmul.mubr.f32.vlgmr.msra.gmra.mrb[46].mxu1 %v30543_v20 }
 0x88f   :  { %28626 = vmatpush3.bf16.msra.mxu1 %v32692_v52  ;;  %25957 = vmatprep.mubr.msk.f32.mxu1 %vm30542_vm2, %v30543_v20 }
 0x890   :  { %28627 = vmatprep.subr.bf16.mxu1 %v30541_v9 }
 0x893   :  { %28629 = vmatpush3.bf16.msra.mxu1 %v32694_v43 }
 0x894   :  { %28630 = vmatprep.subr.bf16.mxu1 %v30541_v9 }
 0x896   :  { %25958 = vmatmul.mubr.f32.vlgmr.msra.gmra.mrb[48].mxu1 %v30543_v20 }
 0x897   :  { %28632 = vmatpush3.bf16.msra.mxu1 %v32388_v42  ;;  %25968 = vmatprep.mubr.msk.f32.mxu1 %vm30542_vm2, %v30543_v20 }
 0x898   :  { %28633 = vmatprep.subr.bf16.mxu1 %v30541_v9 }
 0x89b   :  { %28635 = vmatpush3.bf16.msra.mxu1 %v32410_v49 }
 0x89c   :  { %28636 = vmatprep.subr.bf16.mxu1 %v30541_v9 }
 0x89e   :  { %25969 = vmatmul.mubr.f32.vlgmr.msra.gmra.mrb[50].mxu1 %v30543_v20 }
 0x89f   :  { %28638 = vmatpush3.bf16.msra.mxu1 %v32622_v13  ;;  %25979 = vmatprep.mubr.msk.f32.mxu1 %vm30542_vm2, %v30543_v20 }
 0x8a0   :  { %28639 = vmatprep.subr.bf16.mxu1 %v30541_v9 }
 0x8a3   :  { %28641 = vmatpush3.bf16.msra.mxu1 %v32636_v35 }
 0x8a4   :  { %28648 = vmatprep.subr.bf16.mxu1 %v30541_v9 }
 0x8a6   :  { %25980 = vmatmul.mubr.f32.vlgmr.msra.gmra.mrb[52].mxu1 %v30543_v20 }
 0x8a7   :  { %28650 = vmatpush3.bf16.msra.mxu1 %v32388_v42  ;;  %26001 = vmatprep.mubr.msk.f32.mxu1 %vm30542_vm2, %v30543_v20 }
 0x8a8   :  { %28651 = vmatprep.subr.bf16.mxu1 %v30541_v9 }
 0x8ab   :  { %28653 = vmatpush3.bf16.msra.mxu1 %v32410_v49 }
 0x8ac   :  { %28660 = vmatprep.subr.bf16.mxu1 %v30541_v9 }
 0x8ae   :  { %26002 = vmatmul.mubr.f32.vlgmr.msra.gmra.mrb[54].mxu1 %v30543_v20 }
 0x8af   :  { %28662 = vmatpush3.bf16.msra.mxu1 %v32388_v42  ;;  %26023 = vmatprep.mubr.msk.f32.mxu1 %vm30542_vm2, %v30543_v20 }
 0x8b0   :  { %28663 = vmatprep.subr.bf16.mxu1 %v30541_v9 }
 0x8b3   :  { %28665 = vmatpush3.bf16.msra.mxu1 %v32410_v49 }
 0x8b4   :  { %28702 = vmatprep.subr.bf16.mxu1 %v30541_v9 }
 0x8b6   :  { %26024 = vmatmul.mubr.f32.vlgmr.msra.gmra.mrb[56].mxu1 %v30543_v20 }
 0x8b7   :  { %28704 = vmatpush3.bf16.msra.mxu1 %v32692_v52  ;;  %26100 = vmatprep.mubr.msk.f32.mxu1 %vm30542_vm2, %v30543_v20 }
 0x8b8   :  { %28705 = vmatprep.subr.bf16.mxu1 %v30541_v9 }
 0x8bb   :  { %28707 = vmatpush3.bf16.msra.mxu1 %v32694_v43 }
 0x8bc   :  { %28708 = vmatprep.subr.bf16.mxu1 %v30541_v9 }
 0x8e1   :  { %v6125_v36 = vpop.f32.mrb[32].mxu1 }
 0x8e2   :  { %v25809_v63 = vpop.f32.mrb[33].mxu1  ;;  %v32794_v1 = vadd.f32 %v22726_v15, %v6125_v36 }
 0x8e3   :  { %v32800_v63 = vld [vmem:[%s34777_s10 + $0x1] sm:$0x1] }
 0x8eb   :  { %v8542_v54 = vpop.f32.mrb[38].mxu0 }
 0x8ec   :  { %v26091_v41 = vpop.f32.mrb[39].mxu0 }
 0x90d   :  { %v6595_v21 = vpop.f32.mrb[34].mxu1 }
 0x90e   :  { %v25851_v37 = vpop.f32.mrb[35].mxu1 }
 0x939   :  { %v7065_v59 = vpop.f32.mrb[36].mxu1 }
 0x93a   :  { %v25893_v22 = vpop.f32.mrb[37].mxu1 }
 0x941   :  { %v7166_v57 = vpop.f32.mrb[38].mxu1 }
 0x942   :  { %v25904_v29 = vpop.f32.mrb[39].mxu1  ;;  %v7167_v2 = vadd.f32 %v7166_v57, %v32788_v19 }
 0x949   :  { %v7257_v24 = vpop.f32.mrb[40].mxu1 }
 0x94a   :  { %v7258_v32 = vadd.f32 %v7257_v24, %v7167_v2  ;;  %v25915_v31 = vpop.f32.mrb[41].mxu1 }
 0x94b   :  { %v32806_v31 = vld [vmem:[%s34777_s10 + $0x2] sm:$0x1] }
 0x951   :  { %v7337_v17 = vpop.f32.mrb[42].mxu1 }
 0x952   :  { %v7338_v34 = vadd.f32 %v7337_v17, %v7258_v32  ;;  %v25926_v61 = vpop.f32.mrb[43].mxu1 }
 0x959   :  { %v7414_v8 = vpop.f32.mrb[44].mxu1 }
 0x95a   :  { %v7415_v56 = vadd.f32 %v7414_v8, %v7338_v34  ;;  %v25937_v23 = vpop.f32.mrb[45].mxu1  ;;  %v29625_v34 = vadd.f32 %v32806_v31, %v8542_v54  ;;  %v22730_v8 = vld [vmem:[%s34778_s8 + $0x1] ss:$0 sm:$0xff] }
 0x961   :  { %v7497_v47 = vpop.f32.mrb[46].mxu1 }
 0x962   :  { %v7498_v38 = vadd.f32 %v7497_v47, %v7415_v56  ;;  %v25948_v18 = vpop.f32.mrb[47].mxu1 }
 0x969   :  { %v7572_v12 = vpop.f32.mrb[48].mxu1 }
 0x96a   :  { %v7573_v10 = vadd.f32 %v7572_v12, %v7498_v38  ;;  %v25959_v40 = vpop.f32.mrb[49].mxu1 }
 0x96c   :  { %v8546_v51 = vadd.f32 %v32794_v1, %v7573_v10 }
 0x96e   :  { %v22745_v58 = vmul.f32 -1.442695, %v8546_v51 }
 0x970   :  { %30455 = vpow2.f32 %v22745_v58 }
 0x971   :  { %v7651_v33 = vpop.f32.mrb[50].mxu1 }
 0x972   :  { %v25970_v46 = vpop.f32.mrb[51].mxu1  ;;  %v7652_v16 = vadd.f32 %v32800_v63, %v7651_v33 }
 0x979   :  { %v7742_v41 = vpop.f32.mrb[52].mxu1 }
 0x97a   :  { %v30456_v37 = vpop.eup %30455  ;;  %v7743_v22 = vadd.f32 %v7742_v41, %v7652_v16  ;;  %v25981_v36 = vpop.f32.mrb[53].mxu1 }
 0x97b   :  { %v8550_v57 = vadd.f32 1.0, %v30456_v37 }
 0x97c   :  { %v7823_v29 = vadd.f32 %v7822_v11, %v7743_v22  ;;  %v32812_v11 = vadd.f32 %v22730_v8, %v6595_v21 }
 0x97d   :  { %30457 = vrcp.f32 %v8550_v57 }
 0x981   :  { %v7899_v2 = vpop.f32.mrb[54].mxu1 }
 0x982   :  { %v7900_v24 = vadd.f32 %v7899_v2, %v7823_v29  ;;  %v26003_v32 = vpop.f32.mrb[55].mxu1 }
 0x984   :  { %v7983_v17 = vadd.f32 %v7982_v26, %v7900_v24  ;;  %v22734_v26 = vld [vmem:[%s34778_s8 + $0x2] ss:$0 sm:$0xff] }
 0x985   :  { %v32818_v54 = vadd.f32 %v22734_v26, %v7065_v59 }
 0x987   :  { %v30458_v61 = vpop.eup %30457 }
 0x988   :  { %v8560_v56 = vmul.f32 %v30458_v61, %v29625_v34 }
 0x989   :  { %v8057_v23 = vpop.f32.mrb[56].mxu1 }
 0x98a   :  { %v8058_v47 = vadd.f32 %v8057_v23, %v7983_v17  ;;  %v26025_v38 = vpop.f32.mrb[57].mxu1  ;;  %v8561_v10 = vadd.f32 %v32818_v54, %v8560_v56 }
 0x98c   :  { %v8553_v18 = vadd.f32 %v32812_v11, %v8058_v47 }
 0x98e   :  { %v22746_v15 = vmul.f32 -1.442695, %v8553_v18 }
 0x990   :  { %30459 = vpow2.f32 %v22746_v15 }
 0x99a   :  { %v30460_v12 = vpop.eup %30459 }
 0x99b   :  { %v8557_v40 = vadd.f32 1.0, %v30460_v12 }
 0x99d   :  { %30461 = vrcp.f32 %v8557_v40 }
 0x99e   :  { %30463 = vtanh.f32 %v8561_v10 }
 0x9a7   :  { %v30462_v21 = vpop.eup %30461 }
 0x9a8   :  { %v8563_v51 = vsub.f32 1.0, %v30462_v21  ;;  %v30464_v58 = vpop.eup %30463  ;;  %v8565_v46 = vmul.f32 0.0, %v30462_v21 }
 0x9aa   :  { %v8564_v33 = vmul.f32 %v30464_v58, %v8563_v51 }
 0x9ac   :  { %v32821_v16 = vadd.f32 %v8565_v46, %v8564_v33 }
 0x9ae   :  { %v8568_v41 = vsel %vm2543_vm1, %v32821_v16, 0  ;;  %v10053_v26 = vrot.slane %v32821_v16, 7 }
 0x9af   :  { %v32825_v37 = vand.u32 4294901760, %v8568_v41 }
 0x9b1   :  { %v32828_v59 = vsub.f32 %v8568_v41, %v32825_v37 }
 0x9b3   :  { %v32831_v22 = vand.u32 4294901760, %v32828_v59 }
 0x9b5   :  { %v8642_v36 = vsub.f32 %v32828_v59, %v32831_v22 }
 0x9b7   :  { %v32835_v57 = vand.u32 4294901760, %v8642_v36 }
 0x9b9   :  { %26101 = vmatmul.mubr.f32.vlgmr.msra.gmra.mrb[58].mxu1 %v32835_v57  ;;  %26167 = vmatmul.mubr.f32.vlgmr.msra.gmra.mrb[40].mxu0 %v32835_v57 }
 0x9ba   :  { %28710 = vmatpush3.bf16.msra.mxu1 %v32702_v39  ;;  %28746 = vmatpush3.bf16.msra.mxu0 %v32622_v13 }
 0x9bb   :  { %28711 = vmatprep.subr.bf16.mxu1 %v30541_v9  ;;  %28747 = vmatprep.subr.bf16.mxu0 %v30541_v9 }
 0x9bc   :  { %26111 = vmatprep.mubr.msk.f32.mxu1 %vm30542_vm2, %v30543_v20  ;;  %26177 = vmatprep.mubr.msk.f32.mxu0 %vm30542_vm2, %v30543_v20 }
 0x9be   :  { %28713 = vmatpush3.bf16.msra.mxu1 %v32707_v28  ;;  %28749 = vmatpush3.bf16.msra.mxu0 %v32636_v35 }
 0x9bf   :  { %28714 = vmatprep.subr.bf16.mxu1 %v30541_v9  ;;  %28750 = vmatprep.subr.bf16.mxu0 %v30541_v9 }
 0x9c1   :  { %26112 = vmatmul.mubr.f32.vlgmr.msra.gmra.mrb[58].mxu1 %v32825_v37  ;;  %26178 = vmatmul.mubr.f32.vlgmr.msra.gmra.mrb[40].mxu0 %v32825_v37 }
 0x9c2   :  { %28716 = vmatpush3.bf16.msra.mxu1 %v32713_v55  ;;  %28752 = vmatpush3.bf16.msra.mxu0 %v32403_v14 }
 0x9c3   :  { %28717 = vmatprep.subr.bf16.mxu1 %v30541_v9  ;;  %28753 = vmatprep.subr.bf16.mxu0 %v30541_v9 }
 0x9c4   :  { %26122 = vmatprep.mubr.msk.f32.mxu1 %vm30542_vm2, %v30543_v20  ;;  %26188 = vmatprep.mubr.msk.f32.mxu0 %vm30542_vm2, %v30543_v20 }
 0x9c6   :  { %28719 = vmatpush3.bf16.msra.mxu1 %v32718_v7  ;;  %28755 = vmatpush3.bf16.msra.mxu0 %v32422_v25 }
 0x9c7   :  { %28720 = vmatprep.subr.bf16.mxu1 %v30541_v9  ;;  %28756 = vmatprep.subr.bf16.mxu0 %v30541_v9 }
 0x9c9   :  { %26123 = vmatmul.mubr.f32.vlgmr.msra.gmra.mrb[58].mxu1 %v32828_v59  ;;  %26189 = vmatmul.mubr.f32.vlgmr.msra.gmra.mrb[40].mxu0 %v32828_v59 }
 0x9ca   :  { %28722 = vmatpush3.bf16.msra.mxu1 %v32692_v52  ;;  %28758 = vmatpush3.bf16.msra.mxu0 %v32388_v42 }
 0x9cb   :  { %28723 = vmatprep.subr.bf16.mxu1 %v30541_v9  ;;  %28759 = vmatprep.subr.bf16.mxu0 %v30541_v9 }
 0x9cc   :  { %26133 = vmatprep.mubr.msk.f32.mxu1 %vm30542_vm2, %v30543_v20  ;;  %26199 = vmatprep.mubr.msk.f32.mxu0 %vm30542_vm2, %v30543_v20 }
 0x9ce   :  { %28725 = vmatpush3.bf16.msra.mxu1 %v32694_v43  ;;  %28761 = vmatpush3.bf16.msra.mxu0 %v32410_v49 }
 0x9cf   :  { %28726 = vmatprep.subr.bf16.mxu1 %v30541_v9  ;;  %28762 = vmatprep.subr.bf16.mxu0 %v30541_v9 }
 0x9d1   :  { %26134 = vmatmul.mubr.f32.vlgmr.msra.gmra.mrb[58].mxu1 %v32831_v22  ;;  %26200 = vmatmul.mubr.f32.vlgmr.msra.gmra.mrb[40].mxu0 %v32831_v22 }
 0x9d2   :  { %28728 = vmatpush3.bf16.msra.mxu1 %v32731_v53  ;;  %28764 = vmatpush3.bf16.msra.mxu0 %v32431_v27 }
 0x9d3   :  { %28729 = vmatprep.subr.bf16.mxu1 %v30541_v9  ;;  %28765 = vmatprep.subr.bf16.mxu0 %v30541_v9 }
 0x9d4   :  { %26144 = vmatprep.mubr.msk.f32.mxu1 %vm30542_vm2, %v30543_v20  ;;  %26210 = vmatprep.mubr.msk.f32.mxu0 %vm30542_vm2, %v30543_v20 }
 0x9d6   :  { %28731 = vmatpush3.bf16.msra.mxu1 %v32736_v50  ;;  %28767 = vmatpush3.bf16.msra.mxu0 %v32452_v0 }
 0x9d7   :  { %28732 = vmatprep.subr.bf16.mxu1 %v30541_v9  ;;  %28768 = vmatprep.subr.bf16.mxu0 %v30541_v9 }
 0x9d9   :  { %26145 = vmatmul.mubr.f32.vlgmr.msra.gmra.mrb[58].mxu1 %v32825_v37  ;;  %26211 = vmatmul.mubr.f32.vlgmr.msra.gmra.mrb[40].mxu0 %v32825_v37 }
 0x9da   :  { %28734 = vmatpush3.bf16.msra.mxu1 %v32692_v52  ;;  %28770 = vmatpush3.bf16.msra.mxu0 %v32388_v42 }
 0x9db   :  { %28735 = vmatprep.subr.bf16.mxu1 %v30541_v9  ;;  %28771 = vmatprep.subr.bf16.mxu0 %v30541_v9 }
 0x9dc   :  { %26155 = vmatprep.mubr.msk.f32.mxu1 %vm30542_vm2, %v30543_v20  ;;  %26221 = vmatprep.mubr.msk.f32.mxu0 %vm30542_vm2, %v30543_v20 }
 0x9de   :  { %28737 = vmatpush3.bf16.msra.mxu1 %v32694_v43  ;;  %28773 = vmatpush3.bf16.msra.mxu0 %v32410_v49 }
 0x9df   :  { %28774 = vmatprep.subr.bf16.mxu1 %v30541_v9  ;;  %28810 = vmatprep.subr.bf16.mxu0 %v30541_v9 }
 0x9e1   :  { %26156 = vmatmul.mubr.f32.vlgmr.msra.gmra.mrb[58].mxu1 %v32825_v37  ;;  %26222 = vmatmul.mubr.f32.vlgmr.msra.gmra.mrb[40].mxu0 %v32825_v37 }
 0x9e2   :  { %28776 = vmatpush3.bf16.msra.mxu1 %v32463_v44  ;;  %26232 = vmatprep.mubr.msk.f32.mxu1 %vm30542_vm2, %v30543_v20 }
 0x9e3   :  { %28777 = vmatprep.subr.bf16.mxu1 %v30541_v9  ;;  %28812 = vmatpush3.bf16.msra.mxu0 %v32692_v52 }
 0x9e4   :  { %28813 = vmatprep.subr.bf16.mxu0 %v30541_v9  ;;  %26298 = vmatprep.mubr.msk.f32.mxu0 %vm30542_vm2, %v30543_v20 }
 0x9e6   :  { %28779 = vmatpush3.bf16.msra.mxu1 %v32476_v62 }
 0x9e7   :  { %28780 = vmatprep.subr.bf16.mxu1 %v30541_v9  ;;  %28815 = vmatpush3.bf16.msra.mxu0 %v32694_v43 }
 0x9e8   :  { %28816 = vmatprep.subr.bf16.mxu0 %v30541_v9 }
 0x9e9   :  { %26233 = vmatmul.mubr.f32.vlgmr.msra.gmra.mrb[60].mxu1 %v32835_v57 }
 0x9ea   :  { %28782 = vmatpush3.bf16.msra.mxu1 %v32514_v3  ;;  %26243 = vmatprep.mubr.msk.f32.mxu1 %vm30542_vm2, %v30543_v20 }
 0x9eb   :  { %28783 = vmatprep.subr.bf16.mxu1 %v30541_v9 }
 0x9ee   :  { %28785 = vmatpush3.bf16.msra.mxu1 %v32520_v6 }
 0x9ef   :  { %28786 = vmatprep.subr.bf16.mxu1 %v30541_v9 }
 0x9f1   :  { %26244 = vmatmul.mubr.f32.vlgmr.msra.gmra.mrb[60].mxu1 %v32825_v37 }
 0x9f2   :  { %28788 = vmatpush3.bf16.msra.mxu1 %v32526_v30  ;;  %26254 = vmatprep.mubr.msk.f32.mxu1 %vm30542_vm2, %v30543_v20 }
 0x9f3   :  { %28789 = vmatprep.subr.bf16.mxu1 %v30541_v9 }
 0x9f6   :  { %28791 = vmatpush3.bf16.msra.mxu1 %v32541_v60 }
 0x9f7   :  { %28792 = vmatprep.subr.bf16.mxu1 %v30541_v9 }
 0x9f9   :  { %26255 = vmatmul.mubr.f32.vlgmr.msra.gmra.mrb[60].mxu1 %v32828_v59 }
 0x9fa   :  { %28794 = vmatpush3.bf16.msra.mxu1 %v32463_v44  ;;  %26265 = vmatprep.mubr.msk.f32.mxu1 %vm30542_vm2, %v30543_v20 }
 0x9fb   :  { %28795 = vmatprep.subr.bf16.mxu1 %v30541_v9 }
 0x9fe   :  { %28797 = vmatpush3.bf16.msra.mxu1 %v32476_v62 }
 0x9ff   :  { %28798 = vmatprep.subr.bf16.mxu1 %v30541_v9 }
 0xa01   :  { %26266 = vmatmul.mubr.f32.vlgmr.msra.gmra.mrb[60].mxu1 %v32831_v22 }
 0xa02   :  { %28800 = vmatpush3.bf16.msra.mxu1 %v32572_v45  ;;  %26276 = vmatprep.mubr.msk.f32.mxu1 %vm30542_vm2, %v30543_v20 }
 0xa03   :  { %28801 = vmatprep.subr.bf16.mxu1 %v30541_v9 }
 0xa06   :  { %28803 = vmatpush3.bf16.msra.mxu1 %v32586_v4 }
 0xa07   :  { %28804 = vmatprep.subr.bf16.mxu1 %v30541_v9 }
 0xa09   :  { %26277 = vmatmul.mubr.f32.vlgmr.msra.gmra.mrb[60].mxu1 %v32825_v37 }
 0xa0a   :  { %28806 = vmatpush3.bf16.msra.mxu1 %v32463_v44  ;;  %26287 = vmatprep.mubr.msk.f32.mxu1 %vm30542_vm2, %v30543_v20 }
 0xa0b   :  { %28807 = vmatprep.subr.bf16.mxu1 %v30541_v9 }
 0xa0e   :  { %28809 = vmatpush3.bf16.msra.mxu1 %v32476_v62 }
 0xa0f   :  { %28846 = vmatprep.subr.bf16.mxu1 %v30541_v9 }
 0xa11   :  { %26288 = vmatmul.mubr.f32.vlgmr.msra.gmra.mrb[60].mxu1 %v32825_v37 }
 0xa12   :  { %28848 = vmatpush3.bf16.msra.mxu1 %v32388_v42  ;;  %26364 = vmatprep.mubr.msk.f32.mxu1 %vm30542_vm2, %v30543_v20 }
 0xa13   :  { %28849 = vmatprep.subr.bf16.mxu1 %v30541_v9 }
 0xa16   :  { %28851 = vmatpush3.bf16.msra.mxu1 %v32410_v49 }
 0xa17   :  { %28852 = vmatprep.subr.bf16.mxu1 %v30541_v9 }
 0xab4   :  { %v9051_v29 = vpop.f32.mrb[58].mxu1  ;;  %v9536_v2 = vpop.f32.mrb[40].mxu0 }
 0xab5   :  { %v29627_v24 = vadd.f32 %v32800_v63, %v9536_v2  ;;  %v26157_v32 = vpop.f32.mrb[59].mxu1  ;;  %v26223_v17 = vpop.f32.mrb[41].mxu0  ;;  %v29626_v56 = vadd.f32 %v9051_v29, %v32788_v19 }
 0xab7   :  { %v10036_v34 = vrot.slane %v29627_v24, 7  ;;  %v10026_v23 = vrot.slane %v29626_v56, 7 }
 0xab9   :  { %v10038_v61 = vadd.f32 %v32812_v11, %v10036_v34  ;;  %v10028_v47 = vadd.f32 %v32794_v1, %v10026_v23 }
 0xabb   :  { %v22748_v8 = vmul.f32 -1.442695, %v10038_v61  ;;  %v22747_v18 = vmul.f32 -1.442695, %v10028_v47 }
 0xabd   :  { %30465 = vpow2.f32 %v22748_v8 }
 0xac7   :  { %v30466_v38 = vpop.eup %30465 }
 0xac8   :  { %v10042_v15 = vadd.f32 1.0, %v30466_v38 }
 0xaca   :  { %30467 = vrcp.f32 %v10042_v15 }
 0xacb   :  { %30469 = vpow2.f32 %v22747_v18 }
 0xad4   :  { %v30468_v12 = vpop.eup %30467 }
 0xad5   :  { %v10055_v10 = vmul.f32 %v30468_v12, %v10053_v26  ;;  %v30470_v40 = vpop.eup %30469  ;;  %v10051_v22 = vsub.f32 1.0, %v30468_v12 }
 0xad6   :  { %v10032_v21 = vadd.f32 1.0, %v30470_v40 }
 0xad8   :  { %30471 = vrcp.f32 %v10032_v21 }
 0xae2   :  { %v30472_v41 = vpop.eup %30471 }
 0xae4   :  { %v10021_v51 = vpop.f32.mrb[60].mxu1 }
 0xae5   :  { %v29628_v58 = vadd.f32 %v32806_v31, %v10021_v51  ;;  %v26289_v33 = vpop.f32.mrb[61].mxu1 }
 0xae7   :  { %v10046_v46 = vrot.slane %v29628_v58, 7 }
 0xae9   :  { %v10048_v37 = vmul.f32 %v30472_v41, %v10046_v46 }
 0xaeb   :  { %v10049_v59 = vadd.f32 %v32818_v54, %v10048_v37 }
 0xaed   :  { %30473 = vtanh.f32 %v10049_v59 }
 0xaf7   :  { %v30474_v36 = vpop.eup %30473 }
 0xaf8   :  { %v10052_v57 = vmul.f32 %v30474_v36, %v10051_v22 }
 0xafa   :  { %v32970_v29 = vadd.f32 %v10055_v10, %v10052_v57 }
 0xafc   :  { %v10058_v16 = vrot.slane %v32970_v29, 1  ;;  %v11544_v33 = vrot.slane %v32970_v29, 7 }
 0xafe   :  { %v10059_v2 = vsel %vm2543_vm1, %v10058_v16, 0 }
 0xaff   :  { %v32974_v24 = vand.u32 4294901760, %v10059_v2 }
 0xb01   :  { %v32977_v32 = vsub.f32 %v10059_v2, %v32974_v24 }
 0xb03   :  { %v32980_v17 = vand.u32 4294901760, %v32977_v32 }
 0xb05   :  { %v10133_v34 = vsub.f32 %v32977_v32, %v32980_v17 }
 0xb07   :  { %v32984_v61 = vand.u32 4294901760, %v10133_v34 }
 0xb09   :  { %26299 = vmatmul.mubr.f32.vlgmr.msra.gmra.mrb[42].mxu0 %v32984_v61  ;;  %26365 = vmatmul.mubr.f32.vlgmr.msra.gmra.mrb[62].mxu1 %v32984_v61 }
 0xb0a   :  { %28818 = vmatpush3.bf16.msra.mxu0 %v32702_v39  ;;  %28854 = vmatpush3.bf16.msra.mxu1 %v32622_v13 }
 0xb0b   :  { %28819 = vmatprep.subr.bf16.mxu0 %v30541_v9  ;;  %28855 = vmatprep.subr.bf16.mxu1 %v30541_v9 }
 0xb0c   :  { %26309 = vmatprep.mubr.msk.f32.mxu0 %vm30542_vm2, %v30543_v20  ;;  %26375 = vmatprep.mubr.msk.f32.mxu1 %vm30542_vm2, %v30543_v20 }
 0xb0e   :  { %28821 = vmatpush3.bf16.msra.mxu0 %v32707_v28  ;;  %28857 = vmatpush3.bf16.msra.mxu1 %v32636_v35 }
 0xb0f   :  { %28822 = vmatprep.subr.bf16.mxu0 %v30541_v9  ;;  %28858 = vmatprep.subr.bf16.mxu1 %v30541_v9 }
 0xb11   :  { %26310 = vmatmul.mubr.f32.vlgmr.msra.gmra.mrb[42].mxu0 %v32974_v24  ;;  %26376 = vmatmul.mubr.f32.vlgmr.msra.gmra.mrb[62].mxu1 %v32974_v24 }
 0xb12   :  { %28824 = vmatpush3.bf16.msra.mxu0 %v32713_v55  ;;  %28860 = vmatpush3.bf16.msra.mxu1 %v32403_v14 }
 0xb13   :  { %28825 = vmatprep.subr.bf16.mxu0 %v30541_v9  ;;  %28861 = vmatprep.subr.bf16.mxu1 %v30541_v9 }
 0xb14   :  { %26320 = vmatprep.mubr.msk.f32.mxu0 %vm30542_vm2, %v30543_v20  ;;  %26386 = vmatprep.mubr.msk.f32.mxu1 %vm30542_vm2, %v30543_v20 }
 0xb16   :  { %28827 = vmatpush3.bf16.msra.mxu0 %v32718_v7  ;;  %28863 = vmatpush3.bf16.msra.mxu1 %v32422_v25 }
 0xb17   :  { %28828 = vmatprep.subr.bf16.mxu0 %v30541_v9  ;;  %28864 = vmatprep.subr.bf16.mxu1 %v30541_v9 }
 0xb19   :  { %26321 = vmatmul.mubr.f32.vlgmr.msra.gmra.mrb[42].mxu0 %v32977_v32  ;;  %26387 = vmatmul.mubr.f32.vlgmr.msra.gmra.mrb[62].mxu1 %v32977_v32 }
 0xb1a   :  { %28830 = vmatpush3.bf16.msra.mxu0 %v32692_v52  ;;  %28866 = vmatpush3.bf16.msra.mxu1 %v32388_v42 }
 0xb1b   :  { %28831 = vmatprep.subr.bf16.mxu0 %v30541_v9  ;;  %28867 = vmatprep.subr.bf16.mxu1 %v30541_v9 }
 0xb1c   :  { %26331 = vmatprep.mubr.msk.f32.mxu0 %vm30542_vm2, %v30543_v20  ;;  %26397 = vmatprep.mubr.msk.f32.mxu1 %vm30542_vm2, %v30543_v20 }
 0xb1e   :  { %28833 = vmatpush3.bf16.msra.mxu0 %v32694_v43  ;;  %28869 = vmatpush3.bf16.msra.mxu1 %v32410_v49 }
 0xb1f   :  { %28834 = vmatprep.subr.bf16.mxu0 %v30541_v9  ;;  %28870 = vmatprep.subr.bf16.mxu1 %v30541_v9 }
 0xb21   :  { %26332 = vmatmul.mubr.f32.vlgmr.msra.gmra.mrb[42].mxu0 %v32980_v17  ;;  %26398 = vmatmul.mubr.f32.vlgmr.msra.gmra.mrb[62].mxu1 %v32980_v17 }
 0xb22   :  { %28836 = vmatpush3.bf16.msra.mxu0 %v32731_v53  ;;  %28872 = vmatpush3.bf16.msra.mxu1 %v32431_v27 }
 0xb23   :  { %28837 = vmatprep.subr.bf16.mxu0 %v30541_v9  ;;  %28873 = vmatprep.subr.bf16.mxu1 %v30541_v9 }
 0xb24   :  { %26342 = vmatprep.mubr.msk.f32.mxu0 %vm30542_vm2, %v30543_v20  ;;  %26408 = vmatprep.mubr.msk.f32.mxu1 %vm30542_vm2, %v30543_v20 }
 0xb26   :  { %28839 = vmatpush3.bf16.msra.mxu0 %v32736_v50  ;;  %28875 = vmatpush3.bf16.msra.mxu1 %v32452_v0 }
 0xb27   :  { %28840 = vmatprep.subr.bf16.mxu0 %v30541_v9  ;;  %28876 = vmatprep.subr.bf16.mxu1 %v30541_v9 }
 0xb29   :  { %26343 = vmatmul.mubr.f32.vlgmr.msra.gmra.mrb[42].mxu0 %v32974_v24  ;;  %26409 = vmatmul.mubr.f32.vlgmr.msra.gmra.mrb[62].mxu1 %v32974_v24 }
 0xb2a   :  { %28842 = vmatpush3.bf16.msra.mxu0 %v32692_v52  ;;  %28878 = vmatpush3.bf16.msra.mxu1 %v32388_v42 }
 0xb2b   :  { %28843 = vmatprep.subr.bf16.mxu0 %v30541_v9  ;;  %28879 = vmatprep.subr.bf16.mxu1 %v30541_v9 }
 0xb2c   :  { %26353 = vmatprep.mubr.msk.f32.mxu0 %vm30542_vm2, %v30543_v20  ;;  %26419 = vmatprep.mubr.msk.f32.mxu1 %vm30542_vm2, %v30543_v20 }
 0xb2e   :  { %28845 = vmatpush3.bf16.msra.mxu0 %v32694_v43  ;;  %28881 = vmatpush3.bf16.msra.mxu1 %v32410_v49 }
 0xb2f   :  { %28882 = vmatprep.subr.bf16.mxu0 %v30541_v9  ;;  %28918 = vmatprep.subr.bf16.mxu1 %v30541_v9 }
 0xb31   :  { %26354 = vmatmul.mubr.f32.vlgmr.msra.gmra.mrb[42].mxu0 %v32974_v24  ;;  %26420 = vmatmul.mubr.f32.vlgmr.msra.gmra.mrb[62].mxu1 %v32974_v24 }
 0xb32   :  { %28884 = vmatpush3.bf16.msra.mxu0 %v32463_v44  ;;  %26430 = vmatprep.mubr.msk.f32.mxu0 %vm30542_vm2, %v30543_v20 }
 0xb33   :  { %28885 = vmatprep.subr.bf16.mxu0 %v30541_v9  ;;  %28920 = vmatpush3.bf16.msra.mxu1 %v32692_v52 }
 0xb34   :  { %28921 = vmatprep.subr.bf16.mxu1 %v30541_v9  ;;  %26496 = vmatprep.mubr.msk.f32.mxu1 %vm30542_vm2, %v30543_v20 }
 0xb36   :  { %28887 = vmatpush3.bf16.msra.mxu0 %v32476_v62 }
 0xb37   :  { %28888 = vmatprep.subr.bf16.mxu0 %v30541_v9  ;;  %28923 = vmatpush3.bf16.msra.mxu1 %v32694_v43 }
 0xb38   :  { %28924 = vmatprep.subr.bf16.mxu1 %v30541_v9 }
 0xb39   :  { %26431 = vmatmul.mubr.f32.vlgmr.msra.gmra.mrb[44].mxu0 %v32984_v61 }
 0xb3a   :  { %28890 = vmatpush3.bf16.msra.mxu0 %v32514_v3  ;;  %26441 = vmatprep.mubr.msk.f32.mxu0 %vm30542_vm2, %v30543_v20 }
 0xb3b   :  { %28891 = vmatprep.subr.bf16.mxu0 %v30541_v9 }
 0xb3e   :  { %28893 = vmatpush3.bf16.msra.mxu0 %v32520_v6 }
 0xb3f   :  { %28894 = vmatprep.subr.bf16.mxu0 %v30541_v9 }
 0xb41   :  { %26442 = vmatmul.mubr.f32.vlgmr.msra.gmra.mrb[44].mxu0 %v32974_v24 }
 0xb42   :  { %28896 = vmatpush3.bf16.msra.mxu0 %v32526_v30  ;;  %26452 = vmatprep.mubr.msk.f32.mxu0 %vm30542_vm2, %v30543_v20 }
 0xb43   :  { %28897 = vmatprep.subr.bf16.mxu0 %v30541_v9 }
 0xb46   :  { %28899 = vmatpush3.bf16.msra.mxu0 %v32541_v60 }
 0xb47   :  { %28900 = vmatprep.subr.bf16.mxu0 %v30541_v9 }
 0xb49   :  { %26453 = vmatmul.mubr.f32.vlgmr.msra.gmra.mrb[44].mxu0 %v32977_v32 }
 0xb4a   :  { %28902 = vmatpush3.bf16.msra.mxu0 %v32463_v44  ;;  %26463 = vmatprep.mubr.msk.f32.mxu0 %vm30542_vm2, %v30543_v20 }
 0xb4b   :  { %28903 = vmatprep.subr.bf16.mxu0 %v30541_v9 }
 0xb4e   :  { %28905 = vmatpush3.bf16.msra.mxu0 %v32476_v62 }
 0xb4f   :  { %28906 = vmatprep.subr.bf16.mxu0 %v30541_v9 }
 0xb51   :  { %26464 = vmatmul.mubr.f32.vlgmr.msra.gmra.mrb[44].mxu0 %v32980_v17 }
 0xb52   :  { %28908 = vmatpush3.bf16.msra.mxu0 %v32572_v45  ;;  %26474 = vmatprep.mubr.msk.f32.mxu0 %vm30542_vm2, %v30543_v20 }
 0xb53   :  { %28909 = vmatprep.subr.bf16.mxu0 %v30541_v9 }
 0xb56   :  { %28911 = vmatpush3.bf16.msra.mxu0 %v32586_v4 }
 0xb57   :  { %28912 = vmatprep.subr.bf16.mxu0 %v30541_v9 }
 0xb59   :  { %26475 = vmatmul.mubr.f32.vlgmr.msra.gmra.mrb[44].mxu0 %v32974_v24 }
 0xb5a   :  { %28914 = vmatpush3.bf16.msra.mxu0 %v32463_v44  ;;  %26485 = vmatprep.mubr.msk.f32.mxu0 %vm30542_vm2, %v30543_v20 }
 0xb5b   :  { %28915 = vmatprep.subr.bf16.mxu0 %v30541_v9 }
 0xb5e   :  { %28917 = vmatpush3.bf16.msra.mxu0 %v32476_v62 }
 0xb5f   :  { %28954 = vmatprep.subr.bf16.mxu0 %v30541_v9 }
 0xb61   :  { %26486 = vmatmul.mubr.f32.vlgmr.msra.gmra.mrb[44].mxu0 %v32974_v24 }
 0xb62   :  { %28956 = vmatpush3.bf16.msra.mxu0 %v32388_v42  ;;  %26562 = vmatprep.mubr.msk.f32.mxu0 %vm30542_vm2, %v30543_v20 }
 0xb63   :  { %28957 = vmatprep.subr.bf16.mxu0 %v30541_v9 }
 0xb66   :  { %28959 = vmatpush3.bf16.msra.mxu0 %v32410_v49 }
 0xb67   :  { %28960 = vmatprep.subr.bf16.mxu0 %v30541_v9 }
 0xc04   :  { %v10542_v8 = vpop.f32.mrb[42].mxu0  ;;  %v11027_v56 = vpop.f32.mrb[62].mxu1 }
 0xc05   :  { %v29630_v23 = vadd.f32 %v32800_v63, %v11027_v56  ;;  %v26355_v47 = vpop.f32.mrb[43].mxu0  ;;  %v26421_v38 = vpop.f32.mrb[63].mxu1  ;;  %v29629_v12 = vadd.f32 %v10542_v8, %v32788_v19 }
 0xc07   :  { %v11527_v18 = vrot.slane %v29630_v23, 6  ;;  %v11517_v10 = vrot.slane %v29629_v12, 6 }
 0xc09   :  { %v11529_v15 = vadd.f32 %v32812_v11, %v11527_v18  ;;  %v11519_v40 = vadd.f32 %v32794_v1, %v11517_v10 }
 0xc0b   :  { %v22750_v26 = vmul.f32 -1.442695, %v11529_v15  ;;  %v22749_v51 = vmul.f32 -1.442695, %v11519_v40 }
 0xc0d   :  { %30475 = vpow2.f32 %v22750_v26 }
 0xc17   :  { %v30476_v21 = vpop.eup %30475 }
 0xc18   :  { %v11533_v58 = vadd.f32 1.0, %v30476_v21 }
 0xc1a   :  { %30477 = vrcp.f32 %v11533_v58 }
 0xc1b   :  { %30479 = vpow2.f32 %v22749_v51 }
 0xc24   :  { %v30478_v46 = vpop.eup %30477 }
 0xc25   :  { %v11546_v41 = vmul.f32 %v30478_v46, %v11544_v33  ;;  %v30480_v37 = vpop.eup %30479  ;;  %v11542_v17 = vsub.f32 1.0, %v30478_v46 }
 0xc26   :  { %v11523_v59 = vadd.f32 1.0, %v30480_v37 }
 0xc28   :  { %30481 = vrcp.f32 %v11523_v59 }
 0xc32   :  { %v30482_v2 = vpop.eup %30481 }
 0xc34   :  { %v11512_v22 = vpop.f32.mrb[44].mxu0 }
 0xc35   :  { %v29631_v36 = vadd.f32 %v32806_v31, %v11512_v22  ;;  %v26487_v57 = vpop.f32.mrb[45].mxu0 }
 0xc37   :  { %v11537_v16 = vrot.slane %v29631_v36, 6 }
 0xc39   :  { %v11539_v24 = vmul.f32 %v30482_v2, %v11537_v16 }
 0xc3b   :  { %v11540_v32 = vadd.f32 %v32818_v54, %v11539_v24 }
 0xc3d   :  { %30483 = vtanh.f32 %v11540_v32 }
 0xc47   :  { %v30484_v34 = vpop.eup %30483 }
 0xc48   :  { %v11543_v61 = vmul.f32 %v30484_v34, %v11542_v17 }
 0xc4a   :  { %v33119_v8 = vadd.f32 %v11546_v41, %v11543_v61 }
 0xc4c   :  { %v11549_v29 = vrot.slane %v33119_v8, 2  ;;  %v13035_v57 = vrot.slane %v33119_v8, 7 }
 0xc4e   :  { %v11550_v56 = vsel %vm2543_vm1, %v11549_v29, 0 }
 0xc4f   :  { %v33123_v23 = vand.u32 4294901760, %v11550_v56 }
 0xc51   :  { %v33126_v47 = vsub.f32 %v11550_v56, %v33123_v23 }
 0xc53   :  { %v33129_v38 = vand.u32 4294901760, %v33126_v47 }
 0xc55   :  { %v11624_v18 = vsub.f32 %v33126_v47, %v33129_v38 }
 0xc57   :  { %v33133_v15 = vand.u32 4294901760, %v11624_v18 }
 0xc59   :  { %26497 = vmatmul.mubr.f32.vlgmr.msra.gmra.mrb[64].mxu1 %v33133_v15  ;;  %26563 = vmatmul.mubr.f32.vlgmr.msra.gmra.mrb[46].mxu0 %v33133_v15 }
 0xc5a   :  { %28926 = vmatpush3.bf16.msra.mxu1 %v32702_v39  ;;  %28962 = vmatpush3.bf16.msra.mxu0 %v32622_v13 }
 0xc5b   :  { %28927 = vmatprep.subr.bf16.mxu1 %v30541_v9  ;;  %28963 = vmatprep.subr.bf16.mxu0 %v30541_v9 }
 0xc5c   :  { %26507 = vmatprep.mubr.msk.f32.mxu1 %vm30542_vm2, %v30543_v20  ;;  %26573 = vmatprep.mubr.msk.f32.mxu0 %vm30542_vm2, %v30543_v20 }
 0xc5e   :  { %28929 = vmatpush3.bf16.msra.mxu1 %v32707_v28  ;;  %28965 = vmatpush3.bf16.msra.mxu0 %v32636_v35 }
 0xc5f   :  { %28930 = vmatprep.subr.bf16.mxu1 %v30541_v9  ;;  %28966 = vmatprep.subr.bf16.mxu0 %v30541_v9 }
 0xc61   :  { %26508 = vmatmul.mubr.f32.vlgmr.msra.gmra.mrb[64].mxu1 %v33123_v23  ;;  %26574 = vmatmul.mubr.f32.vlgmr.msra.gmra.mrb[46].mxu0 %v33123_v23 }
 0xc62   :  { %28932 = vmatpush3.bf16.msra.mxu1 %v32713_v55  ;;  %28968 = vmatpush3.bf16.msra.mxu0 %v32403_v14 }
 0xc63   :  { %28933 = vmatprep.subr.bf16.mxu1 %v30541_v9  ;;  %28969 = vmatprep.subr.bf16.mxu0 %v30541_v9 }
 0xc64   :  { %26518 = vmatprep.mubr.msk.f32.mxu1 %vm30542_vm2, %v30543_v20  ;;  %26584 = vmatprep.mubr.msk.f32.mxu0 %vm30542_vm2, %v30543_v20 }
 0xc66   :  { %28935 = vmatpush3.bf16.msra.mxu1 %v32718_v7  ;;  %28971 = vmatpush3.bf16.msra.mxu0 %v32422_v25 }
 0xc67   :  { %28936 = vmatprep.subr.bf16.mxu1 %v30541_v9  ;;  %28972 = vmatprep.subr.bf16.mxu0 %v30541_v9 }
 0xc69   :  { %26519 = vmatmul.mubr.f32.vlgmr.msra.gmra.mrb[64].mxu1 %v33126_v47  ;;  %26585 = vmatmul.mubr.f32.vlgmr.msra.gmra.mrb[46].mxu0 %v33126_v47 }
 0xc6a   :  { %28938 = vmatpush3.bf16.msra.mxu1 %v32692_v52  ;;  %28974 = vmatpush3.bf16.msra.mxu0 %v32388_v42 }
 0xc6b   :  { %28939 = vmatprep.subr.bf16.mxu1 %v30541_v9  ;;  %28975 = vmatprep.subr.bf16.mxu0 %v30541_v9 }
 0xc6c   :  { %26529 = vmatprep.mubr.msk.f32.mxu1 %vm30542_vm2, %v30543_v20  ;;  %26595 = vmatprep.mubr.msk.f32.mxu0 %vm30542_vm2, %v30543_v20 }
 0xc6e   :  { %28941 = vmatpush3.bf16.msra.mxu1 %v32694_v43  ;;  %28977 = vmatpush3.bf16.msra.mxu0 %v32410_v49 }
 0xc6f   :  { %28942 = vmatprep.subr.bf16.mxu1 %v30541_v9  ;;  %28978 = vmatprep.subr.bf16.mxu0 %v30541_v9 }
 0xc71   :  { %26530 = vmatmul.mubr.f32.vlgmr.msra.gmra.mrb[64].mxu1 %v33129_v38  ;;  %26596 = vmatmul.mubr.f32.vlgmr.msra.gmra.mrb[46].mxu0 %v33129_v38 }
 0xc72   :  { %28944 = vmatpush3.bf16.msra.mxu1 %v32731_v53  ;;  %28980 = vmatpush3.bf16.msra.mxu0 %v32431_v27 }
 0xc73   :  { %28945 = vmatprep.subr.bf16.mxu1 %v30541_v9  ;;  %28981 = vmatprep.subr.bf16.mxu0 %v30541_v9 }
 0xc74   :  { %26540 = vmatprep.mubr.msk.f32.mxu1 %vm30542_vm2, %v30543_v20  ;;  %26606 = vmatprep.mubr.msk.f32.mxu0 %vm30542_vm2, %v30543_v20 }
 0xc76   :  { %28947 = vmatpush3.bf16.msra.mxu1 %v32736_v50  ;;  %28983 = vmatpush3.bf16.msra.mxu0 %v32452_v0 }
 0xc77   :  { %28948 = vmatprep.subr.bf16.mxu1 %v30541_v9  ;;  %28984 = vmatprep.subr.bf16.mxu0 %v30541_v9 }
 0xc79   :  { %26541 = vmatmul.mubr.f32.vlgmr.msra.gmra.mrb[64].mxu1 %v33123_v23  ;;  %26607 = vmatmul.mubr.f32.vlgmr.msra.gmra.mrb[46].mxu0 %v33123_v23 }
 0xc7a   :  { %28950 = vmatpush3.bf16.msra.mxu1 %v32692_v52  ;;  %28986 = vmatpush3.bf16.msra.mxu0 %v32388_v42 }
 0xc7b   :  { %28951 = vmatprep.subr.bf16.mxu1 %v30541_v9  ;;  %28987 = vmatprep.subr.bf16.mxu0 %v30541_v9 }
 0xc7c   :  { %26551 = vmatprep.mubr.msk.f32.mxu1 %vm30542_vm2, %v30543_v20  ;;  %26617 = vmatprep.mubr.msk.f32.mxu0 %vm30542_vm2, %v30543_v20 }
 0xc7e   :  { %28953 = vmatpush3.bf16.msra.mxu1 %v32694_v43  ;;  %28989 = vmatpush3.bf16.msra.mxu0 %v32410_v49 }
 0xc7f   :  { %28990 = vmatprep.subr.bf16.mxu1 %v30541_v9  ;;  %29026 = vmatprep.subr.bf16.mxu0 %v30541_v9 }
 0xc81   :  { %26552 = vmatmul.mubr.f32.vlgmr.msra.gmra.mrb[64].mxu1 %v33123_v23  ;;  %26618 = vmatmul.mubr.f32.vlgmr.msra.gmra.mrb[46].mxu0 %v33123_v23 }
 0xc82   :  { %28992 = vmatpush3.bf16.msra.mxu1 %v32463_v44  ;;  %26628 = vmatprep.mubr.msk.f32.mxu1 %vm30542_vm2, %v30543_v20 }
 0xc83   :  { %28993 = vmatprep.subr.bf16.mxu1 %v30541_v9  ;;  %29028 = vmatpush3.bf16.msra.mxu0 %v32692_v52 }
 0xc84   :  { %29029 = vmatprep.subr.bf16.mxu0 %v30541_v9  ;;  %26694 = vmatprep.mubr.msk.f32.mxu0 %vm30542_vm2, %v30543_v20 }
 0xc86   :  { %28995 = vmatpush3.bf16.msra.mxu1 %v32476_v62 }
 0xc87   :  { %28996 = vmatprep.subr.bf16.mxu1 %v30541_v9  ;;  %29031 = vmatpush3.bf16.msra.mxu0 %v32694_v43 }
 0xc88   :  { %29032 = vmatprep.subr.bf16.mxu0 %v30541_v9 }
 0xc89   :  { %26629 = vmatmul.mubr.f32.vlgmr.msra.gmra.mrb[66].mxu1 %v33133_v15 }
 0xc8a   :  { %28998 = vmatpush3.bf16.msra.mxu1 %v32514_v3  ;;  %26639 = vmatprep.mubr.msk.f32.mxu1 %vm30542_vm2, %v30543_v20 }
 0xc8b   :  { %28999 = vmatprep.subr.bf16.mxu1 %v30541_v9 }
 0xc8e   :  { %29001 = vmatpush3.bf16.msra.mxu1 %v32520_v6 }
 0xc8f   :  { %29002 = vmatprep.subr.bf16.mxu1 %v30541_v9 }
 0xc91   :  { %26640 = vmatmul.mubr.f32.vlgmr.msra.gmra.mrb[66].mxu1 %v33123_v23 }
 0xc92   :  { %29004 = vmatpush3.bf16.msra.mxu1 %v32526_v30  ;;  %26650 = vmatprep.mubr.msk.f32.mxu1 %vm30542_vm2, %v30543_v20 }
 0xc93   :  { %29005 = vmatprep.subr.bf16.mxu1 %v30541_v9 }
 0xc96   :  { %29007 = vmatpush3.bf16.msra.mxu1 %v32541_v60 }
 0xc97   :  { %29008 = vmatprep.subr.bf16.mxu1 %v30541_v9 }
 0xc99   :  { %26651 = vmatmul.mubr.f32.vlgmr.msra.gmra.mrb[66].mxu1 %v33126_v47 }
 0xc9a   :  { %29010 = vmatpush3.bf16.msra.mxu1 %v32463_v44  ;;  %26661 = vmatprep.mubr.msk.f32.mxu1 %vm30542_vm2, %v30543_v20 }
 0xc9b   :  { %29011 = vmatprep.subr.bf16.mxu1 %v30541_v9 }
 0xc9e   :  { %29013 = vmatpush3.bf16.msra.mxu1 %v32476_v62 }
 0xc9f   :  { %29014 = vmatprep.subr.bf16.mxu1 %v30541_v9 }
 0xca1   :  { %26662 = vmatmul.mubr.f32.vlgmr.msra.gmra.mrb[66].mxu1 %v33129_v38 }
 0xca2   :  { %29016 = vmatpush3.bf16.msra.mxu1 %v32572_v45  ;;  %26672 = vmatprep.mubr.msk.f32.mxu1 %vm30542_vm2, %v30543_v20 }
 0xca3   :  { %29017 = vmatprep.subr.bf16.mxu1 %v30541_v9 }
 0xca6   :  { %29019 = vmatpush3.bf16.msra.mxu1 %v32586_v4 }
 0xca7   :  { %29020 = vmatprep.subr.bf16.mxu1 %v30541_v9 }
 0xca9   :  { %26673 = vmatmul.mubr.f32.vlgmr.msra.gmra.mrb[66].mxu1 %v33123_v23 }
 0xcaa   :  { %29022 = vmatpush3.bf16.msra.mxu1 %v32463_v44  ;;  %26683 = vmatprep.mubr.msk.f32.mxu1 %vm30542_vm2, %v30543_v20 }
 0xcab   :  { %29023 = vmatprep.subr.bf16.mxu1 %v30541_v9 }
 0xcae   :  { %29025 = vmatpush3.bf16.msra.mxu1 %v32476_v62 }
 0xcaf   :  { %29062 = vmatprep.subr.bf16.mxu1 %v30541_v9 }
 0xcb1   :  { %26684 = vmatmul.mubr.f32.vlgmr.msra.gmra.mrb[66].mxu1 %v33123_v23 }
 0xcb2   :  { %29064 = vmatpush3.bf16.msra.mxu1 %v32388_v42  ;;  %26760 = vmatprep.mubr.msk.f32.mxu1 %vm30542_vm2, %v30543_v20 }
 0xcb3   :  { %29065 = vmatprep.subr.bf16.mxu1 %v30541_v9 }
 0xcb6   :  { %29067 = vmatpush3.bf16.msra.mxu1 %v32410_v49 }
 0xcb7   :  { %29068 = vmatprep.subr.bf16.mxu1 %v30541_v9 }
 0xd54   :  { %v12033_v26 = vpop.f32.mrb[64].mxu1  ;;  %v12518_v12 = vpop.f32.mrb[46].mxu0 }
 0xd55   :  { %v29633_v10 = vadd.f32 %v32800_v63, %v12518_v12  ;;  %v26553_v40 = vpop.f32.mrb[65].mxu1  ;;  %v26619_v21 = vpop.f32.mrb[47].mxu0  ;;  %v29632_v46 = vadd.f32 %v12033_v26, %v32788_v19 }
 0xd57   :  { %v13018_v51 = vrot.slane %v29633_v10, 5  ;;  %v13008_v41 = vrot.slane %v29632_v46, 5 }
 0xd59   :  { %v13020_v58 = vadd.f32 %v32812_v11, %v13018_v51  ;;  %v13010_v37 = vadd.f32 %v32794_v1, %v13008_v41 }
 0xd5b   :  { %v22752_v33 = vmul.f32 -1.442695, %v13020_v58  ;;  %v22751_v22 = vmul.f32 -1.442695, %v13010_v37  ;;  %v33413_v58 = vld [vmem:[%s34777_s10 + $0x1] sm:$0x1] }
 0xd5d   :  { %30485 = vpow2.f32 %v22752_v33 }
 0xd67   :  { %v30486_v59 = vpop.eup %30485 }
 0xd68   :  { %v13024_v36 = vadd.f32 1.0, %v30486_v59 }
 0xd6a   :  { %30487 = vrcp.f32 %v13024_v36  ;;  %v33420_v36 = vld [vmem:[%s34777_s10] sm:$0x1] }
 0xd6b   :  { %30489 = vpow2.f32 %v22751_v22 }
 0xd74   :  { %v30488_v63 = vpop.eup %30487 }
 0xd75   :  { %v13037_v16 = vmul.f32 %v30488_v63, %v13035_v57  ;;  %v30490_v2 = vpop.eup %30489  ;;  %v13033_v23 = vsub.f32 1.0, %v30488_v63 }
 0xd76   :  { %v13014_v24 = vadd.f32 1.0, %v30490_v2 }
 0xd78   :  { %30491 = vrcp.f32 %v13014_v24 }
 0xd82   :  { %v30492_v61 = vpop.eup %30491 }
 0xd84   :  { %v13003_v32 = vpop.f32.mrb[66].mxu1 }
 0xd85   :  { %v29634_v17 = vadd.f32 %v32806_v31, %v13003_v32  ;;  %v26685_v19 = vpop.f32.mrb[67].mxu1 }
 0xd87   :  { %v13028_v34 = vrot.slane %v29634_v17, 5 }
 0xd89   :  { %v13030_v29 = vmul.f32 %v30492_v61, %v13028_v34 }
 0xd8b   :  { %v13031_v56 = vadd.f32 %v32818_v54, %v13030_v29 }
 0xd8d   :  { %30493 = vtanh.f32 %v13031_v56 }
 0xd97   :  { %v30494_v47 = vpop.eup %30493 }
 0xd98   :  { %v13034_v38 = vmul.f32 %v30494_v47, %v13033_v23  ;;  %v33428_v23 = vld [vmem:[%s34777_s10 + $0x2] sm:$0x1] }
 0xd9a   :  { %v33268_v18 = vadd.f32 %v13037_v16, %v13034_v38 }
 0xd9c   :  { %v13040_v8 = vrot.slane %v33268_v18, 3  ;;  %v14526_v17 = vrot.slane %v33268_v18, 7 }
 0xd9e   :  { %v13041_v15 = vsel %vm2543_vm1, %v13040_v8, 0 }
 0xd9f   :  { %v33272_v26 = vand.u32 4294901760, %v13041_v15 }
 0xda1   :  { %v33275_v31 = vsub.f32 %v13041_v15, %v33272_v26 }
 0xda3   :  { %v33278_v12 = vand.u32 4294901760, %v33275_v31 }
 0xda5   :  { %v13115_v10 = vsub.f32 %v33275_v31, %v33278_v12 }
 0xda7   :  { %v33282_v40 = vand.u32 4294901760, %v13115_v10 }
 0xda9   :  { %26695 = vmatmul.mubr.f32.vlgmr.msra.gmra.mrb[48].mxu0 %v33282_v40  ;;  %26761 = vmatmul.mubr.f32.vlgmr.msra.gmra.mrb[68].mxu1 %v33282_v40 }
 0xdaa   :  { %29034 = vmatpush3.bf16.msra.mxu0 %v32702_v39  ;;  %29070 = vmatpush3.bf16.msra.mxu1 %v32622_v13 }
 0xdab   :  { %29035 = vmatprep.subr.bf16.mxu0 %v30541_v9  ;;  %29071 = vmatprep.subr.bf16.mxu1 %v30541_v9 }
 0xdac   :  { %26705 = vmatprep.mubr.msk.f32.mxu0 %vm30542_vm2, %v30543_v20  ;;  %26771 = vmatprep.mubr.msk.f32.mxu1 %vm30542_vm2, %v30543_v20 }
 0xdae   :  { %29037 = vmatpush3.bf16.msra.mxu0 %v32707_v28  ;;  %29073 = vmatpush3.bf16.msra.mxu1 %v32636_v35 }
 0xdaf   :  { %29038 = vmatprep.subr.bf16.mxu0 %v30541_v9  ;;  %29074 = vmatprep.subr.bf16.mxu1 %v30541_v9 }
 0xdb1   :  { %26706 = vmatmul.mubr.f32.vlgmr.msra.gmra.mrb[48].mxu0 %v33272_v26  ;;  %26772 = vmatmul.mubr.f32.vlgmr.msra.gmra.mrb[68].mxu1 %v33272_v26 }
 0xdb2   :  { %29040 = vmatpush3.bf16.msra.mxu0 %v32713_v55  ;;  %29076 = vmatpush3.bf16.msra.mxu1 %v32403_v14 }
 0xdb3   :  { %29041 = vmatprep.subr.bf16.mxu0 %v30541_v9  ;;  %29077 = vmatprep.subr.bf16.mxu1 %v30541_v9 }
 0xdb4   :  { %26716 = vmatprep.mubr.msk.f32.mxu0 %vm30542_vm2, %v30543_v20  ;;  %26782 = vmatprep.mubr.msk.f32.mxu1 %vm30542_vm2, %v30543_v20 }
 0xdb6   :  { %29043 = vmatpush3.bf16.msra.mxu0 %v32718_v7  ;;  %29079 = vmatpush3.bf16.msra.mxu1 %v32422_v25 }
 0xdb7   :  { %29044 = vmatprep.subr.bf16.mxu0 %v30541_v9  ;;  %29080 = vmatprep.subr.bf16.mxu1 %v30541_v9 }
 0xdb9   :  { %26717 = vmatmul.mubr.f32.vlgmr.msra.gmra.mrb[48].mxu0 %v33275_v31  ;;  %26783 = vmatmul.mubr.f32.vlgmr.msra.gmra.mrb[68].mxu1 %v33275_v31 }
 0xdba   :  { %29046 = vmatpush3.bf16.msra.mxu0 %v32692_v52  ;;  %29082 = vmatpush3.bf16.msra.mxu1 %v32388_v42 }
 0xdbb   :  { %29047 = vmatprep.subr.bf16.mxu0 %v30541_v9  ;;  %29083 = vmatprep.subr.bf16.mxu1 %v30541_v9 }
 0xdbc   :  { %26727 = vmatprep.mubr.msk.f32.mxu0 %vm30542_vm2, %v30543_v20  ;;  %26793 = vmatprep.mubr.msk.f32.mxu1 %vm30542_vm2, %v30543_v20 }
 0xdbe   :  { %29049 = vmatpush3.bf16.msra.mxu0 %v32694_v43  ;;  %29085 = vmatpush3.bf16.msra.mxu1 %v32410_v49 }
 0xdbf   :  { %29050 = vmatprep.subr.bf16.mxu0 %v30541_v9  ;;  %29086 = vmatprep.subr.bf16.mxu1 %v30541_v9 }
 0xdc1   :  { %26728 = vmatmul.mubr.f32.vlgmr.msra.gmra.mrb[48].mxu0 %v33278_v12  ;;  %26794 = vmatmul.mubr.f32.vlgmr.msra.gmra.mrb[68].mxu1 %v33278_v12 }
 0xdc2   :  { %29052 = vmatpush3.bf16.msra.mxu0 %v32731_v53  ;;  %29088 = vmatpush3.bf16.msra.mxu1 %v32431_v27 }
 0xdc3   :  { %29053 = vmatprep.subr.bf16.mxu0 %v30541_v9  ;;  %29089 = vmatprep.subr.bf16.mxu1 %v30541_v9 }
 0xdc4   :  { %26738 = vmatprep.mubr.msk.f32.mxu0 %vm30542_vm2, %v30543_v20  ;;  %26804 = vmatprep.mubr.msk.f32.mxu1 %vm30542_vm2, %v30543_v20 }
 0xdc6   :  { %29055 = vmatpush3.bf16.msra.mxu0 %v32736_v50  ;;  %29091 = vmatpush3.bf16.msra.mxu1 %v32452_v0 }
 0xdc7   :  { %29056 = vmatprep.subr.bf16.mxu0 %v30541_v9  ;;  %29092 = vmatprep.subr.bf16.mxu1 %v30541_v9 }
 0xdc9   :  { %26739 = vmatmul.mubr.f32.vlgmr.msra.gmra.mrb[48].mxu0 %v33272_v26  ;;  %26805 = vmatmul.mubr.f32.vlgmr.msra.gmra.mrb[68].mxu1 %v33272_v26 }
 0xdca   :  { %29058 = vmatpush3.bf16.msra.mxu0 %v32692_v52  ;;  %29094 = vmatpush3.bf16.msra.mxu1 %v32388_v42 }
 0xdcb   :  { %29059 = vmatprep.subr.bf16.mxu0 %v30541_v9  ;;  %29095 = vmatprep.subr.bf16.mxu1 %v30541_v9 }
 0xdcc   :  { %26749 = vmatprep.mubr.msk.f32.mxu0 %vm30542_vm2, %v30543_v20  ;;  %26815 = vmatprep.mubr.msk.f32.mxu1 %vm30542_vm2, %v30543_v20 }
 0xdce   :  { %29061 = vmatpush3.bf16.msra.mxu0 %v32694_v43  ;;  %29097 = vmatpush3.bf16.msra.mxu1 %v32410_v49 }
 0xdcf   :  { %29098 = vmatprep.subr.bf16.mxu0 %v30541_v9  ;;  %29134 = vmatprep.subr.bf16.mxu1 %v30541_v9 }
 0xdd1   :  { %26750 = vmatmul.mubr.f32.vlgmr.msra.gmra.mrb[48].mxu0 %v33272_v26  ;;  %26816 = vmatmul.mubr.f32.vlgmr.msra.gmra.mrb[68].mxu1 %v33272_v26 }
 0xdd2   :  { %29100 = vmatpush3.bf16.msra.mxu0 %v32463_v44  ;;  %26826 = vmatprep.mubr.msk.f32.mxu0 %vm30542_vm2, %v30543_v20 }
 0xdd3   :  { %29101 = vmatprep.subr.bf16.mxu0 %v30541_v9  ;;  %29136 = vmatpush3.bf16.msra.mxu1 %v32692_v52 }
 0xdd4   :  { %29137 = vmatprep.subr.bf16.mxu1 %v30541_v9  ;;  %26892 = vmatprep.mubr.msk.f32.mxu1 %vm30542_vm2, %v30543_v20 }
 0xdd6   :  { %29103 = vmatpush3.bf16.msra.mxu0 %v32476_v62 }
 0xdd7   :  { %29104 = vmatprep.subr.bf16.mxu0 %v30541_v9  ;;  %29139 = vmatpush3.bf16.msra.mxu1 %v32694_v43 }
 0xdd8   :  { %29140 = vmatprep.subr.bf16.mxu1 %v30541_v9 }
 0xdd9   :  { %26827 = vmatmul.mubr.f32.vlgmr.msra.gmra.mrb[50].mxu0 %v33282_v40 }
 0xdda   :  { %29106 = vmatpush3.bf16.msra.mxu0 %v32514_v3  ;;  %26837 = vmatprep.mubr.msk.f32.mxu0 %vm30542_vm2, %v30543_v20 }
 0xddb   :  { %29107 = vmatprep.subr.bf16.mxu0 %v30541_v9 }
 0xdde   :  { %29109 = vmatpush3.bf16.msra.mxu0 %v32520_v6 }
 0xddf   :  { %29110 = vmatprep.subr.bf16.mxu0 %v30541_v9 }
 0xde1   :  { %26838 = vmatmul.mubr.f32.vlgmr.msra.gmra.mrb[50].mxu0 %v33272_v26 }
 0xde2   :  { %29112 = vmatpush3.bf16.msra.mxu0 %v32526_v30  ;;  %26848 = vmatprep.mubr.msk.f32.mxu0 %vm30542_vm2, %v30543_v20 }
 0xde3   :  { %29113 = vmatprep.subr.bf16.mxu0 %v30541_v9 }
 0xde6   :  { %29115 = vmatpush3.bf16.msra.mxu0 %v32541_v60 }
 0xde7   :  { %29116 = vmatprep.subr.bf16.mxu0 %v30541_v9 }
 0xde9   :  { %26849 = vmatmul.mubr.f32.vlgmr.msra.gmra.mrb[50].mxu0 %v33275_v31 }
 0xdea   :  { %29118 = vmatpush3.bf16.msra.mxu0 %v32463_v44  ;;  %26859 = vmatprep.mubr.msk.f32.mxu0 %vm30542_vm2, %v30543_v20 }
 0xdeb   :  { %29119 = vmatprep.subr.bf16.mxu0 %v30541_v9 }
 0xdee   :  { %29121 = vmatpush3.bf16.msra.mxu0 %v32476_v62 }
 0xdef   :  { %29122 = vmatprep.subr.bf16.mxu0 %v30541_v9 }
 0xdf1   :  { %26860 = vmatmul.mubr.f32.vlgmr.msra.gmra.mrb[50].mxu0 %v33278_v12 }
 0xdf2   :  { %29124 = vmatpush3.bf16.msra.mxu0 %v32572_v45  ;;  %26870 = vmatprep.mubr.msk.f32.mxu0 %vm30542_vm2, %v30543_v20 }
 0xdf3   :  { %29125 = vmatprep.subr.bf16.mxu0 %v30541_v9 }
 0xdf6   :  { %29127 = vmatpush3.bf16.msra.mxu0 %v32586_v4 }
 0xdf7   :  { %29128 = vmatprep.subr.bf16.mxu0 %v30541_v9 }
 0xdf9   :  { %26871 = vmatmul.mubr.f32.vlgmr.msra.gmra.mrb[50].mxu0 %v33272_v26 }
 0xdfa   :  { %29130 = vmatpush3.bf16.msra.mxu0 %v32463_v44  ;;  %26881 = vmatprep.mubr.msk.f32.mxu0 %vm30542_vm2, %v30543_v20 }
 0xdfb   :  { %29131 = vmatprep.subr.bf16.mxu0 %v30541_v9 }
 0xdfe   :  { %29133 = vmatpush3.bf16.msra.mxu0 %v32476_v62 }
 0xdff   :  { %29170 = vmatprep.subr.bf16.mxu0 %v30541_v9 }
 0xe01   :  { %26882 = vmatmul.mubr.f32.vlgmr.msra.gmra.mrb[50].mxu0 %v33272_v26 }
 0xe02   :  { %29172 = vmatpush3.bf16.msra.mxu0 %v32388_v42  ;;  %26958 = vmatprep.mubr.msk.f32.mxu0 %vm30542_vm2, %v30543_v20 }
 0xe03   :  { %29173 = vmatprep.subr.bf16.mxu0 %v30541_v9 }
 0xe06   :  { %29175 = vmatpush3.bf16.msra.mxu0 %v32410_v49 }
 0xe07   :  { %29176 = vmatprep.subr.bf16.mxu0 %v30541_v9 }
 0xea4   :  { %v13524_v21 = vpop.f32.mrb[48].mxu0  ;;  %v14009_v51 = vpop.f32.mrb[68].mxu1 }
 0xea5   :  { %v29636_v33 = vadd.f32 %v33413_v58, %v14009_v51  ;;  %v26751_v46 = vpop.f32.mrb[49].mxu0  ;;  %v26817_v41 = vpop.f32.mrb[69].mxu1  ;;  %v29635_v57 = vadd.f32 %v33420_v36, %v13524_v21 }
 0xea7   :  { %v14509_v37 = vrot.slane %v29636_v33, 4  ;;  %v14499_v63 = vrot.slane %v29635_v57, 4 }
 0xea9   :  { %v14511_v59 = vadd.f32 %v32812_v11, %v14509_v37  ;;  %v14501_v16 = vadd.f32 %v32794_v1, %v14499_v63 }
 0xeab   :  { %v22754_v22 = vmul.f32 -1.442695, %v14511_v59  ;;  %v22753_v24 = vmul.f32 -1.442695, %v14501_v16 }
 0xead   :  { %30495 = vpow2.f32 %v22754_v22 }
 0xeb7   :  { %v30496_v2 = vpop.eup %30495 }
 0xeb8   :  { %v14515_v32 = vadd.f32 1.0, %v30496_v2 }
 0xeba   :  { %30497 = vrcp.f32 %v14515_v32 }
 0xebb   :  { %30499 = vpow2.f32 %v22753_v24 }
 0xec4   :  { %v30498_v19 = vpop.eup %30497 }
 0xec5   :  { %v14528_v34 = vmul.f32 %v30498_v19, %v14526_v17  ;;  %v30500_v61 = vpop.eup %30499  ;;  %v14524_v18 = vsub.f32 1.0, %v30498_v19 }
 0xec6   :  { %v14505_v29 = vadd.f32 1.0, %v30500_v61 }
 0xec8   :  { %30501 = vrcp.f32 %v14505_v29 }
 0xed2   :  { %v30502_v15 = vpop.eup %30501 }
 0xed4   :  { %v14494_v56 = vpop.f32.mrb[50].mxu0 }
 0xed5   :  { %v29637_v47 = vadd.f32 %v33428_v23, %v14494_v56  ;;  %v26883_v38 = vpop.f32.mrb[51].mxu0 }
 0xed7   :  { %v14519_v8 = vrot.slane %v29637_v47, 4 }
 0xed9   :  { %v14521_v26 = vmul.f32 %v30502_v15, %v14519_v8 }
 0xedb   :  { %v14522_v31 = vadd.f32 %v32818_v54, %v14521_v26 }
 0xedd   :  { %30503 = vtanh.f32 %v14522_v31 }
 0xee7   :  { %v30504_v12 = vpop.eup %30503 }
 0xee8   :  { %v14525_v10 = vmul.f32 %v30504_v12, %v14524_v18 }
 0xeea   :  { %v33432_v40 = vadd.f32 %v14528_v34, %v14525_v10 }
 0xeec   :  { %v14531_v21 = vrot.slane %v33432_v40, 4  ;;  %v16017_v38 = vrot.slane %v33432_v40, 7 }
 0xeee   :  { %v14532_v51 = vsel %vm2543_vm1, %v14531_v21, 0 }
 0xeef   :  { %v33436_v33 = vand.u32 4294901760, %v14532_v51 }
 0xef1   :  { %v33439_v46 = vsub.f32 %v14532_v51, %v33436_v33 }
 0xef3   :  { %v33442_v41 = vand.u32 4294901760, %v33439_v46 }
 0xef5   :  { %v14606_v37 = vsub.f32 %v33439_v46, %v33442_v41 }
 0xef7   :  { %v33446_v59 = vand.u32 4294901760, %v14606_v37 }
 0xef9   :  { %26893 = vmatmul.mubr.f32.vlgmr.msra.gmra.mrb[70].mxu1 %v33446_v59  ;;  %26959 = vmatmul.mubr.f32.vlgmr.msra.gmra.mrb[52].mxu0 %v33446_v59 }
 0xefa   :  { %29142 = vmatpush3.bf16.msra.mxu1 %v32702_v39  ;;  %29178 = vmatpush3.bf16.msra.mxu0 %v32622_v13 }
 0xefb   :  { %29143 = vmatprep.subr.bf16.mxu1 %v30541_v9  ;;  %29179 = vmatprep.subr.bf16.mxu0 %v30541_v9 }
 0xefc   :  { %26903 = vmatprep.mubr.msk.f32.mxu1 %vm30542_vm2, %v30543_v20  ;;  %26969 = vmatprep.mubr.msk.f32.mxu0 %vm30542_vm2, %v30543_v20 }
 0xefe   :  { %29145 = vmatpush3.bf16.msra.mxu1 %v32707_v28  ;;  %29181 = vmatpush3.bf16.msra.mxu0 %v32636_v35 }
 0xeff   :  { %29146 = vmatprep.subr.bf16.mxu1 %v30541_v9  ;;  %29182 = vmatprep.subr.bf16.mxu0 %v30541_v9 }
 0xf01   :  { %26904 = vmatmul.mubr.f32.vlgmr.msra.gmra.mrb[70].mxu1 %v33436_v33  ;;  %26970 = vmatmul.mubr.f32.vlgmr.msra.gmra.mrb[52].mxu0 %v33436_v33 }
 0xf02   :  { %29148 = vmatpush3.bf16.msra.mxu1 %v32713_v55  ;;  %29184 = vmatpush3.bf16.msra.mxu0 %v32403_v14 }
 0xf03   :  { %29149 = vmatprep.subr.bf16.mxu1 %v30541_v9  ;;  %29185 = vmatprep.subr.bf16.mxu0 %v30541_v9 }
 0xf04   :  { %26914 = vmatprep.mubr.msk.f32.mxu1 %vm30542_vm2, %v30543_v20  ;;  %26980 = vmatprep.mubr.msk.f32.mxu0 %vm30542_vm2, %v30543_v20 }
 0xf06   :  { %29151 = vmatpush3.bf16.msra.mxu1 %v32718_v7  ;;  %29187 = vmatpush3.bf16.msra.mxu0 %v32422_v25 }
 0xf07   :  { %29152 = vmatprep.subr.bf16.mxu1 %v30541_v9  ;;  %29188 = vmatprep.subr.bf16.mxu0 %v30541_v9 }
 0xf09   :  { %26915 = vmatmul.mubr.f32.vlgmr.msra.gmra.mrb[70].mxu1 %v33439_v46  ;;  %26981 = vmatmul.mubr.f32.vlgmr.msra.gmra.mrb[52].mxu0 %v33439_v46 }
 0xf0a   :  { %29154 = vmatpush3.bf16.msra.mxu1 %v32692_v52  ;;  %29190 = vmatpush3.bf16.msra.mxu0 %v32388_v42 }
 0xf0b   :  { %29155 = vmatprep.subr.bf16.mxu1 %v30541_v9  ;;  %29191 = vmatprep.subr.bf16.mxu0 %v30541_v9 }
 0xf0c   :  { %26925 = vmatprep.mubr.msk.f32.mxu1 %vm30542_vm2, %v30543_v20  ;;  %26991 = vmatprep.mubr.msk.f32.mxu0 %vm30542_vm2, %v30543_v20 }
 0xf0e   :  { %29157 = vmatpush3.bf16.msra.mxu1 %v32694_v43  ;;  %29193 = vmatpush3.bf16.msra.mxu0 %v32410_v49 }
 0xf0f   :  { %29158 = vmatprep.subr.bf16.mxu1 %v30541_v9  ;;  %29194 = vmatprep.subr.bf16.mxu0 %v30541_v9 }
 0xf11   :  { %26926 = vmatmul.mubr.f32.vlgmr.msra.gmra.mrb[70].mxu1 %v33442_v41  ;;  %26992 = vmatmul.mubr.f32.vlgmr.msra.gmra.mrb[52].mxu0 %v33442_v41 }
 0xf12   :  { %29160 = vmatpush3.bf16.msra.mxu1 %v32731_v53  ;;  %29196 = vmatpush3.bf16.msra.mxu0 %v32431_v27 }
 0xf13   :  { %29161 = vmatprep.subr.bf16.mxu1 %v30541_v9  ;;  %29197 = vmatprep.subr.bf16.mxu0 %v30541_v9 }
 0xf14   :  { %26936 = vmatprep.mubr.msk.f32.mxu1 %vm30542_vm2, %v30543_v20  ;;  %27002 = vmatprep.mubr.msk.f32.mxu0 %vm30542_vm2, %v30543_v20 }
 0xf16   :  { %29163 = vmatpush3.bf16.msra.mxu1 %v32736_v50  ;;  %29199 = vmatpush3.bf16.msra.mxu0 %v32452_v0 }
 0xf17   :  { %29164 = vmatprep.subr.bf16.mxu1 %v30541_v9  ;;  %29200 = vmatprep.subr.bf16.mxu0 %v30541_v9 }
 0xf19   :  { %26937 = vmatmul.mubr.f32.vlgmr.msra.gmra.mrb[70].mxu1 %v33436_v33  ;;  %27003 = vmatmul.mubr.f32.vlgmr.msra.gmra.mrb[52].mxu0 %v33436_v33 }
 0xf1a   :  { %29166 = vmatpush3.bf16.msra.mxu1 %v32692_v52  ;;  %29202 = vmatpush3.bf16.msra.mxu0 %v32388_v42 }
 0xf1b   :  { %29167 = vmatprep.subr.bf16.mxu1 %v30541_v9  ;;  %29203 = vmatprep.subr.bf16.mxu0 %v30541_v9 }
 0xf1c   :  { %26947 = vmatprep.mubr.msk.f32.mxu1 %vm30542_vm2, %v30543_v20  ;;  %27013 = vmatprep.mubr.msk.f32.mxu0 %vm30542_vm2, %v30543_v20 }
 0xf1e   :  { %29169 = vmatpush3.bf16.msra.mxu1 %v32694_v43  ;;  %29205 = vmatpush3.bf16.msra.mxu0 %v32410_v49 }
 0xf1f   :  { %29206 = vmatprep.subr.bf16.mxu1 %v30541_v9  ;;  %29242 = vmatprep.subr.bf16.mxu0 %v30541_v9 }
 0xf21   :  { %26948 = vmatmul.mubr.f32.vlgmr.msra.gmra.mrb[70].mxu1 %v33436_v33  ;;  %27014 = vmatmul.mubr.f32.vlgmr.msra.gmra.mrb[52].mxu0 %v33436_v33 }
 0xf22   :  { %29208 = vmatpush3.bf16.msra.mxu1 %v32463_v44  ;;  %27024 = vmatprep.mubr.msk.f32.mxu1 %vm30542_vm2, %v30543_v20 }
 0xf23   :  { %29209 = vmatprep.subr.bf16.mxu1 %v30541_v9  ;;  %29244 = vmatpush3.bf16.msra.mxu0 %v32692_v52 }
 0xf24   :  { %29245 = vmatprep.subr.bf16.mxu0 %v30541_v9  ;;  %27090 = vmatprep.mubr.msk.f32.mxu0 %vm30542_vm2, %v30543_v20 }
 0xf26   :  { %29211 = vmatpush3.bf16.msra.mxu1 %v32476_v62 }
 0xf27   :  { %29212 = vmatprep.subr.bf16.mxu1 %v30541_v9  ;;  %29247 = vmatpush3.bf16.msra.mxu0 %v32694_v43 }
 0xf28   :  { %29248 = vmatprep.subr.bf16.mxu0 %v30541_v9 }
 0xf29   :  { %27025 = vmatmul.mubr.f32.vlgmr.msra.gmra.mrb[72].mxu1 %v33446_v59 }
 0xf2a   :  { %29214 = vmatpush3.bf16.msra.mxu1 %v32514_v3  ;;  %27035 = vmatprep.mubr.msk.f32.mxu1 %vm30542_vm2, %v30543_v20 }
 0xf2b   :  { %29215 = vmatprep.subr.bf16.mxu1 %v30541_v9 }
 0xf2e   :  { %29217 = vmatpush3.bf16.msra.mxu1 %v32520_v6 }
 0xf2f   :  { %29218 = vmatprep.subr.bf16.mxu1 %v30541_v9 }
 0xf31   :  { %27036 = vmatmul.mubr.f32.vlgmr.msra.gmra.mrb[72].mxu1 %v33436_v33 }
 0xf32   :  { %29220 = vmatpush3.bf16.msra.mxu1 %v32526_v30  ;;  %27046 = vmatprep.mubr.msk.f32.mxu1 %vm30542_vm2, %v30543_v20 }
 0xf33   :  { %29221 = vmatprep.subr.bf16.mxu1 %v30541_v9 }
 0xf36   :  { %29223 = vmatpush3.bf16.msra.mxu1 %v32541_v60 }
 0xf37   :  { %29224 = vmatprep.subr.bf16.mxu1 %v30541_v9 }
 0xf39   :  { %27047 = vmatmul.mubr.f32.vlgmr.msra.gmra.mrb[72].mxu1 %v33439_v46 }
 0xf3a   :  { %29226 = vmatpush3.bf16.msra.mxu1 %v32463_v44  ;;  %27057 = vmatprep.mubr.msk.f32.mxu1 %vm30542_vm2, %v30543_v20 }
 0xf3b   :  { %29227 = vmatprep.subr.bf16.mxu1 %v30541_v9 }
 0xf3e   :  { %29229 = vmatpush3.bf16.msra.mxu1 %v32476_v62 }
 0xf3f   :  { %29230 = vmatprep.subr.bf16.mxu1 %v30541_v9 }
 0xf41   :  { %27058 = vmatmul.mubr.f32.vlgmr.msra.gmra.mrb[72].mxu1 %v33442_v41 }
 0xf42   :  { %29232 = vmatpush3.bf16.msra.mxu1 %v32572_v45  ;;  %27068 = vmatprep.mubr.msk.f32.mxu1 %vm30542_vm2, %v30543_v20 }
 0xf43   :  { %29233 = vmatprep.subr.bf16.mxu1 %v30541_v9 }
 0xf46   :  { %29235 = vmatpush3.bf16.msra.mxu1 %v32586_v4 }
 0xf47   :  { %29236 = vmatprep.subr.bf16.mxu1 %v30541_v9 }
 0xf49   :  { %27069 = vmatmul.mubr.f32.vlgmr.msra.gmra.mrb[72].mxu1 %v33436_v33 }
 0xf4a   :  { %29238 = vmatpush3.bf16.msra.mxu1 %v32463_v44  ;;  %27079 = vmatprep.mubr.msk.f32.mxu1 %vm30542_vm2, %v30543_v20 }
 0xf4b   :  { %29239 = vmatprep.subr.bf16.mxu1 %v30541_v9 }
 0xf4e   :  { %29241 = vmatpush3.bf16.msra.mxu1 %v32476_v62 }
 0xf4f   :  { %29278 = vmatprep.subr.bf16.mxu1 %v30541_v9 }
 0xf51   :  { %27080 = vmatmul.mubr.f32.vlgmr.msra.gmra.mrb[72].mxu1 %v33436_v33 }
 0xf52   :  { %29280 = vmatpush3.bf16.msra.mxu1 %v32388_v42  ;;  %27156 = vmatprep.mubr.msk.f32.mxu1 %vm30542_vm2, %v30543_v20 }
 0xf53   :  { %29281 = vmatprep.subr.bf16.mxu1 %v30541_v9 }
 0xf56   :  { %29283 = vmatpush3.bf16.msra.mxu1 %v32410_v49 }
 0xf57   :  { %29284 = vmatprep.subr.bf16.mxu1 %v30541_v9 }
 0xff4   :  { %v15015_v22 = vpop.f32.mrb[70].mxu1  ;;  %v15500_v57 = vpop.f32.mrb[52].mxu0 }
 0xff5   :  { %v29639_v63 = vadd.f32 %v33413_v58, %v15500_v57  ;;  %v26949_v16 = vpop.f32.mrb[71].mxu1  ;;  %v27015_v2 = vpop.f32.mrb[53].mxu0  ;;  %v29638_v19 = vadd.f32 %v33420_v36, %v15015_v22 }
 0xff7   :  { %v16000_v24 = vrot.slane %v29639_v63, 3  ;;  %v15990_v34 = vrot.slane %v29638_v19, 3 }
 0xff9   :  { %v16002_v32 = vadd.f32 %v32812_v11, %v16000_v24  ;;  %v15992_v61 = vadd.f32 %v32794_v1, %v15990_v34 }
 0xffb   :  { %v22756_v17 = vmul.f32 -1.442695, %v16002_v32  ;;  %v22755_v56 = vmul.f32 -1.442695, %v15992_v61 }
 0xffd   :  { %30505 = vpow2.f32 %v22756_v17 }
0x1007   :  { %v30506_v29 = vpop.eup %30505 }
0x1008   :  { %v16006_v47 = vadd.f32 1.0, %v30506_v29 }
0x100a   :  { %30507 = vrcp.f32 %v16006_v47 }
0x100b   :  { %30509 = vpow2.f32 %v22755_v56 }
0x1014   :  { %v30508_v8 = vpop.eup %30507 }
0x1015   :  { %v16019_v15 = vmul.f32 %v30508_v8, %v16017_v38  ;;  %v30510_v26 = vpop.eup %30509  ;;  %v16015_v41 = vsub.f32 1.0, %v30508_v8 }
0x1016   :  { %v15996_v31 = vadd.f32 1.0, %v30510_v26 }
0x1018   :  { %30511 = vrcp.f32 %v15996_v31 }
0x1022   :  { %v30512_v51 = vpop.eup %30511 }
0x1024   :  { %v15985_v18 = vpop.f32.mrb[72].mxu1 }
0x1025   :  { %v29640_v12 = vadd.f32 %v33428_v23, %v15985_v18  ;;  %v27081_v10 = vpop.f32.mrb[73].mxu1 }
0x1027   :  { %v16010_v21 = vrot.slane %v29640_v12, 3 }
0x1029   :  { %v16012_v33 = vmul.f32 %v30512_v51, %v16010_v21 }
0x102b   :  { %v16013_v46 = vadd.f32 %v32818_v54, %v16012_v33 }
0x102d   :  { %30513 = vtanh.f32 %v16013_v46 }
0x1037   :  { %v30514_v37 = vpop.eup %30513 }
0x1038   :  { %v16016_v59 = vmul.f32 %v30514_v37, %v16015_v41 }
0x103a   :  { %v33581_v22 = vadd.f32 %v16019_v15, %v16016_v59 }
0x103c   :  { %v16022_v40 = vrot.slane %v33581_v22, 5  ;;  %v17508_v10 = vrot.slane %v33581_v22, 7 }
0x103e   :  { %v16023_v57 = vsel %vm2543_vm1, %v16022_v40, 0 }
0x103f   :  { %v33585_v63 = vand.u32 4294901760, %v16023_v57 }
0x1041   :  { %v33588_v16 = vsub.f32 %v16023_v57, %v33585_v63 }
0x1043   :  { %v33591_v2 = vand.u32 4294901760, %v33588_v16 }
0x1045   :  { %v16097_v24 = vsub.f32 %v33588_v16, %v33591_v2 }
0x1047   :  { %v33595_v32 = vand.u32 4294901760, %v16097_v24 }
0x1049   :  { %27091 = vmatmul.mubr.f32.vlgmr.msra.gmra.mrb[54].mxu0 %v33595_v32  ;;  %27157 = vmatmul.mubr.f32.vlgmr.msra.gmra.mrb[74].mxu1 %v33595_v32 }
0x104a   :  { %29250 = vmatpush3.bf16.msra.mxu0 %v32702_v39  ;;  %29286 = vmatpush3.bf16.msra.mxu1 %v32622_v13 }
0x104b   :  { %29251 = vmatprep.subr.bf16.mxu0 %v30541_v9  ;;  %29287 = vmatprep.subr.bf16.mxu1 %v30541_v9 }
0x104c   :  { %27101 = vmatprep.mubr.msk.f32.mxu0 %vm30542_vm2, %v30543_v20  ;;  %27167 = vmatprep.mubr.msk.f32.mxu1 %vm30542_vm2, %v30543_v20 }
0x104e   :  { %29253 = vmatpush3.bf16.msra.mxu0 %v32707_v28  ;;  %29289 = vmatpush3.bf16.msra.mxu1 %v32636_v35 }
0x104f   :  { %29254 = vmatprep.subr.bf16.mxu0 %v30541_v9  ;;  %29290 = vmatprep.subr.bf16.mxu1 %v30541_v9 }
0x1051   :  { %27102 = vmatmul.mubr.f32.vlgmr.msra.gmra.mrb[54].mxu0 %v33585_v63  ;;  %27168 = vmatmul.mubr.f32.vlgmr.msra.gmra.mrb[74].mxu1 %v33585_v63 }
0x1052   :  { %29256 = vmatpush3.bf16.msra.mxu0 %v32713_v55  ;;  %29292 = vmatpush3.bf16.msra.mxu1 %v32403_v14 }
0x1053   :  { %29257 = vmatprep.subr.bf16.mxu0 %v30541_v9  ;;  %29293 = vmatprep.subr.bf16.mxu1 %v30541_v9 }
0x1054   :  { %27112 = vmatprep.mubr.msk.f32.mxu0 %vm30542_vm2, %v30543_v20  ;;  %27178 = vmatprep.mubr.msk.f32.mxu1 %vm30542_vm2, %v30543_v20 }
0x1056   :  { %29259 = vmatpush3.bf16.msra.mxu0 %v32718_v7  ;;  %29295 = vmatpush3.bf16.msra.mxu1 %v32422_v25 }
0x1057   :  { %29260 = vmatprep.subr.bf16.mxu0 %v30541_v9  ;;  %29296 = vmatprep.subr.bf16.mxu1 %v30541_v9 }
0x1059   :  { %27113 = vmatmul.mubr.f32.vlgmr.msra.gmra.mrb[54].mxu0 %v33588_v16  ;;  %27179 = vmatmul.mubr.f32.vlgmr.msra.gmra.mrb[74].mxu1 %v33588_v16 }
0x105a   :  { %29262 = vmatpush3.bf16.msra.mxu0 %v32692_v52  ;;  %29298 = vmatpush3.bf16.msra.mxu1 %v32388_v42 }
0x105b   :  { %29263 = vmatprep.subr.bf16.mxu0 %v30541_v9  ;;  %29299 = vmatprep.subr.bf16.mxu1 %v30541_v9 }
0x105c   :  { %27123 = vmatprep.mubr.msk.f32.mxu0 %vm30542_vm2, %v30543_v20  ;;  %27189 = vmatprep.mubr.msk.f32.mxu1 %vm30542_vm2, %v30543_v20 }
0x105e   :  { %29265 = vmatpush3.bf16.msra.mxu0 %v32694_v43  ;;  %29301 = vmatpush3.bf16.msra.mxu1 %v32410_v49 }
0x105f   :  { %29266 = vmatprep.subr.bf16.mxu0 %v30541_v9  ;;  %29302 = vmatprep.subr.bf16.mxu1 %v30541_v9 }
0x1061   :  { %27124 = vmatmul.mubr.f32.vlgmr.msra.gmra.mrb[54].mxu0 %v33591_v2  ;;  %27190 = vmatmul.mubr.f32.vlgmr.msra.gmra.mrb[74].mxu1 %v33591_v2 }
0x1062   :  { %29268 = vmatpush3.bf16.msra.mxu0 %v32731_v53  ;;  %29304 = vmatpush3.bf16.msra.mxu1 %v32431_v27 }
0x1063   :  { %29269 = vmatprep.subr.bf16.mxu0 %v30541_v9  ;;  %29305 = vmatprep.subr.bf16.mxu1 %v30541_v9 }
0x1064   :  { %27134 = vmatprep.mubr.msk.f32.mxu0 %vm30542_vm2, %v30543_v20  ;;  %27200 = vmatprep.mubr.msk.f32.mxu1 %vm30542_vm2, %v30543_v20 }
0x1066   :  { %29271 = vmatpush3.bf16.msra.mxu0 %v32736_v50  ;;  %29307 = vmatpush3.bf16.msra.mxu1 %v32452_v0 }
0x1067   :  { %29272 = vmatprep.subr.bf16.mxu0 %v30541_v9  ;;  %29308 = vmatprep.subr.bf16.mxu1 %v30541_v9 }
0x1069   :  { %27135 = vmatmul.mubr.f32.vlgmr.msra.gmra.mrb[54].mxu0 %v33585_v63  ;;  %27201 = vmatmul.mubr.f32.vlgmr.msra.gmra.mrb[74].mxu1 %v33585_v63 }
0x106a   :  { %29274 = vmatpush3.bf16.msra.mxu0 %v32692_v52  ;;  %29310 = vmatpush3.bf16.msra.mxu1 %v32388_v42 }
0x106b   :  { %29275 = vmatprep.subr.bf16.mxu0 %v30541_v9  ;;  %29311 = vmatprep.subr.bf16.mxu1 %v30541_v9 }
0x106c   :  { %27145 = vmatprep.mubr.msk.f32.mxu0 %vm30542_vm2, %v30543_v20  ;;  %27211 = vmatprep.mubr.msk.f32.mxu1 %vm30542_vm2, %v30543_v20 }
0x106e   :  { %29277 = vmatpush3.bf16.msra.mxu0 %v32694_v43  ;;  %29313 = vmatpush3.bf16.msra.mxu1 %v32410_v49 }
0x106f   :  { %29314 = vmatprep.subr.bf16.mxu0 %v30541_v9  ;;  %29350 = vmatprep.subr.bf16.mxu1 %v30541_v9 }
0x1071   :  { %27146 = vmatmul.mubr.f32.vlgmr.msra.gmra.mrb[54].mxu0 %v33585_v63  ;;  %27212 = vmatmul.mubr.f32.vlgmr.msra.gmra.mrb[74].mxu1 %v33585_v63 }
0x1072   :  { %29316 = vmatpush3.bf16.msra.mxu0 %v32463_v44  ;;  %27222 = vmatprep.mubr.msk.f32.mxu0 %vm30542_vm2, %v30543_v20 }
0x1073   :  { %29317 = vmatprep.subr.bf16.mxu0 %v30541_v9  ;;  %29352 = vmatpush3.bf16.msra.mxu1 %v32692_v52 }
0x1074   :  { %29353 = vmatprep.subr.bf16.mxu1 %v30541_v9  ;;  %27288 = vmatprep.mubr.msk.f32.mxu1 %vm30542_vm2, %v30543_v20 }
0x1076   :  { %29319 = vmatpush3.bf16.msra.mxu0 %v32476_v62 }
0x1077   :  { %29320 = vmatprep.subr.bf16.mxu0 %v30541_v9  ;;  %29355 = vmatpush3.bf16.msra.mxu1 %v32694_v43 }
0x1078   :  { %29356 = vmatprep.subr.bf16.mxu1 %v30541_v9 }
0x1079   :  { %27223 = vmatmul.mubr.f32.vlgmr.msra.gmra.mrb[56].mxu0 %v33595_v32 }
0x107a   :  { %29322 = vmatpush3.bf16.msra.mxu0 %v32514_v3  ;;  %27233 = vmatprep.mubr.msk.f32.mxu0 %vm30542_vm2, %v30543_v20 }
0x107b   :  { %29323 = vmatprep.subr.bf16.mxu0 %v30541_v9 }
0x107e   :  { %29325 = vmatpush3.bf16.msra.mxu0 %v32520_v6 }
0x107f   :  { %29326 = vmatprep.subr.bf16.mxu0 %v30541_v9 }
0x1081   :  { %27234 = vmatmul.mubr.f32.vlgmr.msra.gmra.mrb[56].mxu0 %v33585_v63 }
0x1082   :  { %29328 = vmatpush3.bf16.msra.mxu0 %v32526_v30  ;;  %27244 = vmatprep.mubr.msk.f32.mxu0 %vm30542_vm2, %v30543_v20 }
0x1083   :  { %29329 = vmatprep.subr.bf16.mxu0 %v30541_v9 }
0x1086   :  { %29331 = vmatpush3.bf16.msra.mxu0 %v32541_v60 }
0x1087   :  { %29332 = vmatprep.subr.bf16.mxu0 %v30541_v9 }
0x1089   :  { %27245 = vmatmul.mubr.f32.vlgmr.msra.gmra.mrb[56].mxu0 %v33588_v16 }
0x108a   :  { %29334 = vmatpush3.bf16.msra.mxu0 %v32463_v44  ;;  %27255 = vmatprep.mubr.msk.f32.mxu0 %vm30542_vm2, %v30543_v20 }
0x108b   :  { %29335 = vmatprep.subr.bf16.mxu0 %v30541_v9 }
0x108e   :  { %29337 = vmatpush3.bf16.msra.mxu0 %v32476_v62 }
0x108f   :  { %29338 = vmatprep.subr.bf16.mxu0 %v30541_v9 }
0x1091   :  { %27256 = vmatmul.mubr.f32.vlgmr.msra.gmra.mrb[56].mxu0 %v33591_v2 }
0x1092   :  { %29340 = vmatpush3.bf16.msra.mxu0 %v32572_v45  ;;  %27266 = vmatprep.mubr.msk.f32.mxu0 %vm30542_vm2, %v30543_v20 }
0x1093   :  { %29341 = vmatprep.subr.bf16.mxu0 %v30541_v9 }
0x1096   :  { %29343 = vmatpush3.bf16.msra.mxu0 %v32586_v4 }
0x1097   :  { %29344 = vmatprep.subr.bf16.mxu0 %v30541_v9 }
0x1099   :  { %27267 = vmatmul.mubr.f32.vlgmr.msra.gmra.mrb[56].mxu0 %v33585_v63 }
0x109a   :  { %29346 = vmatpush3.bf16.msra.mxu0 %v32463_v44  ;;  %27277 = vmatprep.mubr.msk.f32.mxu0 %vm30542_vm2, %v30543_v20 }
0x109b   :  { %29347 = vmatprep.subr.bf16.mxu0 %v30541_v9 }
0x109e   :  { %29349 = vmatpush3.bf16.msra.mxu0 %v32476_v62 }
0x109f   :  { %29386 = vmatprep.subr.bf16.mxu0 %v30541_v9 }
0x10a1   :  { %27278 = vmatmul.mubr.f32.vlgmr.msra.gmra.mrb[56].mxu0 %v33585_v63 }
0x10a2   :  { %29388 = vmatpush3.bf16.msra.mxu0 %v32388_v42  ;;  %27354 = vmatprep.mubr.msk.f32.mxu0 %vm30542_vm2, %v30543_v20 }
0x10a3   :  { %29389 = vmatprep.subr.bf16.mxu0 %v30541_v9 }
0x10a6   :  { %29391 = vmatpush3.bf16.msra.mxu0 %v32410_v49 }
0x10a7   :  { %29392 = vmatprep.subr.bf16.mxu0 %v30541_v9 }
0x1144   :  { %v16506_v17 = vpop.f32.mrb[54].mxu0  ;;  %v16991_v19 = vpop.f32.mrb[74].mxu1 }
0x1145   :  { %v29642_v34 = vadd.f32 %v33413_v58, %v16991_v19  ;;  %v27147_v61 = vpop.f32.mrb[55].mxu0  ;;  %v27213_v29 = vpop.f32.mrb[75].mxu1  ;;  %v29641_v8 = vadd.f32 %v33420_v36, %v16506_v17 }
0x1147   :  { %v17491_v56 = vrot.slane %v29642_v34, 2  ;;  %v17481_v15 = vrot.slane %v29641_v8, 2 }
0x1149   :  { %v17493_v47 = vadd.f32 %v32812_v11, %v17491_v56  ;;  %v17483_v26 = vadd.f32 %v32794_v1, %v17481_v15 }
0x114b   :  { %v22758_v38 = vmul.f32 -1.442695, %v17493_v47  ;;  %v22757_v18 = vmul.f32 -1.442695, %v17483_v26 }
0x114d   :  { %30515 = vpow2.f32 %v22758_v38 }
0x1157   :  { %v30516_v31 = vpop.eup %30515 }
0x1158   :  { %v17497_v12 = vadd.f32 1.0, %v30516_v31 }
0x115a   :  { %30517 = vrcp.f32 %v17497_v12  ;;  %v19514_v12 = vld [vmem:[%s34780_s12 + $0x8] sm:$0xff] }
0x115b   :  { %30519 = vpow2.f32 %v22757_v18 }
0x1164   :  { %v30518_v58 = vpop.eup %30517 }
0x1165   :  { %v17510_v21 = vmul.f32 %v30518_v58, %v17508_v10  ;;  %v30520_v51 = vpop.eup %30519  ;;  %v17506_v63 = vsub.f32 1.0, %v30518_v58  ;;  %v20016_v10 = vand.u32 4294901760, %v19514_v12 }
0x1166   :  { %v17487_v33 = vadd.f32 1.0, %v30520_v51 }
0x1168   :  { %30521 = vrcp.f32 %v17487_v33 }
0x1172   :  { %v30522_v59 = vpop.eup %30521 }
0x1174   :  { %v17476_v46 = vpop.f32.mrb[56].mxu0 }
0x1175   :  { %v29643_v41 = vadd.f32 %v33428_v23, %v17476_v46  ;;  %v27279_v36 = vpop.f32.mrb[57].mxu0 }
0x1177   :  { %v17501_v37 = vrot.slane %v29643_v41, 2 }
0x1179   :  { %v17503_v40 = vmul.f32 %v30522_v59, %v17501_v37  ;;  %v19516_v59 = vld [vmem:[%s34781_s13 + $0x8] sm:$0xff] }
0x117b   :  { %v17504_v57 = vadd.f32 %v32818_v54, %v17503_v40  ;;  %v19517_v40 = vld [vmem:[%s34781_s13 + $0x10] sm:$0xff] }
0x117d   :  { %30523 = vtanh.f32 %v17504_v57 }
0x1187   :  { %v30524_v16 = vpop.eup %30523 }
0x1188   :  { %v17507_v2 = vmul.f32 %v30524_v16, %v17506_v63  ;;  %v19527_v63 = vand.u32 4294901760, %v19516_v59  ;;  %v19518_v16 = vld [vmem:[%s34781_s13 + $0x18] sm:$0xff] }
0x118a   :  { %v33730_v24 = vadd.f32 %v17510_v21, %v17507_v2  ;;  %v19530_v2 = vand.u32 4294901760, %v19517_v40 }
0x118c   :  { %v17513_v22 = vrot.slane %v33730_v24, 6 }
0x118e   :  { %v17514_v32 = vsel %vm2543_vm1, %v17513_v22, 0  ;;  %v19533_v22 = vand.u32 4294901760, %v19518_v16 }
0x118f   :  { %v33734_v17 = vand.u32 4294901760, %v17514_v32 }
0x1191   :  { %v33737_v23 = vsub.f32 %v17514_v32, %v33734_v17 }
0x1193   :  { %v33740_v19 = vand.u32 4294901760, %v33737_v23 }
0x1195   :  { %v17588_v34 = vsub.f32 %v33737_v23, %v33740_v19 }
0x1197   :  { %v33744_v61 = vand.u32 4294901760, %v17588_v34  ;;  %v33963_v34 = vsub.f32 %v19518_v16, %v19533_v22 }
0x1199   :  { %27289 = vmatmul.mubr.f32.vlgmr.msra.gmra.mrb[76].mxu1 %v33744_v61  ;;  %27355 = vmatmul.mubr.f32.vlgmr.msra.gmra.mrb[58].mxu0 %v33744_v61 }
0x119a   :  { %29358 = vmatpush3.bf16.msra.mxu1 %v32702_v39  ;;  %29394 = vmatpush3.bf16.msra.mxu0 %v32622_v13  ;;  %v19004_v13 = vld [vmem:[%s34779_s11 + $0x8] sm:$0xff]  ;;  %v19006_v39 = vsel %vm5666_vm3, %v32219_v48, 0 }
0x119b   :  { %29359 = vmatprep.subr.bf16.mxu1 %v30541_v9  ;;  %29395 = vmatprep.subr.bf16.mxu0 %v30541_v9  ;;  %v33802_v29 = vand.u32 4294901760, %v19006_v39 }
0x119c   :  { %27299 = vmatprep.mubr.msk.f32.mxu1 %vm30542_vm2, %v30543_v20  ;;  %27365 = vmatprep.mubr.msk.f32.mxu0 %vm30542_vm2, %v30543_v20 }
0x119e   :  { %29361 = vmatpush3.bf16.msra.mxu1 %v32707_v28  ;;  %29397 = vmatpush3.bf16.msra.mxu0 %v32636_v35  ;;  %v19015_v35 = vand.u32 4294901760, %v19004_v13  ;;  %v19009_v28 = vsel %vm5666_vm3, %v32208_v5, 0 }
0x119f   :  { %29362 = vmatprep.subr.bf16.mxu1 %v30541_v9  ;;  %29398 = vmatprep.subr.bf16.mxu0 %v30541_v9  ;;  %v33808_v48 = vand.u32 4294901760, %v19009_v28 }
0x11a1   :  { %27300 = vmatmul.mubr.f32.vlgmr.msra.gmra.mrb[76].mxu1 %v33734_v17  ;;  %27366 = vmatmul.mubr.f32.vlgmr.msra.gmra.mrb[58].mxu0 %v33734_v17 }
0x11a2   :  { %29364 = vmatpush3.bf16.msra.mxu1 %v32713_v55  ;;  %29400 = vmatpush3.bf16.msra.mxu0 %v32403_v14  ;;  %v19003_v14 = vld [vmem:[%s34779_s11] sm:$0xff] }
0x11a3   :  { %29365 = vmatprep.subr.bf16.mxu1 %v30541_v9  ;;  %29401 = vmatprep.subr.bf16.mxu0 %v30541_v9 }
0x11a4   :  { %27310 = vmatprep.mubr.msk.f32.mxu1 %vm30542_vm2, %v30543_v20  ;;  %27376 = vmatprep.mubr.msk.f32.mxu0 %vm30542_vm2, %v30543_v20 }
0x11a6   :  { %29367 = vmatpush3.bf16.msra.mxu1 %v32718_v7  ;;  %29403 = vmatpush3.bf16.msra.mxu0 %v32422_v25  ;;  %v19012_v25 = vand.u32 4294901760, %v19003_v14  ;;  %v33800_v7 = vsub.f32 %v19004_v13, %v19015_v35 }
0x11a7   :  { %29368 = vmatprep.subr.bf16.mxu1 %v30541_v9  ;;  %29404 = vmatprep.subr.bf16.mxu0 %v30541_v9 }
0x11a8   :  { %v33798_v55 = vsub.f32 %v19003_v14, %v19012_v25  ;;  %v19108_v56 = vand.u32 4294901760, %v33800_v7 }
0x11a9   :  { %27311 = vmatmul.mubr.f32.vlgmr.msra.gmra.mrb[76].mxu1 %v33737_v23  ;;  %27377 = vmatmul.mubr.f32.vlgmr.msra.gmra.mrb[58].mxu0 %v33737_v23 }
0x11aa   :  { %29370 = vmatpush3.bf16.msra.mxu1 %v32692_v52  ;;  %29406 = vmatpush3.bf16.msra.mxu0 %v32388_v42  ;;  %v19101_v5 = vand.u32 4294901760, %v33798_v55  ;;  %v19109_v38 = vsub.f32 %v33800_v7, %v19108_v56 }
0x11ab   :  { %29371 = vmatprep.subr.bf16.mxu1 %v30541_v9  ;;  %29407 = vmatprep.subr.bf16.mxu0 %v30541_v9 }
0x11ac   :  { %27321 = vmatprep.mubr.msk.f32.mxu1 %vm30542_vm2, %v30543_v20  ;;  %27387 = vmatprep.mubr.msk.f32.mxu0 %vm30542_vm2, %v30543_v20  ;;  %v19102_v47 = vsub.f32 %v33798_v55, %v19101_v5  ;;  %v19110_v26 = vand.u32 4294901760, %v19109_v38 }
0x11ae   :  { %29373 = vmatpush3.bf16.msra.mxu1 %v32694_v43  ;;  %29409 = vmatpush3.bf16.msra.mxu0 %v32410_v49  ;;  %v19103_v15 = vand.u32 4294901760, %v19102_v47 }
0x11af   :  { %29374 = vmatprep.subr.bf16.mxu1 %v30541_v9  ;;  %29410 = vmatprep.subr.bf16.mxu0 %v30541_v9 }
0x11b0   :  { %v29462_v31 = vpack.c.bf16 %v19110_v26, %v19103_v15  ;;  %v30538_v26 = vld [vmem:[%s34777_s10 + $0x1] sm:$0x1] }
0x11b1   :  { %27322 = vmatmul.mubr.f32.vlgmr.msra.gmra.mrb[76].mxu1 %v33740_v19  ;;  %27388 = vmatmul.mubr.f32.vlgmr.msra.gmra.mrb[58].mxu0 %v33740_v19 }
0x11b2   :  { %29376 = vmatpush3.bf16.msra.mxu1 %v32731_v53  ;;  %29412 = vmatpush3.bf16.msra.mxu0 %v32431_v27  ;;  %v33819_v53 = vsub.f32 %v19006_v39, %v33802_v29  ;;  %v33824_v27 = vsub.f32 %v19009_v28, %v33808_v48 }
0x11b3   :  { %29377 = vmatprep.subr.bf16.mxu1 %v30541_v9  ;;  %29413 = vmatprep.subr.bf16.mxu0 %v30541_v9 }
0x11b4   :  { %27332 = vmatprep.mubr.msk.f32.mxu1 %vm30542_vm2, %v30543_v20  ;;  %27398 = vmatprep.mubr.msk.f32.mxu0 %vm30542_vm2, %v30543_v20  ;;  %v33833_v8 = vand.u32 4294901760, %v33819_v53 }
0x11b6   :  { %29379 = vmatpush3.bf16.msra.mxu1 %v32736_v50  ;;  %29415 = vmatpush3.bf16.msra.mxu0 %v32452_v0  ;;  %v33839_v0 = vpack.c.bf16 %v19015_v35, %v19012_v25  ;;  %v33842_v50 = vand.u32 4294901760, %v33824_v27 }
0x11b7   :  { %29380 = vmatprep.subr.bf16.mxu1 %v30541_v9  ;;  %29416 = vmatprep.subr.bf16.mxu0 %v30541_v9 }
0x11b9   :  { %27333 = vmatmul.mubr.f32.vlgmr.msra.gmra.mrb[76].mxu1 %v33734_v17  ;;  %27399 = vmatmul.mubr.f32.vlgmr.msra.gmra.mrb[58].mxu0 %v33734_v17 }
0x11ba   :  { %29382 = vmatpush3.bf16.msra.mxu1 %v32692_v52  ;;  %29418 = vmatpush3.bf16.msra.mxu0 %v32388_v42  ;;  %v19081_v42 = vsub.f32 %v33819_v53, %v33833_v8  ;;  %v19091_v52 = vsub.f32 %v33824_v27, %v33842_v50 }
0x11bb   :  { %29383 = vmatprep.subr.bf16.mxu1 %v30541_v9  ;;  %29419 = vmatprep.subr.bf16.mxu0 %v30541_v9 }
0x11bc   :  { %27343 = vmatprep.mubr.msk.f32.mxu1 %vm30542_vm2, %v30543_v20  ;;  %27409 = vmatprep.mubr.msk.f32.mxu0 %vm30542_vm2, %v30543_v20  ;;  %v33858_v18 = vand.u32 4294901760, %v19081_v42 }
0x11be   :  { %29385 = vmatpush3.bf16.msra.mxu1 %v32694_v43  ;;  %29421 = vmatpush3.bf16.msra.mxu0 %v32410_v49  ;;  %v33864_v49 = vand.u32 4294901760, %v19091_v52  ;;  %v29466_v43 = vpack.c.bf16 %v33800_v7, %v33798_v55  ;;  %v19626_v7 = vand.u32 4294901760, %v33963_v34 }
0x11bf   :  { %29422 = vmatprep.subr.bf16.mxu1 %v30541_v9  ;;  %29459 = vmatprep.subr.bf16.mxu0 %v33839_v0 }
0x11c1   :  { %27344 = vmatmul.mubr.f32.vlgmr.msra.gmra.mrb[76].mxu1 %v33734_v17  ;;  %27410 = vmatmul.mubr.f32.vlgmr.msra.gmra.mrb[58].mxu0 %v33734_v17 }
0x11c2   :  { %29424 = vmatpush3.bf16.msra.mxu1 %v32463_v44  ;;  %29461 = vmatpush3.bf16.msra.mxu0 %v33839_v0 }
0x11c3   :  { %27482 = vmatprep.mubr.f32.mxu0 %v33858_v18  ;;  %29425 = vmatprep.subr.bf16.mxu1 %v30541_v9 }
0x11c4   :  { %27420 = vmatprep.mubr.msk.f32.mxu1 %vm30542_vm2, %v30543_v20  ;;  %29463 = vmatprep.subr.bf16.mxu0 %v29462_v31 }
0x11c5   :  { %27483 = vmatmul.mubr.f32.vlgmr.msra.gmra.mrb[60].mxu0 %v33864_v49 }
0x11c6   :  { %29427 = vmatpush3.bf16.msra.mxu1 %v32476_v62  ;;  %27489 = vmatprep.mubr.f32.mxu0 %v33802_v29 }
0x11c7   :  { %29428 = vmatprep.subr.bf16.mxu1 %v30541_v9  ;;  %29465 = vmatpush3.bf16.msra.mxu0 %v29462_v31 }
0x11c8   :  { %29467 = vmatprep.subr.bf16.mxu0 %v29466_v43 }
0x11c9   :  { %27421 = vmatmul.mubr.f32.vlgmr.msra.gmra.mrb[78].mxu1 %v33744_v61  ;;  %v33966_v61 = vpack.c.bf16 %v19533_v22, %v19530_v2 }
0x11ca   :  { %29430 = vmatpush3.bf16.msra.mxu1 %v32514_v3  ;;  %27431 = vmatprep.mubr.msk.f32.mxu1 %vm30542_vm2, %v30543_v20  ;;  %v29474_v3 = vpack.c.bf16 %v19108_v56, %v19101_v5  ;;  %v19627_v5 = vsub.f32 %v33963_v34, %v19626_v7 }
0x11cb   :  { %29431 = vmatprep.subr.bf16.mxu1 %v30541_v9 }
0x11cd   :  { %27490 = vmatmul.mubr.f32.vlgmr.msra.gmra.mrb[60].mxu0 %v33808_v48 }
0x11ce   :  { %29433 = vmatpush3.bf16.msra.mxu1 %v32520_v6  ;;  %27496 = vmatprep.mubr.f32.mxu0 %v33819_v53  ;;  %v19513_v6 = vld [vmem:[%s34780_s12] sm:$0xff] }
0x11cf   :  { %29434 = vmatprep.subr.bf16.mxu1 %v30541_v9  ;;  %29469 = vmatpush3.bf16.msra.mxu0 %v29466_v43 }
0x11d0   :  { %29471 = vmatprep.subr.bf16.mxu0 %v33839_v0 }
0x11d1   :  { %27432 = vmatmul.mubr.f32.vlgmr.msra.gmra.mrb[78].mxu1 %v33734_v17 }
0x11d2   :  { %29436 = vmatpush3.bf16.msra.mxu1 %v32526_v30  ;;  %27442 = vmatprep.mubr.msk.f32.mxu1 %vm30542_vm2, %v30543_v20  ;;  %v20013_v30 = vand.u32 4294901760, %v19513_v6 }
0x11d3   :  { %29437 = vmatprep.subr.bf16.mxu1 %v30541_v9 }
0x11d4   :  { %v20101_v58 = vsub.f32 %v19513_v6, %v20013_v30  ;;  %v29518_v41 = vpack.c.bf16 %v20016_v10, %v20013_v30 }
0x11d5   :  { %27497 = vmatmul.mubr.f32.vlgmr.msra.gmra.mrb[60].mxu0 %v33824_v27 }
0x11d6   :  { %29439 = vmatpush3.bf16.msra.mxu1 %v32541_v60  ;;  %27503 = vmatprep.mubr.f32.mxu0 %v33833_v8  ;;  %v20108_v60 = vsub.f32 %v19514_v12, %v20016_v10  ;;  %v20102_v21 = vand.u32 4294901760, %v20101_v58 }
0x11d7   :  { %29440 = vmatprep.subr.bf16.mxu1 %v30541_v9  ;;  %29473 = vmatpush3.bf16.msra.mxu0 %v33839_v0 }
0x11d8   :  { %29475 = vmatprep.subr.bf16.mxu0 %v29474_v3  ;;  %v20109_v51 = vand.u32 4294901760, %v20108_v60  ;;  %v20103_v33 = vsub.f32 %v20101_v58, %v20102_v21 }
0x11d9   :  { %27443 = vmatmul.mubr.f32.vlgmr.msra.gmra.mrb[78].mxu1 %v33737_v23  ;;  %v33959_v23 = vsub.f32 %v19516_v59, %v19527_v63 }
0x11da   :  { %29442 = vmatpush3.bf16.msra.mxu1 %v32463_v44  ;;  %27453 = vmatprep.mubr.msk.f32.mxu1 %vm30542_vm2, %v30543_v20  ;;  %v20110_v46 = vsub.f32 %v20108_v60, %v20109_v51  ;;  %v20104_v36 = vand.u32 4294901760, %v20103_v33 }
0x11db   :  { %29443 = vmatprep.subr.bf16.mxu1 %v30541_v9  ;;  %v19612_v13 = vand.u32 4294901760, %v33959_v23 }
0x11dd   :  { %27504 = vmatmul.mubr.f32.vlgmr.msra.gmra.mrb[60].mxu0 %v33842_v50  ;;  %v19613_v35 = vsub.f32 %v33959_v23, %v19612_v13 }
0x11de   :  { %29445 = vmatpush3.bf16.msra.mxu1 %v32476_v62  ;;  %27510 = vmatprep.mubr.f32.mxu0 %v33802_v29 }
0x11df   :  { %29446 = vmatprep.subr.bf16.mxu1 %v30541_v9  ;;  %29477 = vmatpush3.bf16.msra.mxu0 %v29474_v3  ;;  %v19614_v28 = vand.u32 4294901760, %v19613_v35  ;;  %v30539_v3 = vld [vmem:[%s34777_s10] sm:$0x1]  ;;  %v20768_v35 = vld [vmem:[%s34782_s15 + $0x8] sm:$0xff] }
0x11e0   :  { %29479 = vmatprep.subr.bf16.mxu0 %v33839_v0 }
0x11e1   :  { %27454 = vmatmul.mubr.f32.vlgmr.msra.gmra.mrb[78].mxu1 %v33740_v19  ;;  %v33961_v19 = vsub.f32 %v19517_v40, %v19530_v2 }
0x11e2   :  { %29448 = vmatpush3.bf16.msra.mxu1 %v32572_v45  ;;  %27464 = vmatprep.mubr.msk.f32.mxu1 %vm30542_vm2, %v30543_v20  ;;  %v20111_v45 = vand.u32 4294901760, %v20110_v46 }
0x11e3   :  { %29449 = vmatprep.subr.bf16.mxu1 %v30541_v9  ;;  %v19619_v55 = vand.u32 4294901760, %v33961_v19  ;;  %v29498_v38 = vpack.c.bf16 %v33963_v34, %v33961_v19 }
0x11e4   :  { %v29522_v37 = vpack.c.bf16 %v20111_v45, %v20104_v36 }
0x11e5   :  { %27511 = vmatmul.mubr.f32.vlgmr.msra.gmra.mrb[60].mxu0 %v33808_v48 }
0x11e6   :  { %29451 = vmatpush3.bf16.msra.mxu1 %v32586_v4  ;;  %27517 = vmatprep.mubr.f32.mxu0 %v33802_v29  ;;  %v29526_v4 = vpack.c.bf16 %v20108_v60, %v20101_v58 }
0x11e7   :  { %29452 = vmatprep.subr.bf16.mxu1 %v30541_v9  ;;  %29481 = vmatpush3.bf16.msra.mxu0 %v33839_v0  ;;  %v33985_v0 = vpack.c.bf16 %v19626_v7, %v19619_v55 }
0x11e8   :  { %29519 = vmatprep.subr.bf16.mxu0 %v29518_v41 }
0x11e9   :  { %27465 = vmatmul.mubr.f32.vlgmr.msra.gmra.mrb[78].mxu1 %v33734_v17 }
0x11ea   :  { %29454 = vmatpush3.bf16.msra.mxu1 %v32463_v44  ;;  %27475 = vmatprep.mubr.msk.f32.mxu1 %vm30542_vm2, %v30543_v20  ;;  %v29534_v44 = vpack.c.bf16 %v20109_v51, %v20102_v21  ;;  %v18999_v21 = vrot.slane %v33730_v24, 7 }
0x11eb   :  { %29455 = vmatprep.subr.bf16.mxu1 %v30541_v9 }
0x11ed   :  { %27518 = vmatmul.mubr.f32.vlgmr.msra.gmra.mrb[60].mxu0 %v33808_v48 }
0x11ee   :  { %29457 = vmatpush3.bf16.msra.mxu1 %v32476_v62  ;;  %29521 = vmatpush3.bf16.msra.mxu0 %v29518_v41  ;;  %v19515_v62 = vld [vmem:[%s34781_s13] sm:$0xff] }
0x11ef   :  { %27590 = vmatprep.mubr.f32.mxu0 %v33858_v18  ;;  %29523 = vmatprep.subr.bf16.mxu0 %v29522_v37  ;;  %v19524_v57 = vand.u32 4294901760, %v19515_v62 }
0x11f0   :  { %29482 = vmatprep.subr.bf16.mxu1 %v30541_v9 }
0x11f1   :  { %27476 = vmatmul.mubr.f32.vlgmr.msra.gmra.mrb[78].mxu1 %v33734_v17  ;;  %27591 = vmatmul.mubr.f32.vlgmr.msra.gmra.mrb[62].mxu0 %v33864_v49  ;;  %v33955_v32 = vpack.c.bf16 %v19527_v63, %v19524_v57  ;;  %v33957_v17 = vsub.f32 %v19515_v62, %v19524_v57 }
0x11f2   :  { %27597 = vmatprep.mubr.f32.mxu0 %v33802_v29  ;;  %29525 = vmatpush3.bf16.msra.mxu0 %v29522_v37 }
0x11f3   :  { %29527 = vmatprep.subr.bf16.mxu0 %v29526_v4  ;;  %27528 = vmatprep.mubr.msk.f32.mxu1 %vm30542_vm2, %v30543_v20  ;;  %v19605_v14 = vand.u32 4294901760, %v33957_v17  ;;  %v29495_v47 = vpack.c.bf16 %v33959_v23, %v33957_v17 }
0x11f4   :  { %29484 = vmatpush3.bf16.msra.mxu1 %v33955_v32 }
0x11f5   :  { %29485 = vmatprep.subr.bf16.mxu1 %v30541_v9  ;;  %v19606_v25 = vsub.f32 %v33957_v17, %v19605_v14 }
0x11f7   :  { %v19607_v39 = vand.u32 4294901760, %v19606_v25 }
0x11f8   :  { %29487 = vmatpush3.bf16.msra.mxu1 %v33966_v61 }
0x11f9   :  { %27598 = vmatmul.mubr.f32.vlgmr.msra.gmra.mrb[62].mxu0 %v33808_v48  ;;  %29488 = vmatprep.subr.bf16.mxu1 %v30541_v9 }
0x11fa   :  { %27604 = vmatprep.mubr.f32.mxu0 %v33819_v53  ;;  %29529 = vmatpush3.bf16.msra.mxu0 %v29526_v4  ;;  %v19628_v53 = vand.u32 4294901760, %v19627_v5  ;;  %v30540_v4 = vld [vmem:[%s34777_s10 + $0x2] sm:$0x1] }
0x11fb   :  { %29531 = vmatprep.subr.bf16.mxu0 %v29518_v41 }
0x1201   :  { %27605 = vmatmul.mubr.f32.vlgmr.msra.gmra.mrb[62].mxu0 %v33824_v27 }
0x1202   :  { %27611 = vmatprep.mubr.f32.mxu0 %v33833_v8  ;;  %29533 = vmatpush3.bf16.msra.mxu0 %v29518_v41  ;;  %v33983_v8 = vpack.c.bf16 %v19612_v13, %v19605_v14 }
0x1203   :  { %29535 = vmatprep.subr.bf16.mxu0 %v29534_v44 }
0x1209   :  { %27612 = vmatmul.mubr.f32.vlgmr.msra.gmra.mrb[62].mxu0 %v33842_v50 }
0x120a   :  { %27618 = vmatprep.mubr.f32.mxu0 %v33802_v29  ;;  %29537 = vmatpush3.bf16.msra.mxu0 %v29534_v44 }
0x120b   :  { %29539 = vmatprep.subr.bf16.mxu0 %v29518_v41 }
0x1211   :  { %27619 = vmatmul.mubr.f32.vlgmr.msra.gmra.mrb[62].mxu0 %v33808_v48 }
0x1212   :  { %27625 = vmatprep.mubr.f32.mxu0 %v33802_v29  ;;  %29541 = vmatpush3.bf16.msra.mxu0 %v29518_v41  ;;  %v29489_v29 = vpack.c.bf16 %v19614_v28, %v19607_v39  ;;  %v20873_v28 = vand.u32 4294901760, %v20768_v35 }
0x1219   :  { %27626 = vmatmul.mubr.f32.vlgmr.msra.gmra.mrb[62].mxu0 %v33808_v48  ;;  %v19620_v48 = vsub.f32 %v33961_v19, %v19619_v55 }
0x121b   :  { %v19621_v56 = vand.u32 4294901760, %v19620_v48  ;;  %v21267_v48 = vsub.f32 %v20768_v35, %v20873_v28 }
0x121d   :  { %v29492_v27 = vpack.c.bf16 %v19628_v53, %v19621_v56  ;;  %v21268_v56 = vand.u32 4294901760, %v21267_v48 }
0x1294   :  { %v17997_v50 = vpop.f32.mrb[76].mxu1  ;;  %v18482_v15 = vpop.f32.mrb[58].mxu0 }
0x1295   :  { %v29645_v42 = vadd.f32 %v30538_v26, %v18482_v15  ;;  %v27345_v52 = vpop.f32.mrb[77].mxu1  ;;  %v27411_v31 = vpop.f32.mrb[59].mxu0  ;;  %v29644_v6 = vadd.f32 %v30539_v3, %v17997_v50 }
0x1297   :  { %v18982_v18 = vrot.slane %v29645_v42, 1  ;;  %v18972_v30 = vrot.slane %v29644_v6, 1 }
0x1299   :  { %v18984_v49 = vadd.f32 %v32812_v11, %v18982_v18  ;;  %v18974_v58 = vadd.f32 %v32794_v1, %v18972_v30  ;;  %v30544_v30 = vmov 1966171168  }
0x129b   :  { %v22760_v43 = vmul.f32 -1.442695, %v18984_v49  ;;  %v22759_v60 = vmul.f32 -1.442695, %v18974_v58 }
0x129d   :  { %30525 = vpow2.f32 %v22760_v43 }
0x12a7   :  { %v30526_v12 = vpop.eup %30525 }
0x12a8   :  { %v18988_v10 = vadd.f32 1.0, %v30526_v12  ;;  %v20008_v12 = vlaneseq }
0x12aa   :  { %30527 = vrcp.f32 %v18988_v10  ;;  %v20527_v10 = vunpack.c.l.s4 %v30544_v30  ;;  %v20009_v58 = vshrl.u32 %v20008_v12, 7 }
0x12ab   :  { %30529 = vpow2.f32 %v22759_v60 }
0x12ac   :  { %v20528_v60 = vunpack.c.0.s8 %v20527_v10 }
0x12b4   :  { %v30528_v51 = vpop.eup %30527 }
0x12b5   :  { %v19001_v33 = vmul.f32 %v30528_v51, %v18999_v21  ;;  %v30530_v11 = vpop.eup %30529  ;;  %v18997_v40 = vsub.f32 1.0, %v30528_v51  ;;  %v20531_v21 = vsub.s32 %v20528_v60, %v20009_v58 }
0x12b6   :  { %v18978_v36 = vadd.f32 1.0, %v30530_v11 }
0x12b8   :  { %30531 = vrcp.f32 %v18978_v36 }
0x12c0   :  { %v33996_v46 = vpop.f32.mrb[60].mxu0 }
0x12c1   :  { %v33998_v41 = vpop.f32.mrb[61].mxu0  ;;  %v20581_v11 = vrot.slane %v33996_v46, %v20531_v21 }
0x12c2   :  { %v30532_v62 = vpop.eup %30531  ;;  %v20525_v51 = vcombine.high %v33998_v41, %v33998_v41  ;;  %v20532_v36 = vrot.slane %v33998_v41, %v20531_v21 }
0x12c4   :  { %v18967_v45 = vpop.f32.mrb[78].mxu1 }
0x12c5   :  { %v27477_v37 = vpop.f32.mrb[79].mxu1  ;;  %v29646_v1 = vadd.f32 %v30540_v4, %v18967_v45  ;;  %v20539_v45 = vrot.slane %v20525_v51, %v20531_v21 }
0x12c7   :  { %v18992_v44 = vrot.slane %v29646_v1, 1  ;;  %v20589_v1 = vcombine.high %v20581_v11, %v20581_v11 }
0x12c9   :  { %v18994_v24 = vmul.f32 %v30532_v62, %v18992_v44  ;;  %v20540_v44 = vcombine.high %v20532_v36, %v20532_v36  ;;  %v20541_v62 = vcombine.high %v20539_v45, %v20539_v45 }
0x12cb   :  { %v18995_v59 = vadd.f32 %v32818_v54, %v18994_v24  ;;  %v20767_v54 = vld [vmem:[%s34782_s15] sm:$0xff]  ;;  %v20597_v24 = vrot.slane %v20581_v11, %v20531_v21 }
0x12cc   :  { %v20870_v39 = vand.u32 4294901760, %v20767_v54 }
0x12cd   :  { %30533 = vtanh.f32 %v18995_v59 }
0x12ce   :  { %v34046_v55 = vpack.c.bf16 %v20873_v28, %v20870_v39 }
0x12d0   :  { %29567 = vmatprep.subr.bf16.mxu0 %v34046_v55 }
0x12d1   :  { %29569 = vmatpush3.bf16.msra.mxu0 %v34046_v55 }
0x12d7   :  { %v30534_v57 = vpop.eup %30533 }
0x12d8   :  { %v18998_v63 = vmul.f32 %v30534_v57, %v18997_v40  ;;  %v20611_v40 = vrot.slane %v20589_v1, %v20531_v21  ;;  %v34078_v57 = vsub.s32 0, %v20009_v58 }
0x12da   :  { %v19002_v16 = vadd.f32 %v19001_v33, %v18998_v63  ;;  %v20574_v33 = vcombine.high %v33996_v46, %v33996_v46  ;;  %v20569_v46 = vrot.slane %v20541_v62, %v20531_v21 }
0x12dc   :  { %v19520_v2 = vrot.slane %v19002_v16, 7  ;;  %v20588_v4 = vrot.slane %v20574_v33, %v20531_v21  ;;  %v20548_v16 = vrot.slane %v20532_v36, %v20531_v21 }
0x12de   :  { %v19521_v22 = vsel %vm2543_vm1, %v19520_v2, 0  ;;  %v20590_v59 = vcombine.high %v20588_v4, %v20588_v4  ;;  %v34080_v63 = vrot.slane %v20588_v4, %v20531_v21  ;;  %v20555_v2 = vrot.slane %v20539_v45, %v20531_v21 }
0x12df   :  { %v19592_v17 = vand.u32 4294901760, %v19521_v22 }
0x12e0   :  { %v34082_v41 = vrot.slane %v20590_v59, %v20531_v21  ;;  %v20571_v28 = vcombine.high %v20555_v2, %v20555_v2 }
0x12e1   :  { %v19593_v23 = vsub.f32 %v19521_v22, %v19592_v17  ;;  %v20562_v22 = vrot.slane %v20540_v44, %v20531_v21 }
0x12e3   :  { %v19594_v19 = vand.u32 4294901760, %v19593_v23 }
0x12e5   :  { %v19595_v14 = vsub.f32 %v19593_v23, %v19594_v19 }
0x12e7   :  { %v19596_v25 = vand.u32 4294901760, %v19595_v14 }
0x12e9   :  { %27529 = vmatmul.mubr.f32.vlgmr.msra.gmra.mrb[80].mxu1 %v19596_v25  ;;  %v34087_v25 = vrot.slane %v20597_v24, %v34078_v57 }
0x12ea   :  { %29490 = vmatpush3.bf16.msra.mxu1 %v29489_v29  ;;  %27539 = vmatprep.mubr.msk.f32.mxu1 %vm30542_vm2, %v30543_v20  ;;  %v21260_v29 = vsub.f32 %v20767_v54, %v20870_v39  ;;  %v20570_v54 = vcombine.high %v20548_v16, %v20548_v16  ;;  %v34091_v39 = vrot.slane %v20611_v40, %v34078_v57 }
0x12eb   :  { %29491 = vmatprep.subr.bf16.mxu1 %v30541_v9 }
0x12ec   :  { %v34005_v34 = vpop.f32.mrb[62].mxu0  ;;  %v21261_v5 = vand.u32 4294901760, %v21260_v29  ;;  %v34068_v6 = vpack.c.bf16 %v21267_v48, %v21260_v29 }
0x12ed   :  { %v34007_v13 = vpop.f32.mrb[63].mxu0 }
0x12ee   :  { %29493 = vmatpush3.bf16.msra.mxu1 %v29492_v27  ;;  %v21262_v53 = vsub.f32 %v21260_v29, %v21261_v5  ;;  %v21269_v27 = vsub.f32 %v21267_v48, %v21268_v56  ;;  %v34101_v48 = vrot.slane %v34080_v63, %v34078_v57 }
0x12ef   :  { %29494 = vmatprep.subr.bf16.mxu1 %v30541_v9 }
0x12f1   :  { %27540 = vmatmul.mubr.f32.vlgmr.msra.gmra.mrb[80].mxu1 %v19592_v17 }
0x12f2   :  { %29496 = vmatpush3.bf16.msra.mxu1 %v29495_v47  ;;  %27550 = vmatprep.mubr.msk.f32.mxu1 %vm30542_vm2, %v30543_v20  ;;  %v34058_v47 = vpack.c.bf16 %v21268_v56, %v21261_v5 }
0x12f3   :  { %29497 = vmatprep.subr.bf16.mxu1 %v30541_v9 }
0x12f6   :  { %29499 = vmatpush3.bf16.msra.mxu1 %v29498_v38  ;;  %v21263_v38 = vand.u32 4294901760, %v21262_v53 }
0x12f7   :  { %29500 = vmatprep.subr.bf16.mxu1 %v30541_v9 }
0x12f9   :  { %27551 = vmatmul.mubr.f32.vlgmr.msra.gmra.mrb[80].mxu1 %v19593_v23  ;;  %v20621_v23 = vcombine.high %v20611_v40, %v20611_v40 }
0x12fa   :  { %29502 = vmatpush3.bf16.msra.mxu1 %v33955_v32  ;;  %27561 = vmatprep.mubr.msk.f32.mxu1 %vm30542_vm2, %v30543_v20 }
0x12fb   :  { %29503 = vmatprep.subr.bf16.mxu1 %v30541_v9 }
0x12fe   :  { %29505 = vmatpush3.bf16.msra.mxu1 %v33966_v61 }
0x12ff   :  { %29506 = vmatprep.subr.bf16.mxu1 %v30541_v9 }
0x1301   :  { %27562 = vmatmul.mubr.f32.vlgmr.msra.gmra.mrb[80].mxu1 %v19594_v19 }
0x1302   :  { %29508 = vmatpush3.bf16.msra.mxu1 %v33983_v8  ;;  %27572 = vmatprep.mubr.msk.f32.mxu1 %vm30542_vm2, %v30543_v20  ;;  %v21270_v8 = vand.u32 4294901760, %v21269_v27  ;;  %v34108_v27 = vrot.slane %v20621_v23, %v34078_v57 }
0x1303   :  { %29509 = vmatprep.subr.bf16.mxu1 %v30541_v9 }
0x1306   :  { %29511 = vmatpush3.bf16.msra.mxu1 %v33985_v0  ;;  %v34061_v0 = vpack.c.bf16 %v21270_v8, %v21263_v38  ;;  %v20626_v38 = vrot.slane %v20548_v16, %v34078_v57  ;;  %v20630_v8 = vrot.slane %v20562_v22, %v34078_v57 }
0x1307   :  { %29512 = vmatprep.subr.bf16.mxu1 %v30541_v9 }
0x1309   :  { %27573 = vmatmul.mubr.f32.vlgmr.msra.gmra.mrb[80].mxu1 %v19592_v17 }
0x130a   :  { %29514 = vmatpush3.bf16.msra.mxu1 %v33955_v32  ;;  %27583 = vmatprep.mubr.msk.f32.mxu1 %vm30542_vm2, %v30543_v20  ;;  %v20769_v32 = vld [vmem:[%s34782_s15 + $0x10] sm:$0xff] }
0x130b   :  { %29515 = vmatprep.subr.bf16.mxu1 %v30541_v9  ;;  %v20770_v9 = vld [vmem:[%s34782_s15 + $0x18] sm:$0xff]  ;;  %v20876_v20 = vand.u32 4294901760, %v20769_v32 }
0x130d   :  { %v21274_v50 = vsub.f32 %v20769_v32, %v20876_v20 }
0x130e   :  { %29517 = vmatpush3.bf16.msra.mxu1 %v33966_v61  ;;  %v20879_v61 = vand.u32 4294901760, %v20770_v9 }
0x130f   :  { %29543 = vmatprep.subr.bf16.mxu1 %v34046_v55  ;;  %v21275_v26 = vand.u32 4294901760, %v21274_v50 }
0x1310   :  { %v34048_v7 = vpack.c.bf16 %v20879_v61, %v20876_v20  ;;  %v21281_v15 = vsub.f32 %v20770_v9, %v20879_v61  ;;  %v20572_v9 = vcombine.high %v20562_v22, %v20562_v22  ;;  %v20573_v20 = vcombine.high %v20569_v46, %v20569_v46  ;;  %v22761_v61 = vld [vmem:[%s34783_s14] ss:$0 sm:$0xff] }
0x1311   :  { %27584 = vmatmul.mubr.f32.vlgmr.msra.gmra.mrb[80].mxu1 %v19592_v17  ;;  %v21276_v52 = vsub.f32 %v21274_v50, %v21275_v26  ;;  %v20619_v17 = vcombine.high %v20597_v24, %v20597_v24 }
0x1312   :  { %29545 = vmatpush3.bf16.msra.mxu1 %v34046_v55  ;;  %29571 = vmatprep.subr.bf16.mxu0 %v34048_v7  ;;  %v21282_v42 = vand.u32 4294901760, %v21281_v15  ;;  %v34076_v37 = vpack.c.bf16 %v21281_v15, %v21274_v50  ;;  %v20634_v50 = vrot.slane %v20570_v54, %v34078_v57 }
0x1313   :  { %29547 = vmatprep.subr.bf16.mxu1 %v34048_v7  ;;  %29573 = vmatpush3.bf16.msra.mxu0 %v34048_v7  ;;  %v21277_v49 = vand.u32 4294901760, %v21276_v52  ;;  %v34097_v29 = vrot.slane %v20619_v17, %v34078_v57  ;;  %v34125_v52 = vrot.slane %v20571_v28, %v34078_v57 }
0x1314   :  { %29575 = vmatprep.subr.bf16.mxu0 %v34058_v47  ;;  %v21283_v31 = vsub.f32 %v21281_v15, %v21282_v42  ;;  %v34064_v18 = vpack.c.bf16 %v21282_v42, %v21275_v26  ;;  %v34114_v15 = vrot.slane %v20555_v2, %v34078_v57  ;;  %v34122_v42 = vrot.slane %v20569_v46, %v34078_v57 }
0x1316   :  { %29549 = vmatpush3.bf16.msra.mxu1 %v34048_v7  ;;  %v21284_v43 = vand.u32 4294901760, %v21283_v31  ;;  %v34128_v31 = vrot.slane %v20573_v20, %v34078_v57 }
0x1317   :  { %29551 = vmatprep.subr.bf16.mxu1 %v34061_v0 }
0x1318   :  { %v34066_v3 = vpack.c.bf16 %v21284_v43, %v21277_v49 }
0x13e4   :  { %v20004_v19 = vpop.f32.mrb[80].mxu1 }
0x13e5   :  { %v20011_v35 = vrot.slane %v20004_v19, %v34078_v57  ;;  %v27585_v32 = vpop.f32.mrb[81].mxu1 }
0x13e7   :  { %v29648_v5 = vadd.f32 %v34007_v13, %v20011_v35  ;;  %v29647_v56 = vadd.f32 %v34005_v34, %v20011_v35  ;;  %v20638_v34 = vrot.slane %v20572_v9, %v34078_v57 }
0x13e9   :  { %v34116_v26 = vadd.f32 %v29648_v5, %v22761_v61  ;;  %v34118_v13 = vadd.f32 %v29647_v56, %v22761_v61 }
0x13eb   :  { %v20703_v49 = vadd.f32 %v20626_v38, %v34116_v26  ;;  %v20704_v43 = vadd.f32 %v20626_v38, %v34118_v13  ;;  %v20705_v12 = vadd.f32 %v20630_v8, %v34116_v26  ;;  %v20706_v30 = vadd.f32 %v20630_v8, %v34118_v13 }
0x13ec   :  { %v20707_v10 = vadd.f32 %v20634_v50, %v34116_v26  ;;  %v20708_v58 = vadd.f32 %v20634_v50, %v34118_v13  ;;  %v20709_v60 = vadd.f32 %v20638_v34, %v34116_v26  ;;  %v20710_v21 = vadd.f32 %v20638_v34, %v34118_v13 }
0x13ed   :  { %v20735_v51 = vmax.f32 %v20703_v49, 0.0  ;;  %v20736_v33 = vmax.f32 %v20704_v43, 0.0  ;;  %v20737_v11 = vmax.f32 %v20705_v12, 0.0  ;;  %v20738_v36 = vmax.f32 %v20706_v30, 0.0 }
0x13ee   :  { %v20739_v45 = vmax.f32 %v20707_v10, 0.0  ;;  %v20740_v4 = vmax.f32 %v20708_v58, 0.0  ;;  %v20741_v1 = vmax.f32 %v20709_v60, 0.0  ;;  %v20742_v44 = vmax.f32 %v20710_v21, 0.0 }
0x13ef   :  { %v20774_v62 = vsel %vm2543_vm1, %v20735_v51, 0  ;;  %v20777_v24 = vsel %vm2543_vm1, %v20736_v33, 0  ;;  %v20780_v59 = vsel %vm2543_vm1, %v20737_v11, 0  ;;  %v20783_v40 = vsel %vm2543_vm1, %v20738_v36, 0 }
0x13f0   :  { %v34142_v16 = vand.u32 4294901760, %v20774_v62  ;;  %v34144_v2 = vand.u32 4294901760, %v20777_v24  ;;  %v34146_v22 = vand.u32 4294901760, %v20780_v59  ;;  %v34148_v46 = vand.u32 4294901760, %v20783_v40 }
0x13f1   :  { %v20786_v17 = vsel %vm2543_vm1, %v20739_v45, 0  ;;  %v20789_v23 = vsel %vm2543_vm1, %v20740_v4, 0  ;;  %v20792_v19 = vsel %vm2543_vm1, %v20741_v1, 0  ;;  %v20795_v54 = vsel %vm2543_vm1, %v20742_v44, 0 }
0x13f2   :  { %v34155_v35 = vsub.f32 %v20774_v62, %v34142_v16  ;;  %v34158_v32 = vsub.f32 %v20777_v24, %v34144_v2  ;;  %v34161_v28 = vsub.f32 %v20780_v59, %v34146_v22  ;;  %v34164_v9 = vsub.f32 %v20783_v40, %v34148_v46 }
0x13f3   :  { %v34166_v20 = vand.u32 4294901760, %v20786_v17  ;;  %v34168_v61 = vand.u32 4294901760, %v20789_v23  ;;  %v34170_v5 = vand.u32 4294901760, %v20792_v19  ;;  %v34172_v56 = vand.u32 4294901760, %v20795_v54 }
0x13f4   :  { %v20940_v38 = vand.u32 4294901760, %v34155_v35  ;;  %v20950_v8 = vand.u32 4294901760, %v34158_v32  ;;  %v20960_v50 = vand.u32 4294901760, %v34161_v28  ;;  %v20970_v34 = vand.u32 4294901760, %v34164_v9 }
0x13f5   :  { %v34179_v49 = vsub.f32 %v20786_v17, %v34166_v20  ;;  %v34182_v43 = vsub.f32 %v20789_v23, %v34168_v61  ;;  %v34185_v12 = vsub.f32 %v20792_v19, %v34170_v5  ;;  %v34188_v30 = vsub.f32 %v20795_v54, %v34172_v56 }
0x13f6   :  { %27804 = vmatprep.mubr.f32.mxu0 %v20940_v38  ;;  %v20941_v10 = vsub.f32 %v34155_v35, %v20940_v38  ;;  %v20951_v58 = vsub.f32 %v34158_v32, %v20950_v8  ;;  %v20961_v60 = vsub.f32 %v34161_v28, %v20960_v50  ;;  %v20971_v21 = vsub.f32 %v34164_v9, %v20970_v34 }
0x13f7   :  { %35070 = vst [vmem:[#allocation29_spill] sm:$0xff] %v34185_v12  ;;  %35071 = vst [vmem:[#allocation13_spill] sm:$0xff] %v34188_v30  ;;  %27805 = vmatmul.mubr.f32.vlgmr.msra.gmra.mrb[64].mxu0 %v20950_v8  ;;  %v20980_v51 = vand.u32 4294901760, %v34179_v49  ;;  %v20990_v33 = vand.u32 4294901760, %v34182_v43  ;;  %v21000_v11 = vand.u32 4294901760, %v34185_v12  ;;  %v21010_v36 = vand.u32 4294901760, %v34188_v30 }
0x13f8   :  { %27807 = vmatprep.mubr.f32.mxu0 %v20960_v50  ;;  %v20942_v45 = vand.u32 4294901760, %v20941_v10  ;;  %v20952_v4 = vand.u32 4294901760, %v20951_v58  ;;  %v20962_v1 = vand.u32 4294901760, %v20961_v60  ;;  %29577 = vmatpush3.bf16.msra.mxu0 %v34058_v47  ;;  %v20972_v44 = vand.u32 4294901760, %v20971_v21 }
0x13f9   :  { %v20981_v62 = vsub.f32 %v34179_v49, %v20980_v51  ;;  %v20991_v24 = vsub.f32 %v34182_v43, %v20990_v33  ;;  %v21001_v59 = vsub.f32 %v34185_v12, %v21000_v11  ;;  %v20711_v40 = vadd.f32 %v34114_v15, %v34116_v26  ;;  %29579 = vmatprep.subr.bf16.mxu0 %v34064_v18 }
0x13fa   :  { %27636 = vmatprep.mubr.f32.mxu1 %v20942_v45  ;;  %v34208_v17 = vsub.f32 %v34188_v30, %v21010_v36  ;;  %v20712_v47 = vadd.f32 %v34114_v15, %v34118_v13  ;;  %v20713_v23 = vadd.f32 %v34122_v42, %v34116_v26  ;;  %v20714_v19 = vadd.f32 %v34122_v42, %v34118_v13 }
0x13fb   :  { %27637 = vmatmul.mubr.f32.vlgmr.msra.gmra.mrb[82].mxu1 %v20952_v4  ;;  %27808 = vmatmul.mubr.f32.gmra.mrb[66].mxu0 %v20970_v34  ;;  %v20982_v54 = vand.u32 4294901760, %v20981_v62  ;;  %v20992_v38 = vand.u32 4294901760, %v20991_v24  ;;  %v21002_v8 = vand.u32 4294901760, %v21001_v59  ;;  %v20743_v50 = vmax.f32 %v20711_v40, 0.0 }
0x13fc   :  { %27639 = vmatprep.mubr.f32.mxu1 %v20962_v1  ;;  %29553 = vmatpush3.bf16.msra.mxu1 %v34061_v0  ;;  %v21012_v10 = vand.u32 4294901760, %v34208_v17  ;;  %v20744_v58 = vmax.f32 %v20712_v47, 0.0  ;;  %v20745_v60 = vmax.f32 %v20713_v23, 0.0  ;;  %v20746_v15 = vmax.f32 %v20714_v19, 0.0 }
0x13fd   :  { %27810 = vmatprep.mubr.f32.mxu0 %v20980_v51  ;;  %v20798_v21 = vsel %vm2543_vm1, %v20743_v50, 0  ;;  %v20715_v42 = vadd.f32 %v34125_v52, %v34116_v26  ;;  %v20716_v34 = vadd.f32 %v34125_v52, %v34118_v13  ;;  %v20717_v45 = vadd.f32 %v34128_v31, %v34116_v26  ;;  %29555 = vmatprep.subr.bf16.mxu1 %v34066_v3 }
0x13fe   :  { %v34226_v0 = vand.u32 4294901760, %v20798_v21  ;;  %v20801_v4 = vsel %vm2543_vm1, %v20744_v58, 0  ;;  %v20804_v1 = vsel %vm2543_vm1, %v20745_v60, 0  ;;  %v20807_v51 = vsel %vm2543_vm1, %v20746_v15, 0  ;;  %29581 = vmatpush3.bf16.msra.mxu0 %v34064_v18 }
0x13ff   :  { %27640 = vmatmul.mubr.f32.gmra.mrb[84].mxu1 %v20972_v44  ;;  %27811 = vmatmul.mubr.f32.gmra.mrb[68].mxu0 %v20990_v33  ;;  %v34232_v62 = vand.u32 4294901760, %v20801_v4  ;;  %v34234_v52 = vand.u32 4294901760, %v20804_v1  ;;  %v34236_v24 = vand.u32 4294901760, %v20807_v51  ;;  %v20747_v59 = vmax.f32 %v20715_v42, 0.0 }
0x1400   :  { %27642 = vmatprep.mubr.f32.mxu1 %v20982_v54  ;;  %27813 = vmatprep.mubr.f32.mxu0 %v21000_v11  ;;  %v34239_v40 = vsub.f32 %v20798_v21, %v34226_v0  ;;  %v20748_v17 = vmax.f32 %v20716_v34, 0.0  ;;  %v20749_v47 = vmax.f32 %v20717_v45, 0.0  ;;  %v20718_v23 = vadd.f32 %v34128_v31, %v34118_v13 }
0x1401   :  { %v34244_v18 = vsub.f32 %v20801_v4, %v34232_v62  ;;  %v34247_v33 = vsub.f32 %v20804_v1, %v34234_v52  ;;  %v34250_v44 = vsub.f32 %v20807_v51, %v34236_v24  ;;  %v20810_v19 = vsel %vm2543_vm1, %v20747_v59, 0  ;;  %29557 = vmatpush3.bf16.msra.mxu1 %v34066_v3  ;;  %29583 = vmatprep.subr.bf16.mxu0 %v34046_v55 }
0x1402   :  { %35072 = vst [vmem:[#allocation15_spill] sm:$0xff] %v34239_v40  ;;  %v21020_v11 = vand.u32 4294901760, %v34239_v40  ;;  %v34256_v54 = vand.u32 4294901760, %v20810_v19  ;;  %v20813_v31 = vsel %vm2543_vm1, %v20748_v17, 0  ;;  %v20816_v50 = vsel %vm2543_vm1, %v20749_v47, 0  ;;  %29559 = vmatprep.subr.bf16.mxu1 %v34068_v6 }
0x1403   :  { %35073 = vst [vmem:[#allocation17_spill] sm:$0xff] %v34244_v18  ;;  %35074 = vst [vmem:[#allocation20_spill] sm:$0xff] %v34247_v33  ;;  %27643 = vmatmul.mubr.f32.gmra.mrb[86].mxu1 %v20992_v38  ;;  %27814 = vmatmul.mubr.f32.gmra.mrb[70].mxu0 %v21010_v36  ;;  %v21030_v58 = vand.u32 4294901760, %v34244_v18  ;;  %v21040_v3 = vand.u32 4294901760, %v34247_v33  ;;  %v21050_v60 = vand.u32 4294901760, %v34250_v44  ;;  %v34266_v15 = vand.u32 4294901760, %v20813_v31 }
0x1404   :  { %35075 = vst [vmem:[#allocation23_spill] sm:$0xff] %v34250_v44  ;;  %27645 = vmatprep.mubr.f32.mxu1 %v21002_v8  ;;  %27816 = vmatprep.mubr.f32.mxu0 %v21020_v11  ;;  %v21021_v21 = vsub.f32 %v34239_v40, %v21020_v11  ;;  %v34270_v42 = vsub.f32 %v20810_v19, %v34256_v54  ;;  %v34272_v34 = vand.u32 4294901760, %v20816_v50  ;;  %v20750_v38 = vmax.f32 %v20718_v23, 0.0 }
0x1405   :  { %v21031_v36 = vsub.f32 %v34244_v18, %v21030_v58  ;;  %v21041_v45 = vsub.f32 %v34247_v33, %v21040_v3  ;;  %v21051_v4 = vsub.f32 %v34250_v44, %v21050_v60  ;;  %v34278_v1 = vsub.f32 %v20813_v31, %v34266_v15 }
0x1406   :  { %35076 = vst [vmem:[#allocation26_spill] sm:$0xff] %v34270_v42  ;;  %v21022_v51 = vand.u32 4294901760, %v21021_v21  ;;  %v21060_v8 = vand.u32 4294901760, %v34270_v42  ;;  %v34282_v59 = vsub.f32 %v20816_v50, %v34272_v34  ;;  %v20819_v17 = vsel %vm2543_vm1, %v20750_v38, 0 }
0x1407   :  { %35077 = vst [vmem:[#allocation31_spill] sm:$0xff] %v34278_v1  ;;  %v34287_v47 = vrot.slane %v34082_v41, %v34078_v57  ;;  %27646 = vmatmul.mubr.f32.gmra.mrb[88].mxu1 %v21012_v10  ;;  %27817 = vmatmul.mubr.f32.gmra.mrb[72].mxu0 %v21030_v58  ;;  %v21032_v23 = vand.u32 4294901760, %v21031_v36  ;;  %v21042_v19 = vand.u32 4294901760, %v21041_v45  ;;  %v21070_v11 = vand.u32 4294901760, %v34278_v1 }
0x1408   :  { %35078 = vst [vmem:[#allocation35_spill] sm:$0xff] %v34282_v59  ;;  %27648 = vmatprep.mubr.f32.mxu1 %v21022_v51  ;;  %27819 = vmatprep.mubr.f32.mxu0 %v21040_v3  ;;  %v21061_v31 = vsub.f32 %v34270_v42, %v21060_v8  ;;  %v21080_v21 = vand.u32 4294901760, %v34282_v59  ;;  %v34292_v50 = vand.u32 4294901760, %v20819_v17  ;;  %v20719_v38 = vadd.f32 %v34087_v25, %v34116_v26 }
0x1409   :  { %v21071_v53 = vsub.f32 %v34278_v1, %v21070_v11  ;;  %v20720_v10 = vadd.f32 %v34087_v25, %v34118_v13  ;;  %v20721_v58 = vadd.f32 %v34091_v39, %v34116_v26  ;;  %v20722_v3 = vadd.f32 %v34091_v39, %v34118_v13 }
0x140a   :  { %v21052_v36 = vand.u32 4294901760, %v21051_v4  ;;  %v21062_v45 = vand.u32 4294901760, %v21061_v31  ;;  %v34304_v51 = vsub.f32 %v20819_v17, %v34292_v50  ;;  %v20751_v14 = vmax.f32 %v20719_v38, 0.0 }
0x140b   :  { %27649 = vmatmul.mubr.f32.gmra.mrb[90].mxu1 %v21032_v23  ;;  %27820 = vmatmul.mubr.f32.gmra.mrb[74].mxu0 %v21050_v60  ;;  %v21081_v42 = vsub.f32 %v34282_v59, %v21080_v21  ;;  %v20752_v1 = vmax.f32 %v20720_v10, 0.0  ;;  %v20753_v44 = vmax.f32 %v20721_v58, 0.0  ;;  %v20754_v33 = vmax.f32 %v20722_v3, 0.0 }
0x140c   :  { %35079 = vst [vmem:[#allocation5_spill] sm:$0xff] %v34304_v51  ;;  %27651 = vmatprep.mubr.f32.mxu1 %v21042_v19  ;;  %27822 = vmatprep.mubr.f32.mxu0 %v21060_v8  ;;  %v21072_v25 = vand.u32 4294901760, %v21071_v53  ;;  %v21090_v18 = vand.u32 4294901760, %v34304_v51  ;;  %v20822_v39 = vsel %vm2543_vm1, %v20751_v14, 0  ;;  %v20723_v4 = vadd.f32 %v34097_v29, %v34116_v26 }
0x140d   :  { %v34311_v17 = vand.u32 4294901760, %v20822_v39  ;;  %v20825_v23 = vsel %vm2543_vm1, %v20752_v1, 0  ;;  %v20828_v60 = vsel %vm2543_vm1, %v20753_v44, 0  ;;  %v20831_v31 = vsel %vm2543_vm1, %v20754_v33, 0 }
0x140e   :  { %v21091_v38 = vsub.f32 %v34304_v51, %v21090_v18  ;;  %v34317_v19 = vand.u32 4294901760, %v20825_v23  ;;  %v34319_v53 = vand.u32 4294901760, %v20828_v60  ;;  %v34321_v8 = vand.u32 4294901760, %v20831_v31 }
0x140f   :  { %27652 = vmatmul.mubr.f32.gmra.mrb[92].mxu1 %v21052_v36  ;;  %27823 = vmatmul.mubr.f32.gmra.mrb[76].mxu0 %v21070_v11  ;;  %v34324_v14 = vsub.f32 %v20822_v39, %v34311_v17  ;;  %v20755_v10 = vmax.f32 %v20723_v4, 0.0  ;;  %v20724_v1 = vadd.f32 %v34097_v29, %v34118_v13  ;;  %v20725_v33 = vadd.f32 %v34108_v27, %v34116_v26 }
0x1410   :  { %27654 = vmatprep.mubr.f32.mxu1 %v21062_v45  ;;  %27825 = vmatprep.mubr.f32.mxu0 %v21080_v21  ;;  %v21082_v44 = vand.u32 4294901760, %v21081_v42  ;;  %v34331_v58 = vsub.f32 %v20825_v23, %v34317_v19  ;;  %v34334_v3 = vsub.f32 %v20828_v60, %v34319_v53  ;;  %v34337_v11 = vsub.f32 %v20831_v31, %v34321_v8 }
0x1411   :  { %35080 = vst [vmem:[#allocation11_spill] sm:$0xff] %v34324_v14  ;;  %v21100_v36 = vand.u32 4294901760, %v34324_v14  ;;  %v20834_v39 = vsel %vm2543_vm1, %v20755_v10, 0  ;;  %v20756_v29 = vmax.f32 %v20724_v1, 0.0  ;;  %v20757_v4 = vmax.f32 %v20725_v33, 0.0 }
0x1412   :  { %35081 = vst [vmem:[#allocation18_spill] sm:$0xff] %v34331_v58  ;;  %35082 = vst [vmem:[#allocation36_spill] sm:$0xff] %v34334_v3  ;;  %v21110_v51 = vand.u32 4294901760, %v34331_v58  ;;  %v21120_v21 = vand.u32 4294901760, %v34334_v3  ;;  %v21130_v42 = vand.u32 4294901760, %v34337_v11  ;;  %v34344_v45 = vand.u32 4294901760, %v20834_v39 }
0x1413   :  { %35083 = vst [vmem:[#allocation40_spill] sm:$0xff] %v34337_v11  ;;  %27655 = vmatmul.mubr.f32.gmra.mrb[94].mxu1 %v21072_v25  ;;  %27826 = vmatmul.mubr.f32.gmra.mrb[78].mxu0 %v21090_v18  ;;  %v21101_v23 = vsub.f32 %v34324_v14, %v21100_v36  ;;  %v20837_v60 = vsel %vm2543_vm1, %v20756_v29, 0  ;;  %v20840_v31 = vsel %vm2543_vm1, %v20757_v4, 0  ;;  %v20726_v10 = vadd.f32 %v34108_v27, %v34118_v13 }
0x1414   :  { %v35084_v1 = vcombine.high %v34080_v63, %v34080_v63  ;;  %27657 = vmatprep.mubr.f32.mxu1 %v21082_v44  ;;  %27828 = vmatprep.mubr.f32.mxu0 %v21100_v36  ;;  %v21111_v59 = vsub.f32 %v34331_v58, %v21110_v51  ;;  %v34357_v18 = vsub.f32 %v20834_v39, %v34344_v45  ;;  %v34359_v25 = vand.u32 4294901760, %v20837_v60 }
0x1415   :  { %v35086_v29 = vcombine.high %v34082_v41, %v34082_v41  ;;  %v21092_v27 = vand.u32 4294901760, %v21091_v38  ;;  %v34367_v14 = vand.u32 4294901760, %v20840_v31  ;;  %v20758_v63 = vmax.f32 %v20726_v10, 0.0 }
0x1416   :  { %v20682_v33 = vrot.slane %v35084_v1, %v34078_v57  ;;  %35085 = vst [vmem:[#allocation44_spill] sm:$0xff] %v34357_v18  ;;  %v21102_v1 = vand.u32 4294901760, %v21101_v23  ;;  %v21121_v44 = vsub.f32 %v34334_v3, %v21120_v21  ;;  %v21140_v36 = vand.u32 4294901760, %v34357_v18 }
0x1417   :  { %v34365_v4 = vrot.slane %v35086_v29, %v34078_v57  ;;  %v34372_v39 = vsub.f32 %v20837_v60, %v34359_v25  ;;  %27658 = vmatmul.mubr.f32.gmra.mrb[96].mxu1 %v21092_v27  ;;  %27829 = vmatmul.mubr.f32.gmra.mrb[80].mxu0 %v21110_v51  ;;  %v21131_v58 = vsub.f32 %v34337_v11, %v21130_v42  ;;  %v20843_v57 = vsel %vm2543_vm1, %v20758_v63, 0 }
0x1418   :  { %v34376_v41 = vsub.f32 %v20840_v31, %v34367_v14  ;;  %v20727_v38 = vadd.f32 %v34101_v48, %v34116_v26  ;;  %27660 = vmatprep.mubr.f32.mxu1 %v21102_v1  ;;  %27831 = vmatprep.mubr.f32.mxu0 %v21120_v21  ;;  %v21112_v23 = vand.u32 4294901760, %v21111_v59  ;;  %v34382_v29 = vand.u32 4294901760, %v20843_v57 }
0x1419   :  { %v21150_v10 = vand.u32 4294901760, %v34372_v39  ;;  %v20728_v51 = vadd.f32 %v34101_v48, %v34118_v13  ;;  %v21141_v60 = vsub.f32 %v34357_v18, %v21140_v36  ;;  %v20729_v31 = vadd.f32 %v34287_v47, %v34116_v26 }
0x141a   :  { %35087 = vst [vmem:[#allocation45_spill] sm:$0xff] %v34376_v41  ;;  %v20759_v27 = vmax.f32 %v20727_v38, 0.0  ;;  %v20730_v63 = vadd.f32 %v34287_v47, %v34118_v13  ;;  %v21122_v11 = vand.u32 4294901760, %v21121_v44  ;;  %v21160_v21 = vand.u32 4294901760, %v34376_v41 }
0x141b   :  { %v34393_v59 = vsub.f32 %v20843_v57, %v34382_v29  ;;  %v20760_v1 = vmax.f32 %v20728_v51, 0.0  ;;  %27661 = vmatmul.mubr.f32.gmra.mrb[98].mxu1 %v21112_v23  ;;  %27832 = vmatmul.mubr.f32.gmra.mrb[82].mxu0 %v21130_v42  ;;  %v21151_v48 = vsub.f32 %v34372_v39, %v21150_v10  ;;  %v20761_v38 = vmax.f32 %v20729_v31, 0.0 }
0x141c   :  { %v20846_v18 = vsel %vm2543_vm1, %v20759_v27, 0  ;;  %v20762_v3 = vmax.f32 %v20730_v63, 0.0  ;;  %27663 = vmatprep.mubr.f32.mxu1 %v21122_v11  ;;  %27834 = vmatprep.mubr.f32.mxu0 %v21140_v36  ;;  %v21132_v40 = vand.u32 4294901760, %v21131_v58  ;;  %v21142_v57 = vand.u32 4294901760, %v21141_v60 }
0x141d   :  { %35088 = vst [vmem:[#allocation52_spill] sm:$0xff] %v34393_v59  ;;  %v21170_v47 = vand.u32 4294901760, %v34393_v59  ;;  %v34398_v44 = vand.u32 4294901760, %v20846_v18  ;;  %v20849_v30 = vsel %vm2543_vm1, %v20760_v1, 0  ;;  %v20852_v42 = vsel %vm2543_vm1, %v20761_v38, 0 }
0x141e   :  { %v34401_v12 = vand.u32 4294901760, %v20849_v30  ;;  %v20855_v23 = vsel %vm2543_vm1, %v20762_v3, 0  ;;  %v21161_v51 = vsub.f32 %v34376_v41, %v21160_v21  ;;  %v34409_v11 = vand.u32 4294901760, %v20852_v42 }
0x141f   :  { %v34407_v27 = vsub.f32 %v20846_v18, %v34398_v44  ;;  %v34411_v58 = vand.u32 4294901760, %v20855_v23  ;;  %27664 = vmatmul.mubr.f32.gmra.mrb[100].mxu1 %v21132_v40  ;;  %27835 = vmatmul.mubr.f32.gmra.mrb[84].mxu0 %v21150_v10  ;;  %v21152_v36 = vand.u32 4294901760, %v21151_v48  ;;  %v20731_v31 = vadd.f32 %v20682_v33, %v34116_v26 }
0x1420   :  { %v34414_v60 = vsub.f32 %v20849_v30, %v34401_v12  ;;  %v20732_v63 = vadd.f32 %v20682_v33, %v34118_v13  ;;  %27666 = vmatprep.mubr.f32.mxu1 %v21142_v57  ;;  %27837 = vmatprep.mubr.f32.mxu0 %v21160_v21  ;;  %v21171_v18 = vsub.f32 %v34393_v59, %v21170_v47  ;;  %v21162_v33 = vand.u32 4294901760, %v21161_v51 }
0x1421   :  { %35089 = vst [vmem:[#allocation56_spill] sm:$0xff] %v34407_v27  ;;  %v21180_v3 = vand.u32 4294901760, %v34407_v27  ;;  %v34421_v1 = vsub.f32 %v20852_v42, %v34409_v11  ;;  %v34424_v40 = vsub.f32 %v20855_v23, %v34411_v58  ;;  %v20763_v30 = vmax.f32 %v20731_v31, 0.0 }
0x1422   :  { %v21190_v10 = vand.u32 4294901760, %v34414_v60  ;;  %v20764_v48 = vmax.f32 %v20732_v63, 0.0  ;;  %v20733_v38 = vadd.f32 %v34365_v4, %v34116_v26  ;;  %v20734_v59 = vadd.f32 %v34365_v4, %v34118_v13 }
0x1423   :  { %35090 = vst [vmem:[#allocation59_spill] sm:$0xff] %v34424_v40  ;;  %v21181_v21 = vsub.f32 %v34407_v27, %v21180_v3  ;;  %v21200_v57 = vand.u32 4294901760, %v34421_v1  ;;  %27667 = vmatmul.mubr.f32.gmra.mrb[102].mxu1 %v21152_v36  ;;  %27838 = vmatmul.mubr.f32.gmra.mrb[86].mxu0 %v21170_v47  ;;  %v20858_v42 = vsel %vm2543_vm1, %v20763_v30, 0  ;;  %v21172_v31 = vand.u32 4294901760, %v21171_v18 }
0x1424   :  { %v20861_v23 = vsel %vm2543_vm1, %v20764_v48, 0  ;;  %v20765_v41 = vmax.f32 %v20733_v38, 0.0  ;;  %27669 = vmatprep.mubr.f32.mxu1 %v21162_v33  ;;  %27840 = vmatprep.mubr.f32.mxu0 %v21180_v3  ;;  %v21210_v26 = vand.u32 4294901760, %v34424_v40  ;;  %v34436_v51 = vand.u32 4294901760, %v20858_v42 }
0x1425   :  { %v21191_v63 = vsub.f32 %v34414_v60, %v21190_v10  ;;  %v34439_v27 = vand.u32 4294901760, %v20861_v23  ;;  %v20766_v4 = vmax.f32 %v20734_v59, 0.0  ;;  %v21182_v47 = vand.u32 4294901760, %v21181_v21 }
0x1426   :  { %v20864_v13 = vsel %vm2543_vm1, %v20765_v41, 0  ;;  %v21201_v36 = vsub.f32 %v34421_v1, %v21200_v57  ;;  %v34444_v30 = vsub.f32 %v20858_v42, %v34436_v51  ;;  %v21211_v21 = vsub.f32 %v34424_v40, %v21210_v26 }
0x1427   :  { %v34446_v48 = vand.u32 4294901760, %v20864_v13  ;;  %27670 = vmatmul.mubr.f32.gmra.mrb[104].mxu1 %v21172_v31  ;;  %27841 = vmatmul.mubr.f32.gmra.mrb[88].mxu0 %v21190_v10  ;;  %v34449_v3 = vsub.f32 %v20861_v23, %v34439_v27  ;;  %v20867_v18 = vsel %vm2543_vm1, %v20766_v4, 0  ;;  %v21192_v33 = vand.u32 4294901760, %v21191_v63 }
0x1428   :  { %35091 = vst [vmem:[#allocation22_spill] sm:$0xff] %v34444_v30  ;;  %27672 = vmatprep.mubr.f32.mxu1 %v21182_v47  ;;  %27843 = vmatprep.mubr.f32.mxu0 %v21200_v57  ;;  %v21220_v41 = vand.u32 4294901760, %v34444_v30  ;;  %v34456_v38 = vand.u32 4294901760, %v20867_v18  ;;  %v21202_v10 = vand.u32 4294901760, %v21201_v36  ;;  %v21212_v57 = vand.u32 4294901760, %v21211_v21 }
0x1429   :  { %v34454_v59 = vsub.f32 %v20864_v13, %v34446_v48  ;;  %v21230_v42 = vand.u32 4294901760, %v34449_v3 }
0x142a   :  { %v21221_v23 = vsub.f32 %v34444_v30, %v21220_v41  ;;  %v34463_v4 = vsub.f32 %v20867_v18, %v34456_v38 }
0x142b   :  { %v21240_v31 = vand.u32 4294901760, %v34454_v59  ;;  %27673 = vmatmul.mubr.f32.gmra.mrb[106].mxu1 %v21192_v33  ;;  %27844 = vmatmul.mubr.f32.gmra.mrb[90].mxu0 %v21210_v26  ;;  %v21231_v13 = vsub.f32 %v34449_v3, %v21230_v42 }
0x142c   :  { %27675 = vmatprep.mubr.f32.mxu1 %v21202_v10  ;;  %27846 = vmatprep.mubr.f32.mxu0 %v21220_v41  ;;  %v21250_v63 = vand.u32 4294901760, %v34463_v4  ;;  %v21222_v47 = vand.u32 4294901760, %v21221_v23 }
0x142d   :  { %v21241_v40 = vsub.f32 %v34454_v59, %v21240_v31  ;;  %v21232_v36 = vand.u32 4294901760, %v21231_v13 }
0x142e   :  { %v21251_v18 = vsub.f32 %v34463_v4, %v21250_v63 }
0x142f   :  { %27676 = vmatmul.mubr.f32.gmra.mrb[108].mxu1 %v21212_v57  ;;  %27847 = vmatmul.mubr.f32.gmra.mrb[92].mxu0 %v21230_v42  ;;  %v21242_v30 = vand.u32 4294901760, %v21241_v40 }
0x1430   :  { %27678 = vmatprep.mubr.f32.mxu1 %v21222_v47  ;;  %27849 = vmatprep.mubr.f32.mxu0 %v21240_v31  ;;  %v21252_v26 = vand.u32 4294901760, %v21251_v18 }
0x1433   :  { %27679 = vmatmul.mubr.f32.gmra.mrb[110].mxu1 %v21232_v36  ;;  %27850 = vmatmul.mubr.f32.gmra.mrb[94].mxu0 %v21250_v63 }
0x1434   :  { %27681 = vmatprep.mubr.f32.mxu1 %v21242_v30  ;;  %27860 = vmatprep.mubr.f32.mxu0 %v34142_v16 }
0x1437   :  { %27682 = vmatmul.mubr.f32.gmra.mrb[112].mxu1 %v21252_v26  ;;  %27861 = vmatmul.mubr.f32.vlgmr.msra.gmra.mrb[64].mxu0 %v34144_v2 }
0x1438   :  { %27692 = vmatprep.mubr.f32.mxu1 %v34142_v16  ;;  %27863 = vmatprep.mubr.f32.mxu0 %v34146_v22 }
0x1439   :  { %29585 = vmatpush3.bf16.msra.mxu0 %v34046_v55  ;;  %v35092_v55 = vld [vmem:[#allocation29_spill] sm:$0xff] }
0x143a   :  { %29587 = vmatprep.subr.bf16.mxu0 %v34048_v7 }
0x143b   :  { %27693 = vmatmul.mubr.f32.vlgmr.msra.gmra.mrb[82].mxu1 %v34144_v2  ;;  %27864 = vmatmul.mubr.f32.gmra.mrb[66].mxu0 %v34148_v46 }
0x143c   :  { %27695 = vmatprep.mubr.f32.mxu1 %v34146_v22  ;;  %29561 = vmatpush3.bf16.msra.mxu1 %v34068_v6  ;;  %v35094_v6 = vld [vmem:[#allocation15_spill] sm:$0xff] }
0x143d   :  { %27866 = vmatprep.mubr.f32.mxu0 %v34166_v20  ;;  %29563 = vmatprep.subr.bf16.mxu1 %v34076_v37 }
0x143e   :  { %29589 = vmatpush3.bf16.msra.mxu0 %v34048_v7  ;;  %v35093_v7 = vld [vmem:[#allocation13_spill] sm:$0xff] }
0x143f   :  { %27696 = vmatmul.mubr.f32.gmra.mrb[84].mxu1 %v34148_v46  ;;  %27867 = vmatmul.mubr.f32.gmra.mrb[68].mxu0 %v34168_v61 }
0x1440   :  { %27698 = vmatprep.mubr.f32.mxu1 %v34166_v20  ;;  %27869 = vmatprep.mubr.f32.mxu0 %v34170_v5 }
0x1441   :  { %29565 = vmatpush3.bf16.msra.mxu1 %v34076_v37  ;;  %v35095_v37 = vld [vmem:[#allocation17_spill] sm:$0xff] }
0x1443   :  { %27699 = vmatmul.mubr.f32.gmra.mrb[86].mxu1 %v34168_v61  ;;  %27870 = vmatmul.mubr.f32.gmra.mrb[70].mxu0 %v34172_v56 }
0x1444   :  { %27701 = vmatprep.mubr.f32.mxu1 %v34170_v5  ;;  %27872 = vmatprep.mubr.f32.mxu0 %v34226_v0 }
0x1447   :  { %27702 = vmatmul.mubr.f32.gmra.mrb[88].mxu1 %v34172_v56  ;;  %27873 = vmatmul.mubr.f32.gmra.mrb[72].mxu0 %v34232_v62 }
0x1448   :  { %27704 = vmatprep.mubr.f32.mxu1 %v34226_v0  ;;  %27875 = vmatprep.mubr.f32.mxu0 %v34234_v52 }
0x144b   :  { %27705 = vmatmul.mubr.f32.gmra.mrb[90].mxu1 %v34232_v62  ;;  %27876 = vmatmul.mubr.f32.gmra.mrb[74].mxu0 %v34236_v24 }
0x144c   :  { %27707 = vmatprep.mubr.f32.mxu1 %v34234_v52  ;;  %27878 = vmatprep.mubr.f32.mxu0 %v34256_v54 }
0x144f   :  { %27708 = vmatmul.mubr.f32.gmra.mrb[92].mxu1 %v34236_v24  ;;  %27879 = vmatmul.mubr.f32.gmra.mrb[76].mxu0 %v34266_v15 }
0x1450   :  { %27710 = vmatprep.mubr.f32.mxu1 %v34256_v54  ;;  %27881 = vmatprep.mubr.f32.mxu0 %v34272_v34 }
0x1453   :  { %27711 = vmatmul.mubr.f32.gmra.mrb[94].mxu1 %v34266_v15  ;;  %27882 = vmatmul.mubr.f32.gmra.mrb[78].mxu0 %v34292_v50 }
0x1454   :  { %27713 = vmatprep.mubr.f32.mxu1 %v34272_v34  ;;  %27884 = vmatprep.mubr.f32.mxu0 %v34311_v17 }
0x1457   :  { %27714 = vmatmul.mubr.f32.gmra.mrb[96].mxu1 %v34292_v50  ;;  %27885 = vmatmul.mubr.f32.gmra.mrb[80].mxu0 %v34317_v19 }
0x1458   :  { %27716 = vmatprep.mubr.f32.mxu1 %v34311_v17  ;;  %27887 = vmatprep.mubr.f32.mxu0 %v34319_v53 }
0x145b   :  { %27717 = vmatmul.mubr.f32.gmra.mrb[98].mxu1 %v34317_v19  ;;  %27888 = vmatmul.mubr.f32.gmra.mrb[82].mxu0 %v34321_v8 }
0x145c   :  { %27719 = vmatprep.mubr.f32.mxu1 %v34319_v53  ;;  %27890 = vmatprep.mubr.f32.mxu0 %v34344_v45 }
0x145f   :  { %27720 = vmatmul.mubr.f32.gmra.mrb[100].mxu1 %v34321_v8  ;;  %27891 = vmatmul.mubr.f32.gmra.mrb[84].mxu0 %v34359_v25 }
0x1460   :  { %27722 = vmatprep.mubr.f32.mxu1 %v34344_v45  ;;  %27893 = vmatprep.mubr.f32.mxu0 %v34367_v14 }
0x1463   :  { %27723 = vmatmul.mubr.f32.gmra.mrb[102].mxu1 %v34359_v25  ;;  %27894 = vmatmul.mubr.f32.gmra.mrb[86].mxu0 %v34382_v29 }
0x1464   :  { %27725 = vmatprep.mubr.f32.mxu1 %v34367_v14  ;;  %27896 = vmatprep.mubr.f32.mxu0 %v34398_v44 }
0x1467   :  { %27726 = vmatmul.mubr.f32.gmra.mrb[104].mxu1 %v34382_v29  ;;  %27897 = vmatmul.mubr.f32.gmra.mrb[88].mxu0 %v34401_v12 }
0x1468   :  { %27728 = vmatprep.mubr.f32.mxu1 %v34398_v44  ;;  %27899 = vmatprep.mubr.f32.mxu0 %v34409_v11 }
0x146b   :  { %27729 = vmatmul.mubr.f32.gmra.mrb[106].mxu1 %v34401_v12  ;;  %27900 = vmatmul.mubr.f32.gmra.mrb[90].mxu0 %v34411_v58 }
0x146c   :  { %27731 = vmatprep.mubr.f32.mxu1 %v34409_v11  ;;  %27902 = vmatprep.mubr.f32.mxu0 %v34436_v51 }
0x146f   :  { %27732 = vmatmul.mubr.f32.gmra.mrb[108].mxu1 %v34411_v58  ;;  %27903 = vmatmul.mubr.f32.gmra.mrb[92].mxu0 %v34439_v27 }
0x1470   :  { %27734 = vmatprep.mubr.f32.mxu1 %v34436_v51  ;;  %27905 = vmatprep.mubr.f32.mxu0 %v34446_v48 }
0x1473   :  { %27735 = vmatmul.mubr.f32.gmra.mrb[110].mxu1 %v34439_v27  ;;  %27906 = vmatmul.mubr.f32.gmra.mrb[94].mxu0 %v34456_v38 }
0x1474   :  { %27737 = vmatprep.mubr.f32.mxu1 %v34446_v48  ;;  %27916 = vmatprep.mubr.f32.mxu0 %v34142_v16  ;;  %v35096_v16 = vld [vmem:[#allocation20_spill] sm:$0xff] }
0x1477   :  { %27738 = vmatmul.mubr.f32.gmra.mrb[112].mxu1 %v34456_v38  ;;  %27917 = vmatmul.mubr.f32.vlgmr.msra.gmra.mrb[64].mxu0 %v34144_v2  ;;  %v35097_v2 = vld [vmem:[#allocation23_spill] sm:$0xff] }
0x1478   :  { %27748 = vmatprep.mubr.f32.mxu1 %v34155_v35  ;;  %27919 = vmatprep.mubr.f32.mxu0 %v34146_v22  ;;  %v35098_v22 = vld [vmem:[#allocation26_spill] sm:$0xff]  ;;  %v35100_v35 = vld [vmem:[#allocation35_spill] sm:$0xff] }
0x147b   :  { %27749 = vmatmul.mubr.f32.vlgmr.msra.gmra.mrb[82].mxu1 %v34158_v32  ;;  %27920 = vmatmul.mubr.f32.gmra.mrb[66].mxu0 %v34148_v46  ;;  %v35099_v46 = vld [vmem:[#allocation31_spill] sm:$0xff]  ;;  %v35101_v32 = vld [vmem:[#allocation5_spill] sm:$0xff] }
0x147c   :  { %27751 = vmatprep.mubr.f32.mxu1 %v34161_v28  ;;  %27922 = vmatprep.mubr.f32.mxu0 %v34166_v20  ;;  %v35102_v28 = vld [vmem:[#allocation11_spill] sm:$0xff]  ;;  %v35104_v20 = vld [vmem:[#allocation36_spill] sm:$0xff] }
0x147f   :  { %27752 = vmatmul.mubr.f32.gmra.mrb[84].mxu1 %v34164_v9  ;;  %27923 = vmatmul.mubr.f32.gmra.mrb[68].mxu0 %v34168_v61  ;;  %v35103_v9 = vld [vmem:[#allocation18_spill] sm:$0xff]  ;;  %v35105_v61 = vld [vmem:[#allocation40_spill] sm:$0xff] }
0x1480   :  { %27754 = vmatprep.mubr.f32.mxu1 %v34179_v49  ;;  %27925 = vmatprep.mubr.f32.mxu0 %v34170_v5  ;;  %v35106_v5 = vld [vmem:[#allocation44_spill] sm:$0xff] }
0x1481   :  { %v35108_v49 = vld [vmem:[#allocation52_spill] sm:$0xff] }
0x1483   :  { %27755 = vmatmul.mubr.f32.gmra.mrb[86].mxu1 %v34182_v43  ;;  %27926 = vmatmul.mubr.f32.gmra.mrb[70].mxu0 %v34172_v56  ;;  %v35107_v56 = vld [vmem:[#allocation45_spill] sm:$0xff]  ;;  %v35109_v43 = vld [vmem:[#allocation56_spill] sm:$0xff] }
0x1484   :  { %27757 = vmatprep.mubr.f32.mxu1 %v35092_v55  ;;  %27928 = vmatprep.mubr.f32.mxu0 %v34226_v0  ;;  %v35110_v0 = vld [vmem:[#allocation59_spill] sm:$0xff] }
0x1487   :  { %27758 = vmatmul.mubr.f32.gmra.mrb[88].mxu1 %v35093_v7  ;;  %27929 = vmatmul.mubr.f32.gmra.mrb[72].mxu0 %v34232_v62  ;;  %v35111_v62 = vld [vmem:[#allocation22_spill] sm:$0xff] }
0x1488   :  { %27760 = vmatprep.mubr.f32.mxu1 %v35094_v6  ;;  %27931 = vmatprep.mubr.f32.mxu0 %v34234_v52 }
0x148b   :  { %27761 = vmatmul.mubr.f32.gmra.mrb[90].mxu1 %v35095_v37  ;;  %27932 = vmatmul.mubr.f32.gmra.mrb[74].mxu0 %v34236_v24  ;;  %v34606_v24 = vstv %s34784_s16 }
0x148c   :  { %27763 = vmatprep.mubr.f32.mxu1 %v35096_v16  ;;  %27934 = vmatprep.mubr.f32.mxu0 %v34256_v54 }
0x148f   :  { %27764 = vmatmul.mubr.f32.gmra.mrb[92].mxu1 %v35097_v2  ;;  %27935 = vmatmul.mubr.f32.gmra.mrb[76].mxu0 %v34266_v15 }
0x1490   :  { %27766 = vmatprep.mubr.f32.mxu1 %v35098_v22  ;;  %27937 = vmatprep.mubr.f32.mxu0 %v34272_v34 }
0x1493   :  { %27767 = vmatmul.mubr.f32.gmra.mrb[94].mxu1 %v35099_v46  ;;  %27938 = vmatmul.mubr.f32.gmra.mrb[78].mxu0 %v34292_v50 }
0x1494   :  { %27769 = vmatprep.mubr.f32.mxu1 %v35100_v35  ;;  %27940 = vmatprep.mubr.f32.mxu0 %v34311_v17 }
0x1497   :  { %27770 = vmatmul.mubr.f32.gmra.mrb[96].mxu1 %v35101_v32  ;;  %27941 = vmatmul.mubr.f32.gmra.mrb[80].mxu0 %v34317_v19 }
0x1498   :  { %27772 = vmatprep.mubr.f32.mxu1 %v35102_v28  ;;  %27943 = vmatprep.mubr.f32.mxu0 %v34319_v53 }
0x149b   :  { %27773 = vmatmul.mubr.f32.gmra.mrb[98].mxu1 %v35103_v9  ;;  %27944 = vmatmul.mubr.f32.gmra.mrb[82].mxu0 %v34321_v8 }
0x149c   :  { %27775 = vmatprep.mubr.f32.mxu1 %v35104_v20  ;;  %27946 = vmatprep.mubr.f32.mxu0 %v34344_v45 }
0x149f   :  { %27776 = vmatmul.mubr.f32.gmra.mrb[100].mxu1 %v35105_v61  ;;  %27947 = vmatmul.mubr.f32.gmra.mrb[84].mxu0 %v34359_v25 }
0x14a0   :  { %27778 = vmatprep.mubr.f32.mxu1 %v35106_v5  ;;  %27949 = vmatprep.mubr.f32.mxu0 %v34367_v14 }
0x14a3   :  { %27779 = vmatmul.mubr.f32.gmra.mrb[102].mxu1 %v34372_v39  ;;  %27950 = vmatmul.mubr.f32.gmra.mrb[86].mxu0 %v34382_v29 }
0x14a4   :  { %27781 = vmatprep.mubr.f32.mxu1 %v35107_v56  ;;  %27952 = vmatprep.mubr.f32.mxu0 %v34398_v44 }
0x14a7   :  { %27782 = vmatmul.mubr.f32.gmra.mrb[104].mxu1 %v35108_v49  ;;  %27953 = vmatmul.mubr.f32.gmra.mrb[88].mxu0 %v34401_v12 }
0x14a8   :  { %27784 = vmatprep.mubr.f32.mxu1 %v35109_v43  ;;  %27955 = vmatprep.mubr.f32.mxu0 %v34409_v11 }
0x14ab   :  { %27785 = vmatmul.mubr.f32.gmra.mrb[106].mxu1 %v34414_v60  ;;  %27956 = vmatmul.mubr.f32.gmra.mrb[90].mxu0 %v34411_v58 }
0x14ac   :  { %27787 = vmatprep.mubr.f32.mxu1 %v34421_v1  ;;  %27958 = vmatprep.mubr.f32.mxu0 %v34436_v51 }
0x14af   :  { %27788 = vmatmul.mubr.f32.gmra.mrb[108].mxu1 %v35110_v0  ;;  %27959 = vmatmul.mubr.f32.gmra.mrb[92].mxu0 %v34439_v27 }
0x14b0   :  { %27790 = vmatprep.mubr.f32.mxu1 %v35111_v62  ;;  %27961 = vmatprep.mubr.f32.mxu0 %v34446_v48 }
0x14b3   :  { %27791 = vmatmul.mubr.f32.gmra.mrb[110].mxu1 %v34449_v3  ;;  %27962 = vmatmul.mubr.f32.gmra.mrb[94].mxu0 %v34456_v38 }
0x14b4   :  { %27793 = vmatprep.mubr.f32.mxu1 %v34454_v59 }
0x14b7   :  { %27794 = vmatmul.mubr.f32.gmra.mrb[112].mxu1 %v34463_v4 }
0x154a   :  { %v27918_v12 = vpop.f32.mrb[64].mxu0 }
0x154b   :  { %v22497_v52 = vpop.f32.mrb[65].mxu0 }
0x154e   :  { %v27750_v54 = vpop.f32.mrb[82].mxu1  ;;  %v27921_v15 = vpop.f32.mrb[66].mxu0 }
0x154f   :  { %v29649_v34 = vadd.f32 %v27750_v54, %v34606_v24  ;;  %v21611_v50 = vpop.f32.mrb[83].mxu1  ;;  %v22509_v17 = vpop.f32.mrb[67].mxu0 }
0x1550   :  { %v29651_v19 = vadd.f32 %v21611_v50, %v34606_v24 }
0x1551   :  { %v29650_v53 = vadd.f32 %v29649_v34, %v27918_v12 }
0x1552   :  { %v29652_v8 = vadd.f32 %v29651_v19, %v22497_v52  ;;  %v27753_v14 = vpop.f32.mrb[84].mxu1  ;;  %v27924_v45 = vpop.f32.mrb[68].mxu0 }
0x1553   :  { %22689 = vst.msk [vmem:[%s34785_s17 + $0x8] sm:$0xff] %vm22687_vm4, %v29650_v53  ;;  %v29653_v25 = vadd.f32 %v27753_v14, %v34606_v24  ;;  %v21625_v39 = vpop.f32.mrb[85].mxu1  ;;  %v22521_v29 = vpop.f32.mrb[69].mxu0 }
0x1554   :  { %22688 = vst.msk [vmem:[%s34785_s17] sm:$0xff] %vm22687_vm4, %v29652_v8  ;;  %v29655_v44 = vadd.f32 %v21625_v39, %v34606_v24 }
0x1555   :  { %v29654_v27 = vadd.f32 %v29653_v25, %v27921_v15 }
0x1556   :  { %v29656_v11 = vadd.f32 %v29655_v44, %v22509_v17  ;;  %v27756_v58 = vpop.f32.mrb[86].mxu1  ;;  %v27927_v60 = vpop.f32.mrb[70].mxu0 }
0x1557   :  { %22691 = vst.msk [vmem:[%s34785_s17 + $0x18] sm:$0xff] %vm22687_vm4, %v29654_v27  ;;  %v29657_v1 = vadd.f32 %v27756_v58, %v34606_v24  ;;  %v21639_v40 = vpop.f32.mrb[87].mxu1  ;;  %v22533_v51 = vpop.f32.mrb[71].mxu0 }
0x1558   :  { %22690 = vst.msk [vmem:[%s34785_s17 + $0x10] sm:$0xff] %vm22687_vm4, %v29656_v11  ;;  %v29659_v30 = vadd.f32 %v21639_v40, %v34606_v24 }
0x1559   :  { %v29658_v48 = vadd.f32 %v29657_v1, %v27924_v45 }
0x155a   :  { %v29660_v3 = vadd.f32 %v29659_v30, %v22521_v29  ;;  %v27759_v41 = vpop.f32.mrb[88].mxu1  ;;  %v27930_v59 = vpop.f32.mrb[72].mxu0 }
0x155b   :  { %22693 = vst.msk [vmem:[%s34785_s17 + $0x28] sm:$0xff] %vm22687_vm4, %v29658_v48  ;;  %v29661_v38 = vadd.f32 %v27759_v41, %v34606_v24  ;;  %v21653_v33 = vpop.f32.mrb[89].mxu1  ;;  %v22545_v21 = vpop.f32.mrb[73].mxu0 }
0x155c   :  { %22692 = vst.msk [vmem:[%s34785_s17 + $0x20] sm:$0xff] %vm22687_vm4, %v29660_v3  ;;  %v29663_v42 = vadd.f32 %v21653_v33, %v34606_v24 }
0x155d   :  { %v29662_v10 = vadd.f32 %v29661_v38, %v27927_v60 }
0x155e   :  { %v29664_v23 = vadd.f32 %v29663_v42, %v22533_v51  ;;  %v27762_v31 = vpop.f32.mrb[90].mxu1  ;;  %v27933_v4 = vpop.f32.mrb[74].mxu0 }
0x155f   :  { %22695 = vst.msk [vmem:[%s34785_s17 + $0x38] sm:$0xff] %vm22687_vm4, %v29662_v10  ;;  %v29665_v57 = vadd.f32 %v27762_v31, %v34606_v24  ;;  %v21667_v13 = vpop.f32.mrb[91].mxu1  ;;  %v22557_v63 = vpop.f32.mrb[75].mxu0 }
0x1560   :  { %22694 = vst.msk [vmem:[%s34785_s17 + $0x30] sm:$0xff] %vm22687_vm4, %v29664_v23  ;;  %v29667_v47 = vadd.f32 %v21667_v13, %v34606_v24 }
0x1561   :  { %v29666_v36 = vadd.f32 %v29665_v57, %v27930_v59 }
0x1562   :  { %v29668_v18 = vadd.f32 %v29667_v47, %v22545_v21  ;;  %v27765_v26 = vpop.f32.mrb[92].mxu1  ;;  %v27936_v55 = vpop.f32.mrb[76].mxu0 }
0x1563   :  { %22697 = vst.msk [vmem:[%s34785_s17 + $0x48] sm:$0xff] %vm22687_vm4, %v29666_v36  ;;  %v29669_v7 = vadd.f32 %v27765_v26, %v34606_v24  ;;  %v21681_v6 = vpop.f32.mrb[93].mxu1  ;;  %v22569_v37 = vpop.f32.mrb[77].mxu0 }
0x1564   :  { %22696 = vst.msk [vmem:[%s34785_s17 + $0x40] sm:$0xff] %vm22687_vm4, %v29668_v18  ;;  %v29671_v16 = vadd.f32 %v21681_v6, %v34606_v24 }
0x1565   :  { %v29670_v2 = vadd.f32 %v29669_v7, %v27933_v4 }
0x1566   :  { %v29672_v22 = vadd.f32 %v29671_v16, %v22557_v63  ;;  %v27768_v46 = vpop.f32.mrb[94].mxu1  ;;  %v27939_v35 = vpop.f32.mrb[78].mxu0 }
0x1567   :  { %22699 = vst.msk [vmem:[%s34785_s17 + $0x58] sm:$0xff] %vm22687_vm4, %v29670_v2  ;;  %v29673_v32 = vadd.f32 %v27768_v46, %v34606_v24  ;;  %v21695_v28 = vpop.f32.mrb[95].mxu1  ;;  %v22581_v9 = vpop.f32.mrb[79].mxu0 }
0x1568   :  { %22698 = vst.msk [vmem:[%s34785_s17 + $0x50] sm:$0xff] %vm22687_vm4, %v29672_v22  ;;  %v29675_v20 = vadd.f32 %v21695_v28, %v34606_v24 }
0x1569   :  { %v29674_v61 = vadd.f32 %v29673_v32, %v27936_v55 }
0x156a   :  { %v29676_v5 = vadd.f32 %v29675_v20, %v22569_v37  ;;  %v27771_v56 = vpop.f32.mrb[96].mxu1  ;;  %v27942_v49 = vpop.f32.mrb[80].mxu0 }
0x156b   :  { %22701 = vst.msk [vmem:[%s34785_s17 + $0x68] sm:$0xff] %vm22687_vm4, %v29674_v61  ;;  %v29677_v43 = vadd.f32 %v27771_v56, %v34606_v24  ;;  %v21709_v0 = vpop.f32.mrb[97].mxu1  ;;  %v22593_v62 = vpop.f32.mrb[81].mxu0 }
0x156c   :  { %22700 = vst.msk [vmem:[%s34785_s17 + $0x60] sm:$0xff] %vm22687_vm4, %v29676_v5  ;;  %v29679_v12 = vadd.f32 %v21709_v0, %v34606_v24 }
0x156d   :  { %v29678_v52 = vadd.f32 %v29677_v43, %v27939_v35 }
0x156e   :  { %v29680_v54 = vadd.f32 %v29679_v12, %v22581_v9  ;;  %v27774_v15 = vpop.f32.mrb[98].mxu1  ;;  %v27945_v34 = vpop.f32.mrb[82].mxu0 }
0x156f   :  { %22703 = vst.msk [vmem:[%s34785_s17 + $0x78] sm:$0xff] %vm22687_vm4, %v29678_v52  ;;  %v29681_v50 = vadd.f32 %v27774_v15, %v34606_v24  ;;  %v21723_v17 = vpop.f32.mrb[99].mxu1  ;;  %v22605_v19 = vpop.f32.mrb[83].mxu0 }
0x1570   :  { %22702 = vst.msk [vmem:[%s34785_s17 + $0x70] sm:$0xff] %vm22687_vm4, %v29680_v54  ;;  %v29683_v53 = vadd.f32 %v21723_v17, %v34606_v24 }
0x1571   :  { %v29682_v8 = vadd.f32 %v29681_v50, %v27942_v49 }
0x1572   :  { %v29684_v14 = vadd.f32 %v29683_v53, %v22593_v62  ;;  %v27777_v45 = vpop.f32.mrb[100].mxu1  ;;  %v27948_v25 = vpop.f32.mrb[84].mxu0 }
0x1573   :  { %22705 = vst.msk [vmem:[%s34785_s17 + $0x88] sm:$0xff] %vm22687_vm4, %v29682_v8  ;;  %v29685_v39 = vadd.f32 %v27777_v45, %v34606_v24  ;;  %v21737_v29 = vpop.f32.mrb[101].mxu1  ;;  %v22617_v44 = vpop.f32.mrb[85].mxu0 }
0x1574   :  { %22704 = vst.msk [vmem:[%s34785_s17 + $0x80] sm:$0xff] %vm22687_vm4, %v29684_v14  ;;  %v29687_v27 = vadd.f32 %v21737_v29, %v34606_v24 }
0x1575   :  { %v29686_v11 = vadd.f32 %v29685_v39, %v27945_v34 }
0x1576   :  { %v29688_v58 = vadd.f32 %v29687_v27, %v22605_v19  ;;  %v27780_v60 = vpop.f32.mrb[102].mxu1  ;;  %v27951_v1 = vpop.f32.mrb[86].mxu0 }
0x1577   :  { %22707 = vst.msk [vmem:[%s34785_s17 + $0x98] sm:$0xff] %vm22687_vm4, %v29686_v11  ;;  %v29689_v40 = vadd.f32 %v27780_v60, %v34606_v24  ;;  %v21751_v51 = vpop.f32.mrb[103].mxu1  ;;  %v22629_v30 = vpop.f32.mrb[87].mxu0 }
0x1578   :  { %22706 = vst.msk [vmem:[%s34785_s17 + $0x90] sm:$0xff] %vm22687_vm4, %v29688_v58  ;;  %v29691_v48 = vadd.f32 %v21751_v51, %v34606_v24 }
0x1579   :  { %v29690_v3 = vadd.f32 %v29689_v40, %v27948_v25 }
0x157a   :  { %v29692_v41 = vadd.f32 %v29691_v48, %v22617_v44  ;;  %v27783_v59 = vpop.f32.mrb[104].mxu1  ;;  %v27954_v38 = vpop.f32.mrb[88].mxu0 }
0x157b   :  { %22709 = vst.msk [vmem:[%s34785_s17 + $0xa8] sm:$0xff] %vm22687_vm4, %v29690_v3  ;;  %v29693_v33 = vadd.f32 %v27783_v59, %v34606_v24  ;;  %v21765_v21 = vpop.f32.mrb[105].mxu1  ;;  %v22641_v42 = vpop.f32.mrb[89].mxu0 }
0x157c   :  { %22708 = vst.msk [vmem:[%s34785_s17 + $0xa0] sm:$0xff] %vm22687_vm4, %v29692_v41  ;;  %v29695_v10 = vadd.f32 %v21765_v21, %v34606_v24 }
0x157d   :  { %v29694_v23 = vadd.f32 %v29693_v33, %v27951_v1 }
0x157e   :  { %v29696_v31 = vadd.f32 %v29695_v10, %v22629_v30  ;;  %v27786_v4 = vpop.f32.mrb[106].mxu1  ;;  %v27957_v57 = vpop.f32.mrb[90].mxu0 }
0x157f   :  { %22711 = vst.msk [vmem:[%s34785_s17 + $0xb8] sm:$0xff] %vm22687_vm4, %v29694_v23  ;;  %v29697_v13 = vadd.f32 %v27786_v4, %v34606_v24  ;;  %v21779_v63 = vpop.f32.mrb[107].mxu1  ;;  %v22653_v47 = vpop.f32.mrb[91].mxu0 }
0x1580   :  { %22710 = vst.msk [vmem:[%s34785_s17 + $0xb0] sm:$0xff] %vm22687_vm4, %v29696_v31  ;;  %v29699_v36 = vadd.f32 %v21779_v63, %v34606_v24 }
0x1581   :  { %v29698_v18 = vadd.f32 %v29697_v13, %v27954_v38 }
0x1582   :  { %v29700_v26 = vadd.f32 %v29699_v36, %v22641_v42  ;;  %v27789_v55 = vpop.f32.mrb[108].mxu1  ;;  %v27960_v7 = vpop.f32.mrb[92].mxu0 }
0x1583   :  { %22713 = vst.msk [vmem:[%s34785_s17 + $0xc8] sm:$0xff] %vm22687_vm4, %v29698_v18  ;;  %v29701_v6 = vadd.f32 %v27789_v55, %v34606_v24  ;;  %v21793_v37 = vpop.f32.mrb[109].mxu1  ;;  %v22665_v16 = vpop.f32.mrb[93].mxu0 }
0x1584   :  { %22712 = vst.msk [vmem:[%s34785_s17 + $0xc0] sm:$0xff] %vm22687_vm4, %v29700_v26  ;;  %v29703_v2 = vadd.f32 %v21793_v37, %v34606_v24 }
0x1585   :  { %v29702_v22 = vadd.f32 %v29701_v6, %v27957_v57 }
0x1586   :  { %v29704_v46 = vadd.f32 %v29703_v2, %v22653_v47  ;;  %v27792_v35 = vpop.f32.mrb[110].mxu1  ;;  %v27963_v32 = vpop.f32.mrb[94].mxu0 }
0x1587   :  { %22715 = vst.msk [vmem:[%s34785_s17 + $0xd8] sm:$0xff] %vm22687_vm4, %v29702_v22  ;;  %v29705_v28 = vadd.f32 %v27792_v35, %v34606_v24  ;;  %v21807_v9 = vpop.f32.mrb[111].mxu1  ;;  %v22677_v20 = vpop.f32.mrb[95].mxu0 }
0x1588   :  { %22714 = vst.msk [vmem:[%s34785_s17 + $0xd0] sm:$0xff] %vm22687_vm4, %v29704_v46  ;;  %v29707_v61 = vadd.f32 %v21807_v9, %v34606_v24 }
0x1589   :  { %v29706_v5 = vadd.f32 %v29705_v28, %v27960_v7 }
0x158a   :  { %v29708_v56 = vadd.f32 %v29707_v61, %v22665_v16  ;;  %v27795_v49 = vpop.f32.mrb[112].mxu1 }
0x158b   :  { %22717 = vst.msk [vmem:[%s34785_s17 + $0xe8] sm:$0xff] %vm22687_vm4, %v29706_v5  ;;  %v29709_v43 = vadd.f32 %v27795_v49, %v34606_v24  ;;  %v21821_v0 = vpop.f32.mrb[113].mxu1 }
0x158c   :  { %22716 = vst.msk [vmem:[%s34785_s17 + $0xe0] sm:$0xff] %vm22687_vm4, %v29708_v56  ;;  %v29711_v62 = vadd.f32 %v21821_v0, %v34606_v24 }
0x158d   :  { %v29710_v12 = vadd.f32 %v29709_v43, %v27963_v32 }
0x158e   :  { %v29712_v52 = vadd.f32 %v29711_v62, %v22677_v20 }
0x158f   :  { %22719 = vst.msk [vmem:[%s34785_s17 + $0xf8] sm:$0xff] %vm22687_vm4, %v29710_v12 }
0x1590   :  { %22718 = vst.msk [vmem:[%s34785_s17 + $0xf0] sm:$0xff] %vm22687_vm4, %v29712_v52 }

</bundles_post_ra>
